<compile_context>
chip_gen: v5e
topology: v5e:2x2
jax: 0.10.0
libtpu: 0.0.40
codegen_flags: <defaults>
</compile_context>

<pallas_src>
import jax
import jax.numpy as jnp
from jax import lax
from jax.experimental import pallas as pl
from jax.experimental.pallas import tpu as pltpu
import numpy as np

EPS = 1e-5
LANE = 128


def _write_reflect_pad(xp_ref, img):
    """Write reflection-pad(1) of img (H, W, C) bf16 into xp_ref (H+2, W+2, C)."""
    H, W, _ = img.shape
    xp_ref[1:H + 1, 1:W + 1, :] = img
    xp_ref[0:1, 1:W + 1, :] = img[1:2]                    # top row    <- row 1
    xp_ref[H + 1:H + 2, 1:W + 1, :] = img[H - 2:H - 1]    # bottom row <- row H-2
    # left / right columns reflect the already-written interior columns
    # (this also fills the corners with the correct reflected values).
    xp_ref[:, 0:1, :] = xp_ref[:, 2:3, :]
    xp_ref[:, W + 1:W + 2, :] = xp_ref[:, W - 1:W, :]


def _conv3x3_from_padded(xp_ref, w_ref, b):
    """3x3 conv read from the padded VMEM scratch.

    xp_ref: (H+2, W+2, C) bf16 reflection-padded image
    w_ref : (3, 3*C, C) bf16; w_ref[dy] = [tap(dy,0); tap(dy,1); tap(dy,2)]
    b     : (1, C) f32 bias
    returns (H*W, C) f32
    """
    Hp, Wp, C = xp_ref.shape
    H, W = Hp - 2, Wp - 2
    # bias-initialised accumulator (replaces the zero init, so it is free)
    acc = jnp.broadcast_to(b, (H * W, C)).astype(jnp.float32)
    for dy in range(3):
        patch = jnp.concatenate(
            [xp_ref[dy:dy + H, 0:W, :],
             xp_ref[dy:dy + H, 1:W + 1, :],
             xp_ref[dy:dy + H, 2:W + 2, :]], axis=-1)      # (H, W, 3*C) bf16
        acc = acc + jnp.dot(patch.reshape(H * W, 3 * C), w_ref[dy],
                            preferred_element_type=jnp.float32)
    return acc


def _instance_norm(y, hw):
    """y: (H*W, C) f32. Single-pass per-channel mean / biased var over space."""
    inv_n = 1.0 / hw
    mean = jnp.sum(y, axis=0, keepdims=True) * inv_n
    mean_sq = jnp.sum(y * y, axis=0, keepdims=True) * inv_n
    var = mean_sq - mean * mean
    return (y - mean) * lax.rsqrt(var + EPS)


def _res_block_kernel(x_ref, w1_ref, b1_ref, w2_ref, b2_ref, o_ref, xp_ref):
    _, H, W, C = x_ref.shape
    hw = float(H * W)
    x0 = x_ref[0]                                          # load once, reuse

    # conv1 -> instance-norm -> ReLU
    _write_reflect_pad(xp_ref, x0.astype(jnp.bfloat16))
    y = _conv3x3_from_padded(xp_ref, w1_ref, b1_ref[...])
    y = jnp.maximum(_instance_norm(y, hw), 0.0)

    # conv2 -> instance-norm (scratch pad buffer reused)
    _write_reflect_pad(xp_ref, y.reshape(H, W, C).astype(jnp.bfloat16))
    y = _conv3x3_from_padded(xp_ref, w2_ref, b2_ref[...])
    y = _instance_norm(y, hw)

    # residual add, lane-dense (C = multiple of 128) store
    o_ref[0] = (y.reshape(H, W, C) + x0.astype(jnp.float32)).astype(o_ref.dtype)


def _round_up(x, m):
    return (x + m - 1) // m * m


def _prep_weight(w, c_pad):
    """torch (Cout, Cin, 3, 3) -> (3, 3*c_pad, c_pad) bf16, per-dy dx-stacked."""
    c_out, c_in = w.shape[0], w.shape[1]
    wp = jnp.zeros((c_pad, c_pad, 3, 3), w.dtype).at[:c_out, :c_in].set(w)
    wt = jnp.transpose(wp, (2, 3, 1, 0))                  # (ky, kx, Cin, Cout)
    return wt.reshape(3, 3 * c_pad, c_pad).astype(jnp.bfloat16)


def _prep_bias(b, c_pad):
    return jnp.zeros((1, c_pad), jnp.float32).at[0, :b.shape[0]].set(
        b.astype(jnp.float32))


def residual_block_nhwc(x_nhwc, w1, b1, w2, b2):
    """Residual block on NHWC activations (preferred layout, no transposes)."""
    N, H, W, C = x_nhwc.shape
    c_pad = _round_up(C, LANE)
    x_p = x_nhwc if c_pad == C else jnp.pad(
        x_nhwc, ((0, 0), (0, 0), (0, 0), (0, c_pad - C)))

    w1_t, w2_t = _prep_weight(w1, c_pad), _prep_weight(w2, c_pad)
    b1_t, b2_t = _prep_bias(b1, c_pad), _prep_bias(b2, c_pad)

    out = pl.pallas_call(
        _res_block_kernel,
        out_shape=jax.ShapeDtypeStruct((N, H, W, c_pad), x_nhwc.dtype),
        grid=(N,),
        in_specs=[
            pl.BlockSpec((1, H, W, c_pad), lambda n: (n, 0, 0, 0)),
            # weights / biases: constant block index -> DMA'd once, stay resident
            pl.BlockSpec((3, 3 * c_pad, c_pad), lambda n: (0, 0, 0)),
            pl.BlockSpec((1, c_pad), lambda n: (0, 0)),
            pl.BlockSpec((3, 3 * c_pad, c_pad), lambda n: (0, 0, 0)),
            pl.BlockSpec((1, c_pad), lambda n: (0, 0)),
        ],
        out_specs=pl.BlockSpec((1, H, W, c_pad), lambda n: (n, 0, 0, 0)),
        scratch_shapes=[pltpu.VMEM((H + 2, W + 2, c_pad), jnp.bfloat16)],
        compiler_params=pltpu.CompilerParams(
            dimension_semantics=("parallel",),
            vmem_limit_bytes=64 * 1024 * 1024),
    )(x_p, w1_t, b1_t, w2_t, b2_t)
    return out if c_pad == C else out[..., :C]


@jax.jit
def residual_block(x_nchw, w1, b1, w2, b2):
    """PyTorch-convention entry point: x (N, C, H, W), conv weight (C, C, 3, 3)."""
    # TODO(synk): if the surrounding model keeps activations NHWC across blocks,
    # call residual_block_nhwc directly and drop these two HBM-round-trip
    # transposes (they can dominate this memory-bound block, esp. on v5e).
    x_nhwc = jnp.transpose(x_nchw, (0, 2, 3, 1))
    out = residual_block_nhwc(x_nhwc, w1, b1, w2, b2)
    return jnp.transpose(out, (0, 3, 1, 2))


def _reference(x, w1, b1, w2, b2):
    """Pure-JAX reference (NCHW) at matched precision (bf16 matmul, f32 accum)."""
    def conv(z, w, b):
        zp = jnp.pad(z, ((0, 0), (0, 0), (1, 1), (1, 1)), mode="reflect")
        y = lax.conv_general_dilated(
            zp.astype(jnp.bfloat16), w.astype(jnp.bfloat16), (1, 1), "VALID",
            dimension_numbers=("NCHW", "OIHW", "NCHW"),
            preferred_element_type=jnp.float32)
        return y + b[None, :, None, None]

    def inorm(y):
        m = jnp.mean(y, axis=(2, 3), keepdims=True)
        v = jnp.mean((y - m) ** 2, axis=(2, 3), keepdims=True)
        return (y - m) * lax.rsqrt(v + EPS)

    y = jnp.maximum(inorm(conv(x, w1, b1)), 0.0)
    y = inorm(conv(y, w2, b2))
    return y + x


if __name__ == "__main__":
    N, C, H, W = 2, 4, 16, 16

    key = jax.random.PRNGKey(0)
    kx, kw1, kb1, kw2, kb2 = jax.random.split(key, 5)

    x = jax.random.normal(kx, (N, C, H, W), dtype=jnp.float32)
    # deterministic synthetic parameters (shapes match nn.Conv2d(C, C, 3))
    w1 = 0.1 * jax.random.normal(kw1, (C, C, 3, 3), dtype=jnp.float32)
    b1 = 0.1 * jax.random.normal(kb1, (C,), dtype=jnp.float32)
    w2 = 0.1 * jax.random.normal(kw2, (C, C, 3, 3), dtype=jnp.float32)
    b2 = 0.1 * jax.random.normal(kb2, (C,), dtype=jnp.float32)

    out = jax.block_until_ready(residual_block(x, w1, b1, w2, b2))
    ref = jax.block_until_ready(_reference(x, w1, b1, w2, b2))

    assert out.shape == (N, C, H, W)
    np.testing.assert_allclose(np.asarray(out), np.asarray(ref),
                               rtol=2e-3, atol=2e-3)
    print("KERNEL_OK")
</pallas_src>

<mosaic_0001>
module attributes {stable_mosaic.version = 11 : i64} {
  func.func @_res_block_kernel(%arg0: i32, %arg1: memref<1x16x16x128xf32, #tpu.memory_space<vmem>>, %arg2: memref<3x384x128xbf16, #tpu.memory_space<vmem>>, %arg3: memref<1x128xf32, #tpu.memory_space<vmem>>, %arg4: memref<3x384x128xbf16, #tpu.memory_space<vmem>>, %arg5: memref<1x128xf32, #tpu.memory_space<vmem>>, %arg6: memref<1x16x16x128xf32, #tpu.memory_space<vmem>>, %arg7: memref<18x18x128xbf16, #tpu.memory_space<vmem>>) attributes {dimension_semantics = [#tpu.dimension_semantics<parallel>], iteration_bounds = array<i64: 2>, scalar_prefetch = 0 : i64, scratch_operands = 1 : i64, tpu.core_type = #tpu.core_type<tc>, window_params = [{transform_indices = @transform_0, window_bounds = array<i64: 1, 16, 16, 128>}, {pipeline_mode = #tpu.pipeline_mode<synchronous>, transform_indices = @transform_1, window_bounds = array<i64: 3, 384, 128>}, {pipeline_mode = #tpu.pipeline_mode<synchronous>, transform_indices = @transform_2, window_bounds = array<i64: 1, 128>}, {pipeline_mode = #tpu.pipeline_mode<synchronous>, transform_indices = @transform_3, window_bounds = array<i64: 3, 384, 128>}, {pipeline_mode = #tpu.pipeline_mode<synchronous>, transform_indices = @transform_4, window_bounds = array<i64: 1, 128>}, {transform_indices = @transform_5, window_bounds = array<i64: 1, 16, 16, 128>}]} {
    %c0 = arith.constant 0 : index
    %c0_0 = arith.constant 0 : index
    %c0_1 = arith.constant 0 : index
    %c0_2 = arith.constant 0 : index
    %0 = vector.load %arg1[%c0, %c0_0, %c0_1, %c0_2] : memref<1x16x16x128xf32, #tpu.memory_space<vmem>>, vector<1x16x16x128xf32>
    %1 = vector.shape_cast %0 : vector<1x16x16x128xf32> to vector<16x16x128xf32>
    %2 = arith.truncf %1 : vector<16x16x128xf32> to vector<16x16x128xbf16>
    %c1 = arith.constant 1 : index
    %c1_3 = arith.constant 1 : index
    %c0_4 = arith.constant 0 : index
    %3 = vector.load %arg7[%c1, %c1_3, %c0_4] : memref<18x18x128xbf16, #tpu.memory_space<vmem>>, vector<16x16x128xbf16>
    tpu.vector_store %arg7[%c1, %c1_3, %c0_4], %2 {strides = array<i32>} : memref<18x18x128xbf16, #tpu.memory_space<vmem>>, vector<16x16x128xbf16>,
    %4 = vector.extract_strided_slice %2 {offsets = [1, 0, 0], sizes = [1, 16, 128], strides = [1, 1, 1]} : vector<16x16x128xbf16> to vector<1x16x128xbf16>
    %c0_5 = arith.constant 0 : index
    %c1_6 = arith.constant 1 : index
    %c0_7 = arith.constant 0 : index
    %5 = vector.load %arg7[%c0_5, %c1_6, %c0_7] : memref<18x18x128xbf16, #tpu.memory_space<vmem>>, vector<1x16x128xbf16>
    tpu.vector_store %arg7[%c0_5, %c1_6, %c0_7], %4 {strides = array<i32>} : memref<18x18x128xbf16, #tpu.memory_space<vmem>>, vector<1x16x128xbf16>,
    %6 = vector.extract_strided_slice %2 {offsets = [14, 0, 0], sizes = [1, 16, 128], strides = [1, 1, 1]} : vector<16x16x128xbf16> to vector<1x16x128xbf16>
    %c17 = arith.constant 17 : index
    %c1_8 = arith.constant 1 : index
    %c0_9 = arith.constant 0 : index
    %7 = vector.load %arg7[%c17, %c1_8, %c0_9] : memref<18x18x128xbf16, #tpu.memory_space<vmem>>, vector<1x16x128xbf16>
    tpu.vector_store %arg7[%c17, %c1_8, %c0_9], %6 {strides = array<i32>} : memref<18x18x128xbf16, #tpu.memory_space<vmem>>, vector<1x16x128xbf16>,
    %c0_10 = arith.constant 0 : index
    %c2 = arith.constant 2 : index
    %c0_11 = arith.constant 0 : index
    %8 = vector.load %arg7[%c0_10, %c2, %c0_11] : memref<18x18x128xbf16, #tpu.memory_space<vmem>>, vector<18x1x128xbf16>
    %c0_12 = arith.constant 0 : index
    %c0_13 = arith.constant 0 : index
    %c0_14 = arith.constant 0 : index
    %9 = vector.load %arg7[%c0_12, %c0_13, %c0_14] : memref<18x18x128xbf16, #tpu.memory_space<vmem>>, vector<18x1x128xbf16>
    tpu.vector_store %arg7[%c0_12, %c0_13, %c0_14], %8 {strides = array<i32>} : memref<18x18x128xbf16, #tpu.memory_space<vmem>>, vector<18x1x128xbf16>,
    %c0_15 = arith.constant 0 : index
    %c15 = arith.constant 15 : index
    %c0_16 = arith.constant 0 : index
    %10 = vector.load %arg7[%c0_15, %c15, %c0_16] : memref<18x18x128xbf16, #tpu.memory_space<vmem>>, vector<18x1x128xbf16>
    %c0_17 = arith.constant 0 : index
    %c17_18 = arith.constant 17 : index
    %c0_19 = arith.constant 0 : index
    %11 = vector.load %arg7[%c0_17, %c17_18, %c0_19] : memref<18x18x128xbf16, #tpu.memory_space<vmem>>, vector<18x1x128xbf16>
    tpu.vector_store %arg7[%c0_17, %c17_18, %c0_19], %10 {strides = array<i32>} : memref<18x18x128xbf16, #tpu.memory_space<vmem>>, vector<18x1x128xbf16>,
    %c0_20 = arith.constant 0 : index
    %c0_21 = arith.constant 0 : index
    %12 = vector.load %arg3[%c0_20, %c0_21] : memref<1x128xf32, #tpu.memory_space<vmem>>, vector<1x128xf32>
    %13 = vector.shape_cast %12 : vector<1x128xf32> to vector<1x128xf32>
    %14 = vector.broadcast %13 : vector<1x128xf32> to vector<256x128xf32>
    %c0_22 = arith.constant 0 : index
    %c0_23 = arith.constant 0 : index
    %c0_24 = arith.constant 0 : index
    %15 = vector.load %arg7[%c0_22, %c0_23, %c0_24] : memref<18x18x128xbf16, #tpu.memory_space<vmem>>, vector<16x16x128xbf16>
    %c0_25 = arith.constant 0 : index
    %c1_26 = arith.constant 1 : index
    %c0_27 = arith.constant 0 : index
    %16 = vector.load %arg7[%c0_25, %c1_26, %c0_27] : memref<18x18x128xbf16, #tpu.memory_space<vmem>>, vector<16x16x128xbf16>
    %c0_28 = arith.constant 0 : index
    %c2_29 = arith.constant 2 : index
    %c0_30 = arith.constant 0 : index
    %17 = vector.load %arg7[%c0_28, %c2_29, %c0_30] : memref<18x18x128xbf16, #tpu.memory_space<vmem>>, vector<16x16x128xbf16>
    %18 = tpu.concatenate %15, %16, %17 in 2 : vector<16x16x128xbf16>, vector<16x16x128xbf16>, vector<16x16x128xbf16> -> vector<16x16x384xbf16>
    %19 = vector.shape_cast %18 : vector<16x16x384xbf16> to vector<256x384xbf16>
    %c0_31 = arith.constant 0 : index
    %c0_32 = arith.constant 0 : index
    %c0_33 = arith.constant 0 : index
    %20 = vector.load %arg2[%c0_31, %c0_32, %c0_33] : memref<3x384x128xbf16, #tpu.memory_space<vmem>>, vector<1x384x128xbf16>
    %21 = vector.shape_cast %20 : vector<1x384x128xbf16> to vector<384x128xbf16>
    %cst = arith.constant dense<0.000000e+00> : vector<256x128xf32>
    %22 = tpu.matmul %19, %21, %cst {dimension_numbers = #tpu.dot_dimension_numbers<[1], [0], [0], [1], [0, 0, 1, 1], [], []>} : vector<256x384xbf16>, vector<384x128xbf16>, vector<256x128xf32> -> vector<256x128xf32>
    %23 = arith.addf %14, %22 : vector<256x128xf32>
    %c1_34 = arith.constant 1 : index
    %c0_35 = arith.constant 0 : index
    %c0_36 = arith.constant 0 : index
    %24 = vector.load %arg7[%c1_34, %c0_35, %c0_36] : memref<18x18x128xbf16, #tpu.memory_space<vmem>>, vector<16x16x128xbf16>
    %c1_37 = arith.constant 1 : index
    %c1_38 = arith.constant 1 : index
    %c0_39 = arith.constant 0 : index
    %25 = vector.load %arg7[%c1_37, %c1_38, %c0_39] : memref<18x18x128xbf16, #tpu.memory_space<vmem>>, vector<16x16x128xbf16>
    %c1_40 = arith.constant 1 : index
    %c2_41 = arith.constant 2 : index
    %c0_42 = arith.constant 0 : index
    %26 = vector.load %arg7[%c1_40, %c2_41, %c0_42] : memref<18x18x128xbf16, #tpu.memory_space<vmem>>, vector<16x16x128xbf16>
    %27 = tpu.concatenate %24, %25, %26 in 2 : vector<16x16x128xbf16>, vector<16x16x128xbf16>, vector<16x16x128xbf16> -> vector<16x16x384xbf16>
    %28 = vector.shape_cast %27 : vector<16x16x384xbf16> to vector<256x384xbf16>
    %c1_43 = arith.constant 1 : index
    %c0_44 = arith.constant 0 : index
    %c0_45 = arith.constant 0 : index
    %29 = vector.load %arg2[%c1_43, %c0_44, %c0_45] : memref<3x384x128xbf16, #tpu.memory_space<vmem>>, vector<1x384x128xbf16>
    %30 = vector.shape_cast %29 : vector<1x384x128xbf16> to vector<384x128xbf16>
    %cst_46 = arith.constant dense<0.000000e+00> : vector<256x128xf32>
    %31 = tpu.matmul %28, %30, %cst_46 {dimension_numbers = #tpu.dot_dimension_numbers<[1], [0], [0], [1], [0, 0, 1, 1], [], []>} : vector<256x384xbf16>, vector<384x128xbf16>, vector<256x128xf32> -> vector<256x128xf32>
    %32 = arith.addf %23, %31 : vector<256x128xf32>
    %c2_47 = arith.constant 2 : index
    %c0_48 = arith.constant 0 : index
    %c0_49 = arith.constant 0 : index
    %33 = vector.load %arg7[%c2_47, %c0_48, %c0_49] : memref<18x18x128xbf16, #tpu.memory_space<vmem>>, vector<16x16x128xbf16>
    %c2_50 = arith.constant 2 : index
    %c1_51 = arith.constant 1 : index
    %c0_52 = arith.constant 0 : index
    %34 = vector.load %arg7[%c2_50, %c1_51, %c0_52] : memref<18x18x128xbf16, #tpu.memory_space<vmem>>, vector<16x16x128xbf16>
    %c2_53 = arith.constant 2 : index
    %c2_54 = arith.constant 2 : index
    %c0_55 = arith.constant 0 : index
    %35 = vector.load %arg7[%c2_53, %c2_54, %c0_55] : memref<18x18x128xbf16, #tpu.memory_space<vmem>>, vector<16x16x128xbf16>
    %36 = tpu.concatenate %33, %34, %35 in 2 : vector<16x16x128xbf16>, vector<16x16x128xbf16>, vector<16x16x128xbf16> -> vector<16x16x384xbf16>
    %37 = vector.shape_cast %36 : vector<16x16x384xbf16> to vector<256x384xbf16>
    %c2_56 = arith.constant 2 : index
    %c0_57 = arith.constant 0 : index
    %c0_58 = arith.constant 0 : index
    %38 = vector.load %arg2[%c2_56, %c0_57, %c0_58] : memref<3x384x128xbf16, #tpu.memory_space<vmem>>, vector<1x384x128xbf16>
    %39 = vector.shape_cast %38 : vector<1x384x128xbf16> to vector<384x128xbf16>
    %cst_59 = arith.constant dense<0.000000e+00> : vector<256x128xf32>
    %40 = tpu.matmul %37, %39, %cst_59 {dimension_numbers = #tpu.dot_dimension_numbers<[1], [0], [0], [1], [0, 0, 1, 1], [], []>} : vector<256x384xbf16>, vector<384x128xbf16>, vector<256x128xf32> -> vector<256x128xf32>
    %41 = arith.addf %32, %40 : vector<256x128xf32>
    %cst_60 = arith.constant dense<0.000000e+00> : vector<128xf32>
    %42 = vector.multi_reduction <add>, %41, %cst_60 [0] : vector<256x128xf32> to vector<128xf32>
    %43 = vector.shape_cast %42 : vector<128xf32> to vector<1x128xf32>
    %cst_61 = arith.constant 3.906250e-03 : f32
    %44 = vector.broadcast %cst_61 : f32 to vector<1x128xf32>
    %45 = arith.mulf %43, %44 : vector<1x128xf32>
    %46 = arith.mulf %41, %41 : vector<256x128xf32>
    %cst_62 = arith.constant dense<0.000000e+00> : vector<128xf32>
    %47 = vector.multi_reduction <add>, %46, %cst_62 [0] : vector<256x128xf32> to vector<128xf32>
    %48 = vector.shape_cast %47 : vector<128xf32> to vector<1x128xf32>
    %cst_63 = arith.constant 3.906250e-03 : f32
    %49 = vector.broadcast %cst_63 : f32 to vector<1x128xf32>
    %50 = arith.mulf %48, %49 : vector<1x128xf32>
    %51 = arith.mulf %45, %45 : vector<1x128xf32>
    %52 = arith.subf %50, %51 : vector<1x128xf32>
    %53 = vector.broadcast %45 : vector<1x128xf32> to vector<256x128xf32>
    %54 = arith.subf %41, %53 : vector<256x128xf32>
    %cst_64 = arith.constant 9.99999974E-6 : f32
    %55 = vector.broadcast %cst_64 : f32 to vector<1x128xf32>
    %56 = arith.addf %52, %55 : vector<1x128xf32>
    %57 = math.rsqrt %56 : vector<1x128xf32>
    %58 = vector.broadcast %57 : vector<1x128xf32> to vector<256x128xf32>
    %59 = arith.mulf %54, %58 : vector<256x128xf32>
    %cst_65 = arith.constant 0.000000e+00 : f32
    %60 = vector.broadcast %cst_65 : f32 to vector<256x128xf32>
    %61 = arith.maximumf %59, %60 : vector<256x128xf32>
    %62 = vector.shape_cast %61 : vector<256x128xf32> to vector<16x16x128xf32>
    %63 = arith.truncf %62 : vector<16x16x128xf32> to vector<16x16x128xbf16>
    %c1_66 = arith.constant 1 : index
    %c1_67 = arith.constant 1 : index
    %c0_68 = arith.constant 0 : index
    %64 = vector.load %arg7[%c1_66, %c1_67, %c0_68] : memref<18x18x128xbf16, #tpu.memory_space<vmem>>, vector<16x16x128xbf16>
    tpu.vector_store %arg7[%c1_66, %c1_67, %c0_68], %63 {strides = array<i32>} : memref<18x18x128xbf16, #tpu.memory_space<vmem>>, vector<16x16x128xbf16>,
    %65 = vector.extract_strided_slice %63 {offsets = [1, 0, 0], sizes = [1, 16, 128], strides = [1, 1, 1]} : vector<16x16x128xbf16> to vector<1x16x128xbf16>
    %c0_69 = arith.constant 0 : index
    %c1_70 = arith.constant 1 : index
    %c0_71 = arith.constant 0 : index
    %66 = vector.load %arg7[%c0_69, %c1_70, %c0_71] : memref<18x18x128xbf16, #tpu.memory_space<vmem>>, vector<1x16x128xbf16>
    tpu.vector_store %arg7[%c0_69, %c1_70, %c0_71], %65 {strides = array<i32>} : memref<18x18x128xbf16, #tpu.memory_space<vmem>>, vector<1x16x128xbf16>,
    %67 = vector.extract_strided_slice %63 {offsets = [14, 0, 0], sizes = [1, 16, 128], strides = [1, 1, 1]} : vector<16x16x128xbf16> to vector<1x16x128xbf16>
    %c17_72 = arith.constant 17 : index
    %c1_73 = arith.constant 1 : index
    %c0_74 = arith.constant 0 : index
    %68 = vector.load %arg7[%c17_72, %c1_73, %c0_74] : memref<18x18x128xbf16, #tpu.memory_space<vmem>>, vector<1x16x128xbf16>
    tpu.vector_store %arg7[%c17_72, %c1_73, %c0_74], %67 {strides = array<i32>} : memref<18x18x128xbf16, #tpu.memory_space<vmem>>, vector<1x16x128xbf16>,
    %c0_75 = arith.constant 0 : index
    %c2_76 = arith.constant 2 : index
    %c0_77 = arith.constant 0 : index
    %69 = vector.load %arg7[%c0_75, %c2_76, %c0_77] : memref<18x18x128xbf16, #tpu.memory_space<vmem>>, vector<18x1x128xbf16>
    %c0_78 = arith.constant 0 : index
    %c0_79 = arith.constant 0 : index
    %c0_80 = arith.constant 0 : index
    %70 = vector.load %arg7[%c0_78, %c0_79, %c0_80] : memref<18x18x128xbf16, #tpu.memory_space<vmem>>, vector<18x1x128xbf16>
    tpu.vector_store %arg7[%c0_78, %c0_79, %c0_80], %69 {strides = array<i32>} : memref<18x18x128xbf16, #tpu.memory_space<vmem>>, vector<18x1x128xbf16>,
    %c0_81 = arith.constant 0 : index
    %c15_82 = arith.constant 15 : index
    %c0_83 = arith.constant 0 : index
    %71 = vector.load %arg7[%c0_81, %c15_82, %c0_83] : memref<18x18x128xbf16, #tpu.memory_space<vmem>>, vector<18x1x128xbf16>
    %c0_84 = arith.constant 0 : index
    %c17_85 = arith.constant 17 : index
    %c0_86 = arith.constant 0 : index
    %72 = vector.load %arg7[%c0_84, %c17_85, %c0_86] : memref<18x18x128xbf16, #tpu.memory_space<vmem>>, vector<18x1x128xbf16>
    tpu.vector_store %arg7[%c0_84, %c17_85, %c0_86], %71 {strides = array<i32>} : memref<18x18x128xbf16, #tpu.memory_space<vmem>>, vector<18x1x128xbf16>,
    %c0_87 = arith.constant 0 : index
    %c0_88 = arith.constant 0 : index
    %73 = vector.load %arg5[%c0_87, %c0_88] : memref<1x128xf32, #tpu.memory_space<vmem>>, vector<1x128xf32>
    %74 = vector.shape_cast %73 : vector<1x128xf32> to vector<1x128xf32>
    %75 = vector.broadcast %74 : vector<1x128xf32> to vector<256x128xf32>
    %c0_89 = arith.constant 0 : index
    %c0_90 = arith.constant 0 : index
    %c0_91 = arith.constant 0 : index
    %76 = vector.load %arg7[%c0_89, %c0_90, %c0_91] : memref<18x18x128xbf16, #tpu.memory_space<vmem>>, vector<16x16x128xbf16>
    %c0_92 = arith.constant 0 : index
    %c1_93 = arith.constant 1 : index
    %c0_94 = arith.constant 0 : index
    %77 = vector.load %arg7[%c0_92, %c1_93, %c0_94] : memref<18x18x128xbf16, #tpu.memory_space<vmem>>, vector<16x16x128xbf16>
    %c0_95 = arith.constant 0 : index
    %c2_96 = arith.constant 2 : index
    %c0_97 = arith.constant 0 : index
    %78 = vector.load %arg7[%c0_95, %c2_96, %c0_97] : memref<18x18x128xbf16, #tpu.memory_space<vmem>>, vector<16x16x128xbf16>
    %79 = tpu.concatenate %76, %77, %78 in 2 : vector<16x16x128xbf16>, vector<16x16x128xbf16>, vector<16x16x128xbf16> -> vector<16x16x384xbf16>
    %80 = vector.shape_cast %79 : vector<16x16x384xbf16> to vector<256x384xbf16>
    %c0_98 = arith.constant 0 : index
    %c0_99 = arith.constant 0 : index
    %c0_100 = arith.constant 0 : index
    %81 = vector.load %arg4[%c0_98, %c0_99, %c0_100] : memref<3x384x128xbf16, #tpu.memory_space<vmem>>, vector<1x384x128xbf16>
    %82 = vector.shape_cast %81 : vector<1x384x128xbf16> to vector<384x128xbf16>
    %cst_101 = arith.constant dense<0.000000e+00> : vector<256x128xf32>
    %83 = tpu.matmul %80, %82, %cst_101 {dimension_numbers = #tpu.dot_dimension_numbers<[1], [0], [0], [1], [0, 0, 1, 1], [], []>} : vector<256x384xbf16>, vector<384x128xbf16>, vector<256x128xf32> -> vector<256x128xf32>
    %84 = arith.addf %75, %83 : vector<256x128xf32>
    %c1_102 = arith.constant 1 : index
    %c0_103 = arith.constant 0 : index
    %c0_104 = arith.constant 0 : index
    %85 = vector.load %arg7[%c1_102, %c0_103, %c0_104] : memref<18x18x128xbf16, #tpu.memory_space<vmem>>, vector<16x16x128xbf16>
    %c1_105 = arith.constant 1 : index
    %c1_106 = arith.constant 1 : index
    %c0_107 = arith.constant 0 : index
    %86 = vector.load %arg7[%c1_105, %c1_106, %c0_107] : memref<18x18x128xbf16, #tpu.memory_space<vmem>>, vector<16x16x128xbf16>
    %c1_108 = arith.constant 1 : index
    %c2_109 = arith.constant 2 : index
    %c0_110 = arith.constant 0 : index
    %87 = vector.load %arg7[%c1_108, %c2_109, %c0_110] : memref<18x18x128xbf16, #tpu.memory_space<vmem>>, vector<16x16x128xbf16>
    %88 = tpu.concatenate %85, %86, %87 in 2 : vector<16x16x128xbf16>, vector<16x16x128xbf16>, vector<16x16x128xbf16> -> vector<16x16x384xbf16>
    %89 = vector.shape_cast %88 : vector<16x16x384xbf16> to vector<256x384xbf16>
    %c1_111 = arith.constant 1 : index
    %c0_112 = arith.constant 0 : index
    %c0_113 = arith.constant 0 : index
    %90 = vector.load %arg4[%c1_111, %c0_112, %c0_113] : memref<3x384x128xbf16, #tpu.memory_space<vmem>>, vector<1x384x128xbf16>
    %91 = vector.shape_cast %90 : vector<1x384x128xbf16> to vector<384x128xbf16>
    %cst_114 = arith.constant dense<0.000000e+00> : vector<256x128xf32>
    %92 = tpu.matmul %89, %91, %cst_114 {dimension_numbers = #tpu.dot_dimension_numbers<[1], [0], [0], [1], [0, 0, 1, 1], [], []>} : vector<256x384xbf16>, vector<384x128xbf16>, vector<256x128xf32> -> vector<256x128xf32>
    %93 = arith.addf %84, %92 : vector<256x128xf32>
    %c2_115 = arith.constant 2 : index
    %c0_116 = arith.constant 0 : index
    %c0_117 = arith.constant 0 : index
    %94 = vector.load %arg7[%c2_115, %c0_116, %c0_117] : memref<18x18x128xbf16, #tpu.memory_space<vmem>>, vector<16x16x128xbf16>
    %c2_118 = arith.constant 2 : index
    %c1_119 = arith.constant 1 : index
    %c0_120 = arith.constant 0 : index
    %95 = vector.load %arg7[%c2_118, %c1_119, %c0_120] : memref<18x18x128xbf16, #tpu.memory_space<vmem>>, vector<16x16x128xbf16>
    %c2_121 = arith.constant 2 : index
    %c2_122 = arith.constant 2 : index
    %c0_123 = arith.constant 0 : index
    %96 = vector.load %arg7[%c2_121, %c2_122, %c0_123] : memref<18x18x128xbf16, #tpu.memory_space<vmem>>, vector<16x16x128xbf16>
    %97 = tpu.concatenate %94, %95, %96 in 2 : vector<16x16x128xbf16>, vector<16x16x128xbf16>, vector<16x16x128xbf16> -> vector<16x16x384xbf16>
    %98 = vector.shape_cast %97 : vector<16x16x384xbf16> to vector<256x384xbf16>
    %c2_124 = arith.constant 2 : index
    %c0_125 = arith.constant 0 : index
    %c0_126 = arith.constant 0 : index
    %99 = vector.load %arg4[%c2_124, %c0_125, %c0_126] : memref<3x384x128xbf16, #tpu.memory_space<vmem>>, vector<1x384x128xbf16>
    %100 = vector.shape_cast %99 : vector<1x384x128xbf16> to vector<384x128xbf16>
    %cst_127 = arith.constant dense<0.000000e+00> : vector<256x128xf32>
    %101 = tpu.matmul %98, %100, %cst_127 {dimension_numbers = #tpu.dot_dimension_numbers<[1], [0], [0], [1], [0, 0, 1, 1], [], []>} : vector<256x384xbf16>, vector<384x128xbf16>, vector<256x128xf32> -> vector<256x128xf32>
    %102 = arith.addf %93, %101 : vector<256x128xf32>
    %cst_128 = arith.constant dense<0.000000e+00> : vector<128xf32>
    %103 = vector.multi_reduction <add>, %102, %cst_128 [0] : vector<256x128xf32> to vector<128xf32>
    %104 = vector.shape_cast %103 : vector<128xf32> to vector<1x128xf32>
    %cst_129 = arith.constant 3.906250e-03 : f32
    %105 = vector.broadcast %cst_129 : f32 to vector<1x128xf32>
    %106 = arith.mulf %104, %105 : vector<1x128xf32>
    %107 = arith.mulf %102, %102 : vector<256x128xf32>
    %cst_130 = arith.constant dense<0.000000e+00> : vector<128xf32>
    %108 = vector.multi_reduction <add>, %107, %cst_130 [0] : vector<256x128xf32> to vector<128xf32>
    %109 = vector.shape_cast %108 : vector<128xf32> to vector<1x128xf32>
    %cst_131 = arith.constant 3.906250e-03 : f32
    %110 = vector.broadcast %cst_131 : f32 to vector<1x128xf32>
    %111 = arith.mulf %109, %110 : vector<1x128xf32>
    %112 = arith.mulf %106, %106 : vector<1x128xf32>
    %113 = arith.subf %111, %112 : vector<1x128xf32>
    %114 = vector.broadcast %106 : vector<1x128xf32> to vector<256x128xf32>
    %115 = arith.subf %102, %114 : vector<256x128xf32>
    %cst_132 = arith.constant 9.99999974E-6 : f32
    %116 = vector.broadcast %cst_132 : f32 to vector<1x128xf32>
    %117 = arith.addf %113, %116 : vector<1x128xf32>
    %118 = math.rsqrt %117 : vector<1x128xf32>
    %119 = vector.broadcast %118 : vector<1x128xf32> to vector<256x128xf32>
    %120 = arith.mulf %115, %119 : vector<256x128xf32>
    %121 = vector.shape_cast %120 : vector<256x128xf32> to vector<16x16x128xf32>
    %122 = arith.addf %121, %1 : vector<16x16x128xf32>
    %c0_133 = arith.constant 0 : index
    %c0_134 = arith.constant 0 : index
    %c0_135 = arith.constant 0 : index
    %c0_136 = arith.constant 0 : index
    %123 = vector.load %arg6[%c0_133, %c0_134, %c0_135, %c0_136] : memref<1x16x16x128xf32, #tpu.memory_space<vmem>>, vector<1x16x16x128xf32>
    %124 = vector.shape_cast %123 : vector<1x16x16x128xf32> to vector<16x16x128xf32>
    %125 = vector.shape_cast %122 : vector<16x16x128xf32> to vector<1x16x16x128xf32>
    tpu.vector_store %arg6[%c0_133, %c0_134, %c0_135, %c0_136], %125 {strides = array<i32>} : memref<1x16x16x128xf32, #tpu.memory_space<vmem>>, vector<1x16x16x128xf32>,
    return
  }
  func.func @transform_0(%arg0: i32) -> (i32, i32, i32, i32) {
    %c0_i32 = arith.constant 0 : i32
    %c0_i32_0 = arith.constant 0 : i32
    %c0_i32_1 = arith.constant 0 : i32
    %c0_i32_2 = arith.constant 0 : i32
    return %arg0, %c0_i32, %c0_i32_0, %c0_i32_1 : i32, i32, i32, i32
  }
  func.func @transform_1(%arg0: i32) -> (i32, i32, i32) {
    %c0_i32 = arith.constant 0 : i32
    %c0_i32_0 = arith.constant 0 : i32
    %c0_i32_1 = arith.constant 0 : i32
    %c0_i32_2 = arith.constant 0 : i32
    return %c0_i32, %c0_i32_0, %c0_i32_1 : i32, i32, i32
  }
  func.func @transform_2(%arg0: i32) -> (i32, i32) {
    %c0_i32 = arith.constant 0 : i32
    %c0_i32_0 = arith.constant 0 : i32
    %c0_i32_1 = arith.constant 0 : i32
    return %c0_i32, %c0_i32_0 : i32, i32
  }
  func.func @transform_3(%arg0: i32) -> (i32, i32, i32) {
    %c0_i32 = arith.constant 0 : i32
    %c0_i32_0 = arith.constant 0 : i32
    %c0_i32_1 = arith.constant 0 : i32
    %c0_i32_2 = arith.constant 0 : i32
    return %c0_i32, %c0_i32_0, %c0_i32_1 : i32, i32, i32
  }
  func.func @transform_4(%arg0: i32) -> (i32, i32) {
    %c0_i32 = arith.constant 0 : i32
    %c0_i32_0 = arith.constant 0 : i32
    %c0_i32_1 = arith.constant 0 : i32
    return %c0_i32, %c0_i32_0 : i32, i32
  }
  func.func @transform_5(%arg0: i32) -> (i32, i32, i32, i32) {
    %c0_i32 = arith.constant 0 : i32
    %c0_i32_0 = arith.constant 0 : i32
    %c0_i32_1 = arith.constant 0 : i32
    %c0_i32_2 = arith.constant 0 : i32
    return %arg0, %c0_i32, %c0_i32_0, %c0_i32_1 : i32, i32, i32, i32
  }
}

</mosaic_0001>

<bundles_post_ra>
// kernel: residual_block.1
= control target key start
LH: loop header
LB: loop body
LE: loop exit
PB: predicated region body
PF: predicated region fallthrough
CT: control target
= control target key end

     0   :  { %s10061_s18 = smov 0   ;;  %s13354_s0 = inlined_call_operand.vmem [shape: f32[2,16,16,128], index: 0, kind: input, shape index: {}]   ;;  %s13355_s1 = inlined_call_operand.vmem [shape: bf16[3,384,128], index: 1, kind: input, shape index: {}]   ;;  %s13356_s2 = inlined_call_operand.vmem [shape: f32[1,128], index: 2, kind: input, shape index: {}]   ;;  %s13357_s3 = inlined_call_operand.vmem [shape: bf16[3,384,128], index: 3, kind: input, shape index: {}]   ;;  %s13358_s4 = inlined_call_operand.vmem [shape: f32[1,128], index: 4, kind: input, shape index: {}]   ;;  %s13359_s5 = inlined_call_operand.vmem [shape: f32[2,16,16,128], index: 5, kind: output, shape index: {}]  }
   0x1 LB: > { %s8449_s19 = sadd.s32 4294967295, %s10029_s18   ;;  %p8453_p0 = scmp.ge.s32.totalorder %s10029_s18, 1  ;;  %s10029_s18 = sphi %s10061_s18, %s15_s18  }
   0x2   : > { %p187_p1 = scmp.lt.s32.totalorder %s10029_s18, 3 }
   0x4   : > { %p188_p2 = pnand %p8453_p0, %p187_p1 }
   0x6   : > { %191 = sbr.rel (%p188_p2) target bundleno = 1941 (0x795), region = 40 }
   0xb   : > { %v9309_v0 = vld [vmem:[%s13355_s1 + $0x38] sm:$0xff]  ;;  %p215_p3 = scmp.lt.s32.totalorder %s8449_s19, 1  ;;  %v9308_v2 = vld [vmem:[%s13355_s1 + $0x30] sm:$0xff]  ;;  %v9307_v4 = vld [vmem:[%s13355_s1 + $0x28] sm:$0xff]  ;;  %vm289_vm0 = vsmask.f32 256 }
   0xc   : > { %v9317_v1 = vld [vmem:[%s13355_s1 + $0x78] sm:$0xff]  ;;  %9826 = vmatpush.bf16.msra.mxu2 %v9309_v0  ;;  %1760 = vmatpush.bf16.msra.mxu0 %v9309_v0  ;;  %v9316_v3 = vld [vmem:[%s13355_s1 + $0x70] sm:$0xff]  ;;  %v9315_v7 = vld [vmem:[%s13355_s1 + $0x68] sm:$0xff]  ;;  %vm290_vm1 = vsmask.f32 4368  ;;  %vm613_vm2 = vcmask 1043456  }
   0xd   : > { %s13625_s19 = smov (!%p215_p3, %s8449_s19), 1  ;;  %1849 = vmatpush.bf16.msra.mxu1 %v9317_v1  ;;  %9834 = vmatpush.bf16.msra.mxu3 %v9317_v1  ;;  %vm614_vm3 = vsmask.f32 7938  ;;  %vm620_vm4 = vcmask 1040384   ;;  %v9306_v13 = vld [vmem:[%s13355_s1 + $0x20] sm:$0xff]  ;;  %vm10109_vm5 = vmor %vm289_vm0, %vm290_vm1  ;;  %v13397_v19 = vmov 0 }
   0xe   : > { %s9300_s28 = sshll.u32 %s13625_s19, 8  ;;  %v9314_v14 = vld [vmem:[%s13355_s1 + $0x60] sm:$0xff]  ;;  %v13398_v19 = vsel %vm10109_vm5, 4294967295, %v13397_v19  ;;  %vm10117_vm6 = vmand %vm613_vm2, %vm614_vm3  ;;  %v13400_v27 = vmov 0  ;;  %v9305_v32 = vld [vmem:[%s13355_s1 + $0x18] sm:$0xff]  ;;  %v13403_v33 = vmov 0 }
   0xf   : > { %s10089_s6 = scalar_lea.vmem %s13354_s0, %s9300_s28  ;;  %13399 = vst [vmem:[#allocation3_spill] sm:$0xff] %v13398_v19  ;;  %v13401_v27 = vsel %vm10117_vm6, 4294967295, %v13400_v27  ;;  %v667_v28 = vld [vmem:[#allocation2 + $0x60] sm:$0xf]  ;;  %vm10129_vm7 = vmand %vm620_vm4, %vm289_vm0  ;;  %v671_v37 = vld [vmem:[#allocation2 + $0x68] sm:$0x1]  ;;  %s13250_s26 = scalar_lea.vmem %s13359_s5, %s9300_s28 }
  0x10   : > { %9827 = vmatpush.bf16.msra.mxu2 %v9308_v2  ;;  %1761 = vmatpush.bf16.msra.mxu0 %v9308_v2  ;;  %v239_v5 = vld [vmem:[%s10089_s6 + $0x70] sm:$0xff]  ;;  %v240_v6 = vld [vmem:[%s10089_s6 + $0x78] sm:$0xff]  ;;  %v241_v23 = vld [vmem:[%s10089_s6 + $0x80] sm:$0xff]  ;;  %13402 = vst [vmem:[#allocation4_spill] sm:$0xff] %v13401_v27  ;;  %v13404_v33 = vsel %vm10129_vm7, 4294967295, %v13403_v33  ;;  %vm1503_vm10 = vcmask 1046528  }
  0x11   : > { %1850 = vmatpush.bf16.msra.mxu1 %v9316_v3  ;;  %9835 = vmatpush.bf16.msra.mxu3 %v9316_v3  ;;  %v271_v8 = vpack.c.bf16 %v239_v5, %v239_v5  ;;  %v272_v9 = vpack.c.bf16 %v240_v6, %v240_v6  ;;  %v227_v10 = vld [vmem:[%s10089_s6 + $0x10] sm:$0xff]  ;;  %v228_v11 = vld [vmem:[%s10089_s6 + $0x18] sm:$0xff]  ;;  %v242_v24 = vld [vmem:[%s10089_s6 + $0x88] sm:$0xff]  ;;  %v273_v29 = vpack.c.bf16 %v241_v23, %v241_v23  ;;  %vm1246_vm9 = vsmask.f32 7424 }
  0x12   : > { %v259_v12 = vpack.c.bf16 %v227_v10, %v227_v10  ;;  %v260_v20 = vpack.c.bf16 %v228_v11, %v228_v11  ;;  %v10121_v30 = vpack.c.bf16 %v242_v24, %v242_v24  ;;  %v225_v31 = vld [vmem:[%s10089_s6] sm:$0xff]  ;;  %13405 = vst [vmem:[#allocation5_spill] sm:$0xff] %v13404_v33  ;;  %v734_v44 = vld [vmem:[#allocation2 + $0x8] sm:$0x1]  ;;  %v9313_v50 = vld [vmem:[%s13355_s1 + $0x58] sm:$0xff] }
  0x13   : > { %v412_v15 = vshrl.u32 %v271_v8, 16  ;;  %v415_v16 = vshll.u32 %v271_v8, 16  ;;  %v420_v17 = vshrl.u32 %v272_v9, 16  ;;  %v423_v18 = vshll.u32 %v272_v9, 16  ;;  %v730_v43 = vld [vmem:[#allocation2] sm:$0xf]  ;;  %vm10204_vm8 = vmand %vm620_vm4, %vm614_vm3 }
  0x14   : > { %9828 = vmatpush.bf16.msra.mxu2 %v9307_v4  ;;  %1762 = vmatpush.bf16.msra.mxu0 %v9307_v4  ;;  %v310_v21 = vshrl.u32 %v259_v12, 16  ;;  %v313_v22 = vshll.u32 %v259_v12, 16  ;;  %v318_v35 = vshrl.u32 %v260_v20, 16  ;;  %v321_v36 = vshll.u32 %v260_v20, 16  ;;  %v226_v49 = vld [vmem:[%s10089_s6 + $0x8] sm:$0xff]  ;;  %v243_v60 = vld [vmem:[%s10089_s6 + $0x90] sm:$0xff] }
  0x15   : > { %1851 = vmatpush.bf16.msra.mxu1 %v9315_v7  ;;  %9836 = vmatpush.bf16.msra.mxu3 %v9315_v7  ;;  %v414_v25 = vrot.slane %v412_v15, 7  ;;  %v422_v26 = vrot.slane %v420_v17, 7  ;;  %v10133_v38 = vpack.c.bf16 %v225_v31, %v225_v31  ;;  %v429_v48 = vshrl.u32 %v273_v29, 16  ;;  %v674_v55 = vld [vmem:[#allocation2 + $0x6c] sm:$0xf]  ;;  %v9304_v1 = vld [vmem:[%s13355_s1 + $0x10] sm:$0xff] }
  0x16   : > { %v312_v34 = vrot.slane %v310_v21, 7  ;;  %v10137_v47 = vrot.slane %v318_v35, 7  ;;  %v432_v54 = vshll.u32 %v273_v29, 16  ;;  %v437_v61 = vshrl.u32 %v10121_v30, 16  ;;  %v244_v5 = vld [vmem:[%s10089_s6 + $0x98] sm:$0xff]  ;;  %v9312_v6 = vld [vmem:[%s13355_s1 + $0x50] sm:$0xff] }
  0x17   : > { %v417_v39 = vor.u32 %v415_v16, %v414_v25  ;;  %v418_v40 = vrot.slane %v414_v25, 4  ;;  %v425_v41 = vor.u32 %v423_v18, %v422_v26  ;;  %v427_v42 = vrot.slane %v422_v26, 4  ;;  %v9303_v11 = vld [vmem:[%s13355_s1 + $0x8] sm:$0xff]  ;;  %v9302_v31 = vld [vmem:[%s13355_s1] sm:$0xff] }
  0x18   : > { %9829 = vmatpush.bf16.msra.mxu2 %v9306_v13  ;;  %1763 = vmatpush.bf16.msra.mxu0 %v9306_v13  ;;  %v10135_v45 = vor.u32 %v313_v22, %v312_v34  ;;  %v316_v46 = vrot.slane %v312_v34, 4  ;;  %v323_v56 = vor.u32 %v321_v36, %v10137_v47  ;;  %v325_v57 = vrot.slane %v10137_v47, 4  ;;  %v616_v20 = vld [vmem:[#allocation2 + $0xc] sm:$0xf] }
  0x19   : > { %1852 = vmatpush.bf16.msra.mxu1 %v9314_v14  ;;  %9837 = vmatpush.bf16.msra.mxu3 %v9314_v14  ;;  %v426_v51 = vsel %vm10109_vm5, %v418_v40, %v425_v41  ;;  %v668_v52 = vsel %vm10117_vm6, %v417_v39, %v667_v28  ;;  %v672_v53 = vsel %vm10129_vm7, %v427_v42, %v671_v37  ;;  %v431_v59 = vrot.slane %v429_v48, 7  ;;  %v9311_v22 = vld [vmem:[%s13355_s1 + $0x48] sm:$0xff]  ;;  %v9310_v39 = vld [vmem:[%s13355_s1 + $0x40] sm:$0xff] }
  0x1a   : > { %669 = vst [vmem:[#allocation2 + $0x60] sm:$0xf] %v668_v52  ;;  %v731_v58 = vsel %vm10117_vm6, %v10135_v45, %v730_v43  ;;  %v440_v62 = vshll.u32 %v10121_v30, 16  ;;  %v258_v63 = vpack.c.bf16 %v226_v49, %v226_v49  ;;  %v293_v0 = vshrl.u32 %v10133_v38, 16  ;;  %v678_v43 = vld [vmem:[#allocation2 + $0x74] sm:$0x1] }
  0x1b   : > { %670 = vst [vmem:[#allocation2 + $0x64] sm:$0xf] %v426_v51  ;;  %v324_v2 = vsel %vm10109_vm5, %v316_v46, %v323_v56  ;;  %v735_v3 = vsel %vm10129_vm7, %v325_v57, %v734_v44  ;;  %v434_v4 = vor.u32 %v432_v54, %v431_v59  ;;  %v435_v7 = vrot.slane %v431_v59, 4  ;;  %v9325_v51 = vld [vmem:[%s13355_s1 + $0xb8] sm:$0xff] }
  0x1c   : > { %9830 = vmatpush.bf16.msra.mxu2 %v9305_v32  ;;  %1764 = vmatpush.bf16.msra.mxu0 %v9305_v32  ;;  %732 = vst [vmem:[#allocation2] sm:$0xf] %v731_v58  ;;  %v10171_v8 = vrot.slane %v437_v61, 7  ;;  %v295_v9 = vrot.slane %v293_v0, 7  ;;  %v10173_v10 = vpack.c.bf16 %v243_v60, %v243_v60  ;;  %v296_v13 = vshll.u32 %v10133_v38, 16  ;;  %v9341_v56 = vld [vmem:[%s13355_s1 + $0x138] sm:$0xff] }
  0x1d   : > { %1853 = vmatpush.bf16.msra.mxu1 %v9313_v50  ;;  %9838 = vmatpush.bf16.msra.mxu3 %v9313_v50  ;;  %733 = vst [vmem:[#allocation2 + $0x4] sm:$0xf] %v324_v2  ;;  %v675_v12 = vsel %vm10117_vm6, %v434_v4, %v674_v55  ;;  %v301_v14 = vshrl.u32 %v258_v63, 16  ;;  %v304_v15 = vshll.u32 %v258_v63, 16  ;;  %v10183_v21 = vpack.c.bf16 %v244_v5, %v244_v5  ;;  %v622_v38 = vld [vmem:[#allocation2 + $0x14] sm:$0x1] }
  0x1e   : > { %628 = vst [vmem:[#allocation2 + $0x1c] sm:$0xf] %v324_v2  ;;  %v442_v16 = vor.u32 %v440_v62, %v10171_v8  ;;  %v444_v17 = vrot.slane %v10171_v8, 4  ;;  %v299_v18 = vrot.slane %v295_v9, 4  ;;  %v298_v23 = vor.u32 %v296_v13, %v295_v9  ;;  %v9333_v55 = vld [vmem:[%s13355_s1 + $0xf8] sm:$0xff]  ;;  %v245_v5 = vld [vmem:[%s10089_s6 + $0xa0] sm:$0xff] }
  0x1f   : > { %736 = vst [vmem:[#allocation2 + $0x8] sm:$0x1] %v735_v3  ;;  %v303_v24 = vrot.slane %v301_v14, 7  ;;  %v446_v25 = vshrl.u32 %v10173_v10, 16  ;;  %v449_v26 = vshll.u32 %v10173_v10, 16  ;;  %v13406_v48 = vmov 0 }
  0x20   : > { %9831 = vmatpush.bf16.msra.mxu2 %v9304_v1  ;;  %1765 = vmatpush.bf16.msra.mxu0 %v9304_v1  ;;  %673 = vst [vmem:[#allocation2 + $0x68] sm:$0x1] %v672_v53  ;;  %v443_v30 = vsel %vm10109_vm5, %v435_v7, %v442_v16  ;;  %v617_v37 = vsel %vm10117_vm6, %v298_v23, %v616_v20  ;;  %v13407_v48 = vsel %vm10204_vm8, 4294967295, %v13406_v48  ;;  %v454_v53 = vshrl.u32 %v10183_v21, 16  ;;  %v681_v59 = vld [vmem:[#allocation2 + $0x78] sm:$0xf] }
  0x21   : > { %1854 = vmatpush.bf16.msra.mxu1 %v9312_v6  ;;  %9839 = vmatpush.bf16.msra.mxu3 %v9312_v6  ;;  %v753_v28 = vld [vmem:[#allocation2 + $0x60] sm:$0x2]  ;;  %v859_v29 = vld [vmem:[#allocation2 + $0x60] sm:$0x1]  ;;  %676 = vst [vmem:[#allocation2 + $0x6c] sm:$0xf] %v675_v12  ;;  %v306_v35 = vor.u32 %v304_v15, %v303_v24  ;;  %v679_v10 = vsel %vm10129_vm7, %v444_v17, %v678_v43 }
  0x22   : > { %v8466_v32 = vrot.slane %v753_v28, 9  ;;  %v897_v34 = vld [vmem:[#allocation2 + $0x64] sm:$0x8]  ;;  %677 = vst [vmem:[#allocation2 + $0x70] sm:$0xf] %v443_v30  ;;  %v308_v36 = vrot.slane %v303_v24, 4  ;;  %v277_v30 = vpack.c.bf16 %v245_v5, %v245_v5 }
  0x23   : > { %v745_v40 = vld [vmem:[#allocation2] sm:$0x2]  ;;  %v835_v41 = vld [vmem:[#allocation2] sm:$0x1]  ;;  %v8484_v42 = vrot.slane %v897_v34, 11  ;;  %v448_v44 = vrot.slane %v446_v25, 7  ;;  %v307_v52 = vsel %vm10109_vm5, %v299_v18, %v306_v35 }
  0x24   : > { %9832 = vmatpush.bf16.msra.mxu2 %v9303_v11  ;;  %v860_v46 = vsel %vm10129_vm7, %v8466_v32, %v859_v29  ;;  %13408 = vst [vmem:[#allocation6_spill] sm:$0xff] %v13407_v48  ;;  %1766 = vmatpush.bf16.msra.mxu0 %v9303_v11  ;;  %v8458_v49 = vrot.slane %v745_v40, 9  ;;  %v889_v50 = vld [vmem:[#allocation2 + $0x4] sm:$0x8]  ;;  %v10222_v63 = vrot.slane %v454_v53, 7  ;;  %v457_v0 = vshll.u32 %v10183_v21, 16 }
  0x25   : > { %618 = vst [vmem:[#allocation2 + $0xc] sm:$0xf] %v617_v37  ;;  %1855 = vmatpush.bf16.msra.mxu1 %v9311_v22  ;;  %9840 = vmatpush.bf16.msra.mxu3 %v9311_v22  ;;  %v8476_v54 = vrot.slane %v889_v50, 11  ;;  %v452_v58 = vrot.slane %v448_v44, 4  ;;  %v451_v62 = vor.u32 %v449_v26, %v448_v44  ;;  %v623_v3 = vsel %vm10129_vm7, %v308_v36, %v622_v38  ;;  %v10229_v4 = vld [vmem:[#allocation2 + $0x1c] sm:$0x8] }
  0x26   : > { %861 = vst [vmem:[#allocation2 + $0x60] sm:$0x1] %v860_v46  ;;  %v836_v60 = vsel %vm10129_vm7, %v8458_v49, %v835_v41  ;;  %v980_v61 = vld [vmem:[#allocation2 + $0x8] sm:$0x1]  ;;  %v459_v11 = vor.u32 %v457_v0, %v10222_v63  ;;  %v625_v12 = vld [vmem:[#allocation2 + $0x18] sm:$0xf] }
  0x27   : > { %619 = vst [vmem:[#allocation2 + $0x10] sm:$0xf] %v307_v52  ;;  %v981_v1 = vsel %vm10204_vm8, %v8476_v54, %v980_v61  ;;  %v1004_v2 = vld [vmem:[#allocation2 + $0x68] sm:$0x1]  ;;  %v461_v15 = vrot.slane %v10222_v63, 4  ;;  %v9324_v17 = vld [vmem:[%s13355_s1 + $0xb0] sm:$0xff]  ;;  %v682_v20 = vsel %vm10117_vm6, %v451_v62, %v681_v59  ;;  %v626_v35 = vsel %vm10117_vm6, %v10135_v45, %v625_v12 }
  0x28   : > { %837 = vst [vmem:[#allocation2] sm:$0x1] %v836_v60  ;;  %9833 = vmatpush.bf16.msra.mxu2 %v9302_v31  ;;  %1767 = vmatpush.bf16.msra.mxu0 %v9302_v31  ;;  %v1005_v6 = vsel %vm10204_vm8, %v8484_v42, %v1004_v2  ;;  %v754_v7 = vld [vmem:[#allocation2 + $0x6c] sm:$0x2]  ;;  %v862_v9 = vld [vmem:[#allocation2 + $0x6c] sm:$0x1]  ;;  %v460_v25 = vsel %vm10109_vm5, %v452_v58, %v459_v11 }
  0x29   : > { %982 = vst [vmem:[#allocation2 + $0x8] sm:$0x1] %v981_v1  ;;  %1856 = vmatpush.bf16.msra.mxu1 %v9310_v39  ;;  %9841 = vmatpush.bf16.msra.mxu3 %v9310_v39  ;;  %v8467_v13 = vrot.slane %v754_v7, 9  ;;  %v10239_v14 = vld [vmem:[#allocation2 + $0x70] sm:$0x8]  ;;  %v8478_v21 = vrot.slane %v10229_v4, 11 }
  0x2a   : > { %1006 = vst [vmem:[#allocation2 + $0x68] sm:$0x1] %v1005_v6  ;;  %v629_v16 = vld [vmem:[#allocation2 + $0x20] sm:$0x1]  ;;  %v8485_v8 = vrot.slane %v10239_v14, 11  ;;  %v9332_v18 = vld [vmem:[%s13355_s1 + $0xf0] sm:$0xff] }
  0x2b   : > { %624 = vst [vmem:[#allocation2 + $0x14] sm:$0x1] %v623_v3  ;;  %v863_v22 = vsel %vm10129_vm7, %v8467_v13, %v862_v9  ;;  %v685_v29 = vld [vmem:[#allocation2 + $0x80] sm:$0x1]  ;;  %v9340_v39 = vld [vmem:[%s13355_s1 + $0x130] sm:$0xff]  ;;  %v630_v40 = vsel %vm10129_vm7, %v325_v57, %v629_v16  ;;  %v246_v41 = vld [vmem:[%s10089_s6 + $0xa8] sm:$0xff] }
  0x2c   : > { %1938 = vmatpush.bf16.msrb.mxu2 %v9325_v51  ;;  %2869 = vmatpush.bf16.msrb.mxu0 %v9341_v56  ;;  %v746_v23 = vld [vmem:[#allocation2 + $0xc] sm:$0x2]  ;;  %v838_v24 = vld [vmem:[#allocation2 + $0xc] sm:$0x1]  ;;  %680 = vst [vmem:[#allocation2 + $0x74] sm:$0x1] %v679_v10  ;;  %v278_v46 = vpack.c.bf16 %v246_v41, %v246_v41  ;;  %v686_v52 = vsel %vm10129_vm7, %v461_v15, %v685_v29 }
  0x2d   : > { %2780 = vmatpush.bf16.msrb.mxu3 %v9333_v55  ;;  %v9641_v26 = vld [vmem:[#allocation2 + $0x60] sm:$0xff]   ;;  %864 = vst [vmem:[#allocation2 + $0x6c] sm:$0x1] %v863_v22  ;;  %v8459_v28 = vrot.slane %v746_v23, 9  ;;  %v463_v53 = vshrl.u32 %v277_v30, 16  ;;  %v466_v47 = vshll.u32 %v277_v30, 16 }
  0x2e   : > { %1808 = vmatmul.bf16.vlgmr.msra.gmra.mxu2 %v9641_v26  ;;  %v1344_v31 = vshrl.u32 %v9641_v26, 16  ;;  %v1346_v32 = vshll.u32 %v9641_v26, 16  ;;  %v890_v34 = vld [vmem:[#allocation2 + $0x10] sm:$0x8]  ;;  %683 = vst [vmem:[#allocation2 + $0x78] sm:$0xf] %v682_v20 }
  0x2f   : > { %v9447_v36 = vld [vmem:[#allocation2] sm:$0xff]   ;;  %v839_v37 = vsel %vm10129_vm7, %v8459_v28, %v838_v24  ;;  %v8477_v38 = vrot.slane %v890_v34, 11  ;;  %684 = vst [vmem:[#allocation2 + $0x7c] sm:$0xf] %v460_v25  ;;  %v471_v56 = vshrl.u32 %v278_v46, 16  ;;  %v465_v62 = vrot.slane %v463_v53, 7 }
  0x30   : > { %1939 = vmatpush.bf16.msrb.mxu2 %v9324_v17  ;;  %1768 = vmatmul.bf16.vlgmr.msra.gmra.mxu0 %v9447_v36  ;;  %v1070_v45 = vld [vmem:[#allocation2 + $0x8] sm:$0x1]  ;;  %v1248_v42 = vshrl.u32 %v9447_v36, 16  ;;  %v1250_v43 = vshll.u32 %v9447_v36, 16  ;;  %v1348_v44 = vrot.slane %v1346_v32, 1  ;;  %v229_v49 = vld [vmem:[%s10089_s6 + $0x20] sm:$0xff] }
  0x31   : > { %2781 = vmatpush.bf16.msrb.mxu3 %v9332_v18  ;;  %v1214_v50 = vunpack.c.l.b16 %v1070_v45  ;;  %v1078_v51 = vld [vmem:[#allocation2 + $0x68] sm:$0x1]  ;;  %840 = vst [vmem:[#allocation2 + $0xc] sm:$0x1] %v839_v37  ;;  %2870 = vmatpush.bf16.msrb.mxu0 %v9340_v39  ;;  %v10272_v58 = vpack.c.bf16 %v229_v49, %v229_v49  ;;  %v474_v63 = vshll.u32 %v278_v46, 16  ;;  %v10288_v6 = vrot.slane %v471_v56, 7 }
  0x32   : > { %v1252_v54 = vrot.slane %v1250_v43, 1  ;;  %v1222_v55 = vunpack.c.l.b16 %v1078_v51  ;;  %v983_v57 = vld [vmem:[#allocation2 + $0x14] sm:$0x1]  ;;  %627 = vst [vmem:[#allocation2 + $0x18] sm:$0xf] %v626_v35  ;;  %v468_v11 = vor.u32 %v466_v47, %v465_v62  ;;  %v1349_v12 = vor.u32 %v1348_v44, %v1344_v31  ;;  %v230_v22 = vld [vmem:[%s10089_s6 + $0x28] sm:$0xff] }
  0x33   : > { %v10274_v59 = vpack.c.b16 %v1214_v50, %v1214_v50  ;;  %v984_v60 = vsel %vm10204_vm8, %v8477_v38, %v983_v57  ;;  %v1007_v61 = vld [vmem:[#allocation2 + $0x74] sm:$0x1]  ;;  %631 = vst [vmem:[#allocation2 + $0x20] sm:$0x1] %v630_v40  ;;  %v10282_v3 = vld [vmem:[#allocation2 + $0x6c] sm:$0xf0]  ;;  %v476_v14 = vor.u32 %v474_v63, %v10288_v6  ;;  %v10307_v41 = vpack.c.bf16 %v230_v22, %v230_v22 }
  0x34   : > { %v1253_v0 = vor.u32 %v1252_v54, %v1248_v42  ;;  %v10278_v1 = vpack.c.b16 %v1222_v55, %v1222_v55  ;;  %v10280_v2 = vld [vmem:[#allocation2 + $0x6c] sm:$0xff]   ;;  %985 = vst [vmem:[#allocation2 + $0x14] sm:$0x1] %v984_v60  ;;  %v1008_v5 = vsel %vm10204_vm8, %v8485_v8, %v1007_v61  ;;  %v688_v7 = vld [vmem:[#allocation2 + $0x84] sm:$0xf]  ;;  %v469_v18 = vrot.slane %v465_v62, 4 }
  0x35   : > { %v1255_v9 = vshll.u32 %v10274_v59, 16  ;;  %1009 = vst [vmem:[#allocation2 + $0x74] sm:$0x1] %v1008_v5  ;;  %v755_v10 = vld [vmem:[#allocation2 + $0x78] sm:$0x2]  ;;  %v478_v20 = vrot.slane %v10288_v6, 4  ;;  %v689_v29 = vsel %vm10117_vm6, %v468_v11, %v688_v7 }
  0x36   : > { %v1351_v13 = vshll.u32 %v10278_v1, 16  ;;  %v8468_v15 = vrot.slane %v755_v10, 9  ;;  %v865_v16 = vld [vmem:[#allocation2 + $0x78] sm:$0x1]  ;;  %687 = vst [vmem:[#allocation2 + $0x80] sm:$0x1] %v686_v52  ;;  %v477_v46 = vsel %vm10109_vm5, %v469_v18, %v476_v14 }
  0x37   : > { %v1257_v17 = vrot.slane %v1255_v9, 1  ;;  %v899_v8 = vld [vmem:[#allocation2 + $0x7c] sm:$0x8]  ;;  %v10295_v25 = vld [vmem:[#allocation2 + $0xc] sm:$0xf0]  ;;  %v1356_v32 = vshrl.u32 %v10280_v2, 16 }
  0x38   : > { %v1353_v23 = vrot.slane %v1351_v13, 1  ;;  %v1040_v24 = vld [vmem:[#allocation2 + $0xc] sm:$0xff]   ;;  %v866_v26 = vsel %vm10129_vm7, %v8468_v15, %v865_v16  ;;  %v8486_v28 = vrot.slane %v899_v8, 11  ;;  %v248_v35 = vld [vmem:[%s10089_s6 + $0xb8] sm:$0xff]  ;;  %v1358_v37 = vshll.u32 %v10280_v2, 16 }
  0x39   : > { %v247_v30 = vld [vmem:[%s10089_s6 + $0xb0] sm:$0xff]  ;;  %v1258_v31 = vsel %vm1246_vm9, %v1253_v0, %v1257_v17  ;;  %867 = vst [vmem:[#allocation2 + $0x78] sm:$0x1] %v866_v26  ;;  %v747_v34 = vld [vmem:[#allocation2 + $0x18] sm:$0x2]  ;;  %v9323_v43 = vld [vmem:[%s13355_s1 + $0xa8] sm:$0xff]  ;;  %v10334_v62 = vpack.c.bf16 %v248_v35, %v248_v35 }
  0x3a   : > { %1857 = vmatmul.bf16.vlgmr.msra.gmra.mxu1 %v1258_v31  ;;  %v1354_v36 = vsel %vm1246_vm9, %v1349_v12, %v1353_v23  ;;  %v8460_v38 = vrot.slane %v747_v34, 9  ;;  %v841_v39 = vld [vmem:[#allocation2 + $0x18] sm:$0x1]  ;;  %v986_v40 = vld [vmem:[#allocation2 + $0x20] sm:$0x1]  ;;  %v9331_v44 = vld [vmem:[%s13355_s1 + $0xe8] sm:$0xff]  ;;  %1940 = vmatpush.bf16.msrb.mxu2 %v9323_v43  ;;  %v10324_v55 = vpack.c.bf16 %v247_v30, %v247_v30 }
  0x3b   : > { %1897 = vmatmul.bf16.vlgmr.msra.gmra.mxu3 %v1354_v36  ;;  %v1071_v45 = vld [vmem:[#allocation2 + $0x14] sm:$0x1]  ;;  %v987_v42 = vsel %vm10204_vm8, %v8478_v21, %v986_v40  ;;  %690 = vst [vmem:[#allocation2 + $0x84] sm:$0xf] %v689_v29  ;;  %v1360_v51 = vrot.slane %v1358_v37, 1  ;;  %v327_v21 = vshrl.u32 %v10272_v58, 16 }
  0x3c   : > { %v1215_v49 = vunpack.c.l.b16 %v1071_v45  ;;  %v1079_v50 = vld [vmem:[#allocation2 + $0x74] sm:$0x1]  ;;  %v842_v4 = vsel %vm10129_vm7, %v8460_v38, %v841_v39  ;;  %988 = vst [vmem:[#allocation2 + $0x20] sm:$0x1] %v987_v42  ;;  %v1260_v52 = vshrl.u32 %v1040_v24, 16  ;;  %v1262_v53 = vshll.u32 %v1040_v24, 16  ;;  %2782 = vmatpush.bf16.msrb.mxu3 %v9331_v44 }
  0x3d   : > { %v1223_v47 = vunpack.c.l.b16 %v1079_v50  ;;  %843 = vst [vmem:[#allocation2 + $0x18] sm:$0x1] %v842_v4  ;;  %v1010_v54 = vld [vmem:[#allocation2 + $0x80] sm:$0x1]  ;;  %v9339_v60 = vld [vmem:[%s13355_s1 + $0x128] sm:$0xff]  ;;  %v329_v61 = vrot.slane %v327_v21, 7  ;;  %v1361_v10 = vor.u32 %v1360_v51, %v1356_v32 }
  0x3e   : > { %1813 = vmatmul.bf16.gmra.mxu2 %v10280_v2  ;;  %v10327_v57 = vpack.c.b16 %v1215_v49, %v1215_v49  ;;  %v1011_v56 = vsel %vm10204_vm8, %v8486_v28, %v1010_v54  ;;  %691 = vst [vmem:[#allocation2 + $0x88] sm:$0xf] %v477_v46  ;;  %v231_v63 = vld [vmem:[%s10089_s6 + $0x30] sm:$0xff]  ;;  %v1264_v0 = vrot.slane %v1262_v53, 1  ;;  %v330_v2 = vshll.u32 %v10272_v58, 16  ;;  %2871 = vmatpush.bf16.msrb.mxu0 %v9339_v60  ;;  %v232_v51 = vld [vmem:[%s10089_s6 + $0x38] sm:$0xff] }
  0x3f   : > { %v10337_v5 = vpack.c.b16 %v1223_v47, %v1223_v47  ;;  %1012 = vst [vmem:[#allocation2 + $0x80] sm:$0x1] %v1011_v56  ;;  %v335_v7 = vshrl.u32 %v10307_v41, 16  ;;  %v333_v12 = vrot.slane %v329_v61, 4  ;;  %v338_v13 = vshll.u32 %v10307_v41, 16 }
  0x40   : > { %1773 = vmatmul.bf16.gmra.mxu0 %v1040_v24  ;;  %v1267_v9 = vshll.u32 %v10327_v57, 16  ;;  %v10342_v11 = vld [vmem:[#allocation2 + $0x78] sm:$0xff]   ;;  %v692_v15 = vld [vmem:[#allocation2 + $0x8c] sm:$0x1]  ;;  %v1265_v16 = vor.u32 %v1264_v0, %v1260_v52  ;;  %v632_v8 = vld [vmem:[#allocation2 + $0x24] sm:$0xf]  ;;  %v10347_v58 = vpack.c.bf16 %v231_v63, %v231_v63  ;;  %v332_v24 = vor.u32 %v330_v2, %v329_v61 }
  0x41   : > { %v1363_v14 = vshll.u32 %v10337_v5, 16  ;;  %v1370_v17 = vshll.u32 %v10342_v11, 16  ;;  %v337_v26 = vrot.slane %v335_v7, 7  ;;  %v636_v28 = vld [vmem:[#allocation2 + $0x2c] sm:$0x1]  ;;  %v693_v29 = vsel %vm10129_vm7, %v478_v20, %v692_v15 }
  0x42   : > { %v1269_v18 = vrot.slane %v1267_v9, 1  ;;  %v756_v22 = vld [vmem:[#allocation2 + $0x84] sm:$0x2]  ;;  %v868_v23 = vld [vmem:[#allocation2 + $0x84] sm:$0x1]  ;;  %v1368_v32 = vshrl.u32 %v10342_v11, 16  ;;  %v633_v50 = vsel %vm10117_vm6, %v332_v24, %v632_v8  ;;  %v264_v2 = vpack.c.bf16 %v232_v51, %v232_v51 }
  0x43   : > { %v1365_v30 = vrot.slane %v1363_v14, 1  ;;  %v1072_v31 = vld [vmem:[#allocation2 + $0x20] sm:$0x1]  ;;  %v1372_v34 = vrot.slane %v1370_v17, 1  ;;  %v8469_v35 = vrot.slane %v756_v22, 9  ;;  %v340_v38 = vor.u32 %v338_v13, %v337_v26 }
  0x44   : > { %v10354_v36 = vld [vmem:[#allocation2 + $0x18] sm:$0xff]   ;;  %v1216_v37 = vunpack.c.l.b16 %v1072_v31  ;;  %v342_v39 = vrot.slane %v337_v26, 4  ;;  %694 = vst [vmem:[#allocation2 + $0x8c] sm:$0x1] %v693_v29  ;;  %v480_v40 = vshrl.u32 %v10324_v55, 16  ;;  %v1270_v6 = vsel %vm1246_vm9, %v1265_v16, %v1269_v18  ;;  %v249_v9 = vld [vmem:[%s10089_s6 + $0xc0] sm:$0xff] }
  0x45   : > { %v1366_v41 = vsel %vm1246_vm9, %v1361_v10, %v1365_v30  ;;  %v1272_v20 = vshrl.u32 %v10354_v36, 16  ;;  %v1274_v45 = vshll.u32 %v10354_v36, 16  ;;  %v900_v42 = vld [vmem:[#allocation2 + $0x88] sm:$0x8]  ;;  %v869_v46 = vsel %vm10129_vm7, %v8469_v35, %v868_v23  ;;  %634 = vst [vmem:[#allocation2 + $0x24] sm:$0xf] %v633_v50 }
  0x46   : > { %v10361_v43 = vpack.c.b16 %v1216_v37, %v1216_v37  ;;  %v1080_v44 = vld [vmem:[#allocation2 + $0x80] sm:$0x1]  ;;  %v341_v49 = vsel %vm10109_vm5, %v333_v12, %v340_v38  ;;  %870 = vst [vmem:[#allocation2 + $0x84] sm:$0x1] %v869_v46  ;;  %v637_v52 = vsel %vm10129_vm7, %v342_v39, %v636_v28  ;;  %v8487_v53 = vrot.slane %v900_v42, 11  ;;  %v250_v28 = vld [vmem:[%s10089_s6 + $0xc8] sm:$0xff] }
  0x47   : > { %v1276_v4 = vrot.slane %v1274_v45, 1  ;;  %v1224_v21 = vunpack.c.l.b16 %v1080_v44  ;;  %v482_v54 = vrot.slane %v480_v40, 7  ;;  %v483_v56 = vshll.u32 %v10324_v55, 16  ;;  %v695_v61 = vld [vmem:[#allocation2 + $0x90] sm:$0xf]  ;;  %v9330_v8 = vld [vmem:[%s13355_s1 + $0xe0] sm:$0xff] }
  0x48   : > { %v1279_v47 = vshll.u32 %v10361_v43, 16  ;;  %v488_v60 = vshrl.u32 %v10334_v62, 16  ;;  %635 = vst [vmem:[#allocation2 + $0x28] sm:$0xf] %v341_v49  ;;  %v491_v0 = vshll.u32 %v10334_v62, 16  ;;  %v1373_v16 = vor.u32 %v1372_v34, %v1368_v32  ;;  %v9322_v62 = vld [vmem:[%s13355_s1 + $0xa0] sm:$0xff]  ;;  %2783 = vmatpush.bf16.msrb.mxu3 %v9330_v8 }
  0x49   : > { %v10375_v63 = vpack.c.b16 %v1224_v21, %v1224_v21  ;;  %v699_v7 = vld [vmem:[#allocation2 + $0x98] sm:$0x1]  ;;  %638 = vst [vmem:[#allocation2 + $0x2c] sm:$0x1] %v637_v52  ;;  %v485_v12 = vor.u32 %v483_v56, %v482_v54  ;;  %v486_v13 = vrot.slane %v482_v54, 4  ;;  %v1277_v55 = vor.u32 %v1276_v4, %v1272_v20  ;;  %1941 = vmatpush.bf16.msrb.mxu2 %v9322_v62  ;;  %v9338_v39 = vld [vmem:[%s13355_s1 + $0x120] sm:$0xff] }
  0x4a   : > { %1862 = vmatmul.bf16.gmra.mxu1 %v1270_v6  ;;  %v1281_v10 = vrot.slane %v1279_v47, 1  ;;  %v490_v15 = vrot.slane %v488_v60, 7  ;;  %v344_v18 = vshrl.u32 %v10347_v58, 16  ;;  %v639_v26 = vld [vmem:[#allocation2 + $0x30] sm:$0xf]  ;;  %v281_v29 = vpack.c.bf16 %v249_v9, %v249_v9  ;;  %2872 = vmatpush.bf16.msrb.mxu0 %v9338_v39  ;;  %v233_v60 = vld [vmem:[%s10089_s6 + $0x40] sm:$0xff] }
  0x4b   : > { %1902 = vmatmul.bf16.gmra.mxu3 %v1366_v41  ;;  %v1375_v14 = vshll.u32 %v10375_v63, 16  ;;  %v1013_v17 = vld [vmem:[#allocation2 + $0x8c] sm:$0x1]  ;;  %v696_v31 = vsel %vm10117_vm6, %v485_v12, %v695_v61  ;;  %v347_v34 = vshll.u32 %v10347_v58, 16  ;;  %v10396_v37 = vld [vmem:[#allocation2 + $0x84] sm:$0xf0]  ;;  %v282_v42 = vpack.c.bf16 %v250_v28, %v250_v28 }
  0x4c   : > { %v1014_v22 = vsel %vm10204_vm8, %v8487_v53, %v1013_v17  ;;  %v493_v23 = vor.u32 %v491_v0, %v490_v15  ;;  %v495_v24 = vrot.slane %v490_v15, 4  ;;  %v346_v32 = vrot.slane %v344_v18, 7  ;;  %697 = vst [vmem:[#allocation2 + $0x90] sm:$0xf] %v696_v31  ;;  %v748_v58 = vld [vmem:[#allocation2 + $0x24] sm:$0x2] }
  0x4d   : > { %v1377_v30 = vrot.slane %v1375_v14, 1  ;;  %1015 = vst [vmem:[#allocation2 + $0x8c] sm:$0x1] %v1014_v22  ;;  %v10394_v35 = vld [vmem:[#allocation2 + $0x84] sm:$0xff]   ;;  %v352_v40 = vshrl.u32 %v264_v2, 16  ;;  %v355_v6 = vshll.u32 %v264_v2, 16  ;;  %v1282_v61 = vsel %vm1246_vm9, %v1277_v55, %v1281_v10 }
  0x4e   : > { %1818 = vmatmul.bf16.gmra.mxu2 %v10342_v11  ;;  %v494_v38 = vsel %vm10109_vm5, %v486_v13, %v493_v23  ;;  %v700_v41 = vsel %vm10129_vm7, %v495_v24, %v699_v7  ;;  %v844_v20 = vld [vmem:[#allocation2 + $0x24] sm:$0x1]  ;;  %v349_v11 = vor.u32 %v347_v34, %v346_v32  ;;  %v643_v45 = vld [vmem:[#allocation2 + $0x38] sm:$0x1]  ;;  %v8461_v44 = vrot.slane %v748_v58, 9  ;;  %v234_v12 = vld [vmem:[%s10089_s6 + $0x48] sm:$0xff] }
  0x4f   : > { %698 = vst [vmem:[#allocation2 + $0x94] sm:$0xf] %v494_v38  ;;  %v892_v46 = vld [vmem:[#allocation2 + $0x28] sm:$0x8]  ;;  %v350_v49 = vrot.slane %v346_v32, 4  ;;  %v354_v50 = vrot.slane %v352_v40, 7  ;;  %v1378_v0 = vsel %vm1246_vm9, %v1373_v16, %v1377_v30  ;;  %v265_v18 = vpack.c.bf16 %v233_v60, %v233_v60 }
  0x50   : > { %1778 = vmatmul.bf16.gmra.mxu0 %v10354_v36  ;;  %v497_v51 = vshrl.u32 %v281_v29, 16  ;;  %v8479_v4 = vrot.slane %v892_v46, 11  ;;  %v989_v21 = vld [vmem:[#allocation2 + $0x2c] sm:$0x1]  ;;  %v640_v52 = vsel %vm10117_vm6, %v349_v11, %v639_v26  ;;  %701 = vst [vmem:[#allocation2 + $0x98] sm:$0x1] %v700_v41  ;;  %v845_v47 = vsel %vm10129_vm7, %v8461_v44, %v844_v20 }
  0x51   : > { %v500_v53 = vshll.u32 %v281_v29, 16  ;;  %v357_v54 = vor.u32 %v355_v6, %v354_v50  ;;  %v359_v36 = vrot.slane %v354_v50, 4  ;;  %641 = vst [vmem:[#allocation2 + $0x30] sm:$0xf] %v640_v52  ;;  %v505_v7 = vshrl.u32 %v282_v42, 16  ;;  %v9329_v52 = vld [vmem:[%s13355_s1 + $0xd8] sm:$0xff] }
  0x52   : > { %v499_v56 = vrot.slane %v497_v51, 7  ;;  %846 = vst [vmem:[#allocation2 + $0x24] sm:$0x1] %v845_v47  ;;  %v990_v2 = vsel %vm10204_vm8, %v8479_v4, %v989_v21  ;;  %v702_v9 = vld [vmem:[#allocation2 + $0x9c] sm:$0xf]  ;;  %v508_v24 = vshll.u32 %v282_v42, 16  ;;  %v266_v28 = vpack.c.bf16 %v234_v12, %v234_v12  ;;  %2784 = vmatpush.bf16.msrb.mxu3 %v9329_v52 }
  0x53   : > { %991 = vst [vmem:[#allocation2 + $0x2c] sm:$0x1] %v990_v2  ;;  %v358_v15 = vsel %vm10109_vm5, %v350_v49, %v357_v54  ;;  %v644_v14 = vsel %vm10129_vm7, %v359_v36, %v643_v45  ;;  %v757_v10 = vld [vmem:[#allocation2 + $0x90] sm:$0x2]  ;;  %v871_v55 = vld [vmem:[#allocation2 + $0x90] sm:$0x1] }
  0x54   : > { %v1081_v13 = vld [vmem:[#allocation2 + $0x8c] sm:$0x1]  ;;  %v502_v17 = vor.u32 %v500_v53, %v499_v56  ;;  %v503_v16 = vrot.slane %v499_v56, 4  ;;  %v10420_v8 = vrot.slane %v505_v7, 7  ;;  %v8470_v22 = vrot.slane %v757_v10, 9  ;;  %v9321_v21 = vld [vmem:[%s13355_s1 + $0x98] sm:$0xff] }
  0x55   : > { %v1225_v62 = vunpack.c.l.b16 %v1081_v13  ;;  %642 = vst [vmem:[#allocation2 + $0x34] sm:$0xf] %v358_v15  ;;  %v1380_v30 = vshrl.u32 %v10394_v35, 16  ;;  %v1382_v31 = vshll.u32 %v10394_v35, 16  ;;  %v361_v40 = vshrl.u32 %v265_v18, 16  ;;  %1942 = vmatpush.bf16.msrb.mxu2 %v9321_v21  ;;  %v252_v10 = vld [vmem:[%s10089_s6 + $0xd8] sm:$0xff] }
  0x56   : > { %v901_v23 = vld [vmem:[#allocation2 + $0x94] sm:$0x8]  ;;  %v703_v26 = vsel %vm10117_vm6, %v502_v17, %v702_v9  ;;  %645 = vst [vmem:[#allocation2 + $0x38] sm:$0x1] %v644_v14  ;;  %v872_v34 = vsel %vm10129_vm7, %v8470_v22, %v871_v55  ;;  %v510_v39 = vor.u32 %v508_v24, %v10420_v8  ;;  %v364_v6 = vshll.u32 %v265_v18, 16  ;;  %v9337_v14 = vld [vmem:[%s13355_s1 + $0x118] sm:$0xff] }
  0x57   : > { %v10424_v29 = vpack.c.b16 %v1225_v62, %v1225_v62  ;;  %v8488_v32 = vrot.slane %v901_v23, 11  ;;  %v1016_v38 = vld [vmem:[#allocation2 + $0x98] sm:$0x1]  ;;  %704 = vst [vmem:[#allocation2 + $0x9c] sm:$0xf] %v703_v26  ;;  %v369_v11 = vshrl.u32 %v266_v28, 16  ;;  %2873 = vmatpush.bf16.msrb.mxu0 %v9337_v14 }
  0x58   : > { %873 = vst [vmem:[#allocation2 + $0x90] sm:$0x1] %v872_v34  ;;  %v749_v58 = vld [vmem:[#allocation2 + $0x30] sm:$0x2]  ;;  %v10434_v42 = vld [vmem:[#allocation2 + $0x24] sm:$0xf0]  ;;  %v511_v49 = vsel %vm10109_vm5, %v503_v16, %v510_v39 }
  0x59   : > { %v1387_v41 = vshll.u32 %v10424_v29, 16  ;;  %v1017_v20 = vsel %vm10204_vm8, %v8488_v32, %v1016_v38  ;;  %v1044_v45 = vld [vmem:[#allocation2 + $0x24] sm:$0xff]   ;;  %v8462_v44 = vrot.slane %v749_v58, 9  ;;  %v847_v46 = vld [vmem:[#allocation2 + $0x30] sm:$0x1]  ;;  %v1384_v4 = vrot.slane %v1382_v31, 1 }
  0x5a   : > { %1867 = vmatmul.bf16.gmra.mxu1 %v1282_v61  ;;  %1018 = vst [vmem:[#allocation2 + $0x98] sm:$0x1] %v1017_v20  ;;  %v646_v50 = vld [vmem:[#allocation2 + $0x3c] sm:$0xf]  ;;  %v1073_v51 = vld [vmem:[#allocation2 + $0x2c] sm:$0x1] }
  0x5b   : > { %1907 = vmatmul.bf16.gmra.mxu3 %v1378_v0  ;;  %v363_v53 = vrot.slane %v361_v40, 7  ;;  %v1217_v47 = vunpack.c.l.b16 %v1073_v51  ;;  %v848_v54 = vsel %vm10129_vm7, %v8462_v44, %v847_v46  ;;  %705 = vst [vmem:[#allocation2 + $0xa0] sm:$0xf] %v511_v49  ;;  %v371_v36 = vrot.slane %v369_v11, 7  ;;  %v706_v60 = vld [vmem:[#allocation2 + $0xa4] sm:$0x1] }
  0x5c   : > { %v372_v56 = vshll.u32 %v266_v28, 16  ;;  %v251_v61 = vld [vmem:[%s10089_s6 + $0xd0] sm:$0xff]  ;;  %v1389_v0 = vrot.slane %v1387_v41, 1  ;;  %849 = vst [vmem:[#allocation2 + $0x30] sm:$0x1] %v848_v54  ;;  %v512_v7 = vrot.slane %v10420_v8, 4  ;;  %v1385_v34 = vor.u32 %v1384_v4, %v1380_v30 }
  0x5d   : > { %v893_v2 = vld [vmem:[#allocation2 + $0x34] sm:$0x8]  ;;  %v366_v9 = vor.u32 %v364_v6, %v363_v53  ;;  %v10449_v12 = vpack.c.b16 %v1217_v47, %v1217_v47  ;;  %v992_v15 = vld [vmem:[#allocation2 + $0x38] sm:$0x1]  ;;  %v367_v17 = vrot.slane %v363_v53, 4  ;;  %v1284_v55 = vshrl.u32 %v1044_v45, 16 }
  0x5e   : > { %1823 = vmatmul.bf16.gmra.mxu2 %v10394_v35  ;;  %v8480_v13 = vrot.slane %v893_v2, 11  ;;  %v374_v62 = vor.u32 %v372_v56, %v371_v36  ;;  %v1286_v16 = vshll.u32 %v1044_v45, 16  ;;  %v758_v18 = vld [vmem:[#allocation2 + $0x9c] sm:$0x2]  ;;  %v874_v22 = vld [vmem:[#allocation2 + $0x9c] sm:$0x1]  ;;  %v283_v23 = vpack.c.bf16 %v251_v61, %v251_v61 }
  0x5f   : > { %v647_v8 = vsel %vm10117_vm6, %v366_v9, %v646_v50  ;;  %v1291_v24 = vshll.u32 %v10449_v12, 16  ;;  %v8471_v28 = vrot.slane %v758_v18, 9  ;;  %v10464_v38 = vld [vmem:[#allocation2 + $0x90] sm:$0xff]   ;;  %v707_v40 = vsel %vm10129_vm7, %v512_v7, %v706_v60  ;;  %v650_v20 = vld [vmem:[#allocation2 + $0x44] sm:$0x1]  ;;  %v236_v49 = vld [vmem:[%s10089_s6 + $0x58] sm:$0xff] }
  0x60   : > { %1783 = vmatmul.bf16.gmra.mxu0 %v1044_v45  ;;  %v993_v26 = vsel %vm10204_vm8, %v8480_v13, %v992_v15  ;;  %v375_v31 = vsel %vm10109_vm5, %v367_v17, %v374_v62  ;;  %648 = vst [vmem:[#allocation2 + $0x3c] sm:$0xf] %v647_v8  ;;  %v1288_v32 = vrot.slane %v1286_v16, 1  ;;  %v1394_v41 = vshll.u32 %v10464_v38, 16  ;;  %v235_v35 = vld [vmem:[%s10089_s6 + $0x50] sm:$0xff]  ;;  %v253_v18 = vld [vmem:[%s10089_s6 + $0xe0] sm:$0xff] }
  0x61   : > { %994 = vst [vmem:[#allocation2 + $0x38] sm:$0x1] %v993_v26  ;;  %v1082_v39 = vld [vmem:[#allocation2 + $0x98] sm:$0x1]  ;;  %v875_v58 = vsel %vm10129_vm7, %v8471_v28, %v874_v22  ;;  %v284_v11 = vpack.c.bf16 %v252_v10, %v252_v10  ;;  %v1293_v45 = vrot.slane %v1291_v24, 1  ;;  %v376_v44 = vrot.slane %v371_v36, 4 }
  0x62   : > { %v1226_v6 = vunpack.c.l.b16 %v1082_v39  ;;  %649 = vst [vmem:[#allocation2 + $0x40] sm:$0xf] %v375_v31  ;;  %v1289_v30 = vor.u32 %v1288_v32, %v1284_v55  ;;  %v514_v46 = vshrl.u32 %v283_v23, 16  ;;  %v902_v4 = vld [vmem:[#allocation2 + $0xa0] sm:$0x8]  ;;  %v517_v21 = vshll.u32 %v283_v23, 16 }
  0x63   : > { %876 = vst [vmem:[#allocation2 + $0x9c] sm:$0x1] %v875_v58  ;;  %v10473_v50 = vld [vmem:[#allocation2 + $0x30] sm:$0xff]   ;;  %v1390_v52 = vsel %vm1246_vm9, %v1385_v34, %v1389_v0  ;;  %v1392_v53 = vshrl.u32 %v10464_v38, 16  ;;  %v651_v47 = vsel %vm10129_vm7, %v376_v44, %v650_v20  ;;  %v709_v54 = vld [vmem:[#allocation2 + $0xa8] sm:$0xf]  ;;  %v267_v56 = vpack.c.bf16 %v235_v35, %v235_v35 }
  0x64   : > { %v10475_v51 = vpack.c.b16 %v1226_v6, %v1226_v6  ;;  %708 = vst [vmem:[#allocation2 + $0xa4] sm:$0x1] %v707_v40  ;;  %v1298_v36 = vshll.u32 %v10473_v50, 16  ;;  %v1396_v60 = vrot.slane %v1394_v41, 1  ;;  %v516_v61 = vrot.slane %v514_v46, 7  ;;  %v9320_v6 = vld [vmem:[%s13355_s1 + $0x90] sm:$0xff] }
  0x65   : > { %652 = vst [vmem:[#allocation2 + $0x44] sm:$0x1] %v651_v47  ;;  %v522_v2 = vshrl.u32 %v284_v11, 16  ;;  %v1294_v7 = vsel %vm1246_vm9, %v1289_v30, %v1293_v45  ;;  %v8489_v15 = vrot.slane %v902_v4, 11  ;;  %v525_v0 = vshll.u32 %v284_v11, 16  ;;  %v9328_v41 = vld [vmem:[%s13355_s1 + $0xd0] sm:$0xff]  ;;  %1943 = vmatpush.bf16.msrb.mxu2 %v9320_v6 }
  0x66   : > { %v268_v14 = vpack.c.bf16 %v236_v49, %v236_v49  ;;  %v1296_v62 = vshrl.u32 %v10473_v50, 16  ;;  %v1399_v10 = vshll.u32 %v10475_v51, 16  ;;  %v519_v16 = vor.u32 %v517_v21, %v516_v61  ;;  %v653_v20 = vld [vmem:[#allocation2 + $0x48] sm:$0xf]  ;;  %v713_v11 = vld [vmem:[#allocation2 + $0xb0] sm:$0x1]  ;;  %2785 = vmatpush.bf16.msrb.mxu3 %v9328_v41 }
  0x67   : > { %v750_v9 = vld [vmem:[#allocation2 + $0x3c] sm:$0x2]  ;;  %v850_v13 = vld [vmem:[#allocation2 + $0x3c] sm:$0x1]  ;;  %v520_v23 = vrot.slane %v516_v61, 4  ;;  %v524_v24 = vrot.slane %v522_v2, 7  ;;  %v285_v35 = vpack.c.bf16 %v253_v18, %v253_v18  ;;  %v1397_v2 = vor.u32 %v1396_v60, %v1392_v53 }
  0x68   : > { %v1074_v17 = vld [vmem:[#allocation2 + $0x38] sm:$0x1]  ;;  %v8463_v55 = vrot.slane %v750_v9, 9  ;;  %v378_v26 = vshrl.u32 %v267_v56, 16  ;;  %v1300_v28 = vrot.slane %v1298_v36, 1  ;;  %v710_v34 = vsel %vm10117_vm6, %v519_v16, %v709_v54  ;;  %v9336_v54 = vld [vmem:[%s13355_s1 + $0x110] sm:$0xff] }
  0x69   : > { %v1218_v22 = vunpack.c.l.b16 %v1074_v17  ;;  %v894_v8 = vld [vmem:[#allocation2 + $0x40] sm:$0x8]  ;;  %v527_v58 = vor.u32 %v525_v0, %v524_v24  ;;  %v529_v45 = vrot.slane %v524_v24, 4  ;;  %711 = vst [vmem:[#allocation2 + $0xa8] sm:$0xf] %v710_v34  ;;  %v381_v46 = vshll.u32 %v267_v56, 16  ;;  %2874 = vmatpush.bf16.msrb.mxu0 %v9336_v54 }
  0x6a   : > { %1872 = vmatmul.bf16.gmra.mxu1 %v1294_v7  ;;  %v851_v31 = vsel %vm10129_vm7, %v8463_v55, %v850_v13  ;;  %v8481_v32 = vrot.slane %v894_v8, 11  ;;  %v380_v44 = vrot.slane %v378_v26, 7  ;;  %v386_v21 = vshrl.u32 %v268_v14, 16  ;;  %v10510_v7 = vld [vmem:[#allocation2 + $0x9c] sm:$0xff]   ;;  %v657_v0 = vld [vmem:[#allocation2 + $0x50] sm:$0x1] }
  0x6b   : > { %1912 = vmatmul.bf16.gmra.mxu3 %v1390_v52  ;;  %v10490_v39 = vpack.c.b16 %v1218_v22, %v1218_v22  ;;  %852 = vst [vmem:[#allocation2 + $0x3c] sm:$0x1] %v851_v31  ;;  %v1019_v40 = vld [vmem:[#allocation2 + $0xa4] sm:$0x1]  ;;  %v528_v4 = vsel %vm10109_vm5, %v520_v23, %v527_v58  ;;  %v254_v52 = vld [vmem:[%s10089_s6 + $0xe8] sm:$0xff]  ;;  %v389_v36 = vshll.u32 %v268_v14, 16  ;;  %v714_v14 = vsel %vm10129_vm7, %v529_v45, %v713_v11 }
  0x6c   : > { %v1020_v30 = vsel %vm10204_vm8, %v8489_v15, %v1019_v40  ;;  %v995_v49 = vld [vmem:[#allocation2 + $0x44] sm:$0x1]  ;;  %712 = vst [vmem:[#allocation2 + $0xac] sm:$0xf] %v528_v4  ;;  %v383_v56 = vor.u32 %v381_v46, %v380_v44  ;;  %v10512_v9 = vld [vmem:[#allocation2 + $0x9c] sm:$0xf0]  ;;  %v286_v17 = vpack.c.bf16 %v254_v52, %v254_v52  ;;  %v1301_v53 = vor.u32 %v1300_v28, %v1296_v62 }
  0x6d   : > { %1021 = vst [vmem:[#allocation2 + $0xa4] sm:$0x1] %v1020_v30  ;;  %v996_v47 = vsel %vm10204_vm8, %v8481_v32, %v995_v49  ;;  %v1303_v61 = vshll.u32 %v10490_v39, 16  ;;  %v388_v13 = vrot.slane %v386_v21, 7  ;;  %v531_v55 = vshrl.u32 %v285_v35, 16  ;;  %v237_v22 = vld [vmem:[%s10089_s6 + $0x60] sm:$0xff] }
  0x6e   : > { %1828 = vmatmul.bf16.gmra.mxu2 %v10464_v38  ;;  %997 = vst [vmem:[#allocation2 + $0x44] sm:$0x1] %v996_v47  ;;  %v384_v38 = vrot.slane %v380_v44, 4  ;;  %v654_v15 = vsel %vm10117_vm6, %v383_v56, %v653_v20  ;;  %v1401_v60 = vrot.slane %v1399_v10, 1  ;;  %v10522_v23 = vld [vmem:[#allocation2 + $0x3c] sm:$0xf0]  ;;  %v269_v58 = vpack.c.bf16 %v237_v22, %v237_v22 }
  0x6f   : > { %v391_v16 = vor.u32 %v389_v36, %v388_v13  ;;  %v393_v18 = vrot.slane %v388_v13, 4  ;;  %655 = vst [vmem:[#allocation2 + $0x48] sm:$0xf] %v654_v15  ;;  %v534_v24 = vshll.u32 %v285_v35, 16  ;;  %v539_v26 = vshrl.u32 %v286_v17, 16  ;;  %v238_v49 = vld [vmem:[%s10089_s6 + $0x68] sm:$0xff] }
  0x70   : > { %1788 = vmatmul.bf16.gmra.mxu0 %v10473_v50  ;;  %715 = vst [vmem:[#allocation2 + $0xb0] sm:$0x1] %v714_v14  ;;  %v533_v50 = vrot.slane %v531_v55, 7  ;;  %v716_v31 = vld [vmem:[#allocation2 + $0xb4] sm:$0xf]  ;;  %v1305_v32 = vrot.slane %v1303_v61, 1  ;;  %v1402_v47 = vsel %vm1246_vm9, %v1397_v2, %v1401_v60  ;;  %v270_v14 = vpack.c.bf16 %v238_v49, %v238_v49 }
  0x71   : > { %v759_v34 = vld [vmem:[#allocation2 + $0xa8] sm:$0x2]  ;;  %v877_v40 = vld [vmem:[#allocation2 + $0xa8] sm:$0x1]  ;;  %v392_v62 = vsel %vm10109_vm5, %v384_v38, %v391_v16  ;;  %v658_v6 = vsel %vm10129_vm7, %v393_v18, %v657_v0  ;;  %v10530_v11 = vrot.slane %v539_v26, 7  ;;  %v542_v35 = vshll.u32 %v286_v17, 16 }
  0x72   : > { %v10520_v8 = vld [vmem:[#allocation2 + $0x3c] sm:$0xff]   ;;  %v8472_v28 = vrot.slane %v759_v34, 9  ;;  %656 = vst [vmem:[#allocation2 + $0x4c] sm:$0xf] %v392_v62  ;;  %v10528_v41 = vor.u32 %v534_v24, %v533_v50  ;;  %v537_v46 = vrot.slane %v533_v50, 4  ;;  %v1306_v4 = vsel %vm1246_vm9, %v1301_v53, %v1305_v32 }
  0x73   : > { %659 = vst [vmem:[#allocation2 + $0x50] sm:$0x1] %v658_v6  ;;  %v903_v20 = vld [vmem:[#allocation2 + $0xac] sm:$0x8]  ;;  %v544_v61 = vor.u32 %v542_v35, %v10530_v11  ;;  %v395_v38 = vshrl.u32 %v269_v58, 16  ;;  %v1310_v13 = vshll.u32 %v10520_v8, 16 }
  0x74   : > { %v1083_v10 = vld [vmem:[#allocation2 + $0xa4] sm:$0x1]  ;;  %13409 = vst [vmem:[#allocation7_spill] sm:$0xff] %v10528_v41  ;;  %v878_v45 = vsel %vm10129_vm7, %v8472_v28, %v877_v40  ;;  %v8490_v44 = vrot.slane %v903_v20, 11  ;;  %v717_v52 = vsel %vm10117_vm6, %v10528_v41, %v716_v31  ;;  %v660_v17 = vld [vmem:[#allocation2 + $0x54] sm:$0xf] }
  0x75   : > { %13410 = vst [vmem:[#allocation8_spill] sm:$0xff] %v10530_v11  ;;  %v1075_v30 = vld [vmem:[#allocation2 + $0x44] sm:$0x1]  ;;  %v1227_v54 = vunpack.c.l.b16 %v1083_v10  ;;  %v545_v53 = vsel %vm10109_vm5, %v537_v46, %v544_v61  ;;  %v397_v2 = vrot.slane %v395_v38, 7  ;;  %v398_v60 = vshll.u32 %v269_v58, 16  ;;  %v9319_v40 = vld [vmem:[%s13355_s1 + $0x88] sm:$0xff] }
  0x76   : > { %v1219_v21 = vunpack.c.l.b16 %v1075_v30  ;;  %879 = vst [vmem:[#allocation2 + $0xa8] sm:$0x1] %v878_v45  ;;  %v751_v56 = vld [vmem:[#allocation2 + $0x48] sm:$0x2]  ;;  %v853_v36 = vld [vmem:[#allocation2 + $0x48] sm:$0x1]  ;;  %1944 = vmatpush.bf16.msrb.mxu2 %v9319_v40 }
  0x77   : > { %v8464_v15 = vrot.slane %v751_v56, 9  ;;  %v1022_v0 = vld [vmem:[#allocation2 + $0xb0] sm:$0x1]  ;;  %718 = vst [vmem:[#allocation2 + $0xb4] sm:$0xf] %v717_v52  ;;  %v1406_v22 = vshll.u32 %v10510_v7, 16  ;;  %v10552_v31 = vpack.c.b16 %v1227_v54, %v1227_v54  ;;  %v400_v62 = vor.u32 %v398_v60, %v397_v2 }
  0x78   : > { %v1023_v55 = vsel %vm10204_vm8, %v8490_v44, %v1022_v0  ;;  %v720_v16 = vld [vmem:[#allocation2 + $0xbc] sm:$0x1]  ;;  %v10546_v18 = vpack.c.b16 %v1219_v21, %v1219_v21  ;;  %v13360_v26 = vrot.slane %v10530_v11, 4  ;;  %v1308_v10 = vshrl.u32 %v10520_v8, 16  ;;  %v9327_v28 = vld [vmem:[%s13355_s1 + $0xc8] sm:$0xff] }
  0x79   : > { %v854_v50 = vsel %vm10129_vm7, %v8464_v15, %v853_v36  ;;  %v895_v24 = vld [vmem:[#allocation2 + $0x4c] sm:$0x8]  ;;  %1024 = vst [vmem:[#allocation2 + $0xb0] sm:$0x1] %v1023_v55  ;;  %v403_v6 = vshrl.u32 %v270_v14, 16  ;;  %v1312_v58 = vrot.slane %v1310_v13, 1  ;;  %v661_v44 = vsel %vm10117_vm6, %v400_v62, %v660_v17  ;;  %2786 = vmatpush.bf16.msrb.mxu3 %v9327_v28 }
  0x7a   : > { %1877 = vmatmul.bf16.gmra.mxu1 %v1306_v4  ;;  %855 = vst [vmem:[#allocation2 + $0x48] sm:$0x1] %v854_v50  ;;  %v8482_v32 = vrot.slane %v895_v24, 11  ;;  %v998_v34 = vld [vmem:[#allocation2 + $0x50] sm:$0x1]  ;;  %v9335_v35 = vld [vmem:[%s13355_s1 + $0x108] sm:$0xff]  ;;  %v721_v52 = vsel %vm10129_vm7, %v13360_v26, %v720_v16 }
  0x7b   : > { %1917 = vmatmul.bf16.gmra.mxu3 %v1402_v47  ;;  %719 = vst [vmem:[#allocation2 + $0xb8] sm:$0xf] %v545_v53  ;;  %v9349_v30 = vld [vmem:[%s13355_s1 + $0x178] sm:$0xff]  ;;  %v406_v45 = vshll.u32 %v270_v14, 16  ;;  %v1315_v49 = vshll.u32 %v10546_v18, 16  ;;  %v401_v4 = vrot.slane %v397_v2, 4  ;;  %2875 = vmatpush.bf16.msrb.mxu0 %v9335_v35  ;;  %v1313_v14 = vor.u32 %v1312_v58, %v1308_v10 }
  0x7c   : > { %v999_v20 = vsel %vm10204_vm8, %v8482_v32, %v998_v34  ;;  %741 = vst [vmem:[#allocation2 + $0xd0] sm:$0xf] %v545_v53  ;;  %v664_v46 = vld [vmem:[#allocation2 + $0x5c] sm:$0x1]  ;;  %v405_v21 = vrot.slane %v403_v6, 7  ;;  %v1404_v47 = vshrl.u32 %v10510_v7, 16  ;;  %2958 = vmatpush.bf16.msrb.mxu1 %v9349_v30 }
  0x7d   : > { %1000 = vst [vmem:[#allocation2 + $0x50] sm:$0x1] %v999_v20  ;;  %v1408_v54 = vrot.slane %v1406_v22, 1  ;;  %v1411_v56 = vshll.u32 %v10552_v31, 16  ;;  %v9348_v36 = vld [vmem:[%s13355_s1 + $0x170] sm:$0xff]  ;;  %v9644_v20 = vld [vmem:[#allocation2 + $0xa8] sm:$0xff]  }
  0x7e   : > { %1833 = vmatmul.bf16.gmra.mxu2 %v10510_v7  ;;  %662 = vst [vmem:[#allocation2 + $0x54] sm:$0xf] %v661_v44  ;;  %v760_v61 = vld [vmem:[#allocation2 + $0xb4] sm:$0x2]  ;;  %v880_v38 = vld [vmem:[#allocation2 + $0xb4] sm:$0x1]  ;;  %v408_v13 = vor.u32 %v406_v45, %v405_v21 }
  0x7f   : > { %v410_v15 = vrot.slane %v405_v21, 4  ;;  %v8473_v0 = vrot.slane %v760_v61, 9  ;;  %722 = vst [vmem:[#allocation2 + $0xbc] sm:$0x1] %v721_v52  ;;  %v1409_v55 = vor.u32 %v1408_v54, %v1404_v47  ;;  %v1413_v53 = vrot.slane %v1411_v56, 1  ;;  %v9347_v45 = vld [vmem:[%s13355_s1 + $0x168] sm:$0xff] }
  0x80   : > { %1793 = vmatmul.bf16.gmra.mxu0 %v10520_v8  ;;  %v1317_v8 = vrot.slane %v1315_v49, 1  ;;  %v409_v7 = vsel %vm10109_vm5, %v401_v4, %v408_v13  ;;  %2959 = vmatpush.bf16.msrb.mxu1 %v9348_v36  ;;  %v1084_v16 = vld [vmem:[#allocation2 + $0xb0] sm:$0x1]  ;;  %v9318_v4 = vld [vmem:[%s13355_s1 + $0x80] sm:$0xff]  ;;  %v1418_v52 = vshll.u32 %v9644_v20, 16 }
  0x81   : > { %v665_v17 = vsel %vm10129_vm7, %v410_v15, %v664_v46  ;;  %v881_v2 = vsel %vm10129_vm7, %v8473_v0, %v880_v38  ;;  %663 = vst [vmem:[#allocation2 + $0x58] sm:$0xf] %v409_v7  ;;  %v1414_v62 = vsel %vm1246_vm9, %v1409_v55, %v1413_v53  ;;  %v10591_v10 = vld [vmem:[#allocation2 + $0x48] sm:$0xff]   ;;  %v1228_v28 = vunpack.c.l.b16 %v1084_v16  ;;  %v9326_v54 = vld [vmem:[%s13355_s1 + $0xc0] sm:$0xff]  ;;  %1945 = vmatpush.bf16.msrb.mxu2 %v9318_v4 }
  0x82   : > { %v904_v60 = vld [vmem:[#allocation2 + $0xb8] sm:$0x8]  ;;  %882 = vst [vmem:[#allocation2 + $0xb4] sm:$0x1] %v881_v2  ;;  %v1318_v24 = vsel %vm1246_vm9, %v1313_v14, %v1317_v8  ;;  %v1322_v46 = vshll.u32 %v10591_v10, 16  ;;  %v9346_v56 = vld [vmem:[%s13355_s1 + $0x160] sm:$0xff]  ;;  %2787 = vmatpush.bf16.msrb.mxu3 %v9326_v54 }
  0x83   : > { %666 = vst [vmem:[#allocation2 + $0x5c] sm:$0x1] %v665_v17  ;;  %v8491_v50 = vrot.slane %v904_v60, 11  ;;  %v10606_v21 = vpack.c.b16 %v1228_v28, %v1228_v28  ;;  %v9334_v38 = vld [vmem:[%s13355_s1 + $0x100] sm:$0xff]  ;;  %v1320_v13 = vshrl.u32 %v10591_v10, 16  ;;  %v1416_v14 = vshrl.u32 %v9644_v20, 16 }
  0x84   : > { %v1076_v22 = vld [vmem:[#allocation2 + $0x50] sm:$0x1]  ;;  %2960 = vmatpush.bf16.msrb.mxu1 %v9347_v45  ;;  %v1324_v15 = vrot.slane %v1322_v46, 1  ;;  %v1420_v8 = vrot.slane %v1418_v52, 1  ;;  %v9345_v17 = vld [vmem:[%s13355_s1 + $0x158] sm:$0xff]  ;;  %2876 = vmatpush.bf16.msrb.mxu0 %v9334_v38 }
  0x85   : > { %v1220_v32 = vunpack.c.l.b16 %v1076_v22  ;;  %v752_v34 = vld [vmem:[#allocation2 + $0x54] sm:$0x2]  ;;  %v856_v40 = vld [vmem:[#allocation2 + $0x54] sm:$0x1]  ;;  %v1423_v7 = vshll.u32 %v10606_v21, 16  ;;  %v9365_v54 = vld [vmem:[%s13355_s1 + $0x1f8] sm:$0xff] }
  0x86   : > { %v8465_v6 = vrot.slane %v752_v34, 9  ;;  %v1025_v58 = vld [vmem:[#allocation2 + $0xbc] sm:$0x1]  ;;  %v10628_v2 = vor.u32 %v1324_v15, %v1320_v13  ;;  %v10630_v22 = vld [vmem:[#allocation2 + $0xb4] sm:$0xf0]  ;;  %3890 = vmatpush.bf16.msra.mxu3 %v9365_v54  ;;  %v9342_v13 = vld [vmem:[%s13355_s1 + $0x140] sm:$0xff] }
  0x87   : > { %v1026_v30 = vsel %vm10204_vm8, %v8491_v50, %v1025_v58  ;;  %v10600_v44 = vpack.c.b16 %v1220_v32, %v1220_v32  ;;  %v1421_v50 = vor.u32 %v1420_v8, %v1416_v14  ;;  %v2059_v34 = vld [vmem:[#allocation2 + $0xc] sm:$0xf]  ;;  %v10635_v28 = vld [vmem:[#allocation2 + $0x10] sm:$0xf]  ;;  %v2091_v46 = vld [vmem:[#allocation2 + $0x14] sm:$0x1] }
  0x88   : > { %v857_v35 = vsel %vm10129_vm7, %v8465_v6, %v856_v40  ;;  %v896_v49 = vld [vmem:[#allocation2 + $0x58] sm:$0x8]  ;;  %1027 = vst [vmem:[#allocation2 + $0xbc] sm:$0x1] %v1026_v30  ;;  %2961 = vmatpush.bf16.msrb.mxu1 %v9346_v56  ;;  %v2155_v30 = vunpack.c.l.b16 %v2059_v34  ;;  %v2156_v45 = vunpack.c.l.b16 %v10635_v28  ;;  %v2235_v38 = vunpack.c.l.b16 %v2091_v46  ;;  %v9645_v8 = vld [vmem:[#allocation2] sm:$0xf0] }
  0x89   : > { %858 = vst [vmem:[#allocation2 + $0x54] sm:$0x1] %v857_v35  ;;  %v8483_v47 = vrot.slane %v896_v49, 11  ;;  %v1327_v0 = vshll.u32 %v10600_v44, 16  ;;  %v10626_v53 = vld [vmem:[#allocation2 + $0x54] sm:$0xf0] }
  0x8a   : > { %1882 = vmatmul.bf16.gmra.mxu1 %v1318_v24  ;;  %v1001_v36 = vld [vmem:[#allocation2 + $0x5c] sm:$0x1]  ;;  %v1068_v16 = vld [vmem:[#allocation2 + $0xb4] sm:$0xff]   ;;  %v1425_v24 = vrot.slane %v1423_v7, 1  ;;  %v9343_v49 = vld [vmem:[%s13355_s1 + $0x148] sm:$0xff]  ;;  %v2251_v34 = vpack.c.b16 %v2235_v38, %v2235_v38  ;;  %v1505_v46 = vrot.slane %v10274_v59, 1 }
  0x8b   : > { %1922 = vmatmul.bf16.gmra.mxu3 %v1414_v62  ;;  %v1002_v61 = vsel %vm10204_vm8, %v8483_v47, %v1001_v36  ;;  %v1329_v60 = vrot.slane %v1327_v0, 1  ;;  %v9344_v62 = vld [vmem:[%s13355_s1 + $0x150] sm:$0xff]  ;;  %v9357_v47 = vld [vmem:[%s13355_s1 + $0x1b8] sm:$0xff]  ;;  %v1430_v36 = vshll.u32 %v1068_v16, 16  ;;  %v1428_v7 = vshrl.u32 %v1068_v16, 16 }
  0x8c   : > { %1003 = vst [vmem:[#allocation2 + $0x5c] sm:$0x1] %v1002_v61  ;;  %2962 = vmatpush.bf16.msrb.mxu1 %v9345_v17  ;;  %v10654_v61 = vpack.c.b16 %v2156_v45, %v2155_v30  ;;  %3801 = vmatpush.bf16.msra.mxu2 %v9357_v47  ;;  %v1523_v41 = vrot.slane %v10600_v44, 1 }
  0x8d   : > { %v1330_v6 = vsel %vm1246_vm9, %v10628_v2, %v1329_v60  ;;  %v1432_v17 = vrot.slane %v1430_v36, 1  ;;  %v2092_v36 = vld [vmem:[#allocation2 + $0x20] sm:$0x1] }
  0x8e   : > { %1838 = vmatmul.bf16.gmra.mxu2 %v9644_v20  ;;  %v1426_v20 = vsel %vm1246_vm9, %v1421_v50, %v1425_v24  ;;  %v9646_v50 = vld [vmem:[#allocation2] sm:$0xe]  ;;  %v9373_v24 = vld [vmem:[%s13355_s1 + $0x238] sm:$0xff] }
  0x8f   : > { %v1085_v32 = vld [vmem:[#allocation2 + $0xbc] sm:$0x1]  ;;  %3979 = vmatpush.bf16.msra.mxu0 %v9373_v24  ;;  %v9647_v28 = vor.u32 %v9646_v50, %v9645_v8  ;;  %v2236_v8 = vunpack.c.l.b16 %v2092_v36 }
  0x90   : > { %1798 = vmatmul.bf16.gmra.mxu0 %v10591_v10  ;;  %v1052_v55 = vld [vmem:[#allocation2 + $0x54] sm:$0xff]   ;;  %v1229_v35 = vunpack.c.l.b16 %v1085_v32  ;;  %2963 = vmatpush.bf16.msrb.mxu1 %v9344_v62  ;;  %v2270_v32 = vshll.u32 %v10654_v61, 16  ;;  %v9677_v36 = vld [vmem:[#allocation2 + $0x18] sm:$0xf0] }
  0x91   : > { %v1334_v52 = vshll.u32 %v1052_v55, 16  ;;  %v1332_v15 = vshrl.u32 %v1052_v55, 16  ;;  %v1504_v30 = vrot.slane %v9647_v28, 1 }
  0x92   : > { %v10652_v56 = vpack.c.b16 %v1229_v35, %v1229_v35 }
  0x93   : > { %v1077_v40 = vld [vmem:[#allocation2 + $0x5c] sm:$0x1]  ;;  %v1336_v0 = vrot.slane %v1334_v52, 1  ;;  %v2107_v52 = vld [vmem:[#allocation2 + $0xc] sm:$0xe]  ;;  %v1506_v38 = vsel %vm1503_vm10, %v1504_v30, %v1505_v46 }
  0x94   : > { %v1221_v58 = vunpack.c.l.b16 %v1077_v40  ;;  %2964 = vmatpush.bf16.msrb.mxu1 %v9343_v49  ;;  %v1435_v60 = vshll.u32 %v10652_v56, 16 }
  0x95   : > { %v1337_v40 = vor.u32 %v1336_v0, %v1332_v15  ;;  %v9898_v15 = vld [vmem:[#allocation2 + $0xc] sm:$0xe] }
  0x96   : > { %v10644_v4 = vpack.c.b16 %v1221_v58, %v1221_v58  ;;  %v1437_v58 = vrot.slane %v1435_v60, 1  ;;  %v2252_v60 = vpack.c.b16 %v2236_v8, %v2236_v8  ;;  %v9899_v24 = vor.u32 %v9898_v15, %v10295_v25 }
  0x98   : > { %v1339_v14 = vshll.u32 %v10644_v4, 16  ;;  %2965 = vmatpush.bf16.msrb.mxu1 %v9342_v13  ;;  %v2491_v13 = vunpack.c.l.b16 %v2107_v52  ;;  %v2093_v52 = vld [vmem:[#allocation2 + $0x2c] sm:$0x1] }
  0x9a   : > { %1887 = vmatmul.bf16.gmra.mxu1 %v1330_v6  ;;  %v1341_v62 = vrot.slane %v1339_v14, 1  ;;  %v1433_v6 = vor.u32 %v1432_v17, %v1428_v7  ;;  %v10671_v7 = vld [vmem:[#allocation2 + $0x18] sm:$0xff]   ;;  %v2507_v59 = vpack.c.b16 %v2156_v45, %v2491_v13  ;;  %v1507_v45 = vrot.slane %v9899_v24, 1 }
  0x9b   : > { %1927 = vmatmul.bf16.gmra.mxu3 %v1426_v20  ;;  %v2275_v20 = vshll.u32 %v2251_v34, 16  ;;  %v2282_v50 = vshll.u32 %v10671_v7, 16  ;;  %v2280_v28 = vshrl.u32 %v10671_v7, 16  ;;  %v9648_v24 = vld [vmem:[#allocation2 + $0x18] sm:$0xf0] }
  0x9c   : > { %v1342_v35 = vsel %vm1246_vm9, %v1337_v40, %v1341_v62  ;;  %v1438_v49 = vsel %vm1246_vm9, %v1433_v6, %v1437_v58  ;;  %v2524_v40 = vrot.slane %v2251_v34, 1  ;;  %v2287_v58 = vshll.u32 %v2252_v60, 16 }
  0x9d   : > { %v2277_v54 = vrot.slane %v2275_v20, 1  ;;  %v2284_v6 = vrot.slane %v2282_v50, 1 }
  0x9e   : > { %1843 = vmatmul.bf16.gmra.mxu2 %v1068_v16  ;;  %v2272_v16 = vrot.slane %v2270_v32, 1  ;;  %v2523_v32 = vrot.slane %v2507_v59, 1  ;;  %v2289_v34 = vrot.slane %v2287_v58, 1 }
  0xa0   : > { %1803 = vmatmul.bf16.gmra.mxu0 %v1052_v55  ;;  %v2268_v55 = vshrl.u32 %v10654_v61, 16  ;;  %v2525_v30 = vsel %vm1503_vm10, %v2523_v32, %v2524_v40  ;;  %v9649_v32 = vld [vmem:[#allocation2 + $0x18] sm:$0xe]  ;;  %v9372_v40 = vld [vmem:[%s13355_s1 + $0x230] sm:$0xff] }
  0xa1   : > { %3980 = vmatpush.bf16.msra.mxu0 %v9372_v40 }
  0xa2   : > { %v2273_v47 = vor.u32 %v2272_v16, %v2268_v55  ;;  %v10676_v55 = vld [vmem:[#allocation2 + $0x24] sm:$0xff]  }
  0xa3   : > { %v10678_v16 = vld [vmem:[#allocation2 + $0x24] sm:$0xf0]  ;;  %v2294_v58 = vshll.u32 %v10676_v55, 16 }
  0xa4   : > { %v2278_v14 = vsel %vm1246_vm9, %v2273_v47, %v2277_v54  ;;  %v9356_v54 = vld [vmem:[%s13355_s1 + $0x1b0] sm:$0xff] }
  0xa5   : > { %3802 = vmatpush.bf16.msra.mxu2 %v9356_v54 }
  0xaa   : > { %1892 = vmatmul.bf16.gmra.mxu1 %v1342_v35  ;;  %v1508_v35 = vrot.slane %v10327_v57, 1  ;;  %v9364_v57 = vld [vmem:[%s13355_s1 + $0x1f0] sm:$0xff] }
  0xab   : > { %1932 = vmatmul.bf16.gmra.mxu3 %v1438_v49  ;;  %v2285_v49 = vor.u32 %v2284_v6, %v2280_v28 }
  0xac   : > { %v1509_v47 = vsel %vm1503_vm10, %v1507_v45, %v1508_v35  ;;  %3891 = vmatpush.bf16.msra.mxu3 %v9364_v57  ;;  %v1511_v57 = vrot.slane %v10361_v43, 1 }
  0xad   : > { %v1769_v0 = vpop.f32.mrf.mxu0  ;;  %v2290_v15 = vsel %vm1246_vm9, %v2285_v49, %v2289_v34 }
  0xae   : > { %1946 = vmatmul.bf16.vlgmr.msrb.gmra.mxu2 %v1506_v38  ;;  %v9678_v38 = vld [vmem:[#allocation2 + $0x18] sm:$0xe] }
  0xaf   : > { %v9679_v59 = vor.u32 %v9678_v38, %v9677_v36 }
  0xb0   : > { %2877 = vmatmul.bf16.vlgmr.msrb.gmra.mxu0 %v2278_v14 }
  0xb1   : > { %v1809_v17 = vpop.f32.mrf.mxu2  ;;  %v2526_v45 = vrot.slane %v9679_v59, 1 }
  0xb5   : > { %v1771_v62 = vpop.f32.mrf.mxu0 }
  0xb7   : > { %v1858_v20 = vpop.f32.mrf.mxu1 }
  0xb8   : > { %v10682_v46 = vadd.f32 %v1858_v20, %v1769_v0  ;;  %v2237_v0 = vunpack.c.l.b16 %v2093_v52  ;;  %v9650_v20 = vor.u32 %v9649_v32, %v9648_v24 }
  0xb9   : > { %v1811_v25 = vpop.f32.mrf.mxu2 }
  0xba   : > { %2966 = vmatmul.bf16.vlgmr.msrb.gmra.mxu1 %v2525_v30  ;;  %v2253_v6 = vpack.c.b16 %v2237_v0, %v2237_v0  ;;  %v2292_v30 = vshrl.u32 %v10676_v55, 16  ;;  %v1510_v54 = vrot.slane %v9650_v20, 1 }
  0xbb   : > { %2788 = vmatmul.bf16.vlgmr.msrb.gmra.mxu3 %v10654_v61 }
  0xbc   : > { %v2299_v49 = vshll.u32 %v2253_v6, 16  ;;  %v1512_v59 = vsel %vm1503_vm10, %v1510_v54, %v1511_v57 }
  0xbd   : > { %v1774_v13 = vpop.f32.mrf.mxu0 }
  0xbe   : > { %v1898_v14 = vpop.f32.mrf.mxu3  ;;  %1951 = vmatmul.bf16.gmra.mxu2 %v1509_v47 }
  0xbf   : > { %v10693_v61 = vadd.f32 %v1898_v14, %v1809_v17  ;;  %v1860_v8 = vpop.f32.mrf.mxu1  ;;  %v2527_v17 = vrot.slane %v2252_v60, 1  ;;  %v2301_v60 = vrot.slane %v2299_v49, 1 }
  0xc0   : > { %v10695_v50 = vadd.f32 %v1860_v8, %v1771_v62  ;;  %2882 = vmatmul.bf16.gmra.mxu0 %v2290_v15  ;;  %v2296_v62 = vrot.slane %v2294_v58, 1  ;;  %v9901_v15 = vld [vmem:[#allocation2 + $0x24] sm:$0xe]  ;;  %v2094_v8 = vld [vmem:[#allocation2 + $0x38] sm:$0x1]  ;;  %v10711_v58 = vld [vmem:[#allocation2 + $0x30] sm:$0xff]  }
  0xc1   : > { %v1814_v28 = vpop.f32.mrf.mxu2  ;;  %v2528_v36 = vsel %vm1503_vm10, %v2526_v45, %v2527_v17  ;;  %v2238_v40 = vunpack.c.l.b16 %v2094_v8  ;;  %v9902_v45 = vor.u32 %v9901_v15, %v10678_v16  ;;  %v2304_v57 = vshrl.u32 %v10711_v58, 16  ;;  %v10723_v16 = vld [vmem:[#allocation2 + $0x3c] sm:$0xf0] }
  0xc2   : > { %v2297_v14 = vor.u32 %v2296_v62, %v2292_v30  ;;  %v2306_v62 = vshll.u32 %v10711_v58, 16 }
  0xc3   : > { %v2254_v30 = vpack.c.b16 %v2238_v40, %v2238_v40 }
  0xc4   : > { %v2302_v32 = vsel %vm1246_vm9, %v2297_v14, %v2301_v60  ;;  %v10721_v60 = vld [vmem:[#allocation2 + $0x3c] sm:$0xff]  }
  0xc5   : > { %v1776_v35 = vpop.f32.mrf.mxu0 }
  0xc6   : > { %v1900_v34 = vpop.f32.mrf.mxu3 }
  0xc7   : > { %v10702_v52 = vadd.f32 %v1900_v34, %v1811_v25  ;;  %v1863_v47 = vpop.f32.mrf.mxu1  ;;  %v9904_v25 = vld [vmem:[#allocation2 + $0x24] sm:$0xe]  ;;  %v2529_v34 = vrot.slane %v9902_v45, 1  ;;  %v9680_v45 = vld [vmem:[#allocation2 + $0x30] sm:$0xf0] }
  0xc8   : > { %v10706_v38 = vadd.f32 %v1863_v47, %v1774_v13  ;;  %v9905_v49 = vor.u32 %v9904_v25, %v10434_v42  ;;  %v2530_v47 = vrot.slane %v2253_v6, 1 }
  0xc9   : > { %v1816_v0 = vpop.f32.mrf.mxu2 }
  0xca   : > { %2971 = vmatmul.bf16.gmra.mxu1 %v2528_v36  ;;  %v2308_v36 = vrot.slane %v2306_v62, 1  ;;  %v1513_v8 = vrot.slane %v9905_v49, 1  ;;  %v2531_v42 = vsel %vm1503_vm10, %v2529_v34, %v2530_v47 }
  0xcb   : > { %2793 = vmatmul.bf16.gmra.mxu3 %v10671_v7 }
  0xcd   : > { %v1779_v24 = vpop.f32.mrf.mxu0 }
  0xce   : > { %v1903_v43 = vpop.f32.mrf.mxu3  ;;  %1956 = vmatmul.bf16.gmra.mxu2 %v1512_v59  ;;  %v1514_v59 = vrot.slane %v10449_v12, 1  ;;  %v9363_v12 = vld [vmem:[%s13355_s1 + $0x1e8] sm:$0xff] }
  0xcf   : > { %v10713_v13 = vadd.f32 %v1903_v43, %v1814_v28  ;;  %v1865_v20 = vpop.f32.mrf.mxu1  ;;  %v2311_v28 = vshll.u32 %v2254_v30, 16  ;;  %v2095_v43 = vld [vmem:[#allocation2 + $0x44] sm:$0x1]  ;;  %3892 = vmatpush.bf16.msra.mxu3 %v9363_v12 }
  0xd0   : > { %v10716_v17 = vadd.f32 %v1865_v20, %v1776_v35  ;;  %2887 = vmatmul.bf16.gmra.mxu0 %v2302_v32  ;;  %v2309_v32 = vor.u32 %v2308_v36, %v2304_v57  ;;  %v1515_v20 = vsel %vm1503_vm10, %v1513_v8, %v1514_v59  ;;  %v2239_v34 = vunpack.c.l.b16 %v2095_v43  ;;  %v9371_v8 = vld [vmem:[%s13355_s1 + $0x228] sm:$0xff] }
  0xd1   : > { %v1819_v7 = vpop.f32.mrf.mxu2  ;;  %v2313_v40 = vrot.slane %v2311_v28, 1  ;;  %3981 = vmatpush.bf16.msra.mxu0 %v9371_v8 }
  0xd3   : > { %v2314_v49 = vsel %vm1246_vm9, %v2309_v32, %v2313_v40  ;;  %v2255_v32 = vpack.c.b16 %v2239_v34, %v2239_v34  ;;  %v9907_v34 = vld [vmem:[#allocation2 + $0x3c] sm:$0xe] }
  0xd5   : > { %v1781_v54 = vpop.f32.mrf.mxu0  ;;  %v2323_v12 = vshll.u32 %v2255_v32, 16 }
  0xd6   : > { %v1905_v14 = vpop.f32.mrf.mxu3 }
  0xd7   : > { %v10725_v35 = vadd.f32 %v1905_v14, %v1816_v0  ;;  %v1868_v15 = vpop.f32.mrf.mxu1  ;;  %v9355_v0 = vld [vmem:[%s13355_s1 + $0x1a8] sm:$0xff]  ;;  %v9651_v14 = vld [vmem:[#allocation2 + $0x30] sm:$0xf0] }
  0xd8   : > { %v10729_v25 = vadd.f32 %v1868_v15, %v1779_v24  ;;  %v9681_v24 = vld [vmem:[#allocation2 + $0x30] sm:$0xe]  ;;  %3803 = vmatpush.bf16.msra.mxu2 %v9355_v0  ;;  %v2316_v0 = vshrl.u32 %v10721_v60, 16 }
  0xd9   : > { %v1821_v6 = vpop.f32.mrf.mxu2  ;;  %v9682_v36 = vor.u32 %v9681_v24, %v9680_v45  ;;  %v9652_v15 = vld [vmem:[#allocation2 + $0x30] sm:$0xe] }
  0xda   : > { %2976 = vmatmul.bf16.gmra.mxu1 %v2531_v42  ;;  %v2318_v42 = vshll.u32 %v10721_v60, 16  ;;  %v9653_v40 = vor.u32 %v9652_v15, %v9651_v14  ;;  %v2096_v15 = vld [vmem:[#allocation2 + $0x50] sm:$0x1] }
  0xdb   : > { %2798 = vmatmul.bf16.gmra.mxu3 %v10676_v55  ;;  %v2532_v43 = vrot.slane %v9682_v36, 1 }
  0xdd   : > { %v1784_v62 = vpop.f32.mrf.mxu0 }
  0xde   : > { %v1908_v47 = vpop.f32.mrf.mxu3  ;;  %1961 = vmatmul.bf16.gmra.mxu2 %v1515_v20 }
  0xdf   : > { %v10740_v55 = vadd.f32 %v1908_v47, %v1819_v7  ;;  %v1870_v57 = vpop.f32.mrf.mxu1  ;;  %v2533_v7 = vrot.slane %v2254_v30, 1  ;;  %v1516_v47 = vrot.slane %v9653_v40, 1  ;;  %v2325_v30 = vrot.slane %v2323_v12, 1 }
  0xe0   : > { %v10742_v28 = vadd.f32 %v1870_v57, %v1781_v54  ;;  %2892 = vmatmul.bf16.gmra.mxu0 %v2314_v49  ;;  %v2320_v54 = vrot.slane %v2318_v42, 1  ;;  %v1517_v57 = vrot.slane %v10490_v39, 1 }
  0xe1   : > { %v1824_v59 = vpop.f32.mrf.mxu2  ;;  %v2534_v26 = vsel %vm1503_vm10, %v2532_v43, %v2533_v7  ;;  %v9908_v7 = vor.u32 %v9907_v34, %v10723_v16 }
  0xe2   : > { %v2321_v36 = vor.u32 %v2320_v54, %v2316_v0  ;;  %v1518_v8 = vsel %vm1503_vm10, %v1516_v47, %v1517_v57 }
  0xe3   : > { %v2535_v12 = vrot.slane %v9908_v7, 1 }
  0xe4   : > { %v2326_v40 = vsel %vm1246_vm9, %v2321_v36, %v2325_v30  ;;  %v10764_v30 = vld [vmem:[#allocation2 + $0x54] sm:$0xff]  }
  0xe5   : > { %v1786_v20 = vpop.f32.mrf.mxu0 }
  0xe6   : > { %v1910_v45 = vpop.f32.mrf.mxu3 }
  0xe7   : > { %v10749_v24 = vadd.f32 %v1910_v45, %v1821_v6  ;;  %v1873_v49 = vpop.f32.mrf.mxu1  ;;  %v9910_v6 = vld [vmem:[#allocation2 + $0x3c] sm:$0xe]  ;;  %v2240_v45 = vunpack.c.l.b16 %v2096_v15  ;;  %v10766_v15 = vld [vmem:[#allocation2 + $0x54] sm:$0xf0] }
  0xe8   : > { %v10753_v11 = vadd.f32 %v1873_v49, %v1784_v62  ;;  %v2536_v49 = vrot.slane %v2255_v32, 1  ;;  %v2097_v32 = vld [vmem:[#allocation2 + $0x5c] sm:$0x1] }
  0xe9   : > { %13411 = vst [vmem:[#allocation9_spill] sm:$0xff] %v10749_v24  ;;  %v1826_v14 = vpop.f32.mrf.mxu2  ;;  %v2256_v54 = vpack.c.b16 %v2240_v45, %v2240_v45 }
  0xea   : > { %2981 = vmatmul.bf16.gmra.mxu1 %v2534_v26  ;;  %v2537_v34 = vsel %vm1503_vm10, %v2535_v12, %v2536_v49 }
  0xeb   : > { %2803 = vmatmul.bf16.gmra.mxu3 %v10711_v58  ;;  %v9911_v58 = vor.u32 %v9910_v6, %v10522_v23  ;;  %v2335_v57 = vshll.u32 %v2256_v54, 16 }
  0xed   : > { %v1789_v42 = vpop.f32.mrf.mxu0  ;;  %v1519_v16 = vrot.slane %v9911_v58, 1  ;;  %v2337_v6 = vrot.slane %v2335_v57, 1  ;;  %v2241_v58 = vunpack.c.l.b16 %v2097_v32 }
  0xee   : > { %v1913_v39 = vpop.f32.mrf.mxu3  ;;  %1966 = vmatmul.bf16.gmra.mxu2 %v1518_v8 }
  0xef   : > { %v10758_v43 = vadd.f32 %v1913_v39, %v1824_v59  ;;  %v1875_v62 = vpop.f32.mrf.mxu1  ;;  %v9683_v39 = vld [vmem:[#allocation2 + $0x48] sm:$0xf0]  ;;  %v2338_v7 = vsel %vm1246_vm9, %v10628_v2, %v2337_v6  ;;  %v2342_v2 = vshll.u32 %v10764_v30, 16  ;;  %v2257_v6 = vpack.c.b16 %v2241_v58, %v2241_v58  ;;  %v9913_v58 = vld [vmem:[#allocation2 + $0x54] sm:$0xe] }
  0xf0   : > { %v10761_v0 = vadd.f32 %v1875_v62, %v1786_v20  ;;  %2897 = vmatmul.bf16.gmra.mxu0 %v2326_v40  ;;  %v1520_v20 = vrot.slane %v10546_v18, 1  ;;  %v9362_v18 = vld [vmem:[%s13355_s1 + $0x1e0] sm:$0xff]  ;;  %v9684_v62 = vld [vmem:[#allocation2 + $0x48] sm:$0xe] }
  0xf1   : > { %13412 = vst [vmem:[#allocation10_spill] sm:$0xff] %v10758_v43  ;;  %v1829_v26 = vpop.f32.mrf.mxu2  ;;  %3893 = vmatpush.bf16.msra.mxu3 %v9362_v18  ;;  %v9685_v57 = vor.u32 %v9684_v62, %v9683_v39  ;;  %v2340_v18 = vshrl.u32 %v10764_v30, 16  ;;  %v2347_v39 = vshll.u32 %v2257_v6, 16 }
  0xf2   : > { %v1521_v45 = vsel %vm1503_vm10, %v1519_v16, %v1520_v20  ;;  %v9655_v16 = vld [vmem:[#allocation2 + $0x48] sm:$0xe]  ;;  %v9370_v20 = vld [vmem:[%s13355_s1 + $0x220] sm:$0xff] }
  0xf3   : > { %3982 = vmatpush.bf16.msra.mxu0 %v9370_v20 }
  0xf5   : > { %v1791_v47 = vpop.f32.mrf.mxu0 }
  0xf6   : > { %v1915_v36 = vpop.f32.mrf.mxu3 }
  0xf7   : > { %v10768_v59 = vadd.f32 %v1915_v36, %v1826_v14  ;;  %v1878_v8 = vpop.f32.mrf.mxu1  ;;  %v9354_v14 = vld [vmem:[%s13355_s1 + $0x1a0] sm:$0xff] }
  0xf8   : > { %v10772_v40 = vadd.f32 %v1878_v8, %v1789_v42  ;;  %3804 = vmatpush.bf16.msra.mxu2 %v9354_v14  ;;  %v9654_v8 = vld [vmem:[#allocation2 + $0x48] sm:$0xf0] }
  0xf9   : > { %13413 = vst [vmem:[#allocation11_spill] sm:$0xff] %v10768_v59  ;;  %v1831_v23 = vpop.f32.mrf.mxu2  ;;  %v9656_v32 = vor.u32 %v9655_v16, %v9654_v8  ;;  %v2098_v16 = vld [vmem:[#allocation2 + $0x68] sm:$0x1] }
  0xfa   : > { %2986 = vmatmul.bf16.gmra.mxu1 %v2537_v34 }
  0xfb   : > { %2808 = vmatmul.bf16.gmra.mxu3 %v10721_v60 }
  0xfd   : > { %v1794_v42 = vpop.f32.mrf.mxu0 }
  0xfe   : > { %v1918_v60 = vpop.f32.mrf.mxu3  ;;  %1971 = vmatmul.bf16.gmra.mxu2 %v1521_v45  ;;  %v2538_v45 = vrot.slane %v9685_v57, 1 }
  0xff   : > { %v10784_v12 = vadd.f32 %v1918_v60, %v1829_v26  ;;  %v1880_v49 = vpop.f32.mrf.mxu1  ;;  %v2539_v26 = vrot.slane %v2256_v54, 1  ;;  %v2349_v54 = vrot.slane %v2347_v39, 1 }
 0x100   : > { %v10786_v36 = vadd.f32 %v1880_v49, %v1791_v47  ;;  %2902 = vmatmul.bf16.gmra.mxu0 %v2338_v7  ;;  %v2344_v47 = vrot.slane %v2342_v2, 1  ;;  %v1522_v49 = vrot.slane %v9656_v32, 1 }
 0x101   : > { %13414 = vst [vmem:[#allocation12_spill] sm:$0xff] %v10784_v12  ;;  %v1834_v34 = vpop.f32.mrf.mxu2  ;;  %v2540_v12 = vsel %vm1503_vm10, %v2538_v45, %v2539_v26  ;;  %v10802_v45 = vld [vmem:[#allocation2 + $0x60] sm:$0xff]  }
 0x102   : > { %v2345_v57 = vor.u32 %v2344_v47, %v2340_v18  ;;  %v1524_v20 = vsel %vm1503_vm10, %v1522_v49, %v1523_v41  ;;  %v9914_v18 = vor.u32 %v9913_v58, %v10766_v15  ;;  %v2354_v41 = vshll.u32 %v10802_v45, 16  ;;  %v10814_v15 = vld [vmem:[#allocation2 + $0x6c] sm:$0xf0] }
 0x103   : > { %v2542_v49 = vrot.slane %v2257_v6, 1 }
 0x104   : > { %v2350_v32 = vsel %vm1246_vm9, %v2345_v57, %v2349_v54  ;;  %v2352_v54 = vshrl.u32 %v10802_v45, 16 }
 0x105   : > { %v1796_v14 = vpop.f32.mrf.mxu0 }
 0x106   : > { %v1920_v62 = vpop.f32.mrf.mxu3 }
 0x107   : > { %v10793_v7 = vadd.f32 %v1920_v62, %v1831_v23  ;;  %v1883_v60 = vpop.f32.mrf.mxu1  ;;  %v9916_v23 = vld [vmem:[#allocation2 + $0x54] sm:$0xe]  ;;  %v2242_v62 = vunpack.c.l.b16 %v2098_v16  ;;  %v2356_v16 = vrot.slane %v2354_v41, 1  ;;  %v2099_v41 = vld [vmem:[#allocation2 + $0x74] sm:$0x1] }
 0x108   : > { %v10797_v59 = vadd.f32 %v1883_v60, %v1794_v42  ;;  %v9917_v39 = vor.u32 %v9916_v23, %v10626_v53  ;;  %v2541_v60 = vrot.slane %v9914_v18, 1 }
 0x109   : > { %13415 = vst [vmem:[#allocation13_spill] sm:$0xff] %v10793_v7  ;;  %v1836_v8 = vpop.f32.mrf.mxu2  ;;  %v2258_v47 = vpack.c.b16 %v2242_v62, %v2242_v62  ;;  %v1526_v62 = vrot.slane %v10644_v4, 1  ;;  %v9361_v4 = vld [vmem:[%s13355_s1 + $0x1d8] sm:$0xff] }
 0x10a   : > { %2991 = vmatmul.bf16.gmra.mxu1 %v2540_v12  ;;  %v2543_v53 = vsel %vm1503_vm10, %v2541_v60, %v2542_v49  ;;  %3894 = vmatpush.bf16.msra.mxu3 %v9361_v4 }
 0x10b   : > { %2813 = vmatmul.bf16.gmra.mxu3 %v10591_v10 }
 0x10d   : > { %v1799_v2 = vpop.f32.mrf.mxu0 }
 0x10e   : > { %v1923_v44 = vpop.f32.mrf.mxu3  ;;  %1976 = vmatmul.bf16.gmra.mxu2 %v1524_v20 }
 0x10f   : > { %v10804_v42 = vadd.f32 %v1923_v44, %v1834_v34  ;;  %v1885_v26 = vpop.f32.mrf.mxu1  ;;  %v2359_v34 = vshll.u32 %v2258_v47, 16  ;;  %v10812_v44 = vld [vmem:[#allocation2 + $0x6c] sm:$0xff]  }
 0x110   : > { %v10807_v12 = vadd.f32 %v1885_v26, %v1796_v14  ;;  %2907 = vmatmul.bf16.gmra.mxu0 %v2350_v32  ;;  %v1525_v32 = vrot.slane %v9917_v39, 1  ;;  %v2357_v26 = vor.u32 %v2356_v16, %v2352_v54  ;;  %v9686_v39 = vld [vmem:[#allocation2 + $0x60] sm:$0xf0]  ;;  %v2243_v54 = vunpack.c.l.b16 %v2099_v41 }
 0x111   : > { %13416 = vst [vmem:[#allocation14_spill] sm:$0xff] %v10804_v42  ;;  %v1839_v10 = vpop.f32.mrf.mxu2  ;;  %v2361_v18 = vrot.slane %v2359_v34, 1  ;;  %v2364_v41 = vshrl.u32 %v10812_v44, 16 }
 0x112   : > { %v1527_v42 = vsel %vm1503_vm10, %v1525_v32, %v1526_v62  ;;  %v9657_v32 = vld [vmem:[#allocation2 + $0x60] sm:$0xf0]  ;;  %v9658_v62 = vld [vmem:[#allocation2 + $0x60] sm:$0xe]  ;;  %v2259_v7 = vpack.c.b16 %v2243_v54, %v2243_v54  ;;  %v1529_v54 = vrot.slane %v10278_v1, 1 }
 0x113   : > { %v2362_v49 = vsel %vm1246_vm9, %v2357_v26, %v2361_v18  ;;  %v9659_v43 = vor.u32 %v9658_v62, %v9657_v32  ;;  %v2545_v18 = vrot.slane %v2258_v47, 1 }
 0x115   : > { %v1801_v57 = vpop.f32.mrf.mxu0 }
 0x116   : > { %v1925_v20 = vpop.f32.mrf.mxu3 }
 0x117   : > { %v10816_v14 = vadd.f32 %v1925_v20, %v1836_v8  ;;  %v1888_v58 = vpop.f32.mrf.mxu1  ;;  %v9353_v8 = vld [vmem:[%s13355_s1 + $0x198] sm:$0xff] }
 0x118   : > { %v10820_v23 = vadd.f32 %v1888_v58, %v1799_v2  ;;  %v9687_v2 = vld [vmem:[#allocation2 + $0x60] sm:$0xe]  ;;  %3805 = vmatpush.bf16.msra.mxu2 %v9353_v8 }
 0x119   : > { %13417 = vst [vmem:[#allocation15_spill] sm:$0xff] %v10816_v14  ;;  %v1841_v6 = vpop.f32.mrf.mxu2  ;;  %v9688_v20 = vor.u32 %v9687_v2, %v9686_v39  ;;  %v2366_v14 = vshll.u32 %v10812_v44, 16 }
 0x11a   : > { %2996 = vmatmul.bf16.gmra.mxu1 %v2543_v53 }
 0x11b   : > { %2818 = vmatmul.bf16.gmra.mxu3 %v10764_v30  ;;  %v2544_v26 = vrot.slane %v9688_v20, 1  ;;  %v2368_v8 = vrot.slane %v2366_v14, 1 }
 0x11d   : > { %v1804_v60 = vpop.f32.mrf.mxu0  ;;  %v2369_v32 = vor.u32 %v2368_v8, %v2364_v41 }
 0x11e   : > { %v1928_v16 = vpop.f32.mrf.mxu3  ;;  %1981 = vmatmul.bf16.gmra.mxu2 %v1527_v42  ;;  %v9369_v42 = vld [vmem:[%s13355_s1 + $0x218] sm:$0xff] }
 0x11f   : > { %v10831_v30 = vadd.f32 %v1928_v16, %v1839_v10  ;;  %v1890_v34 = vpop.f32.mrf.mxu1  ;;  %3983 = vmatpush.bf16.msra.mxu0 %v9369_v42  ;;  %v2546_v16 = vsel %vm1503_vm10, %v2544_v26, %v2545_v18  ;;  %v10849_v26 = vld [vmem:[#allocation2 + $0x78] sm:$0xff]  }
 0x120   : > { %v10833_v58 = vadd.f32 %v1890_v34, %v1801_v57  ;;  %2912 = vmatmul.bf16.gmra.mxu0 %v2362_v49  ;;  %v2371_v57 = vshll.u32 %v2259_v7, 16  ;;  %v1528_v49 = vrot.slane %v9659_v43, 1  ;;  %v9919_v34 = vld [vmem:[#allocation2 + $0x6c] sm:$0xe] }
 0x121   : > { %13418 = vst [vmem:[#allocation16_spill] sm:$0xff] %v10831_v30  ;;  %v1844_v53 = vpop.f32.mrf.mxu2  ;;  %v2100_v30 = vld [vmem:[#allocation2 + $0x80] sm:$0x1]  ;;  %v9920_v41 = vor.u32 %v9919_v34, %v10814_v15  ;;  %v10863_v34 = vld [vmem:[#allocation2 + $0x84] sm:$0xff]  }
 0x122   : > { %v2373_v62 = vrot.slane %v2371_v57, 1  ;;  %v1530_v14 = vsel %vm1503_vm10, %v1528_v49, %v1529_v54 }
 0x123   : > { %v2547_v54 = vrot.slane %v9920_v41, 1 }
 0x124   : > { %v2374_v43 = vsel %vm1246_vm9, %v2369_v32, %v2373_v62 }
 0x125   : > { %v1806_v10 = vpop.f32.mrf.mxu0 }
 0x126   : > { %v1930_v4 = vpop.f32.mrf.mxu3 }
 0x127   : > { %v10840_v39 = vadd.f32 %v1930_v4, %v1841_v6  ;;  %v1893_v2 = vpop.f32.mrf.mxu1  ;;  %v9922_v6 = vld [vmem:[#allocation2 + $0x6c] sm:$0xe]  ;;  %v2244_v4 = vunpack.c.l.b16 %v2100_v30 }
 0x128   : > { %v10844_v47 = vadd.f32 %v1893_v2, %v1804_v60  ;;  %v2378_v2 = vshll.u32 %v10849_v26, 16  ;;  %v9923_v30 = vor.u32 %v9922_v6, %v10282_v3 }
 0x129   : > { %13419 = vst [vmem:[#allocation17_spill] sm:$0xff] %v10840_v39  ;;  %v1846_v20 = vpop.f32.mrf.mxu2  ;;  %v10856_v57 = vpack.c.b16 %v2244_v4, %v2244_v4  ;;  %v2390_v39 = vshll.u32 %v10863_v34, 16 }
 0x12a   : > { %3001 = vmatmul.bf16.gmra.mxu1 %v2546_v16  ;;  %v2548_v16 = vrot.slane %v2259_v7, 1  ;;  %v2380_v62 = vrot.slane %v2378_v2, 1 }
 0x12b   : > { %2823 = vmatmul.bf16.gmra.mxu3 %v10802_v45  ;;  %v2383_v15 = vshll.u32 %v10856_v57, 16 }
 0x12c   : > { %v2549_v3 = vsel %vm1503_vm10, %v2547_v54, %v2548_v16  ;;  %v9690_v54 = vld [vmem:[#allocation2 + $0x78] sm:$0xe] }
 0x12d   : > { %v2878_v42 = vpop.f32.mrf.mxu0 }
 0x12e   : > { %v1933_v1 = vpop.f32.mrf.mxu3  ;;  %1986 = vmatmul.bf16.gmra.mxu2 %v1530_v14  ;;  %v10865_v14 = vld [vmem:[#allocation2 + $0x84] sm:$0xf0] }
 0x12f   : > { %v10851_v60 = vadd.f32 %v1933_v1, %v1844_v53  ;;  %v1895_v18 = vpop.f32.mrf.mxu1  ;;  %v2376_v53 = vshrl.u32 %v10849_v26, 16  ;;  %v1531_v1 = vrot.slane %v9923_v30, 1  ;;  %v9689_v30 = vld [vmem:[#allocation2 + $0x78] sm:$0xf0] }
 0x130   : > { %v10854_v8 = vadd.f32 %v1895_v18, %v1806_v10  ;;  %2917 = vmatmul.bf16.gmra.mxu0 %v2374_v43  ;;  %v2385_v18 = vrot.slane %v2383_v15, 1 }
 0x131   : > { %13420 = vst [vmem:[#allocation18_spill] sm:$0xff] %v10851_v60  ;;  %v1947_v45 = vpop.f32.mrf.mxu2  ;;  %v2381_v6 = vor.u32 %v2380_v62, %v2376_v53 }
 0x132   : > { %v1948_v49 = vadd.f32 %v1947_v45, %v10682_v46  ;;  %v1532_v46 = vrot.slane %v10337_v5, 1  ;;  %v2101_v45 = vld [vmem:[#allocation2 + $0x8c] sm:$0x1]  ;;  %v9360_v5 = vld [vmem:[%s13355_s1 + $0x1d0] sm:$0xff] }
 0x133   : > { %v2245_v53 = vunpack.c.l.b16 %v2101_v45  ;;  %3895 = vmatpush.bf16.msra.mxu3 %v9360_v5 }
 0x134   : > { %v1533_v2 = vsel %vm1503_vm10, %v1531_v1, %v1532_v46  ;;  %v9691_v1 = vor.u32 %v9690_v54, %v9689_v30  ;;  %v9660_v46 = vld [vmem:[#allocation2 + $0x78] sm:$0xf0] }
 0x135   : > { %v2880_v32 = vpop.f32.mrf.mxu0  ;;  %v10888_v24 = vpack.c.b16 %v2245_v53, %v2245_v53 }
 0x136   : > { %v1935_v10 = vpop.f32.mrf.mxu3 }
 0x137   : > { %v10867_v43 = vadd.f32 %v1935_v10, %v1846_v20  ;;  %v2967_v4 = vpop.f32.mrf.mxu1  ;;  %v9352_v20 = vld [vmem:[%s13355_s1 + $0x190] sm:$0xff]  ;;  %v2395_v30 = vshll.u32 %v10888_v24, 16 }
 0x138   : > { %3806 = vmatpush.bf16.msra.mxu2 %v9352_v20  ;;  %v9368_v20 = vld [vmem:[%s13355_s1 + $0x210] sm:$0xff] }
 0x139   : > { %13421 = vst [vmem:[#allocation19_spill] sm:$0xff] %v10867_v43  ;;  %v1949_v7 = vpop.f32.mrf.mxu2  ;;  %3984 = vmatpush.bf16.msra.mxu0 %v9368_v20 }
 0x13a   : > { %v1950_v41 = vadd.f32 %v1949_v7, %v10695_v50  ;;  %3006 = vmatmul.bf16.gmra.mxu1 %v2549_v3  ;;  %v10883_v50 = vld [vmem:[%s13356_s2] ss:$0 sm:$0xff]  ;;  %v9661_v3 = vld [vmem:[#allocation2 + $0x78] sm:$0xe] }
 0x13b   : > { %2828 = vmatmul.bf16.gmra.mxu3 %v10812_v44  ;;  %v2386_v44 = vsel %vm1246_vm9, %v2381_v6, %v2385_v18  ;;  %v2027_v7 = vadd.f32 %v10883_v50, %v1948_v49  ;;  %v9662_v45 = vor.u32 %v9661_v3, %v9660_v46  ;;  %v2388_v49 = vshrl.u32 %v10863_v34, 16 }
 0x13c   : > { %v2397_v3 = vrot.slane %v2395_v30, 1 }
 0x13d   : > { %v2883_v16 = vpop.f32.mrf.mxu0 }
 0x13e   : > { %v2789_v62 = vpop.f32.mrf.mxu3  ;;  %1991 = vmatmul.bf16.gmra.mxu2 %v1533_v2  ;;  %v2550_v2 = vrot.slane %v9691_v1, 1 }
 0x13f   : > { %v2879_v15 = vadd.f32 %v2878_v42, %v2789_v62  ;;  %v2969_v10 = vpop.f32.mrf.mxu1  ;;  %v2551_v42 = vrot.slane %v10856_v57, 1  ;;  %v9925_v57 = vld [vmem:[#allocation2 + $0x84] sm:$0xe]  ;;  %v2028_v62 = vadd.f32 %v10883_v50, %v1950_v41 }
 0x140   : > { %2922 = vmatmul.bf16.gmra.mxu0 %v2386_v44 }
 0x141   : > { %v2968_v43 = vadd.f32 %v2967_v4, %v2879_v15  ;;  %v1952_v60 = vpop.f32.mrf.mxu2  ;;  %v2392_v4 = vrot.slane %v2390_v39, 1  ;;  %v2552_v53 = vsel %vm1503_vm10, %v2550_v2, %v2551_v42 }
 0x142   : > { %v1953_v6 = vadd.f32 %v1952_v60, %v10706_v38  ;;  %v1534_v60 = vrot.slane %v9662_v45, 1 }
 0x143   : > { %v10891_v18 = vadd.f32 %v2968_v43, %v2027_v7  ;;  %v1535_v43 = vrot.slane %v10375_v63, 1  ;;  %v2393_v46 = vor.u32 %v2392_v4, %v2388_v49  ;;  %v2102_v7 = vld [vmem:[#allocation2 + $0x98] sm:$0x1]  ;;  %v9928_v63 = vld [vmem:[#allocation2 + $0x84] sm:$0xe] }
 0x144   : > { %v2246_v42 = vunpack.c.l.b16 %v2102_v7  ;;  %v2029_v30 = vadd.f32 %v10883_v50, %v1953_v6 }
 0x145   : > { %v2885_v5 = vpop.f32.mrf.mxu0  ;;  %v2398_v2 = vsel %vm1246_vm9, %v2393_v46, %v2397_v3  ;;  %v10924_v46 = vld [vmem:[#allocation2 + $0x9c] sm:$0xf0] }
 0x146   : > { %v2791_v54 = vpop.f32.mrf.mxu3 }
 0x147   : > { %v2881_v44 = vadd.f32 %v2880_v32, %v2791_v54  ;;  %v2972_v38 = vpop.f32.mrf.mxu1  ;;  %v1536_v32 = vsel %vm1503_vm10, %v1534_v60, %v1535_v43 }
 0x149   : > { %v2970_v15 = vadd.f32 %v2969_v10, %v2881_v44  ;;  %v1954_v1 = vpop.f32.mrf.mxu2  ;;  %v10908_v10 = vld [vmem:[#allocation2 + $0x90] sm:$0xff]   ;;  %v10912_v44 = vpack.c.b16 %v2246_v42, %v2246_v42 }
 0x14a   : > { %v1955_v39 = vadd.f32 %v1954_v1, %v10716_v17  ;;  %3011 = vmatmul.bf16.gmra.mxu1 %v2552_v53  ;;  %v9926_v17 = vor.u32 %v9925_v57, %v10865_v14  ;;  %v2402_v60 = vshll.u32 %v10908_v10, 16  ;;  %v2400_v14 = vshrl.u32 %v10908_v10, 16 }
 0x14b   : > { %v10903_v20 = vadd.f32 %v2970_v15, %v2028_v62  ;;  %2833 = vmatmul.bf16.gmra.mxu3 %v10849_v26  ;;  %v9929_v62 = vor.u32 %v9928_v63, %v10396_v37  ;;  %v2407_v6 = vshll.u32 %v10912_v44, 16 }
 0x14c   : > { %v2553_v15 = vrot.slane %v9926_v17, 1  ;;  %v2404_v57 = vrot.slane %v2402_v60, 1 }
 0x14d   : > { %v2888_v45 = vpop.f32.mrf.mxu0 }
 0x14e   : > { %v2794_v41 = vpop.f32.mrf.mxu3  ;;  %1996 = vmatmul.bf16.gmra.mxu2 %v1536_v32  ;;  %v1537_v32 = vrot.slane %v9929_v62, 1 }
 0x14f   : > { %v2884_v49 = vadd.f32 %v2883_v16, %v2794_v41  ;;  %v2974_v4 = vpop.f32.mrf.mxu1  ;;  %v2554_v16 = vrot.slane %v10888_v24, 1  ;;  %v2030_v24 = vadd.f32 %v10883_v50, %v1955_v39  ;;  %v2405_v41 = vor.u32 %v2404_v57, %v2400_v14  ;;  %v9359_v39 = vld [vmem:[%s13355_s1 + $0x1c8] sm:$0xff]  ;;  %v9663_v14 = vld [vmem:[#allocation2 + $0x90] sm:$0xf0]  ;;  %v9664_v57 = vld [vmem:[#allocation2 + $0x90] sm:$0xe] }
 0x150   : > { %2927 = vmatmul.bf16.gmra.mxu0 %v2398_v2  ;;  %v1538_v2 = vrot.slane %v10424_v29, 1  ;;  %v9351_v29 = vld [vmem:[%s13355_s1 + $0x188] sm:$0xff]  ;;  %3896 = vmatpush.bf16.msra.mxu3 %v9359_v39 }
 0x151   : > { %v2973_v54 = vadd.f32 %v2972_v38, %v2884_v49  ;;  %v1957_v26 = vpop.f32.mrf.mxu2  ;;  %v10922_v38 = vld [vmem:[#allocation2 + $0x9c] sm:$0xff]   ;;  %v2555_v37 = vsel %vm1503_vm10, %v2553_v15, %v2554_v16  ;;  %v2409_v49 = vrot.slane %v2407_v6, 1  ;;  %3807 = vmatpush.bf16.msra.mxu2 %v9351_v29  ;;  %v255_v29 = vld [vmem:[%s10089_s6 + $0xf0] sm:$0xff] }
 0x152   : > { %v1958_v43 = vadd.f32 %v1957_v26, %v10729_v25  ;;  %v9693_v26 = vld [vmem:[#allocation2 + $0x90] sm:$0xe] }
 0x153   : > { %v10916_v53 = vadd.f32 %v2973_v54, %v2029_v30  ;;  %v2103_v30 = vld [vmem:[#allocation2 + $0xa4] sm:$0x1] }
 0x154   : > { %v2247_v62 = vunpack.c.l.b16 %v2103_v30  ;;  %v2412_v30 = vshrl.u32 %v10922_v38, 16 }
 0x155   : > { %v2890_v1 = vpop.f32.mrf.mxu0 }
 0x156   : > { %v2796_v3 = vpop.f32.mrf.mxu3 }
 0x157   : > { %v2886_v7 = vadd.f32 %v2885_v5, %v2796_v3  ;;  %v2977_v25 = vpop.f32.mrf.mxu1  ;;  %v1539_v5 = vsel %vm1503_vm10, %v1537_v32, %v1538_v2  ;;  %v2414_v3 = vshll.u32 %v10922_v38, 16 }
 0x159   : > { %v2975_v63 = vadd.f32 %v2974_v4, %v2886_v7  ;;  %v1959_v42 = vpop.f32.mrf.mxu2  ;;  %v9692_v4 = vld [vmem:[#allocation2 + $0x90] sm:$0xf0]  ;;  %v2031_v7 = vadd.f32 %v10883_v50, %v1958_v43  ;;  %v2416_v43 = vrot.slane %v2414_v3, 1 }
 0x15a   : > { %v1960_v17 = vadd.f32 %v1959_v42, %v10742_v28  ;;  %3016 = vmatmul.bf16.gmra.mxu1 %v2555_v37  ;;  %v2410_v28 = vsel %vm1246_vm9, %v2405_v41, %v2409_v49  ;;  %v9694_v6 = vor.u32 %v9693_v26, %v9692_v4  ;;  %v10945_v37 = vpack.c.b16 %v2247_v62, %v2247_v62  ;;  %v9367_v49 = vld [vmem:[%s13355_s1 + $0x208] sm:$0xff] }
 0x15b   : > { %v10930_v54 = vadd.f32 %v2975_v63, %v2030_v24  ;;  %2838 = vmatmul.bf16.gmra.mxu3 %v10863_v34  ;;  %v9665_v63 = vor.u32 %v9664_v57, %v9663_v14  ;;  %v2557_v41 = vrot.slane %v10912_v44, 1  ;;  %3985 = vmatpush.bf16.msra.mxu0 %v9367_v49  ;;  %v287_v26 = vpack.c.bf16 %v255_v29, %v255_v29  ;;  %v9931_v57 = vld [vmem:[#allocation2 + $0x9c] sm:$0xe]  ;;  %v2104_v49 = vld [vmem:[#allocation2 + $0xb0] sm:$0x1] }
 0x15c   : > { %v1541_v44 = vrot.slane %v10475_v51, 1  ;;  %v2417_v14 = vor.u32 %v2416_v43, %v2412_v30  ;;  %v2032_v3 = vadd.f32 %v10883_v50, %v1960_v17  ;;  %v2248_v30 = vunpack.c.l.b16 %v2104_v49 }
 0x15d   : > { %v10940_v60 = vpop.f32.mrf.mxu0  ;;  %v1540_v4 = vrot.slane %v9665_v63, 1  ;;  %v551_v17 = vshll.u32 %v287_v26, 16 }
 0x15e   : > { %v2799_v34 = vpop.f32.mrf.mxu3  ;;  %2001 = vmatmul.bf16.gmra.mxu2 %v1539_v5 }
 0x15f   : > { %v2889_v15 = vadd.f32 %v2888_v45, %v2799_v34  ;;  %v2979_v16 = vpop.f32.mrf.mxu1  ;;  %v2556_v45 = vrot.slane %v9694_v6, 1  ;;  %v548_v6 = vshrl.u32 %v287_v26, 16  ;;  %v1542_v51 = vsel %vm1503_vm10, %v1540_v4, %v1541_v44  ;;  %v723_v26 = vld [vmem:[#allocation2 + $0xc0] sm:$0xf] }
 0x160   : > { %2932 = vmatmul.bf16.gmra.mxu0 %v2410_v28  ;;  %v10977_v44 = vpack.c.b16 %v2248_v30, %v2248_v30 }
 0x161   : > { %v2978_v32 = vadd.f32 %v2977_v25, %v2889_v15  ;;  %v1962_v2 = vpop.f32.mrf.mxu2  ;;  %v2419_v25 = vshll.u32 %v10945_v37, 16  ;;  %v2558_v34 = vsel %vm1503_vm10, %v2556_v45, %v2557_v41  ;;  %v9934_v41 = vld [vmem:[#allocation2 + $0x9c] sm:$0xe] }
 0x162   : > { %v1963_v24 = vadd.f32 %v1962_v2, %v10753_v11  ;;  %v256_v11 = vld [vmem:[%s10089_s6 + $0xf8] sm:$0xff] }
 0x163   : > { %v10948_v42 = vadd.f32 %v2978_v32, %v2031_v7  ;;  %v288_v15 = vpack.c.bf16 %v256_v11, %v256_v11  ;;  %v2421_v2 = vrot.slane %v2419_v25, 1  ;;  %v10971_v11 = vld [vmem:[#allocation2 + $0xa8] sm:$0xff]  }
 0x165   : > { %13422 = vst [vmem:[#allocation20_spill] sm:$0xff] %v10948_v42  ;;  %v10955_v5 = vpop.f32.mrf.mxu0  ;;  %v556_v42 = vshrl.u32 %v288_v15, 16  ;;  %v559_v29 = vshll.u32 %v288_v15, 16  ;;  %v2422_v25 = vsel %vm1246_vm9, %v2417_v14, %v2421_v2  ;;  %v2426_v14 = vshll.u32 %v10971_v11, 16 }
 0x166   : > { %v2801_v39 = vpop.f32.mrf.mxu3 }
 0x167   : > { %v2891_v28 = vadd.f32 %v2890_v1, %v2801_v39  ;;  %v2982_v62 = vpop.f32.mrf.mxu1  ;;  %v550_v1 = vrot.slane %v548_v6, 7  ;;  %v558_v45 = vrot.slane %v556_v42, 7  ;;  %v9932_v42 = vor.u32 %v9931_v57, %v10924_v46 }
 0x169   : > { %v2980_v7 = vadd.f32 %v2979_v16, %v2891_v28  ;;  %v1964_v32 = vpop.f32.mrf.mxu2  ;;  %v554_v16 = vrot.slane %v550_v1, 4  ;;  %v563_v15 = vrot.slane %v558_v45, 4 }
 0x16a   : > { %v1965_v63 = vadd.f32 %v1964_v32, %v10761_v0  ;;  %3021 = vmatmul.bf16.gmra.mxu1 %v2558_v34  ;;  %v561_v0 = vor.u32 %v559_v29, %v558_v45  ;;  %v553_v34 = vor.u32 %v551_v17, %v550_v1  ;;  %v9935_v1 = vor.u32 %v9934_v41, %v10512_v9 }
 0x16b   : > { %v10964_v39 = vadd.f32 %v2980_v7, %v2032_v3  ;;  %2843 = vmatmul.bf16.gmra.mxu3 %v10908_v10  ;;  %v727_v3 = vld [vmem:[#allocation2 + $0xc8] sm:$0x1]  ;;  %v2033_v7 = vadd.f32 %v10883_v50, %v1963_v24  ;;  %v2559_v29 = vrot.slane %v9932_v42, 1  ;;  %v2424_v24 = vshrl.u32 %v10971_v11, 16 }
 0x16c   : > { %v562_v4 = vsel %vm10109_vm5, %v554_v16, %v561_v0  ;;  %v728_v46 = vsel %vm10129_vm7, %v563_v15, %v727_v3  ;;  %v2431_v45 = vshll.u32 %v10977_v44, 16  ;;  %v10994_v16 = vld [vmem:[#allocation2 + $0xb4] sm:$0xff]   ;;  %v1543_v9 = vrot.slane %v9935_v1, 1 }
 0x16d   : > { %v10968_v43 = vpop.f32.mrf.mxu0  ;;  %726 = vst [vmem:[#allocation2 + $0xc4] sm:$0xf] %v562_v4  ;;  %v1544_v41 = vrot.slane %v10552_v31, 1 }
 0x16e   : > { %v2804_v28 = vpop.f32.mrf.mxu3  ;;  %2006 = vmatmul.bf16.gmra.mxu2 %v1542_v51  ;;  %v2560_v51 = vrot.slane %v10945_v37, 1  ;;  %729 = vst [vmem:[#allocation2 + $0xc8] sm:$0x1] %v728_v46  ;;  %v9696_v46 = vld [vmem:[#allocation2 + $0xa8] sm:$0xe] }
 0x16f   : > { %v2894_v10 = vadd.f32 %v10940_v60, %v2804_v28  ;;  %v2984_v6 = vpop.f32.mrf.mxu1  ;;  %v724_v60 = vsel %vm10117_vm6, %v553_v34, %v723_v26  ;;  %v2034_v34 = vadd.f32 %v10883_v50, %v1965_v63  ;;  %v1545_v31 = vsel %vm1503_vm10, %v1543_v9, %v1544_v41  ;;  %v9350_v63 = vld [vmem:[%s13355_s1 + $0x180] sm:$0xff]  ;;  %v9666_v9 = vld [vmem:[#allocation2 + $0xa8] sm:$0xf0]  ;;  %v9667_v41 = vld [vmem:[#allocation2 + $0xa8] sm:$0xe] }
 0x170   : > { %2937 = vmatmul.bf16.gmra.mxu0 %v2422_v25  ;;  %725 = vst [vmem:[#allocation2 + $0xc0] sm:$0xf] %v724_v60  ;;  %v2561_v37 = vsel %vm1503_vm10, %v2559_v29, %v2560_v51  ;;  %v9695_v60 = vld [vmem:[#allocation2 + $0xa8] sm:$0xf0]  ;;  %3808 = vmatpush.bf16.msra.mxu2 %v9350_v63 }
 0x171   : > { %v2983_v32 = vadd.f32 %v2982_v62, %v2894_v10  ;;  %v1967_v2 = vpop.f32.mrf.mxu2  ;;  %v2428_v62 = vrot.slane %v2426_v14, 1  ;;  %v2433_v10 = vrot.slane %v2431_v45, 1 }
 0x172   : > { %v1968_v57 = vadd.f32 %v1967_v2, %v10772_v40  ;;  %v10996_v40 = vld [vmem:[#allocation2 + $0xb4] sm:$0xf0] }
 0x173   : > { %v10986_v49 = vadd.f32 %v2983_v32, %v2033_v7  ;;  %v2429_v15 = vor.u32 %v2428_v62, %v2424_v24  ;;  %v2105_v7 = vld [vmem:[#allocation2 + $0xbc] sm:$0x1] }
 0x174   : > { %v905_v28 = vld [vmem:[#allocation2 + $0xc4] sm:$0x8] }
 0x175   : > { %v10992_v30 = vpop.f32.mrf.mxu0  ;;  %v8492_v14 = vrot.slane %v905_v28, 11  ;;  %v1028_v29 = vld [vmem:[#allocation2 + $0xc8] sm:$0x1] }
 0x176   : > { %v2806_v17 = vpop.f32.mrf.mxu3 }
 0x177   : > { %v2896_v25 = vadd.f32 %v10955_v5, %v2806_v17  ;;  %v2987_v0 = vpop.f32.mrf.mxu1  ;;  %v761_v26 = vld [vmem:[#allocation2 + $0xc0] sm:$0x2]  ;;  %v883_v32 = vld [vmem:[#allocation2 + $0xc0] sm:$0x1]  ;;  %v1029_v24 = vsel %vm10204_vm8, %v8492_v14, %v1028_v29 }
 0x178   : > { %v8474_v5 = vrot.slane %v761_v26, 9  ;;  %1030 = vst [vmem:[#allocation2 + $0xc8] sm:$0x1] %v1029_v24  ;;  %v9668_v26 = vor.u32 %v9667_v41, %v9666_v9 }
 0x179   : > { %v2985_v42 = vadd.f32 %v2984_v6, %v2896_v25  ;;  %v1969_v4 = vpop.f32.mrf.mxu2  ;;  %v9358_v6 = vld [vmem:[%s13355_s1 + $0x1c0] sm:$0xff]  ;;  %v9697_v25 = vor.u32 %v9696_v46, %v9695_v60 }
 0x17a   : > { %v1970_v3 = vadd.f32 %v1969_v4, %v10786_v36  ;;  %3026 = vmatmul.bf16.gmra.mxu1 %v2561_v37  ;;  %v2434_v36 = vsel %vm1246_vm9, %v2429_v15, %v2433_v10  ;;  %v884_v1 = vsel %vm10129_vm7, %v8474_v5, %v883_v32  ;;  %3897 = vmatpush.bf16.msra.mxu3 %v9358_v6  ;;  %v2438_v15 = vshll.u32 %v10994_v16, 16 }
 0x17b   : > { %v11003_v2 = vadd.f32 %v2985_v42, %v2034_v34  ;;  %2848 = vmatmul.bf16.gmra.mxu3 %v10922_v38  ;;  %v2249_v38 = vunpack.c.l.b16 %v2105_v7  ;;  %885 = vst [vmem:[#allocation2 + $0xc0] sm:$0x1] %v884_v1  ;;  %v2035_v37 = vadd.f32 %v10883_v50, %v1968_v57  ;;  %v2562_v14 = vrot.slane %v9697_v25, 1  ;;  %v9366_v7 = vld [vmem:[%s13355_s1 + $0x200] sm:$0xff] }
 0x17c   : > { %v2436_v57 = vshrl.u32 %v10994_v16, 16  ;;  %3986 = vmatpush.bf16.msra.mxu0 %v9366_v7  ;;  %v1546_v6 = vrot.slane %v9668_v26, 1  ;;  %v2036_v46 = vadd.f32 %v10883_v50, %v1970_v3 }
 0x17d   : > { %v2903_v51 = vpop.f32.mrf.mxu0  ;;  %v2265_v10 = vpack.c.b16 %v2249_v38, %v2249_v38 }
 0x17e   : > { %v2809_v62 = vpop.f32.mrf.mxu3  ;;  %2011 = vmatmul.bf16.gmra.mxu2 %v1545_v31 }
 0x17f   : > { %v2899_v45 = vadd.f32 %v10968_v43, %v2809_v62  ;;  %v2989_v17 = vpop.f32.mrf.mxu1  ;;  %v2563_v43 = vrot.slane %v10977_v44, 1  ;;  %v2443_v32 = vshll.u32 %v2265_v10, 16  ;;  %v9937_v44 = vld [vmem:[#allocation2 + $0xb4] sm:$0xe] }
 0x180   : > { %2942 = vmatmul.bf16.gmra.mxu0 %v2434_v36  ;;  %v1547_v36 = vrot.slane %v10606_v21, 1  ;;  %v9940_v21 = vld [vmem:[#allocation2 + $0xb4] sm:$0xe] }
 0x181   : > { %v2988_v28 = vadd.f32 %v2987_v0, %v2899_v45  ;;  %v1972_v34 = vpop.f32.mrf.mxu2  ;;  %v2440_v0 = vrot.slane %v2438_v15, 1  ;;  %v2564_v60 = vsel %vm1503_vm10, %v2562_v14, %v2563_v43  ;;  %v2445_v24 = vrot.slane %v2443_v32, 1  ;;  %v2106_v45 = vld [vmem:[#allocation2 + $0xc8] sm:$0x1] }
 0x182   : > { %v1973_v42 = vadd.f32 %v1972_v34, %v10797_v59 }
 0x183   : > { %v11022_v4 = vadd.f32 %v2988_v28, %v2035_v37  ;;  %v2441_v38 = vor.u32 %v2440_v0, %v2436_v57  ;;  %v2250_v37 = vunpack.c.l.b16 %v2106_v45  ;;  %v9941_v0 = vor.u32 %v9940_v21, %v10630_v22  ;;  %v9698_v45 = vld [vmem:[#allocation2 + $0xc0] sm:$0xf0] }
 0x184   : > { %v2037_v15 = vadd.f32 %v10883_v50, %v1973_v42 }
 0x185   : > { %v2905_v5 = vpop.f32.mrf.mxu0  ;;  %v2446_v41 = vsel %vm1246_vm9, %v2441_v38, %v2445_v24  ;;  %v2266_v14 = vpack.c.b16 %v2250_v37, %v2250_v37 }
 0x186   : > { %v2811_v31 = vpop.f32.mrf.mxu3 }
 0x187   : > { %v2901_v63 = vadd.f32 %v10992_v30, %v2811_v31  ;;  %v2992_v59 = vpop.f32.mrf.mxu1  ;;  %v1548_v30 = vsel %vm1503_vm10, %v1546_v6, %v1547_v36  ;;  %v2566_v31 = vrot.slane %v2265_v10, 1  ;;  %v2455_v6 = vshll.u32 %v2266_v14, 16 }
 0x189   : > { %v2990_v1 = vadd.f32 %v2989_v17, %v2901_v63  ;;  %v1974_v29 = vpop.f32.mrf.mxu2  ;;  %v11039_v17 = vld [vmem:[#allocation2 + $0xc0] sm:$0xff]   ;;  %v2457_v38 = vrot.slane %v2455_v6, 1 }
 0x18a   : > { %v1975_v62 = vadd.f32 %v1974_v29, %v10807_v12  ;;  %3031 = vmatmul.bf16.gmra.mxu1 %v2564_v60  ;;  %v9938_v12 = vor.u32 %v9937_v44, %v10996_v40  ;;  %v2450_v43 = vshll.u32 %v11039_v17, 16  ;;  %v2448_v63 = vshrl.u32 %v11039_v17, 16 }
 0x18b   : > { %v11034_v25 = vadd.f32 %v2990_v1, %v2036_v46  ;;  %2853 = vmatmul.bf16.gmra.mxu3 %v10971_v11  ;;  %v1549_v60 = vrot.slane %v9941_v0, 1  ;;  %v1550_v44 = vrot.slane %v10652_v56, 1  ;;  %v2569_v0 = vrot.slane %v2266_v14, 1 }
 0x18c   : > { %v2565_v32 = vrot.slane %v9938_v12, 1  ;;  %v2452_v40 = vrot.slane %v2450_v43, 1 }
 0x18d   : > { %v2908_v9 = vpop.f32.mrf.mxu0 }
 0x18e   : > { %v2814_v3 = vpop.f32.mrf.mxu3  ;;  %2016 = vmatmul.bf16.gmra.mxu2 %v1548_v30  ;;  %v2567_v46 = vsel %vm1503_vm10, %v2565_v32, %v2566_v31  ;;  %v2453_v22 = vor.u32 %v2452_v40, %v2448_v63  ;;  %v9699_v30 = vld [vmem:[#allocation2 + $0xc0] sm:$0xe] }
 0x18f   : > { %v2904_v28 = vadd.f32 %v2903_v51, %v2814_v3  ;;  %v2994_v34 = vpop.f32.mrf.mxu1  ;;  %v9700_v3 = vor.u32 %v9699_v30, %v9698_v45 }
 0x190   : > { %2947 = vmatmul.bf16.gmra.mxu0 %v2446_v41  ;;  %v2458_v21 = vsel %vm1246_vm9, %v2453_v22, %v2457_v38  ;;  %v10004_v38 = vld [vmem:[#allocation2 + $0x24] sm:$0xe] }
 0x191   : > { %v2993_v26 = vadd.f32 %v2992_v59, %v2904_v28  ;;  %v1977_v11 = vpop.f32.mrf.mxu2  ;;  %v3112_v28 = vld [vmem:[#allocation2 + $0x20] sm:$0x1]  ;;  %v2568_v43 = vrot.slane %v9700_v3, 1 }
 0x192   : > { %v1978_v7 = vadd.f32 %v1977_v11, %v10820_v23  ;;  %v2038_v23 = vadd.f32 %v10883_v50, %v1975_v62  ;;  %v3256_v32 = vunpack.c.l.b16 %v3112_v28 }
 0x193   : > { %v11045_v57 = vadd.f32 %v2993_v26, %v2037_v15  ;;  %v9708_v15 = vld [vmem:[#allocation2 + $0x18] sm:$0xf0]  ;;  %v9709_v26 = vld [vmem:[#allocation2 + $0x18] sm:$0xe] }
 0x194   : > { %v9710_v63 = vor.u32 %v9709_v26, %v9708_v15 }
 0x195   : > { %v2910_v51 = vpop.f32.mrf.mxu0 }
 0x196   : > { %v2816_v36 = vpop.f32.mrf.mxu3 }
 0x197   : > { %v2906_v42 = vadd.f32 %v2905_v5, %v2816_v36  ;;  %v2997_v59 = vpop.f32.mrf.mxu1  ;;  %v1551_v5 = vsel %vm1503_vm10, %v1549_v60, %v1550_v44  ;;  %v2570_v36 = vsel %vm1503_vm10, %v2568_v43, %v2569_v0  ;;  %v3544_v44 = vrot.slane %v9710_v63, 1 }
 0x199   : > { %v2995_v1 = vadd.f32 %v2994_v34, %v2906_v42  ;;  %v1979_v29 = vpop.f32.mrf.mxu2  ;;  %v3272_v42 = vpack.c.b16 %v3256_v32, %v3256_v32 }
 0x19a   : > { %v1980_v10 = vadd.f32 %v1979_v29, %v10833_v58  ;;  %3036 = vmatmul.bf16.gmra.mxu1 %v2567_v46  ;;  %v2039_v58 = vadd.f32 %v10883_v50, %v1978_v7 }
 0x19b   : > { %v11053_v24 = vadd.f32 %v2995_v1, %v2038_v23  ;;  %2858 = vmatmul.bf16.gmra.mxu3 %v10994_v16  ;;  %v3545_v46 = vrot.slane %v3272_v42, 1 }
 0x19c   : > { %v2040_v7 = vadd.f32 %v10883_v50, %v1980_v10 }
 0x19d   : > { %v2913_v56 = vpop.f32.mrf.mxu0  ;;  %v3546_v29 = vsel %vm1503_vm10, %v3544_v44, %v3545_v46 }
 0x19e   : > { %v2819_v41 = vpop.f32.mrf.mxu3  ;;  %2021 = vmatmul.bf16.gmra.mxu2 %v1551_v5 }
 0x19f   : > { %v2909_v62 = vadd.f32 %v2908_v9, %v2819_v41  ;;  %v2999_v37 = vpop.f32.mrf.mxu1  ;;  %v3082_v41 = vld [vmem:[#allocation2 + $0x24] sm:$0xff]  }
 0x1a0   : > { %2952 = vmatmul.bf16.gmra.mxu0 %v2458_v21  ;;  %v3296_v21 = vshll.u32 %v3272_v42, 16 }
 0x1a1   : > { %v2998_v34 = vadd.f32 %v2997_v59, %v2909_v62  ;;  %v1982_v12 = vpop.f32.mrf.mxu2  ;;  %v3113_v62 = vld [vmem:[#allocation2 + $0x2c] sm:$0x1] }
 0x1a2   : > { %v1983_v16 = vadd.f32 %v1982_v12, %v10844_v47  ;;  %v9511_v47 = vld [vmem:[#allocation2 + $0x18] sm:$0xff]   ;;  %v3298_v15 = vrot.slane %v3296_v21, 1 }
 0x1a3   : > { %v11060_v11 = vadd.f32 %v2998_v34, %v2039_v58  ;;  %v3291_v1 = vshll.u32 %v9511_v47, 16  ;;  %v3289_v45 = vshrl.u32 %v9511_v47, 16  ;;  %v3257_v34 = vunpack.c.l.b16 %v3113_v62 }
 0x1a5   : > { %v2915_v31 = vpop.f32.mrf.mxu0  ;;  %v3293_v30 = vrot.slane %v3291_v1, 1  ;;  %v3273_v63 = vpack.c.b16 %v3257_v34, %v3257_v34  ;;  %v3301_v1 = vshrl.u32 %v3082_v41, 16 }
 0x1a6   : > { %v2821_v9 = vpop.f32.mrf.mxu3 }
 0x1a7   : > { %v2911_v40 = vadd.f32 %v2910_v51, %v2821_v9  ;;  %v3002_v6 = vpop.f32.mrf.mxu1  ;;  %v3294_v12 = vor.u32 %v3293_v30, %v3289_v45  ;;  %v3548_v42 = vrot.slane %v3273_v63, 1  ;;  %v9711_v45 = vld [vmem:[#allocation2 + $0x30] sm:$0xf0]  ;;  %v9712_v30 = vld [vmem:[#allocation2 + $0x30] sm:$0xe] }
 0x1a9   : > { %v3000_v59 = vadd.f32 %v2999_v37, %v2911_v40  ;;  %v1984_v60 = vpop.f32.mrf.mxu2  ;;  %v2041_v37 = vadd.f32 %v10883_v50, %v1983_v16  ;;  %v3299_v9 = vsel %vm1246_vm9, %v3294_v12, %v3298_v15 }
 0x1aa   : > { %v1985_v23 = vadd.f32 %v1984_v60, %v10854_v8  ;;  %3041 = vmatmul.bf16.gmra.mxu1 %v2570_v36  ;;  %v10003_v8 = vld [vmem:[#allocation2 + $0x24] sm:$0xf0] }
 0x1ab   : > { %v11065_v14 = vadd.f32 %v3000_v59, %v2040_v7  ;;  %2863 = vmatmul.bf16.gmra.mxu3 %v11039_v17  ;;  %v10005_v26 = vor.u32 %v10004_v38, %v10003_v8  ;;  %v3303_v59 = vshll.u32 %v3082_v41, 16 }
 0x1ac   : > { %v2042_v40 = vadd.f32 %v10883_v50, %v1985_v23  ;;  %v3308_v23 = vshll.u32 %v3273_v63, 16 }
 0x1ad   : > { %v2918_v51 = vpop.f32.mrf.mxu0  ;;  %v3547_v36 = vrot.slane %v10005_v26, 1 }
 0x1ae   : > { %v2824_v22 = vpop.f32.mrf.mxu3  ;;  %3809 = vmatmul.bf16.vlgmr.msra.gmra.mxu2 %v9511_v47 }
 0x1af   : > { %v2914_v10 = vadd.f32 %v2913_v56, %v2824_v22  ;;  %v3004_v5 = vpop.f32.mrf.mxu1  ;;  %v3549_v47 = vsel %vm1503_vm10, %v3547_v36, %v3548_v42  ;;  %v3114_v22 = vld [vmem:[#allocation2 + $0x38] sm:$0x1]  ;;  %v10007_v36 = vld [vmem:[#allocation2 + $0x3c] sm:$0xe] }
 0x1b0   : > { %3987 = vmatmul.bf16.vlgmr.msra.gmra.mxu0 %v3546_v29  ;;  %v3305_v29 = vrot.slane %v3303_v59, 1  ;;  %v3258_v8 = vunpack.c.l.b16 %v3114_v22 }
 0x1b1   : > { %v3003_v3 = vadd.f32 %v3002_v6, %v2914_v10  ;;  %v1987_v17 = vpop.f32.mrf.mxu2 }
 0x1b2   : > { %v1988_v28 = vadd.f32 %v1987_v17, %v10693_v61  ;;  %v3306_v62 = vor.u32 %v3305_v29, %v3301_v1  ;;  %v3274_v12 = vpack.c.b16 %v3258_v8, %v3258_v8  ;;  %v3115_v1 = vld [vmem:[#allocation2 + $0x44] sm:$0x1] }
 0x1b3   : > { %v11071_v58 = vadd.f32 %v3003_v3, %v2041_v37  ;;  %v3310_v37 = vrot.slane %v3308_v23, 1  ;;  %v9713_v3 = vor.u32 %v9712_v30, %v9711_v45 }
 0x1b4   : > { %v2043_v38 = vadd.f32 %v10883_v50, %v1988_v28 }
 0x1b5   : > { %v2920_v56 = vpop.f32.mrf.mxu0  ;;  %v3311_v15 = vsel %vm1246_vm9, %v3306_v62, %v3310_v37 }
 0x1b6   : > { %v2826_v43 = vpop.f32.mrf.mxu3 }
 0x1b7   : > { %v2916_v0 = vadd.f32 %v2915_v31, %v2826_v43  ;;  %v3007_v32 = vpop.f32.mrf.mxu1 }
 0x1b9   : > { %v3005_v16 = vadd.f32 %v3004_v5, %v2916_v0  ;;  %v1989_v6 = vpop.f32.mrf.mxu2  ;;  %v3550_v0 = vrot.slane %v9713_v3, 1 }
 0x1ba   : > { %v1990_v61 = vadd.f32 %v1989_v6, %v10702_v52 }
 0x1bb   : > { %v11076_v7 = vadd.f32 %v3005_v16, %v2042_v40  ;;  %3898 = vmatmul.bf16.vlgmr.msra.gmra.mxu3 %v3299_v9 }
 0x1bc   : > { %v2044_v28 = vadd.f32 %v10883_v50, %v1990_v61 }
 0x1bd   : > { %v2923_v60 = vpop.f32.mrf.mxu0 }
 0x1be   : > { %v2829_v31 = vpop.f32.mrf.mxu3  ;;  %3814 = vmatmul.bf16.gmra.mxu2 %v3082_v41 }
 0x1bf   : > { %v2919_v44 = vadd.f32 %v2918_v51, %v2829_v31  ;;  %v3009_v46 = vpop.f32.mrf.mxu1  ;;  %v3320_v31 = vshll.u32 %v3274_v12, 16 }
 0x1c0   : > { %3992 = vmatmul.bf16.gmra.mxu0 %v3549_v47 }
 0x1c1   : > { %v3008_v10 = vadd.f32 %v3007_v32, %v2919_v44  ;;  %v1992_v52 = vpop.f32.mrf.mxu2  ;;  %v3551_v32 = vrot.slane %v3274_v12, 1  ;;  %v3086_v44 = vld [vmem:[#allocation2 + $0x3c] sm:$0xff]   ;;  %v3322_v45 = vrot.slane %v3320_v31, 1 }
 0x1c2   : > { %v1993_v5 = vadd.f32 %v1992_v52, %v10713_v13  ;;  %v9701_v13 = vld [vmem:[#allocation2 + $0x30] sm:$0xff]  }
 0x1c3   : > { %v11081_v21 = vadd.f32 %v3008_v10, %v2043_v38  ;;  %v3315_v40 = vshll.u32 %v9701_v13, 16  ;;  %v3313_v61 = vshrl.u32 %v9701_v13, 16  ;;  %v3259_v10 = vunpack.c.l.b16 %v3115_v1  ;;  %v9715_v1 = vld [vmem:[#allocation2 + $0x48] sm:$0xe] }
 0x1c5   : > { %v2925_v51 = vpop.f32.mrf.mxu0  ;;  %v3317_v47 = vrot.slane %v3315_v40, 1  ;;  %v3275_v3 = vpack.c.b16 %v3259_v10, %v3259_v10 }
 0x1c6   : > { %v2831_v41 = vpop.f32.mrf.mxu3 }
 0x1c7   : > { %v2921_v17 = vadd.f32 %v2920_v56, %v2831_v41  ;;  %v3012_v34 = vpop.f32.mrf.mxu1  ;;  %v3552_v56 = vsel %vm1503_vm10, %v3550_v0, %v3551_v32  ;;  %v3318_v52 = vor.u32 %v3317_v47, %v3313_v61  ;;  %v13424_v47 = vld [vmem:[#allocation10_spill] sm:$0xff] }
 0x1c9   : > { %v3010_v26 = vadd.f32 %v3009_v46, %v2921_v17  ;;  %v1994_v43 = vpop.f32.mrf.mxu2  ;;  %v10006_v46 = vld [vmem:[#allocation2 + $0x3c] sm:$0xf0]  ;;  %v3323_v41 = vsel %vm1246_vm9, %v3318_v52, %v3322_v45 }
 0x1ca   : > { %v1995_v63 = vadd.f32 %v1994_v43, %v10725_v35  ;;  %v2045_v35 = vadd.f32 %v10883_v50, %v1993_v5  ;;  %v10008_v30 = vor.u32 %v10007_v36, %v10006_v46  ;;  %v3327_v43 = vshll.u32 %v3086_v44, 16  ;;  %v3116_v36 = vld [vmem:[#allocation2 + $0x50] sm:$0x1]  ;;  %v9714_v46 = vld [vmem:[#allocation2 + $0x48] sm:$0xf0] }
 0x1cb   : > { %v11086_v9 = vadd.f32 %v3010_v26, %v2044_v28  ;;  %3903 = vmatmul.bf16.gmra.mxu3 %v3311_v15  ;;  %v3554_v15 = vrot.slane %v3275_v3, 1  ;;  %v9716_v52 = vor.u32 %v9715_v1, %v9714_v46  ;;  %v13426_v46 = vld [vmem:[#allocation12_spill] sm:$0xff] }
 0x1cc   : > { %v2046_v17 = vadd.f32 %v10883_v50, %v1995_v63  ;;  %v3553_v12 = vrot.slane %v10008_v30, 1  ;;  %v3332_v63 = vshll.u32 %v3275_v3, 16 }
 0x1cd   : > { %v2928_v16 = vpop.f32.mrf.mxu0 }
 0x1ce   : > { %v2834_v6 = vpop.f32.mrf.mxu3  ;;  %3819 = vmatmul.bf16.gmra.mxu2 %v9701_v13  ;;  %v3555_v0 = vsel %vm1503_vm10, %v3553_v12, %v3554_v15  ;;  %v3334_v10 = vrot.slane %v3332_v63, 1  ;;  %v10009_v63 = vld [vmem:[#allocation2 + $0x54] sm:$0xf0] }
 0x1cf   : > { %v2924_v42 = vadd.f32 %v2923_v60, %v2834_v6  ;;  %v3014_v59 = vpop.f32.mrf.mxu1  ;;  %v3329_v6 = vrot.slane %v3327_v43, 1 }
 0x1d0   : > { %3997 = vmatmul.bf16.gmra.mxu0 %v3552_v56  ;;  %v3325_v56 = vshrl.u32 %v3086_v44, 16 }
 0x1d1   : > { %v3013_v29 = vadd.f32 %v3012_v34, %v2924_v42  ;;  %v1997_v23 = vpop.f32.mrf.mxu2 }
 0x1d2   : > { %v1998_v22 = vadd.f32 %v1997_v23, %v10740_v55  ;;  %v13423_v55 = vld [vmem:[#allocation9_spill] sm:$0xff]  ;;  %v3330_v23 = vor.u32 %v3329_v6, %v3325_v56  ;;  %v3090_v6 = vld [vmem:[#allocation2 + $0x54] sm:$0xff]  }
 0x1d3   : > { %v11091_v38 = vadd.f32 %v3013_v29, %v2045_v35  ;;  %v3260_v29 = vunpack.c.l.b16 %v3116_v36  ;;  %v3117_v36 = vld [vmem:[#allocation2 + $0x5c] sm:$0x1] }
 0x1d4   : > { %v2047_v42 = vadd.f32 %v10883_v50, %v1998_v22 }
 0x1d5   : > { %v2930_v60 = vpop.f32.mrf.mxu0 }
 0x1d6   : > { %v2836_v8 = vpop.f32.mrf.mxu3 }
 0x1d7   : > { %v2926_v62 = vadd.f32 %v2925_v51, %v2836_v8  ;;  %v3017_v37 = vpop.f32.mrf.mxu1  ;;  %v3276_v8 = vpack.c.b16 %v3260_v29, %v3260_v29  ;;  %v3261_v29 = vunpack.c.l.b16 %v3117_v36 }
 0x1d9   : > { %v3015_v5 = vadd.f32 %v3014_v59, %v2926_v62  ;;  %v1999_v34 = vpop.f32.mrf.mxu2  ;;  %v3335_v62 = vsel %vm1246_vm9, %v3330_v23, %v3334_v10 }
 0x1da   : > { %v2000_v28 = vadd.f32 %v1999_v34, %v13423_v55  ;;  %v13425_v34 = vld [vmem:[#allocation11_spill] sm:$0xff] }
 0x1db   : > { %v11096_v26 = vadd.f32 %v3015_v5, %v2046_v17  ;;  %3908 = vmatmul.bf16.gmra.mxu3 %v3323_v41  ;;  %v9702_v41 = vld [vmem:[#allocation2 + $0x48] sm:$0xff]   ;;  %v3556_v17 = vrot.slane %v9716_v52, 1  ;;  %v3557_v5 = vrot.slane %v3276_v8, 1 }
 0x1dc   : > { %v2048_v22 = vadd.f32 %v10883_v50, %v2000_v28  ;;  %v3339_v55 = vshll.u32 %v9702_v41, 16  ;;  %v3337_v50 = vshrl.u32 %v9702_v41, 16 }
 0x1dd   : > { %v2933_v13 = vpop.f32.mrf.mxu0 }
 0x1de   : > { %v2839_v51 = vpop.f32.mrf.mxu3  ;;  %3824 = vmatmul.bf16.gmra.mxu2 %v3086_v44  ;;  %v3341_v28 = vrot.slane %v3339_v55, 1 }
 0x1df   : > { %v2929_v32 = vadd.f32 %v2928_v16, %v2839_v51  ;;  %v3019_v40 = vpop.f32.mrf.mxu1  ;;  %v10010_v51 = vld [vmem:[#allocation2 + $0x54] sm:$0xe] }
 0x1e0   : > { %4002 = vmatmul.bf16.gmra.mxu0 %v3555_v0  ;;  %v3342_v23 = vor.u32 %v3341_v28, %v3337_v50  ;;  %v3349_v28 = vshrl.u32 %v3090_v6, 16 }
 0x1e1   : > { %v3018_v59 = vadd.f32 %v3017_v37, %v2929_v32  ;;  %v2002_v61 = vpop.f32.mrf.mxu2 }
 0x1e2   : > { %v2003_v31 = vadd.f32 %v2002_v61, %v13424_v47 }
 0x1e3   : > { %v11101_v35 = vadd.f32 %v3018_v59, %v2047_v42  ;;  %v11112_v42 = vld [vmem:[%s13356_s2] ss:$0 sm:$0xff] }
 0x1e4   : > { %v2049_v59 = vadd.f32 %v11112_v42, %v2003_v31 }
 0x1e5   : > { %v2935_v16 = vpop.f32.mrf.mxu0 }
 0x1e6   : > { %v2841_v44 = vpop.f32.mrf.mxu3 }
 0x1e7   : > { %v2931_v45 = vadd.f32 %v2930_v60, %v2841_v44  ;;  %v3022_v30 = vpop.f32.mrf.mxu1  ;;  %v3558_v60 = vsel %vm1503_vm10, %v3556_v17, %v3557_v5  ;;  %v10011_v44 = vor.u32 %v10010_v51, %v10009_v63  ;;  %v13427_v5 = vld [vmem:[#allocation13_spill] sm:$0xff] }
 0x1e9   : > { %v3020_v37 = vadd.f32 %v3019_v40, %v2931_v45  ;;  %v2004_v3 = vpop.f32.mrf.mxu2  ;;  %v3344_v40 = vshll.u32 %v3276_v8, 16 }
 0x1ea   : > { %v2005_v12 = vadd.f32 %v2004_v3, %v13425_v34 }
 0x1eb   : > { %v11106_v15 = vadd.f32 %v3020_v37, %v2048_v22  ;;  %3913 = vmatmul.bf16.gmra.mxu3 %v3335_v62  ;;  %v3346_v10 = vrot.slane %v3344_v40, 1  ;;  %v3277_v22 = vpack.c.b16 %v3261_v29, %v3261_v29  ;;  %v9718_v29 = vld [vmem:[#allocation2 + $0x60] sm:$0xe] }
 0x1ec   : > { %v2050_v3 = vadd.f32 %v11112_v42, %v2005_v12 }
 0x1ed   : > { %v2938_v43 = vpop.f32.mrf.mxu0  ;;  %v3347_v37 = vsel %vm1246_vm9, %v3342_v23, %v3346_v10  ;;  %v3560_v17 = vrot.slane %v3277_v22, 1  ;;  %v3356_v12 = vshll.u32 %v3277_v22, 16 }
 0x1ee   : > { %v2844_v0 = vpop.f32.mrf.mxu3  ;;  %3829 = vmatmul.bf16.gmra.mxu2 %v9702_v41  ;;  %v3559_v41 = vrot.slane %v10011_v44, 1 }
 0x1ef   : > { %v2934_v32 = vadd.f32 %v2933_v13, %v2844_v0  ;;  %v3024_v56 = vpop.f32.mrf.mxu1 }
 0x1f0   : > { %4007 = vmatmul.bf16.gmra.mxu0 %v3558_v60  ;;  %v3351_v60 = vshll.u32 %v3090_v6, 16  ;;  %v3561_v51 = vsel %vm1503_vm10, %v3559_v41, %v3560_v17  ;;  %v9703_v41 = vld [vmem:[#allocation2 + $0x60] sm:$0xff]  }
 0x1f1   : > { %v3023_v61 = vadd.f32 %v3022_v30, %v2934_v32  ;;  %v2007_v47 = vpop.f32.mrf.mxu2 }
 0x1f2   : > { %v2008_v1 = vadd.f32 %v2007_v47, %v13426_v46  ;;  %v3353_v40 = vrot.slane %v3351_v60, 1  ;;  %v9717_v46 = vld [vmem:[#allocation2 + $0x60] sm:$0xf0]  ;;  %v13429_v60 = vld [vmem:[#allocation15_spill] sm:$0xff] }
 0x1f3   : > { %v11116_v13 = vadd.f32 %v3023_v61, %v2049_v59  ;;  %v13428_v61 = vld [vmem:[#allocation14_spill] sm:$0xff] }
 0x1f4   : > { %v2051_v63 = vadd.f32 %v11112_v42, %v2008_v1  ;;  %v3354_v44 = vor.u32 %v3353_v40, %v3349_v28 }
 0x1f5   : > { %v2940_v52 = vpop.f32.mrf.mxu0 }
 0x1f6   : > { %v2846_v45 = vpop.f32.mrf.mxu3 }
 0x1f7   : > { %v2936_v8 = vadd.f32 %v2935_v16, %v2846_v45  ;;  %v3027_v62 = vpop.f32.mrf.mxu1  ;;  %v3358_v45 = vrot.slane %v3356_v12, 1  ;;  %v10013_v12 = vld [vmem:[#allocation2 + $0x6c] sm:$0xe] }
 0x1f9   : > { %v3025_v31 = vadd.f32 %v3024_v56, %v2936_v8  ;;  %v2009_v30 = vpop.f32.mrf.mxu2  ;;  %v3118_v56 = vld [vmem:[#allocation2 + $0x68] sm:$0x1]  ;;  %v9719_v8 = vor.u32 %v9718_v29, %v9717_v46  ;;  %v3119_v46 = vld [vmem:[#allocation2 + $0x74] sm:$0x1] }
 0x1fa   : > { %v2010_v34 = vadd.f32 %v2009_v30, %v13427_v5  ;;  %v3262_v10 = vunpack.c.l.b16 %v3118_v56 }
 0x1fb   : > { %v11121_v55 = vadd.f32 %v3025_v31, %v2050_v3  ;;  %3918 = vmatmul.bf16.gmra.mxu3 %v3347_v37  ;;  %v3359_v31 = vsel %vm1246_vm9, %v3354_v44, %v3358_v45  ;;  %v3562_v17 = vrot.slane %v9719_v8, 1  ;;  %v13430_v45 = vld [vmem:[#allocation16_spill] sm:$0xff] }
 0x1fc   : > { %v3278_v3 = vpack.c.b16 %v3262_v10, %v3262_v10  ;;  %v2052_v1 = vadd.f32 %v11112_v42, %v2010_v34  ;;  %v3361_v34 = vshrl.u32 %v9703_v41, 16 }
 0x1fd   : > { %v2943_v0 = vpop.f32.mrf.mxu0 }
 0x1fe   : > { %v2849_v16 = vpop.f32.mrf.mxu3  ;;  %3834 = vmatmul.bf16.gmra.mxu2 %v3090_v6  ;;  %v3563_v5 = vrot.slane %v3278_v3, 1 }
 0x1ff   : > { %v2939_v32 = vadd.f32 %v2938_v43, %v2849_v16  ;;  %v3029_v50 = vpop.f32.mrf.mxu1 }
 0x200   : > { %4012 = vmatmul.bf16.gmra.mxu0 %v3561_v51 }
 0x201   : > { %v3028_v36 = vadd.f32 %v3027_v62, %v2939_v32  ;;  %v2012_v59 = vpop.f32.mrf.mxu2  ;;  %v3363_v32 = vshll.u32 %v9703_v41, 16 }
 0x202   : > { %v2013_v47 = vadd.f32 %v2012_v59, %v13428_v61  ;;  %v3094_v59 = vld [vmem:[#allocation2 + $0x6c] sm:$0xff]  }
 0x203   : > { %v11126_v23 = vadd.f32 %v3028_v36, %v2051_v63  ;;  %v3368_v36 = vshll.u32 %v3278_v3, 16  ;;  %v10012_v61 = vld [vmem:[#allocation2 + $0x6c] sm:$0xf0] }
 0x204   : > { %v2053_v29 = vadd.f32 %v11112_v42, %v2013_v47 }
 0x205   : > { %v2945_v43 = vpop.f32.mrf.mxu0 }
 0x206   : > { %v2851_v6 = vpop.f32.mrf.mxu3 }
 0x207   : > { %v2941_v37 = vadd.f32 %v2940_v52, %v2851_v6  ;;  %v3032_v22 = vpop.f32.mrf.mxu1  ;;  %v3564_v52 = vsel %vm1503_vm10, %v3562_v17, %v3563_v5 }
 0x209   : > { %v3030_v62 = vadd.f32 %v3029_v50, %v2941_v37  ;;  %v2014_v30 = vpop.f32.mrf.mxu2  ;;  %v3365_v50 = vrot.slane %v3363_v32, 1  ;;  %v3263_v37 = vunpack.c.l.b16 %v3119_v46 }
 0x20a   : > { %v2015_v51 = vadd.f32 %v2014_v30, %v13429_v60 }
 0x20b   : > { %v11131_v16 = vadd.f32 %v3030_v62, %v2052_v1  ;;  %3923 = vmatmul.bf16.gmra.mxu3 %v3359_v31  ;;  %v3366_v31 = vor.u32 %v3365_v50, %v3361_v34  ;;  %v3370_v1 = vrot.slane %v3368_v36, 1  ;;  %v10014_v62 = vor.u32 %v10013_v12, %v10012_v61 }
 0x20c   : > { %v3279_v3 = vpack.c.b16 %v3263_v37, %v3263_v37  ;;  %v2054_v60 = vadd.f32 %v11112_v42, %v2015_v51  ;;  %v3375_v34 = vshll.u32 %v3094_v59, 16  ;;  %v3373_v61 = vshrl.u32 %v3094_v59, 16  ;;  %v3120_v51 = vld [vmem:[#allocation2 + $0x80] sm:$0x1]  ;;  %v13433_v37 = vld [vmem:[#allocation18_spill] sm:$0xff] }
 0x20d   : > { %v2948_v28 = vpop.f32.mrf.mxu0  ;;  %v3371_v17 = vsel %vm1246_vm9, %v3366_v31, %v3370_v1  ;;  %v3565_v32 = vrot.slane %v10014_v62, 1  ;;  %v9720_v62 = vld [vmem:[#allocation2 + $0x78] sm:$0xf0] }
 0x20e   : > { %v2854_v40 = vpop.f32.mrf.mxu3  ;;  %3839 = vmatmul.bf16.gmra.mxu2 %v9703_v41  ;;  %v3377_v46 = vrot.slane %v3375_v34, 1  ;;  %v9704_v34 = vld [vmem:[#allocation2 + $0x78] sm:$0xff]  }
 0x20f   : > { %v2944_v56 = vadd.f32 %v2943_v0, %v2854_v40  ;;  %v3034_v63 = vpop.f32.mrf.mxu1  ;;  %v13431_v40 = vld [vmem:[#allocation17_spill] sm:$0xff] }
 0x210   : > { %4017 = vmatmul.bf16.gmra.mxu0 %v3564_v52  ;;  %v3566_v52 = vrot.slane %v3279_v3, 1 }
 0x211   : > { %v3033_v10 = vadd.f32 %v3032_v22, %v2944_v56  ;;  %v2017_v44 = vpop.f32.mrf.mxu2 }
 0x212   : > { %v2018_v8 = vadd.f32 %v2017_v44, %v13430_v45  ;;  %v3567_v12 = vsel %vm1503_vm10, %v3565_v32, %v3566_v52 }
 0x213   : > { %v11136_v6 = vadd.f32 %v3033_v10, %v2053_v29  ;;  %v3380_v10 = vshll.u32 %v3279_v3, 16 }
 0x215   : > { %v2950_v0 = vpop.f32.mrf.mxu0 }
 0x216   : > { %v2856_v30 = vpop.f32.mrf.mxu3 }
 0x217   : > { %v2946_v41 = vadd.f32 %v2945_v43, %v2856_v30  ;;  %v3037_v5 = vpop.f32.mrf.mxu1  ;;  %v9721_v30 = vld [vmem:[#allocation2 + $0x78] sm:$0xe] }
 0x219   : > { %v3035_v47 = vadd.f32 %v3034_v63, %v2946_v41  ;;  %v2019_v22 = vpop.f32.mrf.mxu2  ;;  %v2055_v63 = vadd.f32 %v11112_v42, %v2018_v8 }
 0x21a   : > { %v2020_v56 = vadd.f32 %v2019_v22, %v13431_v40 }
 0x21b   : > { %v11141_v29 = vadd.f32 %v3035_v47, %v2054_v60  ;;  %3928 = vmatmul.bf16.gmra.mxu3 %v3371_v17  ;;  %v3264_v17 = vunpack.c.l.b16 %v3120_v51  ;;  %v3378_v60 = vor.u32 %v3377_v46, %v3373_v61  ;;  %v3382_v47 = vrot.slane %v3380_v10, 1 }
 0x21c   : > { %v2056_v8 = vadd.f32 %v11112_v42, %v2020_v56  ;;  %v3387_v46 = vshll.u32 %v9704_v34, 16  ;;  %v3385_v56 = vshrl.u32 %v9704_v34, 16 }
 0x21d   : > { %13432 = vst [vmem:[#allocation9_spill] sm:$0xff] %v11141_v29  ;;  %v2953_v50 = vpop.f32.mrf.mxu0  ;;  %v3280_v32 = vpack.c.b16 %v3264_v17, %v3264_v17  ;;  %v3383_v52 = vsel %vm1246_vm9, %v3378_v60, %v3382_v47  ;;  %v10015_v17 = vld [vmem:[#allocation2 + $0x84] sm:$0xf0]  ;;  %v3121_v60 = vld [vmem:[#allocation2 + $0x8c] sm:$0x1] }
 0x21e   : > { %v2859_v43 = vpop.f32.mrf.mxu3  ;;  %3844 = vmatmul.bf16.gmra.mxu2 %v3094_v59  ;;  %v9722_v59 = vor.u32 %v9721_v30, %v9720_v62  ;;  %v3098_v30 = vld [vmem:[#allocation2 + $0x84] sm:$0xff]  }
 0x21f   : > { %v2949_v36 = vadd.f32 %v2948_v28, %v2859_v43  ;;  %v3039_v1 = vpop.f32.mrf.mxu1  ;;  %v3569_v43 = vrot.slane %v3280_v32, 1  ;;  %v3392_v62 = vshll.u32 %v3280_v32, 16 }
 0x220   : > { %4022 = vmatmul.bf16.gmra.mxu0 %v3567_v12  ;;  %v3568_v12 = vrot.slane %v9722_v59, 1 }
 0x221   : > { %v3038_v44 = vadd.f32 %v3037_v5, %v2949_v36  ;;  %v2022_v45 = vpop.f32.mrf.mxu2  ;;  %v13435_v36 = vld [vmem:[#allocation19_spill] sm:$0xff] }
 0x222   : > { %v2023_v31 = vadd.f32 %v2022_v45, %v13433_v37  ;;  %v10016_v45 = vld [vmem:[#allocation2 + $0x84] sm:$0xe] }
 0x223   : > { %v11146_v41 = vadd.f32 %v3038_v44, %v2055_v63 }
 0x224   : > { %v2057_v47 = vadd.f32 %v11112_v42, %v2023_v31 }
 0x225   : > { %13434 = vst [vmem:[#allocation10_spill] sm:$0xff] %v11146_v41  ;;  %v2955_v28 = vpop.f32.mrf.mxu0 }
 0x226   : > { %v2861_v22 = vpop.f32.mrf.mxu3 }
 0x227   : > { %v2951_v3 = vadd.f32 %v2950_v0, %v2861_v22  ;;  %v3042_v61 = vpop.f32.mrf.mxu1  ;;  %v3570_v0 = vsel %vm1503_vm10, %v3568_v12, %v3569_v43  ;;  %v10017_v12 = vor.u32 %v10016_v45, %v10015_v17 }
 0x229   : > { %v3040_v5 = vadd.f32 %v3039_v1, %v2951_v3  ;;  %v2024_v40 = vpop.f32.mrf.mxu2  ;;  %v3389_v1 = vrot.slane %v3387_v46, 1  ;;  %v3571_v31 = vrot.slane %v10017_v12, 1 }
 0x22a   : > { %v2025_v63 = vadd.f32 %v2024_v40, %v13435_v36 }
 0x22b   : > { %v11151_v44 = vadd.f32 %v3040_v5, %v2056_v8  ;;  %3933 = vmatmul.bf16.gmra.mxu3 %v3383_v52  ;;  %v3265_v52 = vunpack.c.l.b16 %v3121_v60  ;;  %v3390_v8 = vor.u32 %v3389_v1, %v3385_v56  ;;  %v3394_v5 = vrot.slane %v3392_v62, 1 }
 0x22c   : > { %v2058_v46 = vadd.f32 %v11112_v42, %v2025_v63  ;;  %v3399_v60 = vshll.u32 %v3098_v30, 16 }
 0x22d   : > { %13436 = vst [vmem:[#allocation11_spill] sm:$0xff] %v11151_v44  ;;  %v3988_v10 = vpop.f32.mrf.mxu0  ;;  %v3281_v36 = vpack.c.b16 %v3265_v52, %v3265_v52  ;;  %v3395_v32 = vsel %vm1246_vm9, %v3390_v8, %v3394_v5  ;;  %v9723_v52 = vld [vmem:[#allocation2 + $0x90] sm:$0xf0]  ;;  %v9724_v8 = vld [vmem:[#allocation2 + $0x90] sm:$0xe] }
 0x22e   : > { %v2864_v51 = vpop.f32.mrf.mxu3  ;;  %3849 = vmatmul.bf16.gmra.mxu2 %v9704_v34  ;;  %v3401_v17 = vrot.slane %v3399_v60, 1 }
 0x22f   : > { %v2954_v37 = vadd.f32 %v2953_v50, %v2864_v51  ;;  %v3044_v50 = vpop.f32.mrf.mxu1 }
 0x230   : > { %4027 = vmatmul.bf16.gmra.mxu0 %v3570_v0 }
 0x231   : > { %v3043_v59 = vadd.f32 %v3042_v61, %v2954_v37  ;;  %v3810_v22 = vpop.f32.mrf.mxu2  ;;  %v3572_v61 = vrot.slane %v3281_v36, 1 }
 0x233   : > { %v11155_v3 = vadd.f32 %v3043_v59, %v2057_v47  ;;  %v3573_v1 = vsel %vm1503_vm10, %v3571_v31, %v3572_v61  ;;  %v3404_v47 = vshll.u32 %v3281_v36, 16  ;;  %v3122_v59 = vld [vmem:[#allocation2 + $0x98] sm:$0x1]  ;;  %v9705_v61 = vld [vmem:[#allocation2 + $0x90] sm:$0xff]  }
 0x234   : > { %v3266_v12 = vunpack.c.l.b16 %v3122_v59 }
 0x235   : > { %13437 = vst [vmem:[#allocation12_spill] sm:$0xff] %v11155_v3  ;;  %v3990_v40 = vpop.f32.mrf.mxu0 }
 0x236   : > { %v2866_v43 = vpop.f32.mrf.mxu3 }
 0x237   : > { %v2956_v34 = vadd.f32 %v2955_v28, %v2866_v43  ;;  %v3397_v28 = vshrl.u32 %v3098_v30, 16 }
 0x239   : > { %v3045_v0 = vadd.f32 %v3044_v50, %v2956_v34  ;;  %v3812_v51 = vpop.f32.mrf.mxu2  ;;  %v3402_v43 = vor.u32 %v3401_v17, %v3397_v28  ;;  %v3406_v50 = vrot.slane %v3404_v47, 1  ;;  %v10019_v17 = vld [vmem:[#allocation2 + $0x9c] sm:$0xe]  ;;  %v3409_v47 = vshrl.u32 %v9705_v61, 16 }
 0x23b   : > { %v11159_v37 = vadd.f32 %v3045_v0, %v2058_v46  ;;  %3938 = vmatmul.bf16.gmra.mxu3 %v3395_v32  ;;  %v9725_v32 = vor.u32 %v9724_v8, %v9723_v52  ;;  %v10018_v52 = vld [vmem:[#allocation2 + $0x9c] sm:$0xf0]  ;;  %v3123_v8 = vld [vmem:[#allocation2 + $0xa4] sm:$0x1] }
 0x23d   : > { %13438 = vst [vmem:[#allocation13_spill] sm:$0xff] %v11159_v37  ;;  %v3993_v56 = vpop.f32.mrf.mxu0 }
 0x23e   : > { %v3899_v45 = vpop.f32.mrf.mxu3  ;;  %3854 = vmatmul.bf16.gmra.mxu2 %v3098_v30  ;;  %v3407_v30 = vsel %vm1246_vm9, %v3402_v43, %v3406_v50  ;;  %v3267_v50 = vunpack.c.l.b16 %v3123_v8 }
 0x23f   : > { %v3900_v62 = vadd.f32 %v3899_v45, %v3810_v22  ;;  %v3282_v22 = vpack.c.b16 %v3266_v12, %v3266_v12 }
 0x240   : > { %4032 = vmatmul.bf16.gmra.mxu0 %v3573_v1 }
 0x241   : > { %v3989_v42 = vadd.f32 %v3988_v10, %v3900_v62  ;;  %v3815_v63 = vpop.f32.mrf.mxu2  ;;  %v3574_v10 = vrot.slane %v9725_v32, 1  ;;  %v3575_v60 = vrot.slane %v3282_v22, 1 }
 0x243   : > { %v11163_v5 = vadd.f32 %v3989_v42, %v10891_v18  ;;  %v3411_v18 = vshll.u32 %v9705_v61, 16  ;;  %v3576_v62 = vsel %vm1503_vm10, %v3574_v10, %v3575_v60  ;;  %v3416_v42 = vshll.u32 %v3282_v22, 16 }
 0x245   : > { %13439 = vst [vmem:[#allocation14_spill] sm:$0xff] %v11163_v5  ;;  %v3995_v34 = vpop.f32.mrf.mxu0  ;;  %v3413_v59 = vrot.slane %v3411_v18, 1 }
 0x246   : > { %v3901_v46 = vpop.f32.mrf.mxu3 }
 0x247   : > { %v3902_v0 = vadd.f32 %v3901_v46, %v3812_v51  ;;  %v3414_v32 = vor.u32 %v3413_v59, %v3409_v47  ;;  %v3418_v46 = vrot.slane %v3416_v42, 1 }
 0x249   : > { %v3991_v36 = vadd.f32 %v3990_v40, %v3902_v0  ;;  %v3817_v31 = vpop.f32.mrf.mxu2  ;;  %v3102_v40 = vld [vmem:[#allocation2 + $0x9c] sm:$0xff]  }
 0x24a   : > { %v3421_v59 = vshrl.u32 %v3102_v40, 16 }
 0x24b   : > { %v11167_v1 = vadd.f32 %v3991_v36, %v10903_v20  ;;  %3943 = vmatmul.bf16.gmra.mxu3 %v3407_v30  ;;  %v10020_v30 = vor.u32 %v10019_v17, %v10018_v52  ;;  %v3124_v52 = vld [vmem:[#allocation2 + $0xb0] sm:$0x1] }
 0x24d   : > { %13440 = vst [vmem:[#allocation15_spill] sm:$0xff] %v11167_v1  ;;  %v3998_v45 = vpop.f32.mrf.mxu0  ;;  %v3577_v18 = vrot.slane %v10020_v30, 1 }
 0x24e   : > { %v3904_v28 = vpop.f32.mrf.mxu3  ;;  %3859 = vmatmul.bf16.gmra.mxu2 %v9705_v61  ;;  %v3419_v61 = vsel %vm1246_vm9, %v3414_v32, %v3418_v46  ;;  %v13441_v32 = vld [vmem:[#allocation20_spill] sm:$0xff]  ;;  %v3268_v46 = vunpack.c.l.b16 %v3124_v52 }
 0x24f   : > { %v3905_v51 = vadd.f32 %v3904_v28, %v3815_v63  ;;  %v3283_v63 = vpack.c.b16 %v3267_v50, %v3267_v50  ;;  %v9727_v50 = vld [vmem:[#allocation2 + $0xa8] sm:$0xe] }
 0x250   : > { %4037 = vmatmul.bf16.gmra.mxu0 %v3576_v62 }
 0x251   : > { %v3994_v12 = vadd.f32 %v3993_v56, %v3905_v51  ;;  %v3820_v43 = vpop.f32.mrf.mxu2  ;;  %v3578_v62 = vrot.slane %v3283_v63, 1  ;;  %v3428_v42 = vshll.u32 %v3283_v63, 16 }
 0x253   : > { %v11171_v20 = vadd.f32 %v3994_v12, %v10916_v53  ;;  %v3423_v53 = vshll.u32 %v3102_v40, 16  ;;  %v3579_v51 = vsel %vm1503_vm10, %v3577_v18, %v3578_v62  ;;  %v9726_v12 = vld [vmem:[#allocation2 + $0xa8] sm:$0xf0] }
 0x255   : > { %v4000_v0 = vpop.f32.mrf.mxu0 }
 0x256   : > { %v3906_v36 = vpop.f32.mrf.mxu3 }
 0x257   : > { %v3907_v10 = vadd.f32 %v3906_v36, %v3817_v31  ;;  %v3425_v31 = vrot.slane %v3423_v53, 1  ;;  %v3430_v36 = vrot.slane %v3428_v42, 1  ;;  %v9706_v53 = vld [vmem:[#allocation2 + $0xa8] sm:$0xff]  }
 0x258   : > { %v3435_v42 = vshll.u32 %v9706_v53, 16 }
 0x259   : > { %v3996_v22 = vadd.f32 %v3995_v34, %v3907_v10  ;;  %v3822_v60 = vpop.f32.mrf.mxu2  ;;  %v3426_v30 = vor.u32 %v3425_v31, %v3421_v59  ;;  %v13442_v31 = vld [vmem:[#allocation7_spill] sm:$0xff] }
 0x25b   : > { %v11175_v56 = vadd.f32 %v3996_v22, %v10930_v54  ;;  %3948 = vmatmul.bf16.gmra.mxu3 %v3419_v61  ;;  %v9728_v61 = vor.u32 %v9727_v50, %v9726_v12  ;;  %v10022_v12 = vld [vmem:[#allocation2 + $0xb4] sm:$0xe] }
 0x25d   : > { %v4003_v28 = vpop.f32.mrf.mxu0 }
 0x25e   : > { %v3909_v47 = vpop.f32.mrf.mxu3  ;;  %3864 = vmatmul.bf16.gmra.mxu2 %v3102_v40  ;;  %v9381_v40 = vld [vmem:[%s13357_s3 + $0x38] sm:$0xff] }
 0x25f   : > { %v3910_v17 = vadd.f32 %v3909_v47, %v3820_v43  ;;  %v3284_v43 = vpack.c.b16 %v3268_v46, %v3268_v46  ;;  %5806 = vmatpush.bf16.msra.mxu1 %v9381_v40  ;;  %v3433_v46 = vshrl.u32 %v9706_v53, 16 }
 0x260   : > { %4042 = vmatmul.bf16.gmra.mxu0 %v3579_v51  ;;  %v3580_v51 = vrot.slane %v9728_v61, 1  ;;  %v10021_v61 = vld [vmem:[#allocation2 + $0xb4] sm:$0xf0] }
 0x261   : > { %v3999_v34 = vadd.f32 %v3998_v45, %v3910_v17  ;;  %v3825_v8 = vpop.f32.mrf.mxu2  ;;  %v3431_v45 = vsel %vm1246_vm9, %v3426_v30, %v3430_v36  ;;  %v3581_v47 = vrot.slane %v3284_v43, 1  ;;  %v738_v17 = vld [vmem:[#allocation2 + $0xcc] sm:$0xf]  ;;  %v3437_v30 = vrot.slane %v3435_v42, 1 }
 0x262   : > { %v3440_v36 = vshll.u32 %v3284_v43, 16  ;;  %v10023_v42 = vor.u32 %v10022_v12, %v10021_v61 }
 0x263   : > { %v11179_v54 = vadd.f32 %v3999_v34, %v13441_v32  ;;  %v3582_v34 = vsel %vm1503_vm10, %v3580_v51, %v3581_v47  ;;  %v742_v32 = vld [vmem:[#allocation2 + $0xd4] sm:$0x1] }
 0x265   : > { %v4005_v10 = vpop.f32.mrf.mxu0  ;;  %v4142_v41 = vmul.f32 %v11179_v54, %v11179_v54 }
 0x266   : > { %v3911_v22 = vpop.f32.mrf.mxu3 }
 0x267   : > { %v3912_v18 = vadd.f32 %v3911_v22, %v3822_v60  ;;  %v739_v60 = vsel %vm10117_vm6, %v13442_v31, %v738_v17  ;;  %v3125_v22 = vld [vmem:[#allocation2 + $0xbc] sm:$0x1]  ;;  %v3442_v31 = vrot.slane %v3440_v36, 1 }
 0x268   : > { %740 = vst [vmem:[#allocation2 + $0xcc] sm:$0xf] %v739_v60 }
 0x269   : > { %v4001_v63 = vadd.f32 %v4000_v0, %v3912_v18  ;;  %v3827_v62 = vpop.f32.mrf.mxu2  ;;  %v13443_v18 = vld [vmem:[#allocation8_spill] sm:$0xff] }
 0x26a   : > { %v13444_v40 = vrot.slane %v13443_v18, 4  ;;  %v906_v18 = vld [vmem:[#allocation2 + $0xd0] sm:$0x8] }
 0x26b   : > { %v11186_v59 = vadd.f32 %v4001_v63, %v10964_v39  ;;  %3953 = vmatmul.bf16.gmra.mxu3 %v3431_v45  ;;  %v3106_v39 = vld [vmem:[#allocation2 + $0xb4] sm:$0xff]  }
 0x26c   : > { %v743_v45 = vsel %vm10129_vm7, %v13444_v40, %v742_v32 }
 0x26d   : > { %v4008_v52 = vpop.f32.mrf.mxu0  ;;  %744 = vst [vmem:[#allocation2 + $0xd4] sm:$0x1] %v743_v45 }
 0x26e   : > { %v3914_v0 = vpop.f32.mrf.mxu3  ;;  %3869 = vmatmul.bf16.gmra.mxu2 %v9706_v53  ;;  %v3438_v53 = vor.u32 %v3437_v30, %v3433_v46  ;;  %v3583_v46 = vrot.slane %v10023_v42, 1  ;;  %v9729_v42 = vld [vmem:[#allocation2 + $0xc0] sm:$0xf0] }
 0x26f   : > { %v3915_v50 = vadd.f32 %v3914_v0, %v3825_v8  ;;  %v3269_v8 = vunpack.c.l.b16 %v3125_v22  ;;  %v762_v47 = vld [vmem:[#allocation2 + $0xcc] sm:$0x2] }
 0x270   : > { %4047 = vmatmul.bf16.gmra.mxu0 %v3582_v34  ;;  %v8475_v43 = vrot.slane %v762_v47, 9  ;;  %v886_v34 = vld [vmem:[#allocation2 + $0xcc] sm:$0x1] }
 0x271   : > { %v4004_v63 = vadd.f32 %v4003_v28, %v3915_v50  ;;  %v3830_v17 = vpop.f32.mrf.mxu2  ;;  %v3285_v19 = vpack.c.b16 %v3269_v8, %v3269_v8  ;;  %v8493_v50 = vrot.slane %v906_v18, 11 }
 0x272   : > { %v887_v28 = vsel %vm10129_vm7, %v8475_v43, %v886_v34  ;;  %v9730_v34 = vld [vmem:[#allocation2 + $0xc0] sm:$0xe] }
 0x273   : > { %v11197_v51 = vadd.f32 %v4004_v63, %v10986_v49  ;;  %v3443_v49 = vsel %vm1246_vm9, %v3438_v53, %v3442_v31  ;;  %888 = vst [vmem:[#allocation2 + $0xcc] sm:$0x1] %v887_v28  ;;  %v3584_v30 = vrot.slane %v3285_v19, 1  ;;  %v3452_v47 = vshll.u32 %v3285_v19, 16  ;;  %v3126_v53 = vld [vmem:[#allocation2 + $0xc8] sm:$0x1] }
 0x274   : > { %v1031_v36 = vld [vmem:[#allocation2 + $0xd4] sm:$0x1] }
 0x275   : > { %v11199_v60 = vpop.f32.mrf.mxu0  ;;  %v1032_v12 = vsel %vm10204_vm8, %v8493_v50, %v1031_v36  ;;  %v3585_v45 = vsel %vm1503_vm10, %v3583_v46, %v3584_v30  ;;  %v3454_v28 = vrot.slane %v3452_v47, 1  ;;  %v9380_v19 = vld [vmem:[%s13357_s3 + $0x30] sm:$0xff]  ;;  %v9707_v46 = vld [vmem:[#allocation2 + $0xc0] sm:$0xff]  }
 0x276   : > { %v3916_v0 = vpop.f32.mrf.mxu3  ;;  %1033 = vst [vmem:[#allocation2 + $0xd4] sm:$0x1] %v1032_v12  ;;  %5807 = vmatpush.bf16.msra.mxu1 %v9380_v19  ;;  %v3459_v36 = vshll.u32 %v9707_v46, 16 }
 0x277   : > { %v3917_v27 = vadd.f32 %v3916_v0, %v3827_v62  ;;  %v3447_v62 = vshll.u32 %v3106_v39, 16  ;;  %v3270_v0 = vunpack.c.l.b16 %v3126_v53 }
 0x279   : > { %v4006_v32 = vadd.f32 %v4005_v10, %v3917_v27  ;;  %v11204_v22 = vpop.f32.mrf.mxu2  ;;  %v3445_v10 = vshrl.u32 %v3106_v39, 16  ;;  %v3449_v8 = vrot.slane %v3447_v62, 1 }
 0x27a   : > { %v3110_v53 = vld [vmem:[#allocation2 + $0xcc] sm:$0xff]  }
 0x27b   : > { %v11209_v61 = vadd.f32 %v4006_v32, %v11003_v2  ;;  %3958 = vmatmul.bf16.gmra.mxu3 %v3443_v49  ;;  %v3450_v18 = vor.u32 %v3449_v8, %v3445_v10  ;;  %v9731_v49 = vor.u32 %v9730_v34, %v9729_v42  ;;  %v3457_v10 = vshrl.u32 %v9707_v46, 16 }
 0x27c   : > { %v3461_v8 = vrot.slane %v3459_v36, 1 }
 0x27d   : > { %v4013_v40 = vpop.f32.mrf.mxu0  ;;  %v3127_v42 = vld [vmem:[#allocation2 + $0xd4] sm:$0x1] }
 0x27e   : > { %v3919_v63 = vpop.f32.mrf.mxu3  ;;  %3874 = vmatmul.bf16.gmra.mxu2 %v3106_v39  ;;  %v3286_v39 = vpack.c.b16 %v3270_v0, %v3270_v0 }
 0x27f   : > { %v3920_v27 = vadd.f32 %v3919_v63, %v3830_v17  ;;  %v10025_v63 = vld [vmem:[#allocation2 + $0xcc] sm:$0xe] }
 0x280   : > { %4052 = vmatmul.bf16.gmra.mxu0 %v3585_v45  ;;  %v3587_v30 = vrot.slane %v3286_v39, 1  ;;  %v3464_v47 = vshll.u32 %v3286_v39, 16 }
 0x281   : > { %v4009_v31 = vadd.f32 %v4008_v52, %v3920_v27  ;;  %v3835_v43 = vpop.f32.mrf.mxu2  ;;  %v3455_v52 = vsel %vm1246_vm9, %v3450_v18, %v3454_v28  ;;  %v3271_v28 = vunpack.c.l.b16 %v3127_v42 }
 0x282   : > { %v3466_v19 = vrot.slane %v3464_v47, 1 }
 0x283   : > { %v11213_v2 = vadd.f32 %v4009_v31, %v11022_v4  ;;  %v3586_v4 = vrot.slane %v9731_v49, 1  ;;  %v10024_v31 = vld [vmem:[#allocation2 + $0xcc] sm:$0xf0]  ;;  %v3462_v49 = vor.u32 %v3461_v8, %v3457_v10  ;;  %v3469_v8 = vshrl.u32 %v3110_v53, 16 }
 0x285   : > { %v11215_v50 = vpop.f32.mrf.mxu0  ;;  %v3588_v62 = vsel %vm1503_vm10, %v3586_v4, %v3587_v30  ;;  %v10026_v4 = vor.u32 %v10025_v63, %v10024_v31  ;;  %v3467_v39 = vsel %vm1246_vm9, %v3462_v49, %v3466_v19 }
 0x286   : > { %v11217_v32 = vpop.f32.mrf.mxu3 }
 0x287   : > { %v3589_v36 = vrot.slane %v10026_v4, 1 }
 0x289   : > { %v11223_v17 = vpop.f32.mrf.mxu2 }
 0x28b   : > { %3963 = vmatmul.bf16.gmra.mxu3 %v3455_v52 }
 0x28d   : > { %v4018_v12 = vpop.f32.mrf.mxu0 }
 0x28e   : > { %v3924_v45 = vpop.f32.mrf.mxu3  ;;  %3879 = vmatmul.bf16.gmra.mxu2 %v9707_v46 }
 0x28f   : > { %v3925_v27 = vadd.f32 %v3924_v45, %v3835_v43  ;;  %v3287_v43 = vpack.c.b16 %v3271_v28, %v3271_v28 }
 0x290   : > { %4057 = vmatmul.bf16.gmra.mxu0 %v3588_v62 }
 0x291   : > { %v4014_v34 = vadd.f32 %v4013_v40, %v3925_v27  ;;  %v3840_v0 = vpop.f32.mrf.mxu2  ;;  %v3590_v62 = vrot.slane %v3287_v43, 1  ;;  %v3471_v40 = vshll.u32 %v3110_v53, 16  ;;  %v3476_v63 = vshll.u32 %v3287_v43, 16 }
 0x293   : > { %v11227_v18 = vadd.f32 %v4014_v34, %v11045_v57  ;;  %v3591_v57 = vsel %vm1503_vm10, %v3589_v36, %v3590_v62  ;;  %v3473_v47 = vrot.slane %v3471_v40, 1  ;;  %v3478_v49 = vrot.slane %v3476_v63, 1 }
 0x295   : > { %v11229_v52 = vpop.f32.mrf.mxu0  ;;  %v3474_v28 = vor.u32 %v3473_v47, %v3469_v8 }
 0x296   : > { %v11231_v30 = vpop.f32.mrf.mxu3 }
 0x299   : > { %v11234_v46 = vpop.f32.mrf.mxu2 }
 0x29b   : > { %3968 = vmatmul.bf16.gmra.mxu3 %v3467_v39  ;;  %v9379_v39 = vld [vmem:[%s13357_s3 + $0x28] sm:$0xff] }
 0x29c   : > { %5808 = vmatpush.bf16.msra.mxu1 %v9379_v39 }
 0x29d   : > { %v4023_v45 = vpop.f32.mrf.mxu0 }
 0x29e   : > { %v3929_v27 = vpop.f32.mrf.mxu3  ;;  %3884 = vmatmul.bf16.gmra.mxu2 %v3110_v53  ;;  %v3479_v53 = vsel %vm1246_vm9, %v3474_v28, %v3478_v49 }
 0x29f   : > { %v3930_v10 = vadd.f32 %v3929_v27, %v3840_v0 }
 0x2a0   : > { %4062 = vmatmul.bf16.gmra.mxu0 %v3591_v57 }
 0x2a1   : > { %v4019_v31 = vadd.f32 %v4018_v12, %v3930_v10  ;;  %v3845_v42 = vpop.f32.mrf.mxu2 }
 0x2a3   : > { %v11238_v34 = vadd.f32 %v4019_v31, %v11060_v11 }
 0x2a5   : > { %v11240_v19 = vpop.f32.mrf.mxu0 }
 0x2a6   : > { %v11242_v4 = vpop.f32.mrf.mxu3 }
 0x2a9   : > { %v11248_v0 = vpop.f32.mrf.mxu2 }
 0x2ab   : > { %3973 = vmatmul.bf16.gmra.mxu3 %v3479_v53 }
 0x2ad   : > { %v4028_v12 = vpop.f32.mrf.mxu0 }
 0x2ae   : > { %v3934_v43 = vpop.f32.mrf.mxu3 }
 0x2af   : > { %v3935_v11 = vadd.f32 %v3934_v43, %v3845_v42 }
 0x2b1   : > { %v4024_v36 = vadd.f32 %v4023_v45, %v3935_v11  ;;  %v3850_v62 = vpop.f32.mrf.mxu2 }
 0x2b3   : > { %v11251_v40 = vadd.f32 %v4024_v36, %v11071_v58  ;;  %v9378_v58 = vld [vmem:[%s13357_s3 + $0x20] sm:$0xff] }
 0x2b4   : > { %5809 = vmatpush.bf16.msra.mxu1 %v9378_v58 }
 0x2b5   : > { %v11253_v57 = vpop.f32.mrf.mxu0 }
 0x2b6   : > { %v11255_v27 = vpop.f32.mrf.mxu3 }
 0x2b9   : > { %v11257_v10 = vpop.f32.mrf.mxu2 }
 0x2bd   : > { %v4033_v8 = vpop.f32.mrf.mxu0 }
 0x2be   : > { %v3939_v47 = vpop.f32.mrf.mxu3 }
 0x2bf   : > { %v3940_v63 = vadd.f32 %v3939_v47, %v3850_v62 }
 0x2c1   : > { %v4029_v31 = vadd.f32 %v4028_v12, %v3940_v63  ;;  %v3855_v28 = vpop.f32.mrf.mxu2 }
 0x2c3   : > { %v11260_v49 = vadd.f32 %v4029_v31, %v11081_v21 }
 0x2c5   : > { %v11262_v42 = vpop.f32.mrf.mxu0 }
 0x2c6   : > { %v11264_v45 = vpop.f32.mrf.mxu3 }
 0x2c9   : > { %v11269_v39 = vpop.f32.mrf.mxu2 }
 0x2cd   : > { %v4038_v53 = vpop.f32.mrf.mxu0 }
 0x2ce   : > { %v3944_v43 = vpop.f32.mrf.mxu3 }
 0x2cf   : > { %v3945_v11 = vadd.f32 %v3944_v43, %v3855_v28  ;;  %v4140_v43 = vmul.f32 %v11171_v20, %v11171_v20 }
 0x2d1   : > { %v4034_v36 = vadd.f32 %v4033_v8, %v3945_v11  ;;  %v3860_v12 = vpop.f32.mrf.mxu2  ;;  %v4138_v8 = vmul.f32 %v11163_v5, %v11163_v5 }
 0x2d3   : > { %v11272_v62 = vadd.f32 %v4034_v36, %v11091_v38  ;;  %v4139_v38 = vmul.f32 %v11167_v1, %v11167_v1 }
 0x2d5   : > { %v11274_v21 = vpop.f32.mrf.mxu0 }
 0x2d6   : > { %v11276_v47 = vpop.f32.mrf.mxu3 }
 0x2d9   : > { %v11278_v63 = vpop.f32.mrf.mxu2 }
 0x2dd   : > { %v11280_v48 = vpop.f32.mrf.mxu0 }
 0x2de   : > { %v3949_v31 = vpop.f32.mrf.mxu3 }
 0x2df   : > { %v3950_v33 = vadd.f32 %v3949_v31, %v3860_v12  ;;  %v3922_v12 = vadd.f32 %v11217_v32, %v11204_v22  ;;  %v3927_v22 = vadd.f32 %v11231_v30, %v11223_v17  ;;  %v3932_v17 = vadd.f32 %v11242_v4, %v11234_v46 }
 0x2e0   : > { %v3937_v4 = vadd.f32 %v11255_v27, %v11248_v0  ;;  %v3942_v0 = vadd.f32 %v11264_v45, %v11257_v10  ;;  %v3947_v10 = vadd.f32 %v11276_v47, %v11269_v39 }
 0x2e1   : > { %v4039_v37 = vadd.f32 %v4038_v53, %v3950_v33  ;;  %v11282_v58 = vpop.f32.mrf.mxu2  ;;  %v9377_v33 = vld [vmem:[%s13357_s3 + $0x18] sm:$0xff]  ;;  %v4100_v53 = vadd.f32 %v11167_v1, %v11163_v5  ;;  %v4011_v5 = vadd.f32 %v11199_v60, %v3922_v12  ;;  %v4016_v60 = vadd.f32 %v11215_v50, %v3927_v22 }
 0x2e2   : > { %5810 = vmatpush.bf16.msra.mxu1 %v9377_v33  ;;  %v4146_v12 = vmul.f32 %v11213_v2, %v11213_v2  ;;  %v4021_v50 = vadd.f32 %v11229_v52, %v3932_v17  ;;  %v4150_v17 = vmul.f32 %v11238_v34, %v11238_v34 }
 0x2e3   : > { %v11285_v28 = vadd.f32 %v4039_v37, %v11101_v35  ;;  %v4170_v35 = vadd.f32 %v4139_v38, %v4138_v8  ;;  %v4141_v37 = vmul.f32 %v11175_v56, %v11175_v56  ;;  %v4101_v3 = vadd.f32 %v4100_v53, %v11171_v20 }
 0x2e4   : > { %v4143_v8 = vmul.f32 %v11186_v59, %v11186_v59 }
 0x2e5   : > { %v11302_v36 = vpop.f32.mrf.mxu0  ;;  %v4171_v44 = vadd.f32 %v4170_v35, %v4140_v43  ;;  %v4102_v1 = vadd.f32 %v4101_v3, %v11175_v56  ;;  %v4144_v43 = vmul.f32 %v11197_v51, %v11197_v51  ;;  %v11324_v3 = vadd.f32 %v4011_v5, %v11034_v25 }
 0x2e6   : > { %v11293_v11 = vpop.f32.mrf.mxu3  ;;  %v11338_v5 = vadd.f32 %v4016_v60, %v11053_v24  ;;  %v11350_v24 = vadd.f32 %v4021_v50, %v11065_v14 }
 0x2e7   : > { %v4172_v38 = vadd.f32 %v4171_v44, %v4141_v37  ;;  %v4103_v32 = vadd.f32 %v4102_v1, %v11179_v54  ;;  %v4145_v44 = vmul.f32 %v11209_v61, %v11209_v61  ;;  %v4147_v25 = vmul.f32 %v11324_v3, %v11324_v3 }
 0x2e8   : > { %v4151_v14 = vmul.f32 %v11350_v24, %v11350_v24  ;;  %v3952_v39 = vadd.f32 %v11293_v11, %v11278_v63 }
 0x2e9   : > { %v11306_v31 = vpop.f32.mrf.mxu2  ;;  %v4173_v33 = vadd.f32 %v4172_v38, %v4142_v41  ;;  %v4104_v53 = vadd.f32 %v4103_v32, %v11186_v59 }
 0x2ea   : > { %v4041_v11 = vadd.f32 %v11274_v21, %v3952_v39 }
 0x2eb   : > { %v4174_v35 = vadd.f32 %v4173_v33, %v4143_v8  ;;  %v4105_v41 = vadd.f32 %v4104_v53, %v11197_v51  ;;  %v4148_v33 = vmul.f32 %v11227_v18, %v11227_v18 }
 0x2ed   : > { %v11330_v30 = vpop.f32.mrf.mxu0  ;;  %v4175_v37 = vadd.f32 %v4174_v35, %v4144_v43  ;;  %v4106_v38 = vadd.f32 %v4105_v41, %v11209_v61  ;;  %v4149_v35 = vmul.f32 %v11338_v5, %v11338_v5 }
 0x2ee   : > { %v3954_v29 = vpop.f32.mrf.mxu3 }
 0x2ef   : > { %v4176_v8 = vadd.f32 %v4175_v37, %v4145_v44  ;;  %v4107_v46 = vadd.f32 %v4106_v38, %v11213_v2  ;;  %v4026_v44 = vadd.f32 %v11240_v19, %v3937_v4  ;;  %v4031_v19 = vadd.f32 %v11253_v57, %v3942_v0 }
 0x2f0   : > { %v4036_v57 = vadd.f32 %v11262_v42, %v3947_v10 }
 0x2f1   : > { %v3870_v1 = vpop.f32.mrf.mxu2  ;;  %v4177_v32 = vadd.f32 %v4176_v8, %v4146_v12  ;;  %v4108_v43 = vadd.f32 %v4107_v46, %v11324_v3  ;;  %v11363_v8 = vadd.f32 %v4026_v44, %v11076_v7  ;;  %v4152_v46 = vmul.f32 %v11251_v40, %v11251_v40 }
 0x2f2   : > { %v11375_v7 = vadd.f32 %v4031_v19, %v11086_v9  ;;  %v11388_v42 = vadd.f32 %v4036_v57, %v11096_v26 }
 0x2f3   : > { %v4178_v53 = vadd.f32 %v4177_v32, %v4147_v25  ;;  %v4109_v52 = vadd.f32 %v4108_v43, %v11227_v18 }
 0x2f4   : > { %v4155_v9 = vmul.f32 %v11375_v7, %v11375_v7  ;;  %v4157_v21 = vmul.f32 %v11388_v42, %v11388_v42 }
 0x2f5   : > { %v4179_v60 = vadd.f32 %v4178_v53, %v4148_v33  ;;  %v4110_v41 = vadd.f32 %v4109_v52, %v11338_v5  ;;  %v4050_v37 = vpop.f32.mrf.mxu0  ;;  %v4153_v33 = vmul.f32 %v11363_v8, %v11363_v8  ;;  %v4154_v53 = vmul.f32 %v11260_v49, %v11260_v49 }
 0x2f6   : > { %v3956_v22 = vpop.f32.mrf.mxu3  ;;  %v3955_v52 = vadd.f32 %v3954_v29, %v11282_v58 }
 0x2f7   : > { %v4180_v12 = vadd.f32 %v4179_v60, %v4149_v35  ;;  %v4111_v38 = vadd.f32 %v4110_v41, %v11238_v34  ;;  %v9376_v41 = vld [vmem:[%s13357_s3 + $0x10] sm:$0xff] }
 0x2f8   : > { %5811 = vmatpush.bf16.msra.mxu1 %v9376_v41 }
 0x2f9   : > { %v3872_v27 = vpop.f32.mrf.mxu2  ;;  %v4181_v25 = vadd.f32 %v4180_v12, %v4150_v17  ;;  %v4112_v50 = vadd.f32 %v4111_v38, %v11350_v24  ;;  %v3957_v17 = vadd.f32 %v3956_v22, %v11306_v31  ;;  %v4156_v12 = vmul.f32 %v11272_v62, %v11272_v62 }
 0x2fa   : > { %v11403_v31 = vadd.f32 %v4041_v11, %v11106_v15 }
 0x2fb   : > { %v4182_v4 = vadd.f32 %v4181_v25, %v4151_v14  ;;  %v4113_v32 = vadd.f32 %v4112_v50, %v11251_v40  ;;  %v4044_v14 = vadd.f32 %v11280_v48, %v3955_v52  ;;  %v4046_v22 = vadd.f32 %v11302_v36, %v3957_v17 }
 0x2fc   : > { %v4158_v48 = vmul.f32 %v11285_v28, %v11285_v28  ;;  %v4159_v36 = vmul.f32 %v11403_v31, %v11403_v31 }
 0x2fd   : > { %v4183_v47 = vadd.f32 %v4182_v4, %v4152_v46  ;;  %v4114_v43 = vadd.f32 %v4113_v32, %v11363_v8  ;;  %v4053_v63 = vpop.f32.mrf.mxu0 }
 0x2fe   : > { %v3959_v45 = vpop.f32.mrf.mxu3 }
 0x2ff   : > { %v4184_v44 = vadd.f32 %v4183_v47, %v4153_v33  ;;  %v4115_v0 = vadd.f32 %v4114_v43, %v11260_v49  ;;  %v3960_v26 = vadd.f32 %v3959_v45, %v3870_v1  ;;  %v11410_v1 = vadd.f32 %v4044_v14, %v11116_v13 }
 0x301   : > { %v3875_v35 = vpop.f32.mrf.mxu2  ;;  %v4185_v29 = vadd.f32 %v4184_v44, %v4154_v53  ;;  %v4116_v58 = vadd.f32 %v4115_v0, %v11375_v7  ;;  %v4049_v45 = vadd.f32 %v11330_v30, %v3960_v26  ;;  %v4160_v30 = vmul.f32 %v11410_v1, %v11410_v1 }
 0x303   : > { %v4186_v38 = vadd.f32 %v4185_v29, %v4155_v9  ;;  %v4117_v19 = vadd.f32 %v4116_v58, %v11272_v62  ;;  %v11423_v43 = vadd.f32 %v4049_v45, %v11126_v23 }
 0x305   : > { %v4187_v25 = vadd.f32 %v4186_v38, %v4156_v12  ;;  %v4118_v50 = vadd.f32 %v4117_v19, %v11388_v42  ;;  %v4055_v47 = vpop.f32.mrf.mxu0  ;;  %v4162_v9 = vmul.f32 %v11423_v43, %v11423_v43  ;;  %v13445_v19 = vld [vmem:[#allocation9_spill] sm:$0xff] }
 0x306   : > { %v3961_v60 = vpop.f32.mrf.mxu3 }
 0x307   : > { %v3962_v10 = vadd.f32 %v3961_v60, %v3872_v27  ;;  %v4188_v46 = vadd.f32 %v4187_v25, %v4157_v21  ;;  %v4119_v4 = vadd.f32 %v4118_v50, %v11285_v28  ;;  %v11417_v27 = vadd.f32 %v4046_v22, %v11121_v55 }
 0x309   : > { %v3877_v32 = vpop.f32.mrf.mxu2  ;;  %v4051_v33 = vadd.f32 %v4050_v37, %v3962_v10  ;;  %v4189_v39 = vadd.f32 %v4188_v46, %v4158_v48  ;;  %v4120_v13 = vadd.f32 %v4119_v4, %v11403_v31  ;;  %v4161_v55 = vmul.f32 %v11417_v27, %v11417_v27 }
 0x30b   : > { %v4190_v52 = vadd.f32 %v4189_v39, %v4159_v36  ;;  %v4121_v44 = vadd.f32 %v4120_v13, %v11410_v1  ;;  %v11429_v37 = vadd.f32 %v4051_v33, %v11131_v16 }
 0x30d   : > { %v4122_v0 = vadd.f32 %v4121_v44, %v11417_v27  ;;  %v4163_v17 = vmul.f32 %v11429_v37, %v11429_v37  ;;  %v4058_v26 = vpop.f32.mrf.mxu0 }
 0x30e   : > { %v3964_v15 = vpop.f32.mrf.mxu3 }
 0x30f   : > { %v3965_v57 = vadd.f32 %v3964_v15, %v3875_v35  ;;  %v4191_v35 = vadd.f32 %v4190_v52, %v4160_v30  ;;  %v4123_v11 = vadd.f32 %v4122_v0, %v11423_v43 }
 0x311   : > { %v4054_v53 = vadd.f32 %v4053_v63, %v3965_v57  ;;  %v4192_v63 = vadd.f32 %v4191_v35, %v4161_v55  ;;  %v3880_v29 = vpop.f32.mrf.mxu2  ;;  %v4124_v58 = vadd.f32 %v4123_v11, %v11429_v37 }
 0x313   : > { %v11435_v60 = vadd.f32 %v4054_v53, %v11136_v6  ;;  %v4193_v16 = vadd.f32 %v4192_v63, %v4162_v9  ;;  %v13447_v53 = vld [vmem:[#allocation11_spill] sm:$0xff] }
 0x315   : > { %v4164_v12 = vmul.f32 %v11435_v60, %v11435_v60  ;;  %v4194_v38 = vadd.f32 %v4193_v16, %v4163_v17  ;;  %v4125_v6 = vadd.f32 %v4124_v58, %v11435_v60  ;;  %v4060_v36 = vpop.f32.mrf.mxu0  ;;  %v13448_v17 = vld [vmem:[#allocation12_spill] sm:$0xff] }
 0x316   : > { %v3966_v23 = vpop.f32.mrf.mxu3 }
 0x317   : > { %v3967_v41 = vadd.f32 %v3966_v23, %v3877_v32  ;;  %v4195_v22 = vadd.f32 %v4194_v38, %v4164_v12  ;;  %v13446_v32 = vld [vmem:[#allocation10_spill] sm:$0xff] }
 0x319   : > { %v4056_v14 = vadd.f32 %v4055_v47, %v3967_v41  ;;  %v3882_v4 = vpop.f32.mrf.mxu2 }
 0x31b   : > { %v11445_v21 = vadd.f32 %v4056_v14, %v13445_v19  ;;  %v13449_v19 = vld [vmem:[#allocation13_spill] sm:$0xff] }
 0x31d   : > { %v4126_v10 = vadd.f32 %v4125_v6, %v11445_v21  ;;  %v4165_v25 = vmul.f32 %v11445_v21, %v11445_v21  ;;  %v4063_v0 = vpop.f32.mrf.mxu0 }
 0x31e   : > { %v3969_v50 = vpop.f32.mrf.mxu3 }
 0x31f   : > { %v4196_v48 = vadd.f32 %v4195_v22, %v4165_v25  ;;  %v3970_v45 = vadd.f32 %v3969_v50, %v3880_v29 }
 0x321   : > { %v4059_v46 = vadd.f32 %v4058_v26, %v3970_v45  ;;  %v3885_v44 = vpop.f32.mrf.mxu2 }
 0x323   : > { %v11451_v15 = vadd.f32 %v4059_v46, %v13446_v32 }
 0x325   : > { %v4127_v33 = vadd.f32 %v4126_v10, %v11451_v15  ;;  %v4166_v57 = vmul.f32 %v11451_v15, %v11451_v15  ;;  %v4065_v38 = vpop.f32.mrf.mxu0 }
 0x326   : > { %v3971_v39 = vpop.f32.mrf.mxu3 }
 0x327   : > { %v4197_v47 = vadd.f32 %v4196_v48, %v4166_v57  ;;  %v3972_v13 = vadd.f32 %v3971_v39, %v3882_v4 }
 0x329   : > { %v4061_v30 = vadd.f32 %v4060_v36, %v3972_v13  ;;  %v3887_v58 = vpop.f32.mrf.mxu2 }
 0x32b   : > { %v11457_v52 = vadd.f32 %v4061_v30, %v13447_v53 }
 0x32d   : > { %v4128_v55 = vadd.f32 %v4127_v33, %v11457_v52  ;;  %v4167_v35 = vmul.f32 %v11457_v52, %v11457_v52 }
 0x32e   : > { %v3974_v9 = vpop.f32.mrf.mxu3 }
 0x32f   : > { %v4198_v23 = vadd.f32 %v4197_v47, %v4167_v35  ;;  %v3975_v63 = vadd.f32 %v3974_v9, %v3885_v44 }
 0x331   : > { %v4064_v11 = vadd.f32 %v4063_v0, %v3975_v63 }
 0x333   : > { %v11463_v41 = vadd.f32 %v4064_v11, %v13448_v17 }
 0x335   : > { %v4129_v29 = vadd.f32 %v4128_v55, %v11463_v41  ;;  %v4168_v16 = vmul.f32 %v11463_v41, %v11463_v41 }
 0x336   : > { %v3976_v12 = vpop.f32.mrf.mxu3 }
 0x337   : > { %v4199_v14 = vadd.f32 %v4198_v23, %v4168_v16  ;;  %v3977_v26 = vadd.f32 %v3976_v12, %v3887_v58  ;;  %v13450_v12 = vld [vmem:[#allocation14_spill] sm:$0xff] }
 0x339   : > { %v4066_v6 = vadd.f32 %v4065_v38, %v3977_v26  ;;  %v13451_v26 = vld [vmem:[#allocation15_spill] sm:$0xff] }
 0x33b   : > { %v11469_v22 = vadd.f32 %v4066_v6, %v13449_v19 }
 0x33d   : > { %v4130_v10 = vadd.f32 %v4129_v29, %v11469_v22  ;;  %v4169_v25 = vmul.f32 %v11469_v22, %v11469_v22 }
 0x33f   : > { %v4131_v50 = vrot.slane %v4130_v10, 4  ;;  %v4200_v48 = vadd.f32 %v4199_v14, %v4169_v25 }
 0x341   : > { %v4132_v45 = vadd.f32 %v4131_v50, %v4130_v10  ;;  %v4201_v46 = vrot.slane %v4200_v48, 4 }
 0x343   : > { %v4133_v4 = vrot.slane %v4132_v45, 2  ;;  %v4202_v32 = vadd.f32 %v4201_v46, %v4200_v48 }
 0x345   : > { %v4134_v36 = vadd.f32 %v4133_v4, %v4132_v45  ;;  %v4203_v33 = vrot.slane %v4202_v32, 2 }
 0x347   : > { %v4135_v57 = vrot.slane %v4134_v36, 1  ;;  %v4204_v39 = vadd.f32 %v4203_v33, %v4202_v32 }
 0x349   : > { %v4136_v47 = vadd.f32 %v4135_v57, %v4134_v36  ;;  %v4205_v13 = vrot.slane %v4204_v39, 1 }
 0x34b   : > { %v11474_v30 = vmul.f32 0.00390625, %v4136_v47  ;;  %v4206_v53 = vadd.f32 %v4205_v13, %v4204_v39 }
 0x34d   : > { %v4207_v44 = vmul.f32 0.00390625, %v4206_v53  ;;  %v4208_v55 = vmul.f32 %v11474_v30, %v11474_v30  ;;  %v4240_v35 = vsub.f32 %v11463_v41, %v11474_v30  ;;  %v4241_v0 = vsub.f32 %v11469_v22, %v11474_v30 }
 0x34e   : > { %v4236_v63 = vsub.f32 %v11435_v60, %v11474_v30  ;;  %v4237_v11 = vsub.f32 %v11445_v21, %v11474_v30  ;;  %v4238_v17 = vsub.f32 %v11451_v15, %v11474_v30  ;;  %v4239_v29 = vsub.f32 %v11457_v52, %v11474_v30 }
 0x34f   : > { %v4209_v9 = vsub.f32 %v4207_v44, %v4208_v55  ;;  %v4210_v14 = vsub.f32 %v13450_v12, %v11474_v30  ;;  %v4211_v38 = vsub.f32 %v13451_v26, %v11474_v30  ;;  %v4212_v6 = vsub.f32 %v11171_v20, %v11474_v30 }
 0x350   : > { %v4213_v22 = vsub.f32 %v11175_v56, %v11474_v30  ;;  %v4214_v10 = vsub.f32 %v11179_v54, %v11474_v30  ;;  %v4215_v25 = vsub.f32 %v11186_v59, %v11474_v30  ;;  %v4216_v50 = vsub.f32 %v11197_v51, %v11474_v30 }
 0x351   : > { %v4242_v23 = vadd.f32 1e-05, %v4209_v9  ;;  %v4217_v48 = vsub.f32 %v11209_v61, %v11474_v30  ;;  %v4218_v45 = vsub.f32 %v11213_v2, %v11474_v30  ;;  %v4219_v20 = vsub.f32 %v11324_v3, %v11474_v30 }
 0x352   : > { %v4220_v56 = vsub.f32 %v11227_v18, %v11474_v30  ;;  %v4221_v54 = vsub.f32 %v11338_v5, %v11474_v30  ;;  %v4222_v59 = vsub.f32 %v11238_v34, %v11474_v30  ;;  %v4223_v51 = vsub.f32 %v11350_v24, %v11474_v30 }
 0x353   : > { %9852 = vrsqrt.f32 %v4242_v23  ;;  %v4224_v61 = vsub.f32 %v11251_v40, %v11474_v30  ;;  %v4225_v2 = vsub.f32 %v11363_v8, %v11474_v30  ;;  %vm4249_vm12 = vweird.f32 %v4242_v23 }
 0x354   : > { %v4226_v18 = vsub.f32 %v11260_v49, %v11474_v30  ;;  %v4227_v5 = vsub.f32 %v11375_v7, %v11474_v30  ;;  %v4228_v34 = vsub.f32 %v11272_v62, %v11474_v30  ;;  %v4229_v24 = vsub.f32 %v11388_v42, %v11474_v30 }
 0x355   : > { %v4230_v40 = vsub.f32 %v11285_v28, %v11474_v30  ;;  %v4231_v8 = vsub.f32 %v11403_v31, %v11474_v30  ;;  %v4232_v49 = vsub.f32 %v11410_v1, %v11474_v30  ;;  %v4233_v7 = vsub.f32 %v11417_v27, %v11474_v30 }
 0x356   : > { %v4234_v32 = vsub.f32 %v11423_v43, %v11474_v30 }
 0x359   : > { %v9853_v16 = vpop.eup %9852 }
 0x35a   : > { %v4244_v41 = vmul.f32 %v9853_v16, %v4242_v23  ;;  %vm4250_vm11 = vweird.f32 %v9853_v16 }
 0x35b   : > { %vm4251_vm13 = vmor %vm4249_vm12, %vm4250_vm11 }
 0x35c   : > { %v4245_v58 = vmul.f32 %v9853_v16, %v4244_v41 }
 0x35e   : > { %v4246_v19 = vmul.f32 0.5, %v4245_v58 }
 0x360   : > { %v4247_v46 = vsub.f32 1.5, %v4246_v19 }
 0x362   : > { %v4248_v3 = vmul.f32 %v9853_v16, %v4247_v46  ;;  %v4777_v46 = vld [vmem:[#allocation2 + $0xc8] sm:$0x1] }
 0x364   : > { %v4252_v4 = vsel %vm4251_vm13, %v9853_v16, %v4248_v3 }
 0x365   : > { %v4283_v62 = vmul.f32 %v4252_v4, %v4240_v35  ;;  %v4284_v36 = vmul.f32 %v4252_v4, %v4241_v0  ;;  %v4253_v33 = vmul.f32 %v4252_v4, %v4210_v14  ;;  %v4254_v42 = vmul.f32 %v4252_v4, %v4211_v38 }
 0x366   : > { %v4255_v57 = vmul.f32 %v4252_v4, %v4212_v6  ;;  %v11540_v39 = vmul.f32 %v4252_v4, %v4213_v22  ;;  %v11542_v28 = vmul.f32 %v4252_v4, %v4214_v10  ;;  %v11544_v31 = vmul.f32 %v4252_v4, %v4215_v25 }
 0x367   : > { %v4315_v47 = vmax.f32 %v4283_v62, 0.0  ;;  %v4316_v13 = vmax.f32 %v4284_v36, 0.0  ;;  %v11546_v1 = vmul.f32 %v4252_v4, %v4216_v50  ;;  %v11548_v53 = vmul.f32 %v4252_v4, %v4217_v48 }
 0x368   : > { %v11550_v27 = vmul.f32 %v4252_v4, %v4218_v45  ;;  %v11552_v43 = vmul.f32 %v4252_v4, %v4219_v20  ;;  %v11554_v44 = vmul.f32 %v4252_v4, %v4220_v56  ;;  %v11556_v55 = vmul.f32 %v4252_v4, %v4221_v54 }
 0x369   : > { %v11558_v35 = vpack.c.bf16 %v4315_v47, %v4315_v47  ;;  %v4348_v0 = vpack.c.bf16 %v4316_v13, %v4316_v13  ;;  %v11560_v9 = vmul.f32 %v4252_v4, %v4222_v59  ;;  %v11562_v23 = vmul.f32 %v4252_v4, %v4223_v51 }
 0x36a   : > { %v11564_v16 = vmul.f32 %v4252_v4, %v4224_v61  ;;  %v11566_v41 = vmul.f32 %v4252_v4, %v4225_v2  ;;  %v11568_v58 = vmul.f32 %v4252_v4, %v4226_v18  ;;  %v11570_v12 = vmul.f32 %v4252_v4, %v4227_v5 }
 0x36b   : > { %v4605_v14 = vshrl.u32 %v11558_v35, 16  ;;  %v4613_v26 = vshrl.u32 %v4348_v0, 16  ;;  %v4616_v38 = vshll.u32 %v4348_v0, 16  ;;  %v4235_v6 = vsub.f32 %v11429_v37, %v11474_v30 }
 0x36c   : > { %v11575_v19 = vmul.f32 %v4252_v4, %v4228_v34  ;;  %v11577_v22 = vmul.f32 %v4252_v4, %v4229_v24  ;;  %v11579_v10 = vmul.f32 %v4252_v4, %v4230_v40  ;;  %v11581_v25 = vmul.f32 %v4252_v4, %v4231_v8 }
 0x36d   : > { %v11583_v50 = vrot.slane %v4605_v14, 7  ;;  %v4615_v48 = vrot.slane %v4613_v26, 7  ;;  %v11585_v45 = vmul.f32 %v4252_v4, %v4232_v49  ;;  %v11587_v20 = vmul.f32 %v4252_v4, %v4233_v7 }
 0x36e   : > { %v11589_v56 = vmul.f32 %v4252_v4, %v4234_v32  ;;  %v11591_v54 = vmul.f32 %v4252_v4, %v4235_v6  ;;  %v11596_v37 = vmul.f32 %v4252_v4, %v4236_v63  ;;  %v11601_v59 = vmul.f32 %v4252_v4, %v4237_v11 }
 0x36f   : > { %v4611_v51 = vrot.slane %v11583_v50, 4  ;;  %v4618_v61 = vor.u32 %v4616_v38, %v4615_v48  ;;  %v4620_v2 = vrot.slane %v4615_v48, 4  ;;  %v11607_v3 = vmul.f32 %v4252_v4, %v4238_v17  ;;  %v4693_v17 = vld [vmem:[#allocation2 + $0x38] sm:$0x1] }
 0x370   : > { %v11612_v60 = vmul.f32 %v4252_v4, %v4239_v29  ;;  %v4285_v5 = vmax.f32 %v4253_v33, 0.0  ;;  %v4286_v34 = vmax.f32 %v4254_v42, 0.0  ;;  %v4287_v24 = vmax.f32 %v4255_v57, 0.0 }
 0x371   : > { %v4619_v18 = vsel %vm10109_vm5, %v4611_v51, %v4618_v61  ;;  %v4778_v11 = vsel %vm10129_vm7, %v4620_v2, %v4777_v46  ;;  %v4288_v15 = vmax.f32 %v11540_v39, 0.0  ;;  %v4289_v40 = vmax.f32 %v11542_v28, 0.0 }
 0x372   : > { %4779 = vst [vmem:[#allocation2 + $0xc8] sm:$0x1] %v4778_v11  ;;  %v4290_v52 = vmax.f32 %v11544_v31, 0.0  ;;  %v4291_v30 = vmax.f32 %v11546_v1, 0.0  ;;  %v4292_v29 = vmax.f32 %v11548_v53, 0.0  ;;  %v4293_v8 = vmax.f32 %v11550_v27, 0.0 }
 0x373   : > { %4776 = vst [vmem:[#allocation2 + $0xc4] sm:$0xf] %v4619_v18  ;;  %v11625_v4 = vpack.c.bf16 %v4285_v5, %v4285_v5  ;;  %v4294_v49 = vmax.f32 %v11552_v43, 0.0  ;;  %v4295_v7 = vmax.f32 %v11554_v44, 0.0  ;;  %v4318_v32 = vpack.c.bf16 %v4286_v34, %v4286_v34 }
 0x374   : > { %v11629_v62 = vpack.c.bf16 %v4287_v24, %v4287_v24  ;;  %v4296_v36 = vmax.f32 %v11556_v55, 0.0  ;;  %v4297_v33 = vmax.f32 %v11560_v9, 0.0  ;;  %v4298_v42 = vmax.f32 %v11562_v23, 0.0 }
 0x375   : > { %v4320_v57 = vpack.c.bf16 %v4288_v15, %v4288_v15  ;;  %v4299_v39 = vmax.f32 %v11564_v16, 0.0  ;;  %v4300_v28 = vmax.f32 %v11566_v41, 0.0  ;;  %v4301_v31 = vmax.f32 %v11568_v58, 0.0 }
 0x376   : > { %v11637_v47 = vpack.c.bf16 %v4289_v40, %v4289_v40  ;;  %v4302_v13 = vmax.f32 %v11570_v12, 0.0  ;;  %v4303_v1 = vmax.f32 %v11575_v19, 0.0  ;;  %v4322_v53 = vpack.c.bf16 %v4290_v52, %v4290_v52 }
 0x377   : > { %v4350_v27 = vshrl.u32 %v11625_v4, 16  ;;  %v4304_v43 = vmax.f32 %v11577_v22, 0.0  ;;  %v4305_v44 = vmax.f32 %v11579_v10, 0.0  ;;  %v4358_v55 = vshrl.u32 %v4318_v32, 16 }
 0x378   : > { %v4367_v0 = vshrl.u32 %v11629_v62, 16  ;;  %v4306_v9 = vmax.f32 %v11581_v25, 0.0  ;;  %v11646_v23 = vpack.c.bf16 %v4291_v30, %v4291_v30  ;;  %v4375_v41 = vshrl.u32 %v4320_v57, 16 }
 0x379   : > { %v11648_v16 = vrot.slane %v4350_v27, 7  ;;  %v11650_v58 = vrot.slane %v4358_v55, 7  ;;  %v4361_v14 = vshll.u32 %v4318_v32, 16  ;;  %v4384_v38 = vshrl.u32 %v11637_v47, 16 }
 0x37a   : > { %v11652_v26 = vrot.slane %v4367_v0, 7  ;;  %v11656_v48 = vrot.slane %v4375_v41, 7  ;;  %v4378_v46 = vshll.u32 %v4320_v57, 16  ;;  %v4392_v51 = vshrl.u32 %v4322_v53, 16 }
 0x37b   : > { %v4356_v6 = vrot.slane %v11648_v16, 4  ;;  %v4324_v61 = vpack.c.bf16 %v4292_v29, %v4292_v29  ;;  %v11658_v2 = vpack.c.bf16 %v4293_v8, %v4293_v8  ;;  %v4363_v18 = vor.u32 %v4361_v14, %v11650_v58 }
 0x37c   : > { %v4373_v11 = vrot.slane %v11652_v26, 4  ;;  %v4326_v5 = vpack.c.bf16 %v4294_v49, %v4294_v49  ;;  %v4380_v34 = vor.u32 %v4378_v46, %v11656_v48  ;;  %v11663_v24 = vrot.slane %v4384_v38, 7 }
 0x37d   : > { %v11665_v15 = vrot.slane %v4392_v51, 7  ;;  %v4307_v40 = vmax.f32 %v11585_v45, 0.0  ;;  %v4364_v52 = vsel %vm10109_vm5, %v4356_v6, %v4363_v18  ;;  %v4395_v30 = vshll.u32 %v4322_v53, 16 }
 0x37e   : > { %v4401_v29 = vshrl.u32 %v11646_v23, 16  ;;  %v4308_v8 = vmax.f32 %v11587_v20, 0.0  ;;  %v11672_v32 = vpack.c.bf16 %v4295_v7, %v4295_v7  ;;  %v4381_v49 = vsel %vm10109_vm5, %v4373_v11, %v4380_v34  ;;  %4671 = vst [vmem:[#allocation2 + $0x10] sm:$0xf] %v4364_v52 }
 0x37f   : > { %v4390_v57 = vrot.slane %v11663_v24, 4  ;;  %v4328_v27 = vpack.c.bf16 %v4296_v36, %v4296_v36  ;;  %v4397_v55 = vor.u32 %v4395_v30, %v11665_v15  ;;  %v4409_v41 = vshrl.u32 %v4324_v61, 16  ;;  %4783 = vst [vmem:[#allocation2 + $0x4] sm:$0xf] %v4381_v49 }
 0x380   : > { %v11678_v0 = vrot.slane %v4401_v29, 7  ;;  %v11680_v53 = vpack.c.bf16 %v4297_v33, %v4297_v33  ;;  %v4330_v14 = vpack.c.bf16 %v4298_v42, %v4298_v42  ;;  %v4418_v38 = vshrl.u32 %v11658_v2, 16  ;;  %4678 = vst [vmem:[#allocation2 + $0x1c] sm:$0xf] %v4381_v49 }
 0x381   : > { %v4426_v7 = vshrl.u32 %v4326_v5, 16  ;;  %v4398_v6 = vsel %vm10109_vm5, %v4390_v57, %v4397_v55  ;;  %v11686_v51 = vrot.slane %v4409_v41, 7  ;;  %v4412_v36 = vshll.u32 %v4324_v61, 16 }
 0x382   : > { %v4407_v46 = vrot.slane %v11678_v0, 4  ;;  %v11688_v18 = vrot.slane %v4418_v38, 7  ;;  %v4429_v34 = vshll.u32 %v4326_v5, 16  ;;  %v4435_v33 = vshrl.u32 %v11672_v32, 16  ;;  %4685 = vst [vmem:[#allocation2 + $0x28] sm:$0xf] %v4398_v6 }
 0x383   : > { %v11690_v11 = vrot.slane %v4426_v7, 7  ;;  %v11693_v42 = vpack.c.bf16 %v4299_v39, %v4299_v39  ;;  %v4332_v52 = vpack.c.bf16 %v4300_v28, %v4300_v28  ;;  %v4414_v30 = vor.u32 %v4412_v36, %v11686_v51 }
 0x384   : > { %v4443_v29 = vshrl.u32 %v4328_v27, 16  ;;  %v11696_v49 = vpack.c.bf16 %v4301_v31, %v4301_v31  ;;  %v4424_v57 = vrot.slane %v11688_v18, 4  ;;  %v4446_v55 = vshll.u32 %v4328_v27, 16 }
 0x385   : > { %v4431_v61 = vor.u32 %v4429_v34, %v11690_v11  ;;  %v4415_v41 = vsel %vm10109_vm5, %v4407_v46, %v4414_v30  ;;  %v11702_v5 = vrot.slane %v4435_v33, 7  ;;  %v4452_v39 = vshrl.u32 %v11680_v53, 16 }
 0x386   : > { %v11704_v38 = vrot.slane %v4443_v29, 7  ;;  %v4309_v28 = vmax.f32 %v11589_v56, 0.0  ;;  %v4310_v7 = vmax.f32 %v11591_v54, 0.0  ;;  %v4460_v6 = vshrl.u32 %v4330_v14, 16  ;;  %4692 = vst [vmem:[#allocation2 + $0x34] sm:$0xf] %v4415_v41 }
 0x387   : > { %v4432_v31 = vsel %vm10109_vm5, %v4424_v57, %v4431_v61  ;;  %v4334_v27 = vpack.c.bf16 %v4302_v13, %v4302_v13  ;;  %v11717_v46 = vpack.c.bf16 %v4303_v1, %v4303_v1  ;;  %v4441_v36 = vrot.slane %v11702_v5, 4 }
 0x388   : > { %v4448_v56 = vor.u32 %v4446_v55, %v11704_v38  ;;  %4699 = vst [vmem:[#allocation2 + $0x40] sm:$0xf] %v4432_v31  ;;  %v11721_v54 = vrot.slane %v4452_v39, 7  ;;  %v11723_v34 = vrot.slane %v4460_v6, 7  ;;  %v4463_v33 = vshll.u32 %v4330_v14, 16 }
 0x389   : > { %v4469_v30 = vshrl.u32 %v11693_v42, 16  ;;  %v4311_v12 = vmax.f32 %v11596_v37, 0.0  ;;  %v4477_v13 = vshrl.u32 %v4332_v52, 16  ;;  %v4486_v1 = vshrl.u32 %v11696_v49, 16 }
 0x38a   : > { %v4449_v19 = vsel %vm10109_vm5, %v4441_v36, %v4448_v56  ;;  %v4312_v29 = vmax.f32 %v11601_v59, 0.0  ;;  %v4336_v57 = vpack.c.bf16 %v4304_v43, %v4304_v43  ;;  %v4458_v61 = vrot.slane %v11721_v54, 4 }
 0x38b   : > { %v4465_v14 = vor.u32 %v4463_v33, %v11723_v34  ;;  %4706 = vst [vmem:[#allocation2 + $0x4c] sm:$0xf] %v4449_v19  ;;  %v11736_v55 = vrot.slane %v4469_v30, 7  ;;  %v11738_v37 = vrot.slane %v4477_v13, 7  ;;  %v4480_v41 = vshll.u32 %v4332_v52, 16 }
 0x38c   : > { %v11740_v39 = vrot.slane %v4486_v1, 7  ;;  %v11745_v59 = vpack.c.bf16 %v4305_v44, %v4305_v44  ;;  %v4494_v43 = vshrl.u32 %v4334_v27, 16  ;;  %v4503_v31 = vshrl.u32 %v11717_v46, 16 }
 0x38d   : > { %v4466_v22 = vsel %vm10109_vm5, %v4458_v61, %v4465_v14  ;;  %v4338_v6 = vpack.c.bf16 %v4306_v9, %v4306_v9  ;;  %v11756_v52 = vpack.c.bf16 %v4307_v40, %v4307_v40  ;;  %v4475_v10 = vrot.slane %v11736_v55, 4 }
 0x38e   : > { %v4482_v44 = vor.u32 %v4480_v41, %v11738_v37  ;;  %4713 = vst [vmem:[#allocation2 + $0x58] sm:$0xf] %v4466_v22  ;;  %v4492_v36 = vrot.slane %v11740_v39, 4  ;;  %v11761_v56 = vrot.slane %v4494_v43, 7  ;;  %v4497_v33 = vshll.u32 %v4334_v27, 16 }
 0x38f   : > { %v11763_v30 = vrot.slane %v4503_v31, 7  ;;  %v4313_v25 = vmax.f32 %v11607_v3, 0.0  ;;  %v4314_v9 = vmax.f32 %v11612_v60, 0.0  ;;  %v4511_v40 = vshrl.u32 %v4336_v57, 16 }
 0x390   : > { %v4483_v45 = vsel %vm10109_vm5, %v4475_v10, %v4482_v44  ;;  %v4340_v19 = vpack.c.bf16 %v4308_v8, %v4308_v8  ;;  %v11772_v13 = vpack.c.bf16 %v4309_v28, %v4309_v28  ;;  %v4499_v1 = vor.u32 %v4497_v33, %v11761_v56 }
 0x391   : > { %v4520_v27 = vshrl.u32 %v11745_v59, 16  ;;  %4720 = vst [vmem:[#allocation2 + $0x64] sm:$0xf] %v4483_v45  ;;  %v4509_v61 = vrot.slane %v11763_v30, 4  ;;  %v11777_v3 = vrot.slane %v4511_v40, 7  ;;  %v4514_v60 = vshll.u32 %v4336_v57, 16 }
 0x392   : > { %13454 = vst [vmem:[#allocation16_spill] sm:$0xff] %v11772_v13  ;;  %v4528_v14 = vshrl.u32 %v4338_v6, 16  ;;  %v4342_v41 = vpack.c.bf16 %v4310_v7, %v4310_v7  ;;  %v4500_v22 = vsel %vm10109_vm5, %v4492_v36, %v4499_v1  ;;  %v4537_v8 = vshrl.u32 %v11756_v52, 16 }
 0x393   : > { %v11781_v20 = vrot.slane %v4520_v27, 7  ;;  %v11784_v28 = vpack.c.bf16 %v4311_v12, %v4311_v12  ;;  %v4516_v43 = vor.u32 %v4514_v60, %v11777_v3  ;;  %v4531_v10 = vshll.u32 %v4338_v6, 16  ;;  %4727 = vst [vmem:[#allocation2 + $0x70] sm:$0xf] %v4500_v22 }
 0x394   : > { %v11787_v31 = vrot.slane %v4528_v14, 7  ;;  %v4344_v44 = vpack.c.bf16 %v4312_v29, %v4312_v29  ;;  %v11790_v33 = vrot.slane %v4537_v8, 7  ;;  %v4545_v7 = vshrl.u32 %v4340_v19, 16 }
 0x395   : > { %13455 = vst [vmem:[#allocation17_spill] sm:$0xff] %v11781_v20  ;;  %v4526_v57 = vrot.slane %v11781_v20, 4  ;;  %v11792_v45 = vpack.c.bf16 %v4313_v25, %v4313_v25  ;;  %v4353_v36 = vshll.u32 %v11625_v4, 16  ;;  %v4517_v12 = vsel %vm10109_vm5, %v4509_v61, %v4516_v43 }
 0x396   : > { %13456 = vst [vmem:[#allocation18_spill] sm:$0xff] %v11784_v28  ;;  %v4533_v40 = vor.u32 %v4531_v10, %v11787_v31  ;;  %v4543_v1 = vrot.slane %v11790_v33, 4  ;;  %v11799_v27 = vrot.slane %v4545_v7, 7  ;;  %v4548_v6 = vshll.u32 %v4340_v19, 16 }
 0x397   : > { %13457 = vst [vmem:[#allocation19_spill] sm:$0xff] %v11790_v33  ;;  %v4554_v29 = vshrl.u32 %v11772_v13, 16  ;;  %v4346_v60 = vpack.c.bf16 %v4314_v9, %v4314_v9  ;;  %v4355_v14 = vor.u32 %v4353_v36, %v11648_v16  ;;  %v4562_v4 = vshrl.u32 %v4342_v41, 16  ;;  %v4672_v16 = vld [vmem:[#allocation2 + $0x14] sm:$0x1] }
 0x398   : > { %4734 = vst [vmem:[#allocation2 + $0x7c] sm:$0xf] %v4517_v12  ;;  %v4534_v25 = vsel %vm10109_vm5, %v4526_v57, %v4533_v40  ;;  %v4365_v22 = vrot.slane %v11650_v58, 4  ;;  %v4550_v61 = vor.u32 %v4548_v6, %v11799_v27  ;;  %v4571_v43 = vshrl.u32 %v11784_v28, 16  ;;  %v4679_v40 = vld [vmem:[#allocation2 + $0x20] sm:$0x1] }
 0x399   : > { %v11807_v8 = vrot.slane %v4554_v29, 7  ;;  %4741 = vst [vmem:[#allocation2 + $0x88] sm:$0xf] %v4534_v25  ;;  %v11811_v10 = vrot.slane %v4562_v4, 7  ;;  %v4565_v9 = vshll.u32 %v4342_v41, 16  ;;  %v4579_v7 = vshrl.u32 %v4344_v44, 16 }
 0x39a   : > { %v4399_v36 = vrot.slane %v11665_v15, 4  ;;  %v11816_v57 = vsel %vm10109_vm5, %v4543_v1, %v4550_v61  ;;  %v11819_v12 = vrot.slane %v4571_v43, 7  ;;  %v4582_v25 = vshll.u32 %v4344_v44, 16  ;;  %v4686_v4 = vld [vmem:[#allocation2 + $0x2c] sm:$0x1] }
 0x39b   : > { %13458 = vst [vmem:[#allocation20_spill] sm:$0xff] %v11807_v8  ;;  %v4560_v58 = vrot.slane %v11807_v8, 4  ;;  %v4567_v6 = vor.u32 %v4565_v9, %v11811_v10  ;;  %v11822_v29 = vrot.slane %v4579_v7, 7  ;;  %v4588_v41 = vshrl.u32 %v11792_v45, 16  ;;  %v4707_v8 = vld [vmem:[#allocation2 + $0x50] sm:$0x1] }
 0x39c   : > { %13459 = vst [vmem:[#allocation7_spill] sm:$0xff] %v11816_v57  ;;  %v4416_v19 = vrot.slane %v11686_v51, 4  ;;  %v4433_v15 = vrot.slane %v11690_v11, 4  ;;  %v4577_v1 = vrot.slane %v11819_v12, 4  ;;  %v4596_v61 = vshrl.u32 %v4346_v60, 16 }
 0x39d   : > { %13460 = vst [vmem:[#allocation8_spill] sm:$0xff] %v11819_v12  ;;  %v4700_v57 = vld [vmem:[#allocation2 + $0x44] sm:$0x1]  ;;  %v4450_v43 = vrot.slane %v11704_v38, 4  ;;  %v4568_v9 = vsel %vm10109_vm5, %v4560_v58, %v4567_v6  ;;  %v4584_v7 = vor.u32 %v4582_v25, %v11822_v29  ;;  %v11832_v44 = vrot.slane %v4588_v41, 7 }
 0x39e   : > { %v4714_v28 = vld [vmem:[#allocation2 + $0x5c] sm:$0x1]  ;;  %v11834_v33 = vrot.slane %v4596_v61, 7  ;;  %v4599_v51 = vshll.u32 %v4346_v60, 16  ;;  %v13461_v11 = vshll.u32 %v11558_v35, 16  ;;  %v4467_v6 = vrot.slane %v11723_v34, 4 }
 0x39f   : > { %v9857_v13 = vld [vmem:[#allocation2 + $0xc] sm:$0xf]  ;;  %4755 = vst [vmem:[#allocation2 + $0xa0] sm:$0xf] %v4568_v9  ;;  %v4721_v58 = vld [vmem:[#allocation2 + $0x68] sm:$0x1]  ;;  %v11846_v25 = vsel %vm10109_vm5, %v4577_v1, %v4584_v7  ;;  %v4673_v35 = vsel %vm10129_vm7, %v4365_v22, %v4672_v16  ;;  %v4687_v9 = vsel %vm10129_vm7, %v4399_v36, %v4686_v4  ;;  %v4694_v22 = vsel %vm10129_vm7, %v4416_v19, %v4693_v17 }
 0x3a0   : > { %v11839_v12 = vor.u32 %v13461_v11, %v11583_v50  ;;  %v4669_v38 = vsel %vm10117_vm6, %v4355_v14, %v9857_v13  ;;  %v4594_v41 = vrot.slane %v11832_v44, 4  ;;  %v4728_v50 = vld [vmem:[#allocation2 + $0x74] sm:$0x1]  ;;  %v4484_v60 = vrot.slane %v11738_v37, 4  ;;  %4674 = vst [vmem:[#allocation2 + $0x14] sm:$0x1] %v4673_v35 }
 0x3a1   : > { %4670 = vst [vmem:[#allocation2 + $0xc] sm:$0xf] %v4669_v38  ;;  %v4601_v61 = vor.u32 %v4599_v51, %v11834_v33  ;;  %v13463_v13 = vrot.slane %v11656_v48, 4  ;;  %v4735_v14 = vld [vmem:[#allocation2 + $0x80] sm:$0x1]  ;;  %v4501_v1 = vrot.slane %v11761_v56, 4  ;;  %v4708_v36 = vsel %vm10129_vm7, %v4450_v43, %v4707_v8 }
 0x3a2   : > { %v4742_v16 = vld [vmem:[#allocation2 + $0x8c] sm:$0x1]  ;;  %v4518_v37 = vrot.slane %v11777_v3, 4  ;;  %4688 = vst [vmem:[#allocation2 + $0x2c] sm:$0x1] %v4687_v9  ;;  %v4535_v56 = vrot.slane %v11787_v31, 4  ;;  %v4715_v17 = vsel %vm10129_vm7, %v4467_v6, %v4714_v28  ;;  %v4722_v63 = vsel %vm10129_vm7, %v4484_v60, %v4721_v58 }
 0x3a3   : > { %v4680_v34 = vsel %vm10129_vm7, %v13463_v13, %v4679_v40  ;;  %v11865_v7 = vsel %vm10109_vm5, %v4594_v41, %v4601_v61  ;;  %v4701_v40 = vsel %vm10129_vm7, %v4433_v15, %v4700_v57  ;;  %v4749_v51 = vld [vmem:[#allocation2 + $0x98] sm:$0x1]  ;;  %4695 = vst [vmem:[#allocation2 + $0x38] sm:$0x1] %v4694_v22  ;;  %v4756_v19 = vld [vmem:[#allocation2 + $0xa4] sm:$0x1]  ;;  %v4729_v31 = vsel %vm10129_vm7, %v4501_v1, %v4728_v50 }
 0x3a4   : > { %4681 = vst [vmem:[#allocation2 + $0x20] sm:$0x1] %v4680_v34  ;;  %v4552_v3 = vrot.slane %v11799_v27, 4  ;;  %v4569_v4 = vrot.slane %v11811_v10, 4  ;;  %v9375_v8 = vld [vmem:[%s13357_s3 + $0x8] sm:$0xff]  ;;  %v9405_v28 = vld [vmem:[%s13357_s3 + $0xf8] sm:$0xff]  ;;  %v4736_v57 = vsel %vm10129_vm7, %v4518_v37, %v4735_v14  ;;  %v4743_v38 = vsel %vm10129_vm7, %v4535_v56, %v4742_v16 }
 0x3a5   : > { %4702 = vst [vmem:[#allocation2 + $0x44] sm:$0x1] %v4701_v40  ;;  %v4586_v27 = vrot.slane %v11822_v29, 4  ;;  %v9397_v10 = vld [vmem:[%s13357_s3 + $0xb8] sm:$0xff]  ;;  %v4763_v43 = vld [vmem:[#allocation2 + $0xb0] sm:$0x1]  ;;  %5812 = vmatpush.bf16.msra.mxu1 %v9375_v8  ;;  %6826 = vmatpush.bf16.msrb.mxu0 %v9405_v28 }
 0x3a6   : > { %4709 = vst [vmem:[#allocation2 + $0x50] sm:$0x1] %v4708_v36  ;;  %v9389_v15 = vld [vmem:[%s13357_s3 + $0x78] sm:$0xff]  ;;  %v4370_v11 = vshll.u32 %v11629_v62, 16  ;;  %v4780_v29 = vld [vmem:[#allocation2] sm:$0xf]  ;;  %v4750_v6 = vsel %vm10129_vm7, %v4552_v3, %v4749_v51  ;;  %v4757_v62 = vsel %vm10129_vm7, %v4569_v4, %v4756_v19  ;;  %5984 = vmatpush.bf16.msrb.mxu3 %v9397_v10 }
 0x3a7   : > { %4716 = vst [vmem:[#allocation2 + $0x5c] sm:$0x1] %v4715_v17  ;;  %v4603_v58 = vrot.slane %v11834_v33, 4  ;;  %v4770_v41 = vld [vmem:[#allocation2 + $0xbc] sm:$0x1]  ;;  %v4591_v50 = vshll.u32 %v11792_v45, 16  ;;  %v4764_v61 = vsel %vm10129_vm7, %v4586_v27, %v4763_v43  ;;  %5895 = vmatpush.bf16.msrb.mxu2 %v9389_v15 }
 0x3a8   : > { %4723 = vst [vmem:[#allocation2 + $0x68] sm:$0x1] %v4722_v63  ;;  %v11902_v35 = vor.u32 %v4370_v11, %v11652_v26  ;;  %v9404_v33 = vld [vmem:[%s13357_s3 + $0xf0] sm:$0xff]  ;;  %v4784_v60 = vld [vmem:[#allocation2 + $0x8] sm:$0x1]  ;;  %v9374_v34 = vld [vmem:[%s13357_s3] sm:$0xff] }
 0x3a9   : > { %4730 = vst [vmem:[#allocation2 + $0x74] sm:$0x1] %v4729_v31  ;;  %v9396_v26 = vld [vmem:[%s13357_s3 + $0xb0] sm:$0xff]  ;;  %v11916_v45 = vor.u32 %v4591_v50, %v11832_v44  ;;  %v4787_v1 = vld [vmem:[#allocation2 + $0xcc] sm:$0xf]  ;;  %v4771_v9 = vsel %vm10129_vm7, %v4603_v58, %v4770_v41  ;;  %5813 = vmatpush.bf16.msra.mxu1 %v9374_v34  ;;  %6827 = vmatpush.bf16.msrb.mxu0 %v9404_v33  ;;  %v4387_v40 = vshll.u32 %v11637_v47, 16 }
 0x3aa   : > { %4737 = vst [vmem:[#allocation2 + $0x80] sm:$0x1] %v4736_v57  ;;  %v4939_v13 = vld [vmem:[#allocation2 + $0x10] sm:$0x8]  ;;  %v4791_v22 = vld [vmem:[#allocation2 + $0xd4] sm:$0x1]  ;;  %v4781_v44 = vsel %vm10117_vm6, %v11902_v35, %v4780_v29  ;;  %5985 = vmatpush.bf16.msrb.mxu3 %v9396_v26 }
 0x3ab   : > { %4744 = vst [vmem:[#allocation2 + $0x8c] sm:$0x1] %v4743_v38  ;;  %v9388_v14 = vld [vmem:[%s13357_s3 + $0x70] sm:$0xff]  ;;  %v9403_v16 = vld [vmem:[%s13357_s3 + $0xe8] sm:$0xff]  ;;  %v4675_v37 = vld [vmem:[#allocation2 + $0x18] sm:$0xf]  ;;  %v4389_v4 = vor.u32 %v4387_v40, %v11663_v24 }
 0x3ac   : > { %4751 = vst [vmem:[#allocation2 + $0x98] sm:$0x1] %v4750_v6  ;;  %v13464_v51 = vrot.slane %v11656_v48, 4  ;;  %v8897_v36 = vrot.slane %v4939_v13, 11  ;;  %5896 = vmatpush.bf16.msrb.mxu2 %v9388_v14  ;;  %v9395_v17 = vld [vmem:[%s13357_s3 + $0xa8] sm:$0xff]  ;;  %v4404_v47 = vshll.u32 %v11646_v23, 16  ;;  %v4788_v48 = vsel %vm10117_vm6, %v11916_v45, %v4787_v1 }
 0x3ad   : > { %4758 = vst [vmem:[#allocation2 + $0xa4] sm:$0x1] %v4757_v62  ;;  %v9387_v19 = vld [vmem:[%s13357_s3 + $0x68] sm:$0xff]  ;;  %v4682_v3 = vld [vmem:[#allocation2 + $0x24] sm:$0xf]  ;;  %v4421_v31 = vshll.u32 %v11658_v2, 16  ;;  %v4792_v23 = vsel %vm10129_vm7, %v4603_v58, %v4791_v22  ;;  %6828 = vmatpush.bf16.msrb.mxu0 %v9403_v16 }
 0x3ae   : > { %4765 = vst [vmem:[#allocation2 + $0xb0] sm:$0x1] %v4764_v61  ;;  %v4785_v56 = vsel %vm10129_vm7, %v13464_v51, %v4784_v60  ;;  %v4689_v63 = vld [vmem:[#allocation2 + $0x30] sm:$0xf]  ;;  %v9413_v8 = vld [vmem:[%s13357_s3 + $0x138] sm:$0xff]  ;;  %v4406_v28 = vor.u32 %v4404_v47, %v11678_v0  ;;  %v9402_v57 = vld [vmem:[%s13357_s3 + $0xe0] sm:$0xff]  ;;  %5986 = vmatpush.bf16.msrb.mxu3 %v9395_v17  ;;  %v4683_v6 = vsel %vm10117_vm6, %v4389_v4, %v4682_v3 }
 0x3af   : > { %4769 = vst [vmem:[#allocation2 + $0xb8] sm:$0xf] %v11865_v7  ;;  %v5031_v27 = vld [vmem:[#allocation2 + $0x14] sm:$0x1]  ;;  %v4423_v24 = vor.u32 %v4421_v31, %v11688_v18  ;;  %v4938_v2 = vld [vmem:[#allocation2 + $0x4] sm:$0x8]  ;;  %v4676_v18 = vsel %vm10117_vm6, %v11902_v35, %v4675_v37  ;;  %6915 = vmatpush.bf16.msrb.mxu1 %v9413_v8 }
 0x3b0   : > { %4772 = vst [vmem:[#allocation2 + $0xbc] sm:$0x1] %v4771_v9  ;;  %v5032_v15 = vsel %vm10204_vm8, %v8897_v36, %v5031_v27  ;;  %5897 = vmatpush.bf16.msrb.mxu2 %v9387_v19  ;;  %v9394_v0 = vld [vmem:[%s13357_s3 + $0xa0] sm:$0xff]  ;;  %v4696_v11 = vld [vmem:[#allocation2 + $0x3c] sm:$0xf]  ;;  %v4438_v38 = vshll.u32 %v11672_v32, 16  ;;  %v4690_v32 = vsel %vm10117_vm6, %v4406_v28, %v4689_v63 }
 0x3b1   : > { %4782 = vst [vmem:[#allocation2] sm:$0xf] %v4781_v44  ;;  %v9386_v43 = vld [vmem:[%s13357_s3 + $0x60] sm:$0xff]  ;;  %v4703_v29 = vld [vmem:[#allocation2 + $0x48] sm:$0xf]  ;;  %v4455_v58 = vshll.u32 %v11680_v53, 16  ;;  %6829 = vmatpush.bf16.msrb.mxu0 %v9402_v57  ;;  %v4697_v33 = vsel %vm10117_vm6, %v4423_v24, %v4696_v11 }
 0x3b2   : > { %4786 = vst [vmem:[#allocation2 + $0x8] sm:$0x1] %v4785_v56  ;;  %v4440_v41 = vor.u32 %v4438_v38, %v11702_v5  ;;  %v4472_v50 = vshll.u32 %v11693_v42, 16  ;;  %v8896_v62 = vrot.slane %v4938_v2, 11  ;;  %v4489_v53 = vshll.u32 %v11696_v49, 16  ;;  %5987 = vmatpush.bf16.msrb.mxu3 %v9394_v0  ;;  %v9393_v42 = vld [vmem:[%s13357_s3 + $0x98] sm:$0xff] }
 0x3b3   : > { %4789 = vst [vmem:[#allocation2 + $0xcc] sm:$0xf] %v4788_v48  ;;  %v4506_v35 = vshll.u32 %v11717_v46, 16  ;;  %v9385_v5 = vld [vmem:[%s13357_s3 + $0x58] sm:$0xff]  ;;  %v4710_v60 = vld [vmem:[#allocation2 + $0x54] sm:$0xf]  ;;  %v4457_v13 = vor.u32 %v4455_v58, %v11721_v54 }
 0x3b4   : > { %4790 = vst [vmem:[#allocation2 + $0xd0] sm:$0xf] %v11865_v7  ;;  %v9401_v7 = vld [vmem:[%s13357_s3 + $0xd8] sm:$0xff]  ;;  %5898 = vmatpush.bf16.msrb.mxu2 %v9386_v43  ;;  %v4523_v61 = vshll.u32 %v11745_v59, 16  ;;  %v9400_v46 = vld [vmem:[%s13357_s3 + $0xd0] sm:$0xff]  ;;  %v4474_v22 = vor.u32 %v4472_v50, %v11736_v55  ;;  %v4704_v59 = vsel %vm10117_vm6, %v4440_v41, %v4703_v29  ;;  %v4491_v40 = vor.u32 %v4489_v53, %v11740_v39  ;;  %v13466_v63 = vld [vmem:[#allocation17_spill] sm:$0xff] }
 0x3b5   : > { %4793 = vst [vmem:[#allocation2 + $0xd4] sm:$0x1] %v4792_v23  ;;  %v4717_v26 = vld [vmem:[#allocation2 + $0x60] sm:$0xf]  ;;  %v9392_v1 = vld [vmem:[%s13357_s3 + $0x90] sm:$0xff]  ;;  %6830 = vmatpush.bf16.msrb.mxu0 %v9401_v7  ;;  %v4508_v19 = vor.u32 %v4506_v35, %v11763_v30  ;;  %v4540_v3 = vshll.u32 %v11756_v52, 16  ;;  %v4711_v28 = vsel %vm10117_vm6, %v4457_v13, %v4710_v60 }
 0x3b6   : > { %5033 = vst [vmem:[#allocation2 + $0x14] sm:$0x1] %v5032_v15  ;;  %v4724_v9 = vld [vmem:[#allocation2 + $0x6c] sm:$0xf]  ;;  %v4731_v54 = vld [vmem:[#allocation2 + $0x78] sm:$0xf]  ;;  %5988 = vmatpush.bf16.msrb.mxu3 %v9393_v42  ;;  %v4525_v4 = vor.u32 %v4523_v61, %v13466_v63  ;;  %v4718_v2 = vsel %vm10117_vm6, %v4474_v22, %v4717_v26 }
 0x3b7   : > { %4677 = vst [vmem:[#allocation2 + $0x18] sm:$0xf] %v4676_v18  ;;  %v9384_v55 = vld [vmem:[%s13357_s3 + $0x50] sm:$0xff]  ;;  %v4738_v17 = vld [vmem:[#allocation2 + $0x84] sm:$0xf]  ;;  %v13468_v57 = vld [vmem:[#allocation19_spill] sm:$0xff]  ;;  %v4725_v18 = vsel %vm10117_vm6, %v4491_v40, %v4724_v9 }
 0x3b8   : > { %v4794_v49 = vld [vmem:[#allocation2] sm:$0x2]  ;;  %4684 = vst [vmem:[#allocation2 + $0x24] sm:$0xf] %v4683_v6  ;;  %v4884_v16 = vld [vmem:[#allocation2] sm:$0x1]  ;;  %5899 = vmatpush.bf16.msrb.mxu2 %v9385_v5  ;;  %v4542_v30 = vor.u32 %v4540_v3, %v13468_v57 }
 0x3b9   : > { %v8878_v34 = vrot.slane %v4794_v49, 9  ;;  %v5028_v14 = vld [vmem:[#allocation2 + $0x8] sm:$0x1]  ;;  %4691 = vst [vmem:[#allocation2 + $0x30] sm:$0xf] %v4690_v32  ;;  %v13467_v31 = vld [vmem:[#allocation16_spill] sm:$0xff]  ;;  %6831 = vmatpush.bf16.msrb.mxu0 %v9400_v46  ;;  %v4732_v32 = vsel %vm10117_vm6, %v4508_v19, %v4731_v54 }
 0x3ba   : > { %v4811_v44 = vld [vmem:[#allocation2 + $0xcc] sm:$0x2]  ;;  %v5029_v37 = vsel %vm10204_vm8, %v8896_v62, %v5028_v14  ;;  %4698 = vst [vmem:[#allocation2 + $0x3c] sm:$0xf] %v4697_v33  ;;  %v4935_v47 = vld [vmem:[#allocation2 + $0xcc] sm:$0x1]  ;;  %5989 = vmatpush.bf16.msrb.mxu3 %v9392_v1  ;;  %v4739_v33 = vsel %vm10117_vm6, %v4525_v4, %v4738_v17 }
 0x3bb   : > { %v8895_v51 = vrot.slane %v4811_v44, 9  ;;  %v4885_v56 = vsel %vm10129_vm7, %v8878_v34, %v4884_v16  ;;  %v4955_v36 = vld [vmem:[#allocation2 + $0xd0] sm:$0x8]  ;;  %5030 = vst [vmem:[#allocation2 + $0x8] sm:$0x1] %v5029_v37  ;;  %v4557_v8 = vshll.u32 %v13467_v31, 16 }
 0x3bc   : > { %4886 = vst [vmem:[#allocation2] sm:$0x1] %v4885_v56  ;;  %v8913_v39 = vrot.slane %v4955_v36, 11  ;;  %v4745_v48 = vld [vmem:[#allocation2 + $0x90] sm:$0xf]  ;;  %v9399_v0 = vld [vmem:[%s13357_s3 + $0xc8] sm:$0xff]  ;;  %5900 = vmatpush.bf16.msrb.mxu2 %v9384_v55 }
 0x3bd   : > { %v4936_v23 = vsel %vm10129_vm7, %v8895_v51, %v4935_v47  ;;  %v5079_v27 = vld [vmem:[#allocation2 + $0xd4] sm:$0x1]  ;;  %4705 = vst [vmem:[#allocation2 + $0x48] sm:$0xf] %v4704_v59  ;;  %v9391_v43 = vld [vmem:[%s13357_s3 + $0x88] sm:$0xff]  ;;  %v13470_v41 = vld [vmem:[#allocation20_spill] sm:$0xff]  ;;  %v4746_v60 = vsel %vm10117_vm6, %v4542_v30, %v4745_v48  ;;  %6832 = vmatpush.bf16.msrb.mxu0 %v9399_v0 }
 0x3be   : > { %v13469_v24 = vld [vmem:[#allocation18_spill] sm:$0xff]  ;;  %4937 = vst [vmem:[#allocation2 + $0xcc] sm:$0x1] %v4936_v23  ;;  %v5080_v15 = vsel %vm10204_vm8, %v8913_v39, %v5079_v27  ;;  %v9383_v11 = vld [vmem:[%s13357_s3 + $0x48] sm:$0xff]  ;;  %v4752_v38 = vld [vmem:[#allocation2 + $0x9c] sm:$0xf]  ;;  %v4559_v50 = vor.u32 %v4557_v8, %v13470_v41  ;;  %5990 = vmatpush.bf16.msrb.mxu3 %v9391_v43 }
 0x3bf   : > { %v4574_v52 = vshll.u32 %v13469_v24, 16  ;;  %5081 = vst [vmem:[#allocation2 + $0xd4] sm:$0x1] %v5080_v15  ;;  %v9739_v29 = vld [vmem:[#allocation2] sm:$0xf0]  ;;  %v13472_v55 = vld [vmem:[#allocation7_spill] sm:$0xff] }
 0x3c0   : > { %v9740_v58 = vld [vmem:[#allocation2] sm:$0xe]  ;;  %v4759_v6 = vld [vmem:[#allocation2 + $0xa8] sm:$0xf]  ;;  %4712 = vst [vmem:[#allocation2 + $0x54] sm:$0xf] %v4711_v28  ;;  %5901 = vmatpush.bf16.msrb.mxu2 %v9383_v11  ;;  %v4753_v9 = vsel %vm10117_vm6, %v4559_v50, %v4752_v38 }
 0x3c1   : > { %v12040_v62 = vld [vmem:[#allocation2 + $0x28] sm:$0x8]  ;;  %v4766_v7 = vld [vmem:[#allocation2 + $0xb4] sm:$0xf]  ;;  %v13471_v53 = vld [vmem:[#allocation8_spill] sm:$0xff]  ;;  %v9741_v49 = vor.u32 %v9740_v58, %v9739_v29 }
 0x3c2   : > { %v4576_v35 = vor.u32 %v4574_v52, %v13471_v53  ;;  %4719 = vst [vmem:[#allocation2 + $0x60] sm:$0xf] %v4718_v2  ;;  %v9398_v42 = vld [vmem:[%s13357_s3 + $0xc0] sm:$0xff]  ;;  %v4795_v5 = vld [vmem:[#allocation2 + $0xc] sm:$0x2]  ;;  %v8899_v37 = vrot.slane %v12040_v62, 11  ;;  %v4767_v36 = vsel %vm10117_vm6, %v11916_v45, %v4766_v7 }
 0x3c3   : > { %4726 = vst [vmem:[#allocation2 + $0x6c] sm:$0xf] %v4725_v18  ;;  %v5118_v61 = vld [vmem:[#allocation2 + $0x8] sm:$0x1]  ;;  %v4796_v46 = vld [vmem:[#allocation2 + $0x18] sm:$0x2]  ;;  %6833 = vmatpush.bf16.msrb.mxu0 %v9398_v42 }
 0x3c4   : > { %v4773_v26 = vld [vmem:[#allocation2 + $0xc0] sm:$0xf]  ;;  %4733 = vst [vmem:[#allocation2 + $0x78] sm:$0xf] %v4732_v32  ;;  %v5262_v1 = vunpack.c.l.b16 %v5118_v61  ;;  %v8879_v59 = vrot.slane %v4795_v5, 9  ;;  %v4760_v16 = vsel %vm10117_vm6, %v4576_v35, %v4759_v6  ;;  %v8880_v51 = vrot.slane %v4796_v46, 9 }
 0x3c5   : > { %v9543_v13 = vld [vmem:[#allocation2] sm:$0xff]   ;;  %4740 = vst [vmem:[#allocation2 + $0x84] sm:$0xf] %v4739_v33  ;;  %v4887_v54 = vld [vmem:[#allocation2 + $0xc] sm:$0x1]  ;;  %v5550_v19 = vrot.slane %v9741_v49, 1  ;;  %v4774_v31 = vsel %vm10117_vm6, %v11839_v12, %v4773_v26 }
 0x3c6   : > { %v9390_v34 = vld [vmem:[%s13357_s3 + $0x80] sm:$0xff]  ;;  %v5297_v22 = vshll.u32 %v9543_v13, 16  ;;  %5814 = vmatmul.bf16.vlgmr.msra.gmra.mxu1 %v9543_v13  ;;  %4747 = vst [vmem:[#allocation2 + $0x90] sm:$0xf] %v4746_v60  ;;  %v5278_v40 = vpack.c.b16 %v5262_v1, %v5262_v1  ;;  %v4940_v56 = vld [vmem:[#allocation2 + $0x1c] sm:$0x8]  ;;  %v4888_v45 = vsel %vm10129_vm7, %v8879_v59, %v4887_v54 }
 0x3c7   : > { %v9382_v14 = vld [vmem:[%s13357_s3 + $0x40] sm:$0xff]  ;;  %4748 = vst [vmem:[#allocation2 + $0x94] sm:$0xf] %v13472_v55  ;;  %v4798_v3 = vld [vmem:[#allocation2 + $0x30] sm:$0x2]  ;;  %v5295_v47 = vshrl.u32 %v9543_v13, 16  ;;  %5991 = vmatpush.bf16.msrb.mxu3 %v9390_v34 }
 0x3c8   : > { %v4797_v44 = vld [vmem:[#allocation2 + $0x24] sm:$0x2]  ;;  %v5299_v17 = vrot.slane %v5297_v22, 1  ;;  %4754 = vst [vmem:[#allocation2 + $0x9c] sm:$0xf] %v4753_v9  ;;  %5902 = vmatpush.bf16.msrb.mxu2 %v9382_v14  ;;  %v5551_v39 = vrot.slane %v5278_v40, 1 }
 0x3c9   : > { %v5302_v48 = vshll.u32 %v5278_v40, 16  ;;  %v4890_v63 = vld [vmem:[#allocation2 + $0x18] sm:$0x1]  ;;  %v8881_v4 = vrot.slane %v4797_v44, 9  ;;  %v4943_v8 = vld [vmem:[#allocation2 + $0x40] sm:$0x8] }
 0x3ca   : > { %4761 = vst [vmem:[#allocation2 + $0xa8] sm:$0xf] %v4760_v16  ;;  %v5119_v28 = vld [vmem:[#allocation2 + $0x14] sm:$0x1]  ;;  %v8898_v27 = vrot.slane %v4940_v56, 11  ;;  %v5300_v30 = vor.u32 %v5299_v17, %v5295_v47  ;;  %v5552_v24 = vsel %vm1503_vm10, %v5550_v19, %v5551_v39  ;;  %v8882_v12 = vrot.slane %v4798_v3, 9 }
 0x3cb   : > { %v9412_v23 = vld [vmem:[%s13357_s3 + $0x130] sm:$0xff]  ;;  %v4799_v57 = vld [vmem:[#allocation2 + $0x3c] sm:$0x2]  ;;  %4762 = vst [vmem:[#allocation2 + $0xac] sm:$0xf] %v11846_v25  ;;  %v5304_v52 = vrot.slane %v5302_v48, 1  ;;  %5992 = vmatmul.bf16.vlgmr.msrb.gmra.mxu3 %v5552_v24  ;;  %v4891_v15 = vsel %vm10129_vm7, %v8880_v51, %v4890_v63  ;;  %v5263_v50 = vunpack.c.l.b16 %v5119_v28 }
 0x3cc   : > { %v5034_v20 = vld [vmem:[#allocation2 + $0x20] sm:$0x1]  ;;  %v4942_v2 = vld [vmem:[#allocation2 + $0x34] sm:$0x8]  ;;  %4768 = vst [vmem:[#allocation2 + $0xb4] sm:$0xf] %v4767_v36  ;;  %6916 = vmatpush.bf16.msrb.mxu1 %v9412_v23 }
 0x3cd   : > { %v4893_v0 = vld [vmem:[#allocation2 + $0x24] sm:$0x1]  ;;  %v4896_v43 = vld [vmem:[#allocation2 + $0x30] sm:$0x1]  ;;  %4775 = vst [vmem:[#allocation2 + $0xc0] sm:$0xf] %v4774_v31  ;;  %v5305_v11 = vsel %vm1246_vm9, %v5300_v30, %v5304_v52  ;;  %v5035_v29 = vsel %vm10204_vm8, %v8898_v27, %v5034_v20  ;;  %v5279_v14 = vpack.c.b16 %v5263_v50, %v5263_v50 }
 0x3ce   : > { %v4894_v25 = vsel %vm10129_vm7, %v8881_v4, %v4893_v0  ;;  %v8883_v38 = vrot.slane %v4799_v57, 9  ;;  %v4800_v18 = vld [vmem:[#allocation2 + $0x48] sm:$0x2]  ;;  %4889 = vst [vmem:[#allocation2 + $0xc] sm:$0x1] %v4888_v45  ;;  %5903 = vmatmul.bf16.vlgmr.msrb.gmra.mxu2 %v5305_v11  ;;  %v8900_v58 = vrot.slane %v4942_v2, 11  ;;  %v4897_v32 = vsel %vm10129_vm7, %v8882_v12, %v4896_v43 }
 0x3cf   : > { %v4944_v6 = vld [vmem:[#allocation2 + $0x4c] sm:$0x8]  ;;  %v8901_v41 = vrot.slane %v4943_v8, 11  ;;  %4892 = vst [vmem:[#allocation2 + $0x18] sm:$0x1] %v4891_v15  ;;  %v8884_v7 = vrot.slane %v4800_v18, 9 }
 0x3d0   : > { %v5037_v62 = vld [vmem:[#allocation2 + $0x2c] sm:$0x1]  ;;  %v4945_v53 = vld [vmem:[#allocation2 + $0x58] sm:$0x8]  ;;  %v9943_v35 = vld [vmem:[#allocation2 + $0xc] sm:$0xe] }
 0x3d1   : > { %4895 = vst [vmem:[#allocation2 + $0x24] sm:$0x1] %v4894_v25  ;;  %v5038_v33 = vsel %vm10204_vm8, %v8899_v37, %v5037_v62  ;;  %v4899_v42 = vld [vmem:[#allocation2 + $0x3c] sm:$0x1]  ;;  %v4801_v5 = vld [vmem:[#allocation2 + $0x54] sm:$0x2] }
 0x3d2   : > { %5036 = vst [vmem:[#allocation2 + $0x20] sm:$0x1] %v5035_v29  ;;  %v4900_v60 = vsel %vm10129_vm7, %v8883_v38, %v4899_v42  ;;  %v5040_v61 = vld [vmem:[#allocation2 + $0x38] sm:$0x1]  ;;  %v8885_v49 = vrot.slane %v4801_v5, 9  ;;  %v8902_v46 = vrot.slane %v4944_v6, 11 }
 0x3d3   : > { %4898 = vst [vmem:[#allocation2 + $0x30] sm:$0x1] %v4897_v32  ;;  %v5041_v26 = vsel %vm10204_vm8, %v8900_v58, %v5040_v61  ;;  %v4902_v13 = vld [vmem:[#allocation2 + $0x48] sm:$0x1]  ;;  %v5043_v34 = vld [vmem:[#allocation2 + $0x44] sm:$0x1] }
 0x3d4   : > { %5039 = vst [vmem:[#allocation2 + $0x2c] sm:$0x1] %v5038_v33  ;;  %v4903_v1 = vsel %vm10129_vm7, %v8884_v7, %v4902_v13  ;;  %v4905_v9 = vld [vmem:[#allocation2 + $0x54] sm:$0x1]  ;;  %v4802_v22 = vld [vmem:[#allocation2 + $0x60] sm:$0x2]  ;;  %v5044_v59 = vsel %vm10204_vm8, %v8901_v41, %v5043_v34 }
 0x3d5   : > { %4901 = vst [vmem:[#allocation2 + $0x3c] sm:$0x1] %v4900_v60  ;;  %v5046_v44 = vld [vmem:[#allocation2 + $0x50] sm:$0x1]  ;;  %v8886_v16 = vrot.slane %v4802_v22, 9  ;;  %v8903_v37 = vrot.slane %v4945_v53, 11  ;;  %v4906_v36 = vsel %vm10129_vm7, %v8885_v49, %v4905_v9 }
 0x3d6   : > { %v12094_v54 = vld [vmem:[#allocation2 + $0xc] sm:$0xff]   ;;  %5042 = vst [vmem:[#allocation2 + $0x38] sm:$0x1] %v5041_v26  ;;  %v5047_v55 = vsel %vm10204_vm8, %v8902_v46, %v5046_v44  ;;  %v5554_v17 = vrot.slane %v5279_v14, 1  ;;  %v4908_v19 = vld [vmem:[#allocation2 + $0x60] sm:$0x1] }
 0x3d7   : > { %v12096_v40 = vld [vmem:[#allocation2 + $0xc] sm:$0xf0]  ;;  %4904 = vst [vmem:[#allocation2 + $0x48] sm:$0x1] %v4903_v1  ;;  %v4909_v47 = vsel %vm10129_vm7, %v8886_v16, %v4908_v19  ;;  %v5049_v39 = vld [vmem:[#allocation2 + $0x5c] sm:$0x1]  ;;  %6834 = vmatmul.bf16.vlgmr.msrb.gmra.mxu0 %v12094_v54 }
 0x3d8   : > { %v5088_v51 = vld [vmem:[#allocation2 + $0xc] sm:$0xff]   ;;  %5045 = vst [vmem:[#allocation2 + $0x44] sm:$0x1] %v5044_v59  ;;  %v5050_v48 = vsel %vm10204_vm8, %v8903_v37, %v5049_v39  ;;  %v5314_v31 = vshll.u32 %v5279_v14, 16  ;;  %v9763_v52 = vld [vmem:[#allocation2 + $0x18] sm:$0xff]   ;;  %v12109_v15 = vld [vmem:[#allocation2 + $0x24] sm:$0xff]  }
 0x3d9   : > { %v9942_v56 = vld [vmem:[#allocation2 + $0xc] sm:$0xf0]  ;;  %4907 = vst [vmem:[#allocation2 + $0x54] sm:$0x1] %v4906_v36  ;;  %v5309_v63 = vshll.u32 %v5088_v51, 16  ;;  %5819 = vmatmul.bf16.gmra.mxu1 %v5088_v51  ;;  %v5307_v45 = vshrl.u32 %v5088_v51, 16 }
 0x3da   : > { %v9944_v3 = vor.u32 %v9943_v35, %v9942_v56  ;;  %5048 = vst [vmem:[#allocation2 + $0x50] sm:$0x1] %v5047_v55  ;;  %v5120_v23 = vld [vmem:[#allocation2 + $0x20] sm:$0x1]  ;;  %v5316_v57 = vrot.slane %v5314_v31, 1  ;;  %v6328_v43 = vshll.u32 %v9763_v52, 16 }
 0x3db   : > { %4910 = vst [vmem:[#allocation2 + $0x60] sm:$0x1] %v4909_v47  ;;  %v5311_v28 = vrot.slane %v5309_v63, 1  ;;  %v5264_v24 = vunpack.c.l.b16 %v5120_v23  ;;  %v9742_v20 = vld [vmem:[#allocation2 + $0x18] sm:$0xf0]  ;;  %v9411_v41 = vld [vmem:[%s13357_s3 + $0x128] sm:$0xff] }
 0x3dc   : > { %v5553_v4 = vrot.slane %v9944_v3, 1  ;;  %5051 = vst [vmem:[#allocation2 + $0x5c] sm:$0x1] %v5050_v48  ;;  %v9743_v12 = vld [vmem:[#allocation2 + $0x18] sm:$0xe]  ;;  %v6330_v58 = vrot.slane %v6328_v43, 1  ;;  %6917 = vmatpush.bf16.msrb.mxu1 %v9411_v41 }
 0x3dd   : > { %v5312_v27 = vor.u32 %v5311_v28, %v5307_v45  ;;  %v5280_v2 = vpack.c.b16 %v5264_v24, %v5264_v24  ;;  %v9945_v0 = vld [vmem:[#allocation2 + $0x24] sm:$0xf0]  ;;  %v9744_v11 = vor.u32 %v9743_v12, %v9742_v20  ;;  %v9946_v18 = vld [vmem:[#allocation2 + $0x24] sm:$0xe]  ;;  %v5121_v29 = vld [vmem:[#allocation2 + $0x2c] sm:$0x1] }
 0x3de   : > { %v5555_v8 = vsel %vm1503_vm10, %v5553_v4, %v5554_v17  ;;  %v4947_v50 = vld [vmem:[#allocation2 + $0x70] sm:$0x8]  ;;  %v4949_v32 = vld [vmem:[#allocation2 + $0x88] sm:$0x8]  ;;  %v4803_v62 = vld [vmem:[#allocation2 + $0x6c] sm:$0x2]  ;;  %v5265_v42 = vunpack.c.l.b16 %v5121_v29  ;;  %v9947_v60 = vor.u32 %v9946_v18, %v9945_v0 }
 0x3df   : > { %5997 = vmatmul.bf16.gmra.mxu3 %v5555_v8  ;;  %v5317_v30 = vsel %vm1246_vm9, %v5312_v27, %v5316_v57  ;;  %v5557_v25 = vrot.slane %v5280_v2, 1  ;;  %v5326_v38 = vshll.u32 %v5280_v2, 16  ;;  %v5556_v6 = vrot.slane %v9744_v11, 1  ;;  %v12114_v7 = vld [vmem:[#allocation2 + $0xa0] sm:$0x8]  ;;  %v12125_v16 = vld [vmem:[#allocation2 + $0x24] sm:$0xff]  }
 0x3e0   : > { %5908 = vmatmul.bf16.gmra.mxu2 %v5317_v30  ;;  %v6326_v53 = vshrl.u32 %v9763_v52, 16  ;;  %v4946_v5 = vld [vmem:[#allocation2 + $0x64] sm:$0x8]  ;;  %v8905_v61 = vrot.slane %v4947_v50, 11  ;;  %v8887_v46 = vrot.slane %v4803_v62, 9  ;;  %v8907_v26 = vrot.slane %v4949_v32, 11 }
 0x3e1   : > { %v5558_v35 = vsel %vm1503_vm10, %v5556_v6, %v5557_v25  ;;  %v5328_v33 = vrot.slane %v5326_v38, 1  ;;  %v8909_v13 = vrot.slane %v12114_v7, 11  ;;  %v5333_v34 = vshll.u32 %v12109_v15, 16  ;;  %v4911_v22 = vld [vmem:[#allocation2 + $0x6c] sm:$0x1]  ;;  %v9764_v7 = vld [vmem:[#allocation2 + $0x30] sm:$0xff]  }
 0x3e2   : > { %v12117_v49 = vor.u32 %v6330_v58, %v6326_v53  ;;  %v8904_v14 = vrot.slane %v4946_v5, 11  ;;  %v12123_v9 = vpack.c.b16 %v5265_v42, %v5265_v42  ;;  %v5052_v59 = vld [vmem:[#allocation2 + $0x68] sm:$0x1]  ;;  %v4804_v44 = vld [vmem:[#allocation2 + $0x78] sm:$0x2]  ;;  %v5559_v51 = vrot.slane %v9947_v60, 1 }
 0x3e3   : > { %v12127_v37 = vld [vmem:[#allocation2 + $0x24] sm:$0xf0]  ;;  %v4912_v56 = vsel %vm10129_vm7, %v8887_v46, %v4911_v22  ;;  %v4948_v36 = vld [vmem:[#allocation2 + $0x7c] sm:$0x8]  ;;  %v4805_v55 = vld [vmem:[#allocation2 + $0x84] sm:$0x2] }
 0x3e4   : > { %v5329_v1 = vsel %vm1246_vm9, %v12117_v49, %v5328_v33  ;;  %4913 = vst [vmem:[#allocation2 + $0x6c] sm:$0x1] %v4912_v56  ;;  %v5053_v17 = vsel %vm10204_vm8, %v8904_v14, %v5052_v59  ;;  %v4914_v19 = vld [vmem:[#allocation2 + $0x78] sm:$0x1]  ;;  %v5055_v3 = vld [vmem:[#allocation2 + $0x74] sm:$0x1] }
 0x3e5   : > { %v4806_v47 = vld [vmem:[#allocation2 + $0x90] sm:$0x2]  ;;  %v5335_v39 = vrot.slane %v5333_v34, 1  ;;  %5054 = vst [vmem:[#allocation2 + $0x68] sm:$0x1] %v5053_v17  ;;  %v8888_v48 = vrot.slane %v4804_v44, 9  ;;  %v5056_v63 = vsel %vm10204_vm8, %v8905_v61, %v5055_v3 }
 0x3e6   : > { %v4917_v4 = vld [vmem:[#allocation2 + $0x84] sm:$0x1]  ;;  %v5560_v31 = vrot.slane %v12123_v9, 1  ;;  %5057 = vst [vmem:[#allocation2 + $0x74] sm:$0x1] %v5056_v63  ;;  %v8889_v8 = vrot.slane %v4805_v55, 9 }
 0x3e7   : > { %6839 = vmatmul.bf16.gmra.mxu0 %v9763_v52  ;;  %v5058_v45 = vld [vmem:[#allocation2 + $0x80] sm:$0x1]  ;;  %v4807_v28 = vld [vmem:[#allocation2 + $0x9c] sm:$0x2]  ;;  %v4915_v23 = vsel %vm10129_vm7, %v8888_v48, %v4914_v19  ;;  %v8906_v27 = vrot.slane %v4948_v36, 11  ;;  %v8890_v57 = vrot.slane %v4806_v47, 9 }
 0x3e8   : > { %v4950_v30 = vld [vmem:[#allocation2 + $0x94] sm:$0x8]  ;;  %v4808_v24 = vld [vmem:[#allocation2 + $0xa8] sm:$0x2]  ;;  %4916 = vst [vmem:[#allocation2 + $0x78] sm:$0x1] %v4915_v23  ;;  %v5561_v42 = vsel %vm1503_vm10, %v5559_v51, %v5560_v31 }
 0x3e9   : > { %5824 = vmatmul.bf16.gmra.mxu1 %v9763_v52  ;;  %v4918_v52 = vsel %vm10129_vm7, %v8889_v8, %v4917_v4  ;;  %v4920_v20 = vld [vmem:[#allocation2 + $0x90] sm:$0x1]  ;;  %v5061_v12 = vld [vmem:[#allocation2 + $0x8c] sm:$0x1]  ;;  %v5059_v2 = vsel %vm10204_vm8, %v8906_v27, %v5058_v45  ;;  %v8891_v11 = vrot.slane %v4807_v28, 9  ;;  %v8908_v38 = vrot.slane %v4950_v30, 11 }
 0x3ea   : > { %4919 = vst [vmem:[#allocation2 + $0x84] sm:$0x1] %v4918_v52  ;;  %v4921_v0 = vsel %vm10129_vm7, %v8890_v57, %v4920_v20  ;;  %v5062_v43 = vsel %vm10204_vm8, %v8907_v26, %v5061_v12  ;;  %v4923_v25 = vld [vmem:[#allocation2 + $0x9c] sm:$0x1]  ;;  %v8892_v18 = vrot.slane %v4808_v24, 9  ;;  %v5331_v58 = vshrl.u32 %v12109_v15, 16 }
 0x3eb   : > { %5060 = vst [vmem:[#allocation2 + $0x80] sm:$0x1] %v5059_v2  ;;  %v4809_v29 = vld [vmem:[#allocation2 + $0xb4] sm:$0x2]  ;;  %v5338_v6 = vshll.u32 %v12123_v9, 16  ;;  %v4924_v41 = vsel %vm10129_vm7, %v8891_v11, %v4923_v25  ;;  %v6352_v56 = vshll.u32 %v9764_v7, 16 }
 0x3ec   : > { %4922 = vst [vmem:[#allocation2 + $0x90] sm:$0x1] %v4921_v0  ;;  %v4952_v50 = vld [vmem:[#allocation2 + $0xac] sm:$0x8]  ;;  %v5064_v32 = vld [vmem:[#allocation2 + $0x98] sm:$0x1]  ;;  %v5336_v5 = vor.u32 %v5335_v39, %v5331_v58 }
 0x3ed   : > { %5063 = vst [vmem:[#allocation2 + $0x8c] sm:$0x1] %v5062_v43  ;;  %v4926_v62 = vld [vmem:[#allocation2 + $0xa8] sm:$0x1]  ;;  %v5065_v53 = vsel %vm10204_vm8, %v8908_v38, %v5064_v32  ;;  %v8893_v33 = vrot.slane %v4809_v29, 9  ;;  %v8910_v61 = vrot.slane %v4952_v50, 11 }
 0x3ee   : > { %4925 = vst [vmem:[#allocation2 + $0x9c] sm:$0x1] %v4924_v41  ;;  %v5067_v60 = vld [vmem:[#allocation2 + $0xa4] sm:$0x1]  ;;  %v5122_v46 = vld [vmem:[#allocation2 + $0x38] sm:$0x1] }
 0x3ef   : > { %6002 = vmatmul.bf16.gmra.mxu3 %v5558_v35  ;;  %v4927_v35 = vsel %vm10129_vm7, %v8892_v18, %v4926_v62  ;;  %5066 = vst [vmem:[#allocation2 + $0x98] sm:$0x1] %v5065_v53  ;;  %v5340_v26 = vrot.slane %v5338_v6, 1  ;;  %v4929_v34 = vld [vmem:[#allocation2 + $0xb4] sm:$0x1]  ;;  %v5266_v22 = vunpack.c.l.b16 %v5122_v46  ;;  %v5096_v19 = vld [vmem:[#allocation2 + $0x3c] sm:$0xff]  }
 0x3f0   : > { %5913 = vmatmul.bf16.gmra.mxu2 %v5329_v1  ;;  %4928 = vst [vmem:[#allocation2 + $0xa8] sm:$0x1] %v4927_v35  ;;  %v4930_v14 = vsel %vm10129_vm7, %v8893_v33, %v4929_v34  ;;  %v5070_v1 = vld [vmem:[#allocation2 + $0xb0] sm:$0x1]  ;;  %v9745_v44 = vld [vmem:[#allocation2 + $0x30] sm:$0xf0] }
 0x3f1   : > { %v5341_v9 = vsel %vm1246_vm9, %v5336_v5, %v5340_v26  ;;  %v5071_v59 = vsel %vm10204_vm8, %v8910_v61, %v5070_v1  ;;  %4931 = vst [vmem:[#allocation2 + $0xb4] sm:$0x1] %v4930_v14  ;;  %v9746_v51 = vld [vmem:[#allocation2 + $0x30] sm:$0xe]  ;;  %v9948_v3 = vld [vmem:[#allocation2 + $0x3c] sm:$0xf0] }
 0x3f2   : > { %5072 = vst [vmem:[#allocation2 + $0xb0] sm:$0x1] %v5071_v59  ;;  %v9747_v36 = vor.u32 %v9746_v51, %v9745_v44  ;;  %v6354_v47 = vrot.slane %v6352_v56, 1  ;;  %v9410_v48 = vld [vmem:[%s13357_s3 + $0x120] sm:$0xff]  ;;  %v6350_v63 = vshrl.u32 %v9764_v7, 16  ;;  %v5357_v2 = vshll.u32 %v5096_v19, 16 }
 0x3f3   : > { %6918 = vmatpush.bf16.msrb.mxu1 %v9410_v48  ;;  %v5123_v8 = vld [vmem:[#allocation2 + $0x44] sm:$0x1]  ;;  %v4953_v45 = vld [vmem:[#allocation2 + $0xb8] sm:$0x8]  ;;  %v4810_v23 = vld [vmem:[#allocation2 + $0xc0] sm:$0x2] }
 0x3f4   : > { %v5562_v39 = vrot.slane %v9747_v36, 1  ;;  %v12170_v28 = vor.u32 %v6354_v47, %v6350_v63  ;;  %v9949_v27 = vld [vmem:[#allocation2 + $0x3c] sm:$0xe]  ;;  %v12174_v30 = vld [vmem:[#allocation2 + $0x3c] sm:$0xf0]  ;;  %v5267_v52 = vunpack.c.l.b16 %v5123_v8  ;;  %v8911_v20 = vrot.slane %v4953_v45, 11 }
 0x3f5   : > { %v12172_v57 = vld [vmem:[#allocation2 + $0x3c] sm:$0xff]   ;;  %v8894_v12 = vrot.slane %v4810_v23, 9  ;;  %v9950_v43 = vor.u32 %v9949_v27, %v9948_v3  ;;  %v5359_v6 = vrot.slane %v5357_v2, 1  ;;  %v5355_v41 = vshrl.u32 %v5096_v19, 16  ;;  %v5124_v53 = vld [vmem:[#allocation2 + $0x50] sm:$0x1] }
 0x3f6   : > { %v5283_v0 = vpack.c.b16 %v5267_v52, %v5267_v52  ;;  %v4932_v11 = vld [vmem:[#allocation2 + $0xc0] sm:$0x1]  ;;  %v5073_v25 = vld [vmem:[#allocation2 + $0xbc] sm:$0x1]  ;;  %v5268_v33 = vunpack.c.l.b16 %v5124_v53  ;;  %v9748_v5 = vld [vmem:[#allocation2 + $0x48] sm:$0xf0] }
 0x3f7   : > { %6844 = vmatmul.bf16.gmra.mxu0 %v12125_v16  ;;  %v4933_v38 = vsel %vm10129_vm7, %v8894_v12, %v4932_v11  ;;  %v5074_v18 = vsel %vm10204_vm8, %v8911_v20, %v5073_v25  ;;  %v5565_v29 = vrot.slane %v9950_v43, 1  ;;  %v5360_v62 = vor.u32 %v5359_v6, %v5355_v41  ;;  %v5100_v14 = vld [vmem:[#allocation2 + $0x54] sm:$0xff]   ;;  %v9766_v2 = vld [vmem:[#allocation2 + $0x60] sm:$0xff]   ;;  %v5104_v6 = vld [vmem:[#allocation2 + $0x6c] sm:$0xff]  }
 0x3f8   : > { %4934 = vst [vmem:[#allocation2 + $0xc0] sm:$0x1] %v4933_v38  ;;  %v5566_v58 = vrot.slane %v5283_v0, 1  ;;  %v5362_v50 = vshll.u32 %v5283_v0, 16  ;;  %v5284_v61 = vpack.c.b16 %v5268_v33, %v5268_v33  ;;  %v9951_v1 = vld [vmem:[#allocation2 + $0x54] sm:$0xf0] }
 0x3f9   : > { %5829 = vmatmul.bf16.gmra.mxu1 %v12109_v15  ;;  %v5068_v15 = vsel %vm10204_vm8, %v8909_v13, %v5067_v60  ;;  %v5282_v13 = vpack.c.b16 %v5266_v22, %v5266_v22  ;;  %5075 = vst [vmem:[#allocation2 + $0xbc] sm:$0x1] %v5074_v18  ;;  %v9749_v60 = vld [vmem:[#allocation2 + $0x48] sm:$0xe]  ;;  %v9409_v59 = vld [vmem:[%s13357_s3 + $0x118] sm:$0xff]  ;;  %v5381_v47 = vshll.u32 %v5100_v14, 16 }
 0x3fa   : > { %5069 = vst [vmem:[#allocation2 + $0xa4] sm:$0x1] %v5068_v15  ;;  %v5567_v32 = vsel %vm1503_vm10, %v5565_v29, %v5566_v58  ;;  %v5364_v21 = vrot.slane %v5362_v50, 1  ;;  %v9750_v15 = vor.u32 %v9749_v60, %v9748_v5  ;;  %v5569_v26 = vrot.slane %v5284_v61, 1  ;;  %6919 = vmatpush.bf16.msrb.mxu1 %v9409_v59  ;;  %v9952_v36 = vld [vmem:[#allocation2 + $0x54] sm:$0xe] }
 0x3fb   : > { %v5563_v55 = vrot.slane %v5282_v13, 1  ;;  %v5350_v17 = vshll.u32 %v5282_v13, 16  ;;  %v5374_v34 = vshll.u32 %v5284_v61, 16  ;;  %v5125_v13 = vld [vmem:[#allocation2 + $0x5c] sm:$0x1]  ;;  %v9953_v48 = vor.u32 %v9952_v36, %v9951_v1  ;;  %v9408_v61 = vld [vmem:[%s13357_s3 + $0x110] sm:$0xff] }
 0x3fc   : > { %v5365_v35 = vsel %vm1246_vm9, %v5360_v62, %v5364_v21  ;;  %v5568_v22 = vrot.slane %v9750_v15, 1  ;;  %v5269_v3 = vunpack.c.l.b16 %v5125_v13  ;;  %v5379_v8 = vshrl.u32 %v5100_v14, 16  ;;  %v9751_v43 = vld [vmem:[#allocation2 + $0x60] sm:$0xf0]  ;;  %v9752_v11 = vld [vmem:[#allocation2 + $0x60] sm:$0xe] }
 0x3fd   : > { %v5564_v4 = vsel %vm1503_vm10, %v5562_v39, %v5563_v55  ;;  %v5352_v31 = vrot.slane %v5350_v17, 1  ;;  %v5376_v51 = vrot.slane %v5374_v34, 1  ;;  %v12191_v55 = vld [vmem:[#allocation2 + $0x54] sm:$0xff]   ;;  %v5571_v63 = vrot.slane %v9953_v48, 1  ;;  %v9954_v41 = vld [vmem:[#allocation2 + $0x6c] sm:$0xf0] }
 0x3fe   : > { %v12193_v17 = vld [vmem:[#allocation2 + $0x54] sm:$0xf0]  ;;  %v5285_v39 = vpack.c.b16 %v5269_v3, %v5269_v3  ;;  %v6400_v38 = vshll.u32 %v9766_v2, 16  ;;  %v9753_v18 = vor.u32 %v9752_v11, %v9751_v43  ;;  %v6398_v62 = vshrl.u32 %v9766_v2, 16  ;;  %v5127_v33 = vld [vmem:[#allocation2 + $0x74] sm:$0x1]  ;;  %6920 = vmatpush.bf16.msrb.mxu1 %v9408_v61 }
 0x3ff   : > { %6007 = vmatmul.bf16.gmra.mxu3 %v5561_v42  ;;  %v5353_v24 = vsel %vm1246_vm9, %v12170_v28, %v5352_v31  ;;  %v9765_v42 = vld [vmem:[#allocation2 + $0x48] sm:$0xff]   ;;  %v5383_v31 = vrot.slane %v5381_v47, 1  ;;  %v12208_v15 = vld [vmem:[#allocation2 + $0x6c] sm:$0xf0]  ;;  %v5271_v34 = vunpack.c.l.b16 %v5127_v33  ;;  %v5403_v48 = vshrl.u32 %v5104_v6, 16 }
 0x400   : > { %5918 = vmatmul.bf16.gmra.mxu2 %v5341_v9  ;;  %v6376_v46 = vshll.u32 %v9765_v42, 16  ;;  %v6374_v44 = vshrl.u32 %v9765_v42, 16  ;;  %v5386_v45 = vshll.u32 %v5285_v39, 16  ;;  %v6402_v50 = vrot.slane %v6400_v38, 1  ;;  %v9955_v60 = vld [vmem:[#allocation2 + $0x6c] sm:$0xe] }
 0x401   : > { %v5384_v27 = vor.u32 %v5383_v31, %v5379_v8  ;;  %v5287_v59 = vpack.c.b16 %v5271_v34, %v5271_v34  ;;  %v9755_v43 = vld [vmem:[#allocation2 + $0x78] sm:$0xe]  ;;  %v5076_v61 = vld [vmem:[#allocation2 + $0xc8] sm:$0x1] }
 0x402   : > { %v6378_v9 = vrot.slane %v6376_v46, 1  ;;  %v5388_v52 = vrot.slane %v5386_v45, 1  ;;  %v12206_v46 = vld [vmem:[#allocation2 + $0x6c] sm:$0xff]   ;;  %v5128_v45 = vld [vmem:[#allocation2 + $0x80] sm:$0x1] }
 0x403   : > { %v9407_v10 = vld [vmem:[%s13357_s3 + $0x108] sm:$0xff] }
 0x404   : > { %v12189_v56 = vor.u32 %v6378_v9, %v6374_v44  ;;  %v5389_v20 = vsel %vm1246_vm9, %v5384_v27, %v5388_v52  ;;  %v9956_v44 = vor.u32 %v9955_v60, %v9954_v41  ;;  %6921 = vmatpush.bf16.msrb.mxu1 %v9407_v10 }
 0x406   : > { %v5577_v36 = vrot.slane %v9956_v44, 1  ;;  %v5129_v44 = vld [vmem:[#allocation2 + $0x8c] sm:$0x1] }
 0x407   : > { %6849 = vmatmul.bf16.gmra.mxu0 %v9764_v7 }
 0x409   : > { %5834 = vmatmul.bf16.gmra.mxu1 %v9764_v7  ;;  %v5570_v7 = vsel %vm1503_vm10, %v5568_v22, %v5569_v26  ;;  %v5405_v22 = vshll.u32 %v5104_v6, 16 }
 0x40b   : > { %v5407_v3 = vrot.slane %v5405_v22, 1 }
 0x40d   : > { %v5408_v8 = vor.u32 %v5407_v3, %v5403_v48  ;;  %v5273_v48 = vunpack.c.l.b16 %v5129_v44 }
 0x40f   : > { %6012 = vmatmul.bf16.gmra.mxu3 %v5564_v4  ;;  %v5572_v4 = vrot.slane %v5285_v39, 1 }
 0x410   : > { %5923 = vmatmul.bf16.gmra.mxu2 %v5353_v24  ;;  %v5126_v24 = vld [vmem:[#allocation2 + $0x68] sm:$0x1] }
 0x411   : > { %v5573_v23 = vsel %vm1503_vm10, %v5571_v63, %v5572_v4  ;;  %v5270_v12 = vunpack.c.l.b16 %v5126_v24  ;;  %v5410_v63 = vshll.u32 %v5287_v59, 16 }
 0x413   : > { %v5286_v25 = vpack.c.b16 %v5270_v12, %v5270_v12  ;;  %v5272_v12 = vunpack.c.l.b16 %v5128_v45 }
 0x415   : > { %v5575_v29 = vrot.slane %v5286_v25, 1  ;;  %v5398_v58 = vshll.u32 %v5286_v25, 16  ;;  %v5288_v25 = vpack.c.b16 %v5272_v12, %v5272_v12 }
 0x417   : > { %6854 = vmatmul.bf16.gmra.mxu0 %v12172_v57  ;;  %v5400_v21 = vrot.slane %v5398_v58, 1  ;;  %v4954_v58 = vld [vmem:[#allocation2 + $0xc4] sm:$0x8] }
 0x418   : > { %v8912_v33 = vrot.slane %v4954_v58, 11 }
 0x419   : > { %5839 = vmatmul.bf16.gmra.mxu1 %v5096_v19  ;;  %v5377_v19 = vsel %vm1246_vm9, %v12189_v56, %v5376_v51 }
 0x41f   : > { %6017 = vmatmul.bf16.gmra.mxu3 %v5567_v32  ;;  %v5574_v32 = vrot.slane %v9753_v18, 1 }
 0x420   : > { %5928 = vmatmul.bf16.gmra.mxu2 %v5365_v35 }
 0x421   : > { %v5576_v53 = vsel %vm1503_vm10, %v5574_v32, %v5575_v29 }
 0x427   : > { %6859 = vmatmul.bf16.gmra.mxu0 %v9765_v42 }
 0x429   : > { %5844 = vmatmul.bf16.gmra.mxu1 %v9765_v42  ;;  %v12201_v42 = vor.u32 %v6402_v50, %v6398_v62  ;;  %v5581_v62 = vrot.slane %v5288_v25, 1 }
 0x42b   : > { %v5401_v26 = vsel %vm1246_vm9, %v12201_v42, %v5400_v21  ;;  %v5108_v21 = vld [vmem:[#allocation2 + $0x84] sm:$0xff]  }
 0x42c   : > { %v5429_v45 = vshll.u32 %v5108_v21, 16 }
 0x42f   : > { %6022 = vmatmul.bf16.gmra.mxu3 %v5570_v7 }
 0x430   : > { %5933 = vmatmul.bf16.gmra.mxu2 %v5377_v19  ;;  %v5578_v19 = vrot.slane %v5287_v59, 1 }
 0x432   : > { %v5579_v31 = vsel %vm1503_vm10, %v5577_v36, %v5578_v19 }
 0x437   : > { %6864 = vmatmul.bf16.gmra.mxu0 %v12191_v55 }
 0x439   : > { %5849 = vmatmul.bf16.gmra.mxu1 %v5100_v14 }
 0x43f   : > { %6027 = vmatmul.bf16.gmra.mxu3 %v5573_v23  ;;  %v5412_v23 = vrot.slane %v5410_v63, 1  ;;  %v12241_v63 = vld [vmem:[#allocation2 + $0x84] sm:$0xff]  }
 0x440   : > { %5938 = vmatmul.bf16.gmra.mxu2 %v5389_v20 }
 0x441   : > { %v5413_v52 = vsel %vm1246_vm9, %v5408_v8, %v5412_v23  ;;  %v7164_v8 = vld [vmem:[#allocation2 + $0x74] sm:$0x1] }
 0x442   : > { %v7308_v12 = vunpack.c.l.b16 %v7164_v8 }
 0x443   : > { %v5815_v0 = vpop.f32.mrf.mxu1 }
 0x447   : > { %6869 = vmatmul.bf16.gmra.mxu0 %v9766_v2 }
 0x449   : > { %5854 = vmatmul.bf16.gmra.mxu1 %v9766_v2  ;;  %v9767_v2 = vld [vmem:[#allocation2 + $0x78] sm:$0xff]  }
 0x44a   : > { %v6424_v18 = vshll.u32 %v9767_v2, 16  ;;  %v6422_v34 = vshrl.u32 %v9767_v2, 16 }
 0x44b   : > { %v5817_v35 = vpop.f32.mrf.mxu1 }
 0x44e   : > { %v5993_v5 = vpop.f32.mrf.mxu3 }
 0x44f   : > { %6032 = vmatmul.bf16.gmra.mxu3 %v5576_v53  ;;  %v5422_v53 = vshll.u32 %v5288_v25, 16 }
 0x450   : > { %5943 = vmatmul.bf16.gmra.mxu2 %v5401_v26  ;;  %v5077_v26 = vsel %vm10204_vm8, %v8912_v33, %v5076_v61  ;;  %v7180_v33 = vld [vmem:[#allocation2 + $0x6c] sm:$0xe]  ;;  %v12256_v61 = vld [vmem:[#allocation2 + $0x84] sm:$0xff]  }
 0x451   : > { %v5904_v14 = vpop.f32.mrf.mxu2  ;;  %v5424_v22 = vrot.slane %v5422_v53, 1  ;;  %5078 = vst [vmem:[#allocation2 + $0xc8] sm:$0x1] %v5077_v26  ;;  %v7564_v44 = vunpack.c.l.b16 %v7180_v33 }
 0x452   : > { %v5905_v1 = vadd.f32 %v5904_v14, %v5815_v0  ;;  %v9754_v0 = vld [vmem:[#allocation2 + $0x78] sm:$0xf0] }
 0x453   : > { %v9756_v29 = vor.u32 %v9755_v43, %v9754_v0  ;;  %v12245_v0 = vld [vmem:[#allocation2 + $0x6c] sm:$0xff]  }
 0x454   : > { %v12212_v9 = vadd.f32 %v5993_v5, %v5905_v1  ;;  %v12214_v7 = vpop.f32.mrf.mxu0  ;;  %v6426_v5 = vrot.slane %v6424_v18, 1  ;;  %v5431_v18 = vrot.slane %v5429_v45, 1 }
 0x455   : > { %v5580_v60 = vrot.slane %v9756_v29, 1  ;;  %v7168_v29 = vld [vmem:[#allocation2 + $0xa4] sm:$0x1] }
 0x456   : > { %v5820_v51 = vpop.f32.mrf.mxu1  ;;  %v5995_v13 = vpop.f32.mrf.mxu3  ;;  %v7312_v26 = vunpack.c.l.b16 %v7168_v29 }
 0x457   : > { %6874 = vmatmul.bf16.gmra.mxu0 %v12206_v46  ;;  %v5582_v1 = vsel %vm1503_vm10, %v5580_v60, %v5581_v62  ;;  %v12254_v60 = vpack.c.b16 %v7308_v12, %v7308_v12 }
 0x459   : > { %v5906_v47 = vpop.f32.mrf.mxu2  ;;  %5859 = vmatmul.bf16.gmra.mxu1 %v5104_v6 }
 0x45a   : > { %v5907_v39 = vadd.f32 %v5906_v47, %v5817_v35  ;;  %v9957_v35 = vld [vmem:[#allocation2 + $0x84] sm:$0xf0] }
 0x45c   : > { %v12217_v4 = vadd.f32 %v5995_v13, %v5907_v39  ;;  %v12220_v27 = vpop.f32.mrf.mxu0  ;;  %v9958_v13 = vld [vmem:[#allocation2 + $0x84] sm:$0xe] }
 0x45d   : > { %v9959_v23 = vor.u32 %v9958_v13, %v9957_v35  ;;  %v7170_v35 = vld [vmem:[#allocation2 + $0xbc] sm:$0x1]  ;;  %v7182_v13 = vld [vmem:[#allocation2 + $0x84] sm:$0xe] }
 0x45e   : > { %v5822_v24 = vpop.f32.mrf.mxu1  ;;  %v7566_v29 = vunpack.c.l.b16 %v7182_v13 }
 0x45f   : > { %6037 = vmatmul.bf16.gmra.mxu3 %v5579_v31  ;;  %v12243_v31 = vld [vmem:[#allocation2 + $0x84] sm:$0xf0] }
 0x460   : > { %5948 = vmatmul.bf16.gmra.mxu2 %v5413_v52  ;;  %v5289_v52 = vpack.c.b16 %v5273_v48, %v5273_v48  ;;  %v13380_v48 = vunpack.c.h.b16 %v12256_v61 }
 0x462   : > { %v5998_v20 = vpop.f32.mrf.mxu3  ;;  %v5434_v62 = vshll.u32 %v5289_v52, 16 }
 0x463   : > { %v5909_v11 = vpop.f32.mrf.mxu2 }
 0x464   : > { %v5910_v38 = vadd.f32 %v5909_v11, %v5820_v51  ;;  %v12223_v6 = vpop.f32.mrf.mxu0  ;;  %v12230_v51 = vor.u32 %v6426_v5, %v6422_v34  ;;  %v13379_v5 = vunpack.c.h.b16 %v12245_v0  ;;  %v7172_v34 = vld [vmem:[#allocation2 + $0xd4] sm:$0x1] }
 0x466   : > { %v12225_v41 = vadd.f32 %v5998_v20, %v5910_v38  ;;  %v5825_v50 = vpop.f32.mrf.mxu1  ;;  %v5425_v47 = vsel %vm1246_vm9, %v12230_v51, %v5424_v22  ;;  %v5583_v38 = vrot.slane %v9959_v23, 1  ;;  %v12259_v22 = vld [vmem:[#allocation2 + $0x9c] sm:$0xff]   ;;  %v7316_v23 = vunpack.c.l.b16 %v7172_v34 }
 0x467   : > { %6879 = vmatmul.bf16.gmra.mxu0 %v9767_v2 }
 0x469   : > { %5864 = vmatmul.bf16.gmra.mxu1 %v9767_v2  ;;  %v7166_v2 = vld [vmem:[#allocation2 + $0x8c] sm:$0x1] }
 0x46a   : > { %v6000_v32 = vpop.f32.mrf.mxu3  ;;  %v7310_v53 = vunpack.c.l.b16 %v7166_v2  ;;  %v13381_v2 = vunpack.c.h.b16 %v12259_v22 }
 0x46b   : > { %v5911_v14 = vpop.f32.mrf.mxu2 }
 0x46c   : > { %v5912_v59 = vadd.f32 %v5911_v14, %v5822_v24  ;;  %v12232_v36 = vpop.f32.mrf.mxu0  ;;  %v12263_v8 = vpack.c.b16 %v7310_v53, %v7310_v53 }
 0x46e   : > { %v12234_v19 = vadd.f32 %v6000_v32, %v5912_v59  ;;  %v5827_v3 = vpop.f32.mrf.mxu1  ;;  %v5584_v32 = vrot.slane %v5289_v52, 1  ;;  %v7314_v59 = vunpack.c.l.b16 %v7170_v35  ;;  %v7611_v52 = vrot.slane %v12254_v60, 1 }
 0x46f   : > { %6042 = vmatmul.bf16.gmra.mxu3 %v5582_v1  ;;  %v5130_v1 = vld [vmem:[#allocation2 + $0x98] sm:$0x1] }
 0x470   : > { %5953 = vmatmul.bf16.gmra.mxu2 %v5425_v47  ;;  %v5585_v47 = vsel %vm1503_vm10, %v5583_v38, %v5584_v32  ;;  %v5274_v12 = vunpack.c.l.b16 %v5130_v1  ;;  %v12271_v38 = vpack.c.b16 %v7312_v26, %v7312_v26  ;;  %v12280_v35 = vpack.c.b16 %v7314_v59, %v7314_v59  ;;  %v7188_v59 = vld [vmem:[#allocation2 + $0xcc] sm:$0xe] }
 0x471   : > { %v7582_v26 = vpack.c.b16 %v13380_v48, %v7566_v29 }
 0x472   : > { %v6003_v39 = vpop.f32.mrf.mxu3  ;;  %13477 = vst [vmem:[#allocation13_spill] sm:$0xff] %v12280_v35  ;;  %v7623_v29 = vrot.slane %v12271_v38, 1 }
 0x473   : > { %v5914_v24 = vpop.f32.mrf.mxu2 }
 0x474   : > { %v5915_v20 = vadd.f32 %v5914_v24, %v5825_v50  ;;  %v12247_v43 = vpop.f32.mrf.mxu0  ;;  %v5427_v50 = vshrl.u32 %v5108_v21, 16  ;;  %v7580_v24 = vpack.c.b16 %v13379_v5, %v7564_v44  ;;  %v7617_v44 = vrot.slane %v12263_v8, 1 }
 0x476   : > { %v12249_v11 = vadd.f32 %v6003_v39, %v5915_v20  ;;  %v12251_v25 = vpop.f32.mrf.mxu1  ;;  %v5432_v14 = vor.u32 %v5431_v18, %v5427_v50  ;;  %v5436_v39 = vrot.slane %v5434_v62, 1  ;;  %v7184_v20 = vld [vmem:[#allocation2 + $0x9c] sm:$0xe]  ;;  %v12273_v18 = vld [vmem:[#allocation2 + $0xcc] sm:$0xff]   ;;  %v7610_v33 = vrot.slane %v7580_v24, 1 }
 0x477   : > { %6884 = vmatmul.bf16.gmra.mxu0 %v12241_v63  ;;  %13474 = vst [vmem:[#allocation10_spill] sm:$0xff] %v12273_v18  ;;  %v7186_v50 = vld [vmem:[#allocation2 + $0xb4] sm:$0xe]  ;;  %v7568_v13 = vunpack.c.l.b16 %v7184_v20  ;;  %v7616_v24 = vrot.slane %v7582_v26, 1  ;;  %v5290_v20 = vpack.c.b16 %v5274_v12, %v5274_v12  ;;  %v13483_v12 = vunpack.c.h.b16 %v12273_v18 }
 0x478   : > { %v5437_v53 = vsel %vm1246_vm9, %v5432_v14, %v5436_v39  ;;  %v12290_v14 = vsel %vm1503_vm10, %v7610_v33, %v7611_v52  ;;  %v9768_v39 = vld [vmem:[#allocation2 + $0x90] sm:$0xff]   ;;  %v7570_v48 = vunpack.c.l.b16 %v7186_v50 }
 0x479   : > { %5869 = vmatmul.bf16.gmra.mxu1 %v5108_v21  ;;  %v12265_v21 = vld [vmem:[#allocation2 + $0xb4] sm:$0xff]   ;;  %13479 = vst [vmem:[#allocation15_spill] sm:$0xff] %v12290_v14  ;;  %v7584_v5 = vpack.c.b16 %v13381_v2, %v7568_v13  ;;  %v7572_v14 = vunpack.c.l.b16 %v7188_v59  ;;  %v5587_v59 = vrot.slane %v5290_v20, 1 }
 0x47a   : > { %v6005_v58 = vpop.f32.mrf.mxu3  ;;  %13473 = vst [vmem:[#allocation9_spill] sm:$0xff] %v12265_v21  ;;  %v13481_v52 = vunpack.c.h.b16 %v12265_v21 }
 0x47b   : > { %v5916_v10 = vpop.f32.mrf.mxu2  ;;  %v7588_v2 = vpack.c.b16 %v13483_v12, %v7572_v14 }
 0x47c   : > { %v5917_v45 = vadd.f32 %v5916_v10, %v5827_v3  ;;  %v12275_v32 = vpop.f32.mrf.mxu0  ;;  %v9757_v10 = vld [vmem:[#allocation2 + $0x90] sm:$0xf0]  ;;  %v7586_v33 = vpack.c.b16 %v13481_v52, %v7570_v48  ;;  %v5446_v52 = vshll.u32 %v5290_v20, 16  ;;  %v5131_v20 = vld [vmem:[#allocation2 + $0xa4] sm:$0x1] }
 0x47d   : > { %13475 = vst [vmem:[#allocation11_spill] sm:$0xff] %v12275_v32 }
 0x47e   : > { %v12277_v3 = vadd.f32 %v6005_v58, %v5917_v45  ;;  %v5832_v62 = vpop.f32.mrf.mxu1  ;;  %v9758_v45 = vld [vmem:[#allocation2 + $0x90] sm:$0xe]  ;;  %v7622_v58 = vrot.slane %v7584_v5, 1  ;;  %v7628_v50 = vrot.slane %v7586_v33, 1  ;;  %v6446_v33 = vshrl.u32 %v9768_v39, 16 }
 0x47f   : > { %6047 = vmatmul.bf16.gmra.mxu3 %v5585_v47  ;;  %v12287_v47 = vpack.c.b16 %v7316_v23, %v7316_v23  ;;  %v12297_v23 = vsel %vm1503_vm10, %v7616_v24, %v7617_v44  ;;  %v9759_v32 = vor.u32 %v9758_v45, %v9757_v10  ;;  %v5112_v10 = vld [vmem:[#allocation2 + $0x9c] sm:$0xff]   ;;  %v5448_v12 = vrot.slane %v5446_v52, 1 }
 0x480   : > { %13476 = vst [vmem:[#allocation12_spill] sm:$0xff] %v12277_v3  ;;  %5958 = vmatmul.bf16.gmra.mxu2 %v5437_v53  ;;  %v7629_v53 = vrot.slane %v12280_v35, 1  ;;  %v6448_v3 = vshll.u32 %v9768_v39, 16  ;;  %v12303_v13 = vsel %vm1503_vm10, %v7622_v58, %v7623_v29  ;;  %v9960_v58 = vld [vmem:[#allocation2 + $0x9c] sm:$0xf0]  ;;  %v5275_v52 = vunpack.c.l.b16 %v5131_v20 }
 0x481   : > { %13478 = vst [vmem:[#allocation14_spill] sm:$0xff] %v12287_v47  ;;  %v7635_v35 = vrot.slane %v12287_v47, 1  ;;  %v5586_v14 = vrot.slane %v9759_v32, 1  ;;  %v9406_v32 = vld [vmem:[%s13357_s3 + $0x100] sm:$0xff] }
 0x482   : > { %v6008_v34 = vpop.f32.mrf.mxu3  ;;  %13480 = vst [vmem:[#allocation3_spill] sm:$0xff] %v12297_v23  ;;  %v6450_v45 = vrot.slane %v6448_v3, 1  ;;  %6922 = vmatpush.bf16.msrb.mxu1 %v9406_v32  ;;  %v9437_v32 = vld [vmem:[%s13357_s3 + $0x1f8] sm:$0xff] }
 0x483   : > { %v5919_v1 = vpop.f32.mrf.mxu2  ;;  %13482 = vst [vmem:[#allocation5_spill] sm:$0xff] %v12303_v13  ;;  %7935 = vmatpush.bf16.msra.mxu0 %v9437_v32  ;;  %v9769_v32 = vld [vmem:[#allocation2 + $0xa8] sm:$0xff]  }
 0x484   : > { %v5920_v26 = vadd.f32 %v5919_v1, %v12251_v25  ;;  %v12308_v44 = vpop.f32.mrf.mxu0  ;;  %v12313_v25 = vsel %vm1503_vm10, %v7628_v50, %v7629_v53  ;;  %v7634_v1 = vrot.slane %v7588_v2, 1  ;;  %v12319_v53 = vor.u32 %v6450_v45, %v6446_v33 }
 0x485   : > { %13484 = vst [vmem:[#allocation4_spill] sm:$0xff] %v12313_v25  ;;  %v9961_v25 = vld [vmem:[#allocation2 + $0x9c] sm:$0xe] }
 0x486   : > { %v12310_v5 = vadd.f32 %v6008_v34, %v5920_v26  ;;  %v5835_v24 = vpop.f32.mrf.mxu1  ;;  %v12316_v29 = vsel %vm1503_vm10, %v7634_v1, %v7635_v35  ;;  %v5588_v26 = vsel %vm1503_vm10, %v5586_v14, %v5587_v59  ;;  %v12328_v35 = vld [vmem:[#allocation2 + $0x9c] sm:$0xff]   ;;  %v9962_v45 = vor.u32 %v9961_v25, %v9960_v58 }
 0x487   : > { %6889 = vmatmul.bf16.gmra.mxu0 %v9768_v39  ;;  %13485 = vst [vmem:[#allocation6_spill] sm:$0xff] %v12316_v29 }
 0x488   : > { %v5589_v23 = vrot.slane %v9962_v45, 1  ;;  %v9436_v45 = vld [vmem:[%s13357_s3 + $0x1f0] sm:$0xff] }
 0x489   : > { %5874 = vmatmul.bf16.gmra.mxu1 %v9768_v39  ;;  %v12330_v39 = vld [vmem:[#allocation2 + $0x9c] sm:$0xf0]  ;;  %7936 = vmatpush.bf16.msra.mxu0 %v9436_v45 }
 0x48a   : > { %v6010_v48 = vpop.f32.mrf.mxu3 }
 0x48b   : > { %v5921_v34 = vpop.f32.mrf.mxu2 }
 0x48c   : > { %v5922_v13 = vadd.f32 %v5921_v34, %v5832_v62  ;;  %v12321_v2 = vpop.f32.mrf.mxu0  ;;  %v5449_v62 = vsel %vm1246_vm9, %v12319_v53, %v5448_v12  ;;  %v5451_v12 = vshrl.u32 %v5112_v10, 16 }
 0x48e   : > { %v12323_v50 = vadd.f32 %v6010_v48, %v5922_v13  ;;  %v5837_v3 = vpop.f32.mrf.mxu1  ;;  %v5453_v13 = vshll.u32 %v5112_v10, 16  ;;  %v5291_v48 = vpack.c.b16 %v5275_v52, %v5275_v52  ;;  %v5132_v52 = vld [vmem:[#allocation2 + $0xb0] sm:$0x1] }
 0x48f   : > { %6052 = vmatmul.bf16.gmra.mxu3 %v5588_v26 }
 0x490   : > { %5963 = vmatmul.bf16.gmra.mxu2 %v5449_v62  ;;  %v5590_v47 = vrot.slane %v5291_v48, 1  ;;  %v5455_v18 = vrot.slane %v5453_v13, 1  ;;  %v5458_v20 = vshll.u32 %v5291_v48, 16 }
 0x492   : > { %v6013_v59 = vpop.f32.mrf.mxu3  ;;  %v5591_v58 = vsel %vm1503_vm10, %v5589_v23, %v5590_v47  ;;  %v5456_v62 = vor.u32 %v5455_v18, %v5451_v12  ;;  %v9421_v47 = vld [vmem:[%s13357_s3 + $0x178] sm:$0xff]  ;;  %v9428_v18 = vld [vmem:[%s13357_s3 + $0x1b0] sm:$0xff] }
 0x493   : > { %v5924_v1 = vpop.f32.mrf.mxu2  ;;  %7004 = vmatpush.bf16.msra.mxu2 %v9421_v47  ;;  %v9420_v12 = vld [vmem:[%s13357_s3 + $0x170] sm:$0xff] }
 0x494   : > { %v5925_v14 = vadd.f32 %v5924_v1, %v5835_v24  ;;  %v12334_v33 = vpop.f32.mrf.mxu0  ;;  %v9429_v24 = vld [vmem:[%s13357_s3 + $0x1b8] sm:$0xff]  ;;  %v5460_v1 = vrot.slane %v5458_v20, 1  ;;  %v9427_v20 = vld [vmem:[%s13357_s3 + $0x1a8] sm:$0xff] }
 0x495   : > { %13486 = vst [vmem:[#allocation17_spill] sm:$0xff] %v12334_v33  ;;  %7846 = vmatpush.bf16.msra.mxu3 %v9429_v24  ;;  %v9760_v24 = vld [vmem:[#allocation2 + $0xa8] sm:$0xf0]  ;;  %v9964_v33 = vld [vmem:[#allocation2 + $0xb4] sm:$0xe] }
 0x496   : > { %v12336_v34 = vadd.f32 %v6013_v59, %v5925_v14  ;;  %v5840_v26 = vpop.f32.mrf.mxu1  ;;  %v5461_v23 = vsel %vm1246_vm9, %v5456_v62, %v5460_v1  ;;  %v5276_v14 = vunpack.c.l.b16 %v5132_v52  ;;  %v6472_v52 = vshll.u32 %v9769_v32, 16 }
 0x497   : > { %6894 = vmatmul.bf16.gmra.mxu0 %v12328_v35  ;;  %7005 = vmatpush.bf16.msra.mxu2 %v9420_v12  ;;  %v9963_v12 = vld [vmem:[#allocation2 + $0xb4] sm:$0xf0] }
 0x498   : > { %13487 = vst [vmem:[#allocation16_spill] sm:$0xff] %v12336_v34  ;;  %v5292_v62 = vpack.c.b16 %v5276_v14, %v5276_v14 }
 0x499   : > { %5879 = vmatmul.bf16.gmra.mxu1 %v5112_v10  ;;  %7847 = vmatpush.bf16.msra.mxu3 %v9428_v18 }
 0x49a   : > { %v6015_v29 = vpop.f32.mrf.mxu3 }
 0x49b   : > { %v5926_v25 = vpop.f32.mrf.mxu2 }
 0x49c   : > { %v5927_v59 = vadd.f32 %v5926_v25, %v5837_v3  ;;  %v12346_v10 = vpop.f32.mrf.mxu0  ;;  %v9761_v25 = vld [vmem:[#allocation2 + $0xa8] sm:$0xe] }
 0x49d   : > { %13488 = vst [vmem:[#allocation19_spill] sm:$0xff] %v12346_v10  ;;  %v9762_v1 = vor.u32 %v9761_v25, %v9760_v24  ;;  %7848 = vmatpush.bf16.msra.mxu3 %v9427_v20  ;;  %v6474_v20 = vrot.slane %v6472_v52, 1  ;;  %v9426_v24 = vld [vmem:[%s13357_s3 + $0x1a0] sm:$0xff]  ;;  %v9433_v25 = vld [vmem:[%s13357_s3 + $0x1d8] sm:$0xff] }
 0x49e   : > { %v12348_v13 = vadd.f32 %v6015_v29, %v5927_v59  ;;  %v5842_v48 = vpop.f32.mrf.mxu1  ;;  %v9435_v29 = vld [vmem:[%s13357_s3 + $0x1e8] sm:$0xff]  ;;  %v5133_v10 = vld [vmem:[#allocation2 + $0xbc] sm:$0x1] }
 0x49f   : > { %6057 = vmatmul.bf16.gmra.mxu3 %v5591_v58  ;;  %7937 = vmatpush.bf16.msra.mxu0 %v9435_v29  ;;  %v5470_v29 = vshll.u32 %v5292_v62, 16 }
 0x4a0   : > { %13489 = vst [vmem:[#allocation18_spill] sm:$0xff] %v12348_v13  ;;  %5968 = vmatmul.bf16.gmra.mxu2 %v5461_v23  ;;  %v9434_v23 = vld [vmem:[%s13357_s3 + $0x1e0] sm:$0xff]  ;;  %v9419_v13 = vld [vmem:[%s13357_s3 + $0x168] sm:$0xff] }
 0x4a1   : > { %7006 = vmatpush.bf16.msra.mxu2 %v9419_v13  ;;  %7849 = vmatpush.bf16.msra.mxu3 %v9426_v24  ;;  %v9431_v24 = vld [vmem:[%s13357_s3 + $0x1c8] sm:$0xff] }
 0x4a2   : > { %v6018_v3 = vpop.f32.mrf.mxu3 }
 0x4a3   : > { %v5929_v58 = vpop.f32.mrf.mxu2  ;;  %7938 = vmatpush.bf16.msra.mxu0 %v9434_v23  ;;  %v5472_v23 = vrot.slane %v5470_v29, 1  ;;  %v12408_v29 = vld [vmem:[#allocation2 + $0xb4] sm:$0xf0] }
 0x4a4   : > { %v5930_v59 = vadd.f32 %v5929_v58, %v5840_v26  ;;  %v12369_v45 = vpop.f32.mrf.mxu0  ;;  %v5593_v26 = vrot.slane %v5292_v62, 1  ;;  %v12379_v58 = vld [vmem:[#allocation2 + $0xb4] sm:$0xff]   ;;  %v9418_v62 = vld [vmem:[%s13357_s3 + $0x160] sm:$0xff]  ;;  %13496 = vst [vmem:[#allocation24_spill] sm:$0xff] %v12408_v29 }
 0x4a5   : > { %13490 = vst [vmem:[#allocation20_spill] sm:$0xff] %v12369_v45  ;;  %7007 = vmatpush.bf16.msra.mxu2 %v9418_v62  ;;  %v5477_v62 = vshll.u32 %v12379_v58, 16 }
 0x4a6   : > { %v12371_v47 = vadd.f32 %v6018_v3, %v5930_v59  ;;  %v5845_v18 = vpop.f32.mrf.mxu1  ;;  %v5592_v3 = vrot.slane %v9762_v1, 1  ;;  %v6470_v59 = vshrl.u32 %v9769_v32, 16  ;;  %v9425_v1 = vld [vmem:[%s13357_s3 + $0x198] sm:$0xff] }
 0x4a7   : > { %6899 = vmatmul.bf16.gmra.mxu0 %v9769_v32  ;;  %7850 = vmatpush.bf16.msra.mxu3 %v9425_v1  ;;  %v9423_v1 = vld [vmem:[%s13357_s3 + $0x188] sm:$0xff] }
 0x4a8   : > { %13491 = vst [vmem:[#allocation8_spill] sm:$0xff] %v12371_v47  ;;  %v5594_v52 = vsel %vm1503_vm10, %v5592_v3, %v5593_v26  ;;  %7939 = vmatpush.bf16.msra.mxu0 %v9433_v25  ;;  %v12394_v21 = vor.u32 %v6474_v20, %v6470_v59  ;;  %v9432_v26 = vld [vmem:[%s13357_s3 + $0x1d0] sm:$0xff]  ;;  %v9445_v25 = vld [vmem:[%s13357_s3 + $0x238] sm:$0xff] }
 0x4a9   : > { %5884 = vmatmul.bf16.gmra.mxu1 %v9769_v32  ;;  %v9424_v3 = vld [vmem:[%s13357_s3 + $0x190] sm:$0xff] }
 0x4aa   : > { %v6020_v14 = vpop.f32.mrf.mxu3  ;;  %13492 = vst [vmem:[#allocation7_spill] sm:$0xff] %v12394_v21  ;;  %v5473_v20 = vsel %vm1246_vm9, %v12394_v21, %v5472_v23  ;;  %8024 = vmatpush.bf16.msra.mxu1 %v9445_v25  ;;  %v9965_v23 = vor.u32 %v9964_v33, %v9963_v12  ;;  %v9430_v25 = vld [vmem:[%s13357_s3 + $0x1c0] sm:$0xff]  ;;  %v9415_v33 = vld [vmem:[%s13357_s3 + $0x148] sm:$0xff] }
 0x4ab   : > { %v5931_v47 = vpop.f32.mrf.mxu2  ;;  %7851 = vmatpush.bf16.msra.mxu3 %v9424_v3 }
 0x4ac   : > { %v5932_v45 = vadd.f32 %v5931_v47, %v5842_v48  ;;  %v12396_v13 = vpop.f32.mrf.mxu0  ;;  %v9417_v48 = vld [vmem:[%s13357_s3 + $0x158] sm:$0xff]  ;;  %7940 = vmatpush.bf16.msra.mxu0 %v9432_v26 }
 0x4ad   : > { %13493 = vst [vmem:[#allocation21_spill] sm:$0xff] %v12396_v13  ;;  %v12406_v47 = vld [vmem:[#allocation2 + $0xb4] sm:$0xff]   ;;  %7008 = vmatpush.bf16.msra.mxu2 %v9417_v48  ;;  %v5479_v13 = vrot.slane %v5477_v62, 1  ;;  %v9414_v62 = vld [vmem:[%s13357_s3 + $0x140] sm:$0xff] }
 0x4ae   : > { %v12398_v32 = vadd.f32 %v6020_v14, %v5932_v45  ;;  %v5847_v34 = vpop.f32.mrf.mxu1  ;;  %13495 = vst [vmem:[#allocation23_spill] sm:$0xff] %v12406_v47  ;;  %v5277_v14 = vunpack.c.l.b16 %v5133_v10  ;;  %v9416_v10 = vld [vmem:[%s13357_s3 + $0x150] sm:$0xff] }
 0x4af   : > { %6062 = vmatmul.bf16.gmra.mxu3 %v5594_v52 }
 0x4b0   : > { %13494 = vst [vmem:[#allocation22_spill] sm:$0xff] %v12398_v32  ;;  %5973 = vmatmul.bf16.gmra.mxu2 %v5473_v20  ;;  %v5293_v52 = vpack.c.b16 %v5277_v14, %v5277_v14  ;;  %7941 = vmatpush.bf16.msra.mxu0 %v9431_v24  ;;  %v5595_v14 = vrot.slane %v9965_v23, 1  ;;  %v5475_v24 = vshrl.u32 %v12379_v58, 16 }
 0x4b1   : > { %7009 = vmatpush.bf16.msra.mxu2 %v9416_v10  ;;  %7852 = vmatpush.bf16.msra.mxu3 %v9423_v1 }
 0x4b2   : > { %v6023_v45 = vpop.f32.mrf.mxu3  ;;  %v5596_v3 = vrot.slane %v5293_v52, 1  ;;  %v5482_v10 = vshll.u32 %v5293_v52, 16 }
 0x4b3   : > { %v5934_v59 = vpop.f32.mrf.mxu2 }
 0x4b4   : > { %v5935_v26 = vadd.f32 %v5934_v59, %v5845_v18  ;;  %v12428_v20 = vpop.f32.mrf.mxu0  ;;  %v6137_v18 = vld [vmem:[#allocation2 + $0x14] sm:$0x1]  ;;  %7942 = vmatpush.bf16.msra.mxu0 %v9430_v25  ;;  %v5597_v1 = vsel %vm1503_vm10, %v5595_v14, %v5596_v3  ;;  %v6316_v25 = vshll.u32 %v12094_v54, 16 }
 0x4b5   : > { %13497 = vst [vmem:[#allocation25_spill] sm:$0xff] %v12428_v20  ;;  %v6281_v59 = vunpack.c.l.b16 %v6137_v18  ;;  %7010 = vmatpush.bf16.msra.mxu2 %v9415_v33  ;;  %v5484_v20 = vrot.slane %v5482_v10, 1  ;;  %v7157_v10 = vld [vmem:[#allocation2 + $0x20] sm:$0x1] }
 0x4b6   : > { %v12430_v48 = vadd.f32 %v6023_v45, %v5935_v26  ;;  %v5850_v32 = vpop.f32.mrf.mxu1  ;;  %v9422_v45 = vld [vmem:[%s13357_s3 + $0x180] sm:$0xff]  ;;  %v5480_v26 = vor.u32 %v5479_v13, %v5475_v24  ;;  %v6318_v21 = vrot.slane %v6316_v25, 1  ;;  %v6314_v13 = vshrl.u32 %v12094_v54, 16 }
 0x4b7   : > { %6904 = vmatmul.bf16.gmra.mxu0 %v12406_v47  ;;  %7853 = vmatpush.bf16.msra.mxu3 %v9422_v45  ;;  %v6297_v33 = vpack.c.b16 %v6281_v59, %v6281_v59  ;;  %v9770_v25 = vld [vmem:[#allocation2 + $0xc0] sm:$0xff]  }
 0x4b8   : > { %13498 = vst [vmem:[#allocation26_spill] sm:$0xff] %v12430_v48  ;;  %v5485_v18 = vsel %vm1246_vm9, %v5480_v26, %v5484_v20  ;;  %v6319_v24 = vor.u32 %v6318_v21, %v6314_v13  ;;  %v7301_v20 = vunpack.c.l.b16 %v7157_v10  ;;  %v9607_v21 = vld [vmem:[#allocation2 + $0x18] sm:$0xff]  }
 0x4b9   : > { %5889 = vmatmul.bf16.gmra.mxu1 %v12379_v58  ;;  %7011 = vmatpush.bf16.msra.mxu2 %v9414_v62  ;;  %v6321_v14 = vshll.u32 %v6297_v33, 16 }
 0x4ba   : > { %v6025_v12 = vpop.f32.mrf.mxu3  ;;  %v12461_v13 = vpack.c.b16 %v7301_v20, %v7301_v20 }
 0x4bb   : > { %v5936_v23 = vpop.f32.mrf.mxu2  ;;  %v6323_v59 = vrot.slane %v6321_v14, 1 }
 0x4bc   : > { %v5937_v48 = vadd.f32 %v5936_v23, %v5847_v34  ;;  %v12449_v29 = vpop.f32.mrf.mxu0  ;;  %v9967_v34 = vld [vmem:[#allocation2 + $0xc] sm:$0xe]  ;;  %v6138_v23 = vld [vmem:[#allocation2 + $0x20] sm:$0x1]  ;;  %13503 = vst [vmem:[#allocation31_spill] sm:$0xff] %v12461_v13 }
 0x4bd   : > { %13499 = vst [vmem:[#allocation27_spill] sm:$0xff] %v12449_v29  ;;  %v9968_v26 = vor.u32 %v9967_v34, %v12096_v40  ;;  %v6324_v54 = vsel %vm1246_vm9, %v6319_v24, %v6323_v59  ;;  %v7336_v40 = vshll.u32 %v9607_v21, 16  ;;  %v9444_v24 = vld [vmem:[%s13357_s3 + $0x230] sm:$0xff] }
 0x4be   : > { %v12451_v58 = vadd.f32 %v6025_v12, %v5937_v48  ;;  %v5852_v52 = vpop.f32.mrf.mxu1  ;;  %8025 = vmatpush.bf16.msra.mxu1 %v9444_v24  ;;  %v6139_v24 = vld [vmem:[#allocation2 + $0x2c] sm:$0x1] }
 0x4bf   : > { %6067 = vmatmul.bf16.gmra.mxu3 %v5597_v1 }
 0x4c0   : > { %13500 = vst [vmem:[#allocation28_spill] sm:$0xff] %v12451_v58  ;;  %5978 = vmatmul.bf16.gmra.mxu2 %v5485_v18  ;;  %v6282_v18 = vunpack.c.l.b16 %v6138_v23  ;;  %v7341_v23 = vshll.u32 %v12461_v13, 16  ;;  %v7158_v58 = vld [vmem:[#allocation2 + $0x2c] sm:$0x1] }
 0x4c2   : > { %v6028_v47 = vpop.f32.mrf.mxu3 }
 0x4c3   : > { %v5939_v3 = vpop.f32.mrf.mxu2 }
 0x4c4   : > { %v5940_v45 = vadd.f32 %v5939_v3, %v5850_v32  ;;  %v12455_v1 = vpop.f32.mrf.mxu0  ;;  %v6569_v3 = vrot.slane %v9968_v26, 1  ;;  %v12472_v26 = vld [vmem:[#allocation2 + $0x24] sm:$0xf0] }
 0x4c5   : > { %13501 = vst [vmem:[#allocation29_spill] sm:$0xff] %v12455_v1  ;;  %v6570_v1 = vrot.slane %v6297_v33, 1 }
 0x4c6   : > { %v12457_v48 = vadd.f32 %v6028_v47, %v5940_v45  ;;  %v5855_v12 = vpop.f32.mrf.mxu1  ;;  %v6298_v45 = vpack.c.b16 %v6282_v18, %v6282_v18 }
 0x4c7   : > { %6909 = vmatmul.bf16.gmra.mxu0 %v9770_v25  ;;  %v6571_v59 = vsel %vm1503_vm10, %v6569_v3, %v6570_v1  ;;  %v7338_v25 = vrot.slane %v7336_v40, 1  ;;  %v9771_v1 = vld [vmem:[#allocation2 + $0x18] sm:$0xf0]  ;;  %v9772_v3 = vld [vmem:[#allocation2 + $0x18] sm:$0xe]  ;;  %v7302_v40 = vunpack.c.l.b16 %v7158_v58 }
 0x4c8   : > { %13502 = vst [vmem:[#allocation30_spill] sm:$0xff] %v12457_v48  ;;  %v6333_v33 = vshll.u32 %v6298_v45, 16 }
 0x4c9   : > { %6923 = vmatmul.bf16.vlgmr.msrb.gmra.mxu1 %v6324_v54  ;;  %v7343_v54 = vrot.slane %v7341_v23, 1  ;;  %v6283_v23 = vunpack.c.l.b16 %v6139_v24 }
 0x4ca   : > { %v6030_v62 = vpop.f32.mrf.mxu3 }
 0x4cb   : > { %v5941_v32 = vpop.f32.mrf.mxu2 }
 0x4cc   : > { %v5942_v47 = vadd.f32 %v5941_v32, %v5852_v52  ;;  %v12463_v14 = vpop.f32.mrf.mxu0  ;;  %v7127_v52 = vld [vmem:[#allocation2 + $0x24] sm:$0xff]  }
 0x4cd   : > { %13504 = vst [vmem:[#allocation32_spill] sm:$0xff] %v12463_v14 }
 0x4ce   : > { %v12465_v10 = vadd.f32 %v6030_v62, %v5942_v47  ;;  %v5857_v34 = vpop.f32.mrf.mxu1  ;;  %v7334_v62 = vshrl.u32 %v9607_v21, 16  ;;  %v6335_v47 = vrot.slane %v6333_v33, 1 }
 0x4cf   : > { %7854 = vmatmul.bf16.vlgmr.msra.gmra.mxu3 %v9607_v21 }
 0x4d0   : > { %13505 = vst [vmem:[#allocation33_spill] sm:$0xff] %v12465_v10  ;;  %7012 = vmatmul.bf16.vlgmr.msra.gmra.mxu2 %v6571_v59  ;;  %v7339_v14 = vor.u32 %v7338_v25, %v7334_v62  ;;  %v6336_v21 = vsel %vm1246_vm9, %v12117_v49, %v6335_v47  ;;  %v6573_v25 = vrot.slane %v6298_v45, 1 }
 0x4d2   : > { %v6033_v20 = vpop.f32.mrf.mxu3  ;;  %v7344_v29 = vsel %vm1246_vm9, %v7339_v14, %v7343_v54  ;;  %v12486_v14 = vpack.c.b16 %v7302_v40, %v7302_v40 }
 0x4d3   : > { %v5944_v18 = vpop.f32.mrf.mxu2 }
 0x4d4   : > { %v5945_v32 = vadd.f32 %v5944_v18, %v5855_v12  ;;  %v12474_v10 = vpop.f32.mrf.mxu0  ;;  %v9773_v12 = vor.u32 %v9772_v3, %v9771_v1  ;;  %v7348_v18 = vshll.u32 %v7127_v52, 16  ;;  %13510 = vst [vmem:[#allocation38_spill] sm:$0xff] %v12486_v14  ;;  %v7346_v1 = vshrl.u32 %v7127_v52, 16 }
 0x4d5   : > { %13506 = vst [vmem:[#allocation34_spill] sm:$0xff] %v12474_v10  ;;  %v6338_v3 = vshrl.u32 %v12125_v16, 16 }
 0x4d6   : > { %v12476_v48 = vadd.f32 %v6033_v20, %v5945_v32  ;;  %v5860_v13 = vpop.f32.mrf.mxu1  ;;  %v6340_v20 = vshll.u32 %v12125_v16, 16  ;;  %v6572_v32 = vrot.slane %v9773_v12, 1  ;;  %v7350_v47 = vrot.slane %v7348_v18, 1 }
 0x4d7   : > { %7943 = vmatmul.bf16.vlgmr.msra.gmra.mxu0 %v7344_v29  ;;  %v6299_v29 = vpack.c.b16 %v6283_v23, %v6283_v23 }
 0x4d8   : > { %13507 = vst [vmem:[#allocation35_spill] sm:$0xff] %v12476_v48  ;;  %v6574_v54 = vsel %vm1503_vm10, %v6572_v32, %v6573_v25  ;;  %v6342_v45 = vrot.slane %v6340_v20, 1 }
 0x4d9   : > { %6928 = vmatmul.bf16.gmra.mxu1 %v6336_v21  ;;  %v6345_v24 = vshll.u32 %v6299_v29, 16  ;;  %v9970_v21 = vld [vmem:[#allocation2 + $0x24] sm:$0xe] }
 0x4da   : > { %v6035_v59 = vpop.f32.mrf.mxu3  ;;  %v6343_v40 = vor.u32 %v6342_v45, %v6338_v3  ;;  %v9795_v45 = vld [vmem:[#allocation2 + $0x30] sm:$0xff]   ;;  %v6576_v3 = vrot.slane %v6299_v29, 1 }
 0x4db   : > { %v5946_v33 = vpop.f32.mrf.mxu2  ;;  %v6347_v20 = vrot.slane %v6345_v24, 1 }
 0x4dc   : > { %v5947_v62 = vadd.f32 %v5946_v33, %v5857_v34  ;;  %v12482_v48 = vpop.f32.mrf.mxu0  ;;  %v7353_v34 = vshll.u32 %v12486_v14, 16 }
 0x4dd   : > { %13508 = vst [vmem:[#allocation36_spill] sm:$0xff] %v12482_v48  ;;  %v6348_v48 = vsel %vm1246_vm9, %v6343_v40, %v6347_v20  ;;  %v12509_v40 = vld [vmem:[#allocation2 + $0x3c] sm:$0xf0] }
 0x4de   : > { %v12484_v10 = vadd.f32 %v6035_v59, %v5947_v62  ;;  %v5862_v49 = vpop.f32.mrf.mxu1  ;;  %v7351_v59 = vor.u32 %v7350_v47, %v7346_v1  ;;  %v7159_v62 = vld [vmem:[#allocation2 + $0x38] sm:$0x1]  ;;  %v7355_v25 = vrot.slane %v7353_v34, 1  ;;  %13514 = vst [vmem:[#allocation42_spill] sm:$0xff] %v12509_v40 }
 0x4df   : > { %7859 = vmatmul.bf16.gmra.mxu3 %v7127_v52  ;;  %v7303_v14 = vunpack.c.l.b16 %v7159_v62 }
 0x4e0   : > { %13509 = vst [vmem:[#allocation37_spill] sm:$0xff] %v12484_v10  ;;  %7017 = vmatmul.bf16.gmra.mxu2 %v6574_v54  ;;  %v6140_v10 = vld [vmem:[#allocation2 + $0x38] sm:$0x1]  ;;  %v9971_v54 = vor.u32 %v9970_v21, %v12127_v37  ;;  %v7356_v16 = vsel %vm1246_vm9, %v7351_v59, %v7355_v25  ;;  %v7360_v21 = vshll.u32 %v9795_v45, 16  ;;  %v7358_v25 = vshrl.u32 %v9795_v45, 16 }
 0x4e1   : > { %v6284_v47 = vunpack.c.l.b16 %v6140_v10  ;;  %v9443_v10 = vld [vmem:[%s13357_s3 + $0x228] sm:$0xff] }
 0x4e2   : > { %v6038_v58 = vpop.f32.mrf.mxu3  ;;  %v6575_v1 = vrot.slane %v9971_v54, 1  ;;  %8026 = vmatpush.bf16.msra.mxu1 %v9443_v10  ;;  %v7362_v62 = vrot.slane %v7360_v21, 1 }
 0x4e3   : > { %v5949_v12 = vpop.f32.mrf.mxu2  ;;  %v6300_v24 = vpack.c.b16 %v6284_v47, %v6284_v47 }
 0x4e4   : > { %v5950_v33 = vadd.f32 %v5949_v12, %v5860_v13  ;;  %v12491_v23 = vpop.f32.mrf.mxu0 }
 0x4e6   : > { %v12493_v32 = vadd.f32 %v6038_v58, %v5950_v33  ;;  %v5865_v18 = vpop.f32.mrf.mxu1  ;;  %v12498_v58 = vpack.c.b16 %v7303_v14, %v7303_v14  ;;  %v6357_v14 = vshll.u32 %v6300_v24, 16 }
 0x4e7   : > { %7948 = vmatmul.bf16.gmra.mxu0 %v7356_v16 }
 0x4e8   : > { %13511 = vst [vmem:[#allocation39_spill] sm:$0xff] %v12498_v58  ;;  %v7365_v29 = vshll.u32 %v12498_v58, 16  ;;  %v6359_v16 = vrot.slane %v6357_v14, 1  ;;  %v6141_v58 = vld [vmem:[#allocation2 + $0x44] sm:$0x1]  ;;  %v6579_v14 = vrot.slane %v6300_v24, 1 }
 0x4e9   : > { %6933 = vmatmul.bf16.gmra.mxu1 %v6348_v48  ;;  %v6577_v48 = vsel %vm1503_vm10, %v6575_v1, %v6576_v3  ;;  %v9774_v3 = vld [vmem:[#allocation2 + $0x30] sm:$0xf0]  ;;  %v6285_v10 = vunpack.c.l.b16 %v6141_v58 }
 0x4ea   : > { %v6040_v52 = vpop.f32.mrf.mxu3 }
 0x4eb   : > { %v5951_v13 = vpop.f32.mrf.mxu2 }
 0x4ec   : > { %v5952_v34 = vadd.f32 %v5951_v13, %v5862_v49  ;;  %v12500_v12 = vpop.f32.mrf.mxu0  ;;  %v7131_v49 = vld [vmem:[#allocation2 + $0x3c] sm:$0xff]   ;;  %v7363_v13 = vor.u32 %v7362_v62, %v7358_v25 }
 0x4ed   : > { %13512 = vst [vmem:[#allocation40_spill] sm:$0xff] %v12500_v12  ;;  %v7160_v12 = vld [vmem:[#allocation2 + $0x44] sm:$0x1]  ;;  %v7372_v25 = vshll.u32 %v7131_v49, 16 }
 0x4ee   : > { %v12502_v37 = vadd.f32 %v6040_v52, %v5952_v34  ;;  %v5867_v59 = vpop.f32.mrf.mxu1  ;;  %v7367_v52 = vrot.slane %v7365_v29, 1  ;;  %v7304_v21 = vunpack.c.l.b16 %v7160_v12 }
 0x4ef   : > { %7864 = vmatmul.bf16.gmra.mxu3 %v9795_v45  ;;  %v6360_v45 = vsel %vm1246_vm9, %v12170_v28, %v6359_v16  ;;  %v7374_v58 = vrot.slane %v7372_v25, 1  ;;  %v7370_v16 = vshrl.u32 %v7131_v49, 16 }
 0x4f0   : > { %13513 = vst [vmem:[#allocation41_spill] sm:$0xff] %v12502_v37  ;;  %7022 = vmatmul.bf16.gmra.mxu2 %v6577_v48  ;;  %v9775_v37 = vld [vmem:[#allocation2 + $0x30] sm:$0xe]  ;;  %v7368_v40 = vsel %vm1246_vm9, %v7363_v13, %v7367_v52  ;;  %v12523_v52 = vpack.c.b16 %v7304_v21, %v7304_v21  ;;  %v6362_v13 = vshrl.u32 %v12172_v57, 16 }
 0x4f2   : > { %v6043_v33 = vpop.f32.mrf.mxu3  ;;  %13518 = vst [vmem:[#allocation46_spill] sm:$0xff] %v12523_v52 }
 0x4f3   : > { %v5954_v20 = vpop.f32.mrf.mxu2 }
 0x4f4   : > { %v5955_v54 = vadd.f32 %v5954_v20, %v5865_v18  ;;  %v12511_v47 = vpop.f32.mrf.mxu0  ;;  %v9776_v18 = vor.u32 %v9775_v37, %v9774_v3 }
 0x4f6   : > { %v12513_v34 = vadd.f32 %v6043_v33, %v5955_v54  ;;  %v5870_v1 = vpop.f32.mrf.mxu1  ;;  %v6364_v33 = vshll.u32 %v12172_v57, 16  ;;  %v6578_v20 = vrot.slane %v9776_v18, 1 }
 0x4f7   : > { %7953 = vmatmul.bf16.gmra.mxu0 %v7368_v40  ;;  %v6301_v40 = vpack.c.b16 %v6285_v10, %v6285_v10 }
 0x4f8   : > { %13515 = vst [vmem:[#allocation43_spill] sm:$0xff] %v12513_v34  ;;  %v6580_v37 = vsel %vm1503_vm10, %v6578_v20, %v6579_v14  ;;  %v6366_v24 = vrot.slane %v6364_v33, 1 }
 0x4f9   : > { %6938 = vmatmul.bf16.gmra.mxu1 %v6360_v45  ;;  %v6369_v3 = vshll.u32 %v6301_v40, 16  ;;  %v9973_v45 = vld [vmem:[#allocation2 + $0x3c] sm:$0xe] }
 0x4fa   : > { %v6045_v48 = vpop.f32.mrf.mxu3  ;;  %v6367_v21 = vor.u32 %v6366_v24, %v6362_v13  ;;  %v9796_v24 = vld [vmem:[#allocation2 + $0x48] sm:$0xff]   ;;  %v6582_v13 = vrot.slane %v6301_v40, 1 }
 0x4fb   : > { %v5956_v29 = vpop.f32.mrf.mxu2  ;;  %v6371_v33 = vrot.slane %v6369_v3, 1 }
 0x4fc   : > { %v5957_v62 = vadd.f32 %v5956_v29, %v5867_v59  ;;  %v12519_v54 = vpop.f32.mrf.mxu0  ;;  %v7377_v59 = vshll.u32 %v12523_v52, 16 }
 0x4fd   : > { %13516 = vst [vmem:[#allocation44_spill] sm:$0xff] %v12519_v54  ;;  %v6372_v54 = vsel %vm1246_vm9, %v6367_v21, %v6371_v33  ;;  %v12546_v21 = vld [vmem:[#allocation2 + $0x54] sm:$0xf0] }
 0x4fe   : > { %v12521_v34 = vadd.f32 %v6045_v48, %v5957_v62  ;;  %v5872_v28 = vpop.f32.mrf.mxu1  ;;  %v7375_v48 = vor.u32 %v7374_v58, %v7370_v16  ;;  %v7161_v62 = vld [vmem:[#allocation2 + $0x50] sm:$0x1]  ;;  %v7379_v14 = vrot.slane %v7377_v59, 1  ;;  %13522 = vst [vmem:[#allocation50_spill] sm:$0xff] %v12546_v21 }
 0x4ff   : > { %7869 = vmatmul.bf16.gmra.mxu3 %v7131_v49  ;;  %v7305_v52 = vunpack.c.l.b16 %v7161_v62 }
 0x500   : > { %13517 = vst [vmem:[#allocation45_spill] sm:$0xff] %v12521_v34  ;;  %7027 = vmatmul.bf16.gmra.mxu2 %v6580_v37  ;;  %v6142_v34 = vld [vmem:[#allocation2 + $0x50] sm:$0x1]  ;;  %v9974_v37 = vor.u32 %v9973_v45, %v12174_v30  ;;  %v7380_v57 = vsel %vm1246_vm9, %v7375_v48, %v7379_v14  ;;  %v7384_v45 = vshll.u32 %v9796_v24, 16  ;;  %v7382_v14 = vshrl.u32 %v9796_v24, 16 }
 0x501   : > { %v6286_v58 = vunpack.c.l.b16 %v6142_v34  ;;  %v9442_v34 = vld [vmem:[%s13357_s3 + $0x220] sm:$0xff] }
 0x502   : > { %v6048_v12 = vpop.f32.mrf.mxu3  ;;  %v6581_v16 = vrot.slane %v9974_v37, 1  ;;  %8027 = vmatpush.bf16.msra.mxu1 %v9442_v34  ;;  %v7386_v62 = vrot.slane %v7384_v45, 1 }
 0x503   : > { %v5959_v18 = vpop.f32.mrf.mxu2  ;;  %v6302_v3 = vpack.c.b16 %v6286_v58, %v6286_v58 }
 0x504   : > { %v5960_v29 = vadd.f32 %v5959_v18, %v5870_v1  ;;  %v12528_v10 = vpop.f32.mrf.mxu0 }
 0x506   : > { %v12530_v20 = vadd.f32 %v6048_v12, %v5960_v29  ;;  %v5875_v25 = vpop.f32.mrf.mxu1  ;;  %v12535_v12 = vpack.c.b16 %v7305_v52, %v7305_v52  ;;  %v6381_v52 = vshll.u32 %v6302_v3, 16 }
 0x507   : > { %7958 = vmatmul.bf16.gmra.mxu0 %v7380_v57 }
 0x508   : > { %13519 = vst [vmem:[#allocation47_spill] sm:$0xff] %v12535_v12  ;;  %v7389_v40 = vshll.u32 %v12535_v12, 16  ;;  %v6383_v57 = vrot.slane %v6381_v52, 1  ;;  %v6143_v12 = vld [vmem:[#allocation2 + $0x5c] sm:$0x1]  ;;  %v6585_v52 = vrot.slane %v6302_v3, 1 }
 0x509   : > { %6943 = vmatmul.bf16.gmra.mxu1 %v6372_v54  ;;  %v6583_v54 = vsel %vm1503_vm10, %v6581_v16, %v6582_v13  ;;  %v9777_v13 = vld [vmem:[#allocation2 + $0x48] sm:$0xf0]  ;;  %v6287_v34 = vunpack.c.l.b16 %v6143_v12 }
 0x50a   : > { %v6050_v49 = vpop.f32.mrf.mxu3 }
 0x50b   : > { %v5961_v1 = vpop.f32.mrf.mxu2 }
 0x50c   : > { %v5962_v59 = vadd.f32 %v5961_v1, %v5872_v28  ;;  %v12537_v18 = vpop.f32.mrf.mxu0  ;;  %v7135_v28 = vld [vmem:[#allocation2 + $0x54] sm:$0xff]   ;;  %v7387_v1 = vor.u32 %v7386_v62, %v7382_v14 }
 0x50d   : > { %13520 = vst [vmem:[#allocation48_spill] sm:$0xff] %v12537_v18  ;;  %v7162_v18 = vld [vmem:[#allocation2 + $0x5c] sm:$0x1]  ;;  %v7396_v14 = vshll.u32 %v7135_v28, 16 }
 0x50e   : > { %v12539_v30 = vadd.f32 %v6050_v49, %v5962_v59  ;;  %v5877_v48 = vpop.f32.mrf.mxu1  ;;  %v7391_v49 = vrot.slane %v7389_v40, 1  ;;  %v7306_v45 = vunpack.c.l.b16 %v7162_v18 }
 0x50f   : > { %7874 = vmatmul.bf16.gmra.mxu3 %v9796_v24  ;;  %v6384_v24 = vsel %vm1246_vm9, %v12189_v56, %v6383_v57  ;;  %v7398_v12 = vrot.slane %v7396_v14, 1  ;;  %v7394_v57 = vshrl.u32 %v7135_v28, 16 }
 0x510   : > { %13521 = vst [vmem:[#allocation49_spill] sm:$0xff] %v12539_v30  ;;  %7032 = vmatmul.bf16.gmra.mxu2 %v6583_v54  ;;  %v9778_v30 = vld [vmem:[#allocation2 + $0x48] sm:$0xe]  ;;  %v7392_v21 = vsel %vm1246_vm9, %v7387_v1, %v7391_v49  ;;  %v12560_v49 = vpack.c.b16 %v7306_v45, %v7306_v45  ;;  %v6386_v1 = vshrl.u32 %v12191_v55, 16 }
 0x512   : > { %v6053_v29 = vpop.f32.mrf.mxu3  ;;  %13526 = vst [vmem:[#allocation54_spill] sm:$0xff] %v12560_v49 }
 0x513   : > { %v5964_v33 = vpop.f32.mrf.mxu2 }
 0x514   : > { %v5965_v37 = vadd.f32 %v5964_v33, %v5875_v25  ;;  %v12548_v58 = vpop.f32.mrf.mxu0  ;;  %v9779_v25 = vor.u32 %v9778_v30, %v9777_v13 }
 0x516   : > { %v12550_v59 = vadd.f32 %v6053_v29, %v5965_v37  ;;  %v5880_v16 = vpop.f32.mrf.mxu1  ;;  %v6388_v29 = vshll.u32 %v12191_v55, 16  ;;  %v6584_v33 = vrot.slane %v9779_v25, 1 }
 0x517   : > { %7963 = vmatmul.bf16.gmra.mxu0 %v7392_v21  ;;  %v6303_v21 = vpack.c.b16 %v6287_v34, %v6287_v34 }
 0x518   : > { %13523 = vst [vmem:[#allocation51_spill] sm:$0xff] %v12550_v59  ;;  %v6586_v30 = vsel %vm1503_vm10, %v6584_v33, %v6585_v52  ;;  %v6390_v3 = vrot.slane %v6388_v29, 1 }
 0x519   : > { %6948 = vmatmul.bf16.gmra.mxu1 %v6384_v24  ;;  %v6393_v13 = vshll.u32 %v6303_v21, 16  ;;  %v9976_v24 = vld [vmem:[#allocation2 + $0x54] sm:$0xe] }
 0x51a   : > { %v6055_v54 = vpop.f32.mrf.mxu3  ;;  %v6391_v45 = vor.u32 %v6390_v3, %v6386_v1  ;;  %v9797_v3 = vld [vmem:[#allocation2 + $0x60] sm:$0xff]   ;;  %v6588_v1 = vrot.slane %v6303_v21, 1 }
 0x51b   : > { %v5966_v40 = vpop.f32.mrf.mxu2  ;;  %v6395_v29 = vrot.slane %v6393_v13, 1 }
 0x51c   : > { %v5967_v62 = vadd.f32 %v5966_v40, %v5877_v48  ;;  %v12556_v37 = vpop.f32.mrf.mxu0  ;;  %v7401_v48 = vshll.u32 %v12560_v49, 16 }
 0x51d   : > { %13524 = vst [vmem:[#allocation52_spill] sm:$0xff] %v12556_v37  ;;  %v6396_v37 = vsel %vm1246_vm9, %v6391_v45, %v6395_v29  ;;  %v7406_v45 = vshrl.u32 %v9797_v3, 16 }
 0x51e   : > { %v12558_v59 = vadd.f32 %v6055_v54, %v5967_v62  ;;  %v5882_v56 = vpop.f32.mrf.mxu1  ;;  %v7399_v54 = vor.u32 %v7398_v12, %v7394_v57  ;;  %v7163_v62 = vld [vmem:[#allocation2 + $0x68] sm:$0x1]  ;;  %v7403_v52 = vrot.slane %v7401_v48, 1 }
 0x51f   : > { %7879 = vmatmul.bf16.gmra.mxu3 %v7135_v28  ;;  %v7307_v49 = vunpack.c.l.b16 %v7163_v62 }
 0x520   : > { %13525 = vst [vmem:[#allocation53_spill] sm:$0xff] %v12558_v59  ;;  %7037 = vmatmul.bf16.gmra.mxu2 %v6586_v30  ;;  %v6144_v59 = vld [vmem:[#allocation2 + $0x68] sm:$0x1]  ;;  %v9977_v30 = vor.u32 %v9976_v24, %v12193_v17  ;;  %v7404_v55 = vsel %vm1246_vm9, %v7399_v54, %v7403_v52  ;;  %v7408_v24 = vshll.u32 %v9797_v3, 16 }
 0x521   : > { %v6288_v12 = vunpack.c.l.b16 %v6144_v59  ;;  %v9441_v59 = vld [vmem:[%s13357_s3 + $0x218] sm:$0xff] }
 0x522   : > { %v6058_v18 = vpop.f32.mrf.mxu3  ;;  %v6587_v57 = vrot.slane %v9977_v30, 1  ;;  %8028 = vmatpush.bf16.msra.mxu1 %v9441_v59  ;;  %v9858_v30 = vld [vmem:[#allocation2 + $0x6c] sm:$0xff]  }
 0x523   : > { %v5969_v25 = vpop.f32.mrf.mxu2  ;;  %v6304_v13 = vpack.c.b16 %v6288_v12, %v6288_v12 }
 0x524   : > { %v5970_v40 = vadd.f32 %v5969_v25, %v5880_v16  ;;  %v12565_v34 = vpop.f32.mrf.mxu0 }
 0x526   : > { %v12567_v33 = vadd.f32 %v6058_v18, %v5970_v40  ;;  %v5885_v14 = vpop.f32.mrf.mxu1  ;;  %v12572_v18 = vpack.c.b16 %v7307_v49, %v7307_v49  ;;  %v6405_v49 = vshll.u32 %v6304_v13, 16 }
 0x527   : > { %7968 = vmatmul.bf16.gmra.mxu0 %v7404_v55  ;;  %v7235_v55 = vunpack.c.l.b16 %v9858_v30 }
 0x528   : > { %v7413_v21 = vshll.u32 %v12572_v18, 16 }
 0x529   : > { %6953 = vmatmul.bf16.gmra.mxu1 %v6396_v37  ;;  %v6589_v37 = vsel %vm1503_vm10, %v6587_v57, %v6588_v1  ;;  %v9780_v1 = vld [vmem:[#allocation2 + $0x60] sm:$0xf0] }
 0x52a   : > { %v6060_v28 = vpop.f32.mrf.mxu3  ;;  %v7415_v52 = vrot.slane %v7413_v21, 1 }
 0x52b   : > { %v5971_v16 = vpop.f32.mrf.mxu2 }
 0x52c   : > { %v5972_v48 = vadd.f32 %v5971_v16, %v5882_v56  ;;  %v12574_v25 = vpop.f32.mrf.mxu0  ;;  %v7410_v56 = vrot.slane %v7408_v24, 1 }
 0x52d   : > { %13527 = vst [vmem:[#allocation55_spill] sm:$0xff] %v12574_v25 }
 0x52e   : > { %v12576_v17 = vadd.f32 %v6060_v28, %v5972_v48  ;;  %v5887_v54 = vpop.f32.mrf.mxu1  ;;  %v6407_v28 = vrot.slane %v6405_v49, 1  ;;  %v7411_v16 = vor.u32 %v7410_v56, %v7406_v45  ;;  %v6412_v45 = vshll.u32 %v12206_v46, 16 }
 0x52f   : > { %7884 = vmatmul.bf16.gmra.mxu3 %v9797_v3 }
 0x530   : > { %13528 = vst [vmem:[#allocation56_spill] sm:$0xff] %v12576_v17  ;;  %7042 = vmatmul.bf16.gmra.mxu2 %v6589_v37  ;;  %v9781_v17 = vld [vmem:[#allocation2 + $0x60] sm:$0xe]  ;;  %v6145_v37 = vld [vmem:[#allocation2 + $0x74] sm:$0x1]  ;;  %v7416_v59 = vsel %vm1246_vm9, %v7411_v16, %v7415_v52  ;;  %v6408_v3 = vsel %vm1246_vm9, %v12201_v42, %v6407_v28 }
 0x531   : > { %v9782_v21 = vor.u32 %v9781_v17, %v9780_v1  ;;  %v6289_v49 = vunpack.c.l.b16 %v6145_v37  ;;  %v6414_v17 = vrot.slane %v6412_v45, 1 }
 0x532   : > { %v6063_v40 = vpop.f32.mrf.mxu3 }
 0x533   : > { %v5974_v62 = vpop.f32.mrf.mxu2  ;;  %v6590_v30 = vrot.slane %v9782_v21, 1  ;;  %v6305_v28 = vpack.c.b16 %v6289_v49, %v6289_v49 }
 0x534   : > { %v5975_v29 = vadd.f32 %v5974_v62, %v5885_v14  ;;  %v12583_v12 = vpop.f32.mrf.mxu0  ;;  %v13530_v14 = vunpack.c.h.b16 %v12245_v0 }
 0x535   : > { %v6417_v37 = vshll.u32 %v6305_v28, 16 }
 0x536   : > { %v12585_v48 = vadd.f32 %v6063_v40, %v5975_v29  ;;  %v5890_v57 = vpop.f32.mrf.mxu1  ;;  %v7260_v24 = vpack.c.b16 %v13530_v14, %v7235_v55  ;;  %v6591_v40 = vrot.slane %v6304_v13, 1  ;;  %v7425_v13 = vshll.u32 %v12254_v60, 16 }
 0x537   : > { %7973 = vmatmul.bf16.gmra.mxu0 %v7416_v59  ;;  %v9979_v59 = vld [vmem:[#allocation2 + $0x6c] sm:$0xe]  ;;  %v6419_v45 = vrot.slane %v6417_v37, 1 }
 0x538   : > { %13529 = vst [vmem:[#allocation57_spill] sm:$0xff] %v12585_v48  ;;  %v7420_v29 = vshll.u32 %v7260_v24, 16  ;;  %v6592_v0 = vsel %vm1503_vm10, %v6590_v30, %v6591_v40  ;;  %v7418_v1 = vshrl.u32 %v7260_v24, 16  ;;  %v7427_v40 = vrot.slane %v7425_v13, 1 }
 0x539   : > { %6958 = vmatmul.bf16.gmra.mxu1 %v6408_v3  ;;  %v9980_v60 = vor.u32 %v9979_v59, %v12208_v15 }
 0x53a   : > { %v6065_v25 = vpop.f32.mrf.mxu3  ;;  %v7422_v16 = vrot.slane %v7420_v29, 1 }
 0x53b   : > { %v5976_v56 = vpop.f32.mrf.mxu2 }
 0x53c   : > { %v5977_v62 = vadd.f32 %v5976_v56, %v5887_v54  ;;  %v12593_v48 = vpop.f32.mrf.mxu0  ;;  %v6410_v54 = vshrl.u32 %v12206_v46, 16  ;;  %v7423_v14 = vor.u32 %v7422_v16, %v7418_v1  ;;  %v7165_v56 = vld [vmem:[#allocation2 + $0x80] sm:$0x1]  ;;  %v6593_v1 = vrot.slane %v9980_v60, 1  ;;  %v9859_v60 = vld [vmem:[#allocation2 + $0x84] sm:$0xff]  }
 0x53e   : > { %v12595_v52 = vadd.f32 %v6065_v25, %v5977_v62  ;;  %v5892_v42 = vpop.f32.mrf.mxu1  ;;  %v6415_v25 = vor.u32 %v6414_v17, %v6410_v54  ;;  %v6146_v62 = vld [vmem:[#allocation2 + $0x80] sm:$0x1]  ;;  %v7428_v46 = vsel %vm1246_vm9, %v7423_v14, %v7427_v40  ;;  %v9798_v17 = vld [vmem:[#allocation2 + $0x78] sm:$0xff]   ;;  %v6594_v54 = vrot.slane %v6305_v28, 1 }
 0x53f   : > { %7889 = vmatmul.bf16.gmra.mxu3 %v7260_v24  ;;  %v6290_v16 = vunpack.c.l.b16 %v6146_v62  ;;  %v7432_v59 = vshll.u32 %v9798_v17, 16 }
 0x540   : > { %13531 = vst [vmem:[#allocation58_spill] sm:$0xff] %v12595_v52  ;;  %7047 = vmatmul.bf16.gmra.mxu2 %v6592_v0  ;;  %v6420_v0 = vsel %vm1246_vm9, %v6415_v25, %v6419_v45  ;;  %v7309_v52 = vunpack.c.l.b16 %v7165_v56  ;;  %v6595_v25 = vsel %vm1503_vm10, %v6593_v1, %v6594_v54  ;;  %v7430_v45 = vshrl.u32 %v9798_v17, 16 }
 0x541   : > { %v6306_v37 = vpack.c.b16 %v6290_v16, %v6290_v16  ;;  %v7434_v40 = vrot.slane %v7432_v59, 1 }
 0x542   : > { %v6068_v55 = vpop.f32.mrf.mxu3 }
 0x543   : > { %v5979_v3 = vpop.f32.mrf.mxu2 }
 0x544   : > { %v5980_v21 = vadd.f32 %v5979_v3, %v5890_v57  ;;  %v12600_v49 = vpop.f32.mrf.mxu0 }
 0x546   : > { %v12602_v30 = vadd.f32 %v6068_v55, %v5980_v21  ;;  %v6924_v29 = vpop.f32.mrf.mxu1  ;;  %v12607_v55 = vpack.c.b16 %v7309_v52, %v7309_v52  ;;  %v9440_v21 = vld [vmem:[%s13357_s3 + $0x210] sm:$0xff]  ;;  %v12621_v52 = vld [vmem:[%s13358_s4] ss:$0 sm:$0xff] }
 0x547   : > { %7978 = vmatmul.bf16.gmra.mxu0 %v7428_v46  ;;  %8029 = vmatpush.bf16.msra.mxu1 %v9440_v21  ;;  %v6925_v62 = vadd.f32 %v6924_v29, %v12214_v7  ;;  %v7239_v46 = vunpack.c.l.b16 %v9859_v60  ;;  %v6073_v16 = vadd.f32 %v12621_v52, %v12212_v9  ;;  %v9784_v21 = vld [vmem:[#allocation2 + $0x78] sm:$0xe]  ;;  %v6147_v29 = vld [vmem:[#allocation2 + $0x8c] sm:$0x1]  ;;  %v13535_v9 = vunpack.c.h.b16 %v12256_v61 }
 0x548   : > { %13532 = vst [vmem:[#allocation59_spill] sm:$0xff] %v12607_v55  ;;  %v7437_v28 = vshll.u32 %v12607_v55, 16  ;;  %v6074_v60 = vadd.f32 %v12621_v52, %v12217_v4 }
 0x549   : > { %6963 = vmatmul.bf16.gmra.mxu1 %v6420_v0 }
 0x54a   : > { %v6070_v24 = vpop.f32.mrf.mxu3  ;;  %v7439_v0 = vrot.slane %v7437_v28, 1  ;;  %v7262_v28 = vpack.c.b16 %v13535_v9, %v7239_v46 }
 0x54b   : > { %v5981_v57 = vpop.f32.mrf.mxu2 }
 0x54c   : > { %v5982_v13 = vadd.f32 %v5981_v57, %v5892_v42  ;;  %v12609_v3 = vpop.f32.mrf.mxu0  ;;  %v6429_v42 = vshll.u32 %v6306_v37, 16 }
 0x54d   : > { %13533 = vst [vmem:[#allocation60_spill] sm:$0xff] %v12609_v3  ;;  %v9783_v3 = vld [vmem:[#allocation2 + $0x78] sm:$0xf0] }
 0x54e   : > { %v12611_v15 = vadd.f32 %v6070_v24, %v5982_v13  ;;  %v6926_v14 = vpop.f32.mrf.mxu1  ;;  %v6431_v1 = vrot.slane %v6429_v42, 1  ;;  %v7435_v13 = vor.u32 %v7434_v40, %v7430_v45  ;;  %v9785_v42 = vor.u32 %v9784_v21, %v9783_v3 }
 0x54f   : > { %7894 = vmatmul.bf16.gmra.mxu3 %v9798_v17  ;;  %v6291_v40 = vunpack.c.l.b16 %v6147_v29  ;;  %v7449_v21 = vshll.u32 %v12263_v8, 16  ;;  %v6434_v29 = vshrl.u32 %v12241_v63, 16 }
 0x550   : > { %13534 = vst [vmem:[#allocation61_spill] sm:$0xff] %v12611_v15  ;;  %7052 = vmatmul.bf16.gmra.mxu2 %v6595_v25  ;;  %v7440_v17 = vsel %vm1246_vm9, %v7435_v13, %v7439_v0  ;;  %v6432_v59 = vsel %vm1246_vm9, %v12230_v51, %v6431_v1  ;;  %v6596_v51 = vrot.slane %v9785_v42, 1  ;;  %v7442_v13 = vshrl.u32 %v7262_v28, 16 }
 0x551   : > { %v6307_v1 = vpack.c.b16 %v6291_v40, %v6291_v40 }
 0x552   : > { %v7855_v56 = vpop.f32.mrf.mxu3 }
 0x553   : > { %v7013_v24 = vpop.f32.mrf.mxu2 }
 0x554   : > { %v7014_v57 = vadd.f32 %v7013_v24, %v6925_v62  ;;  %v7944_v54 = vpop.f32.mrf.mxu0  ;;  %v6927_v62 = vadd.f32 %v6926_v14, %v12220_v27  ;;  %v6597_v24 = vrot.slane %v6306_v37, 1 }
 0x555   : > { %v12628_v55 = vadd.f32 %v7944_v54, %v7855_v56  ;;  %v6436_v56 = vshll.u32 %v12241_v63, 16 }
 0x556   : > { %v12626_v25 = vadd.f32 %v7014_v57, %v6073_v16  ;;  %v6929_v15 = vpop.f32.mrf.mxu1  ;;  %v7444_v16 = vshll.u32 %v7262_v28, 16  ;;  %v6598_v27 = vsel %vm1503_vm10, %v6596_v51, %v6597_v24  ;;  %v6148_v24 = vld [vmem:[#allocation2 + $0x98] sm:$0x1] }
 0x557   : > { %7983 = vmatmul.bf16.gmra.mxu0 %v7440_v17  ;;  %v6438_v54 = vrot.slane %v6436_v56, 1  ;;  %v6930_v4 = vadd.f32 %v6929_v15, %v12223_v6  ;;  %v6441_v17 = vshll.u32 %v6307_v1, 16  ;;  %v7451_v56 = vrot.slane %v7449_v21, 1 }
 0x558   : > { %v7446_v37 = vrot.slane %v7444_v16, 1 }
 0x559   : > { %6968 = vmatmul.bf16.gmra.mxu1 %v6432_v59  ;;  %v9982_v59 = vld [vmem:[#allocation2 + $0x84] sm:$0xe]  ;;  %v6439_v40 = vor.u32 %v6438_v54, %v6434_v29  ;;  %v6443_v15 = vrot.slane %v6441_v17, 1  ;;  %v9799_v54 = vld [vmem:[#allocation2 + $0x90] sm:$0xff]  }
 0x55a   : > { %v7857_v7 = vpop.f32.mrf.mxu3  ;;  %v7447_v42 = vor.u32 %v7446_v37, %v7442_v13 }
 0x55b   : > { %v7015_v45 = vpop.f32.mrf.mxu2  ;;  %v6444_v51 = vsel %vm1246_vm9, %v6439_v40, %v6443_v15 }
 0x55c   : > { %v7016_v0 = vadd.f32 %v7015_v45, %v6927_v62  ;;  %v7946_v57 = vpop.f32.mrf.mxu0  ;;  %v7167_v45 = vld [vmem:[#allocation2 + $0x98] sm:$0x1]  ;;  %v7452_v16 = vsel %vm1246_vm9, %v7447_v42, %v7451_v56  ;;  %v9860_v56 = vld [vmem:[#allocation2 + $0x9c] sm:$0xff]  }
 0x55d   : > { %v12641_v3 = vadd.f32 %v7946_v57, %v7857_v7  ;;  %v6075_v7 = vadd.f32 %v12621_v52, %v12225_v41  ;;  %v7311_v41 = vunpack.c.l.b16 %v7167_v45  ;;  %v6292_v57 = vunpack.c.l.b16 %v6148_v24 }
 0x55e   : > { %v12639_v61 = vadd.f32 %v7016_v0, %v6074_v60  ;;  %v6931_v46 = vpop.f32.mrf.mxu1  ;;  %v9983_v0 = vor.u32 %v9982_v59, %v12243_v31  ;;  %v7454_v24 = vshrl.u32 %v9799_v54, 16  ;;  %v7243_v15 = vunpack.c.l.b16 %v9860_v56 }
 0x55f   : > { %7899 = vmatmul.bf16.gmra.mxu3 %v7262_v28  ;;  %v12659_v29 = vpack.c.b16 %v7311_v41, %v7311_v41  ;;  %v6308_v31 = vpack.c.b16 %v6292_v57, %v6292_v57 }
 0x560   : > { %7057 = vmatmul.bf16.gmra.mxu2 %v6598_v27  ;;  %v6932_v27 = vadd.f32 %v6931_v46, %v12232_v36  ;;  %v6599_v13 = vrot.slane %v9983_v0, 1  ;;  %v9439_v36 = vld [vmem:[%s13357_s3 + $0x208] sm:$0xff] }
 0x561   : > { %8030 = vmatpush.bf16.msra.mxu1 %v9439_v36  ;;  %v13537_v36 = vld [vmem:[#allocation11_spill] sm:$0xff] }
 0x562   : > { %v7860_v14 = vpop.f32.mrf.mxu3 }
 0x563   : > { %v7018_v9 = vpop.f32.mrf.mxu2 }
 0x564   : > { %v7019_v62 = vadd.f32 %v7018_v9, %v6930_v4  ;;  %v7949_v60 = vpop.f32.mrf.mxu0  ;;  %v6600_v4 = vrot.slane %v6307_v1, 1  ;;  %v7456_v9 = vshll.u32 %v9799_v54, 16 }
 0x565   : > { %v12651_v8 = vadd.f32 %v7949_v60, %v7860_v14  ;;  %v6076_v14 = vadd.f32 %v12621_v52, %v12234_v19  ;;  %v7461_v19 = vshll.u32 %v12659_v29, 16 }
 0x566   : > { %v12649_v28 = vadd.f32 %v7019_v62, %v6075_v7  ;;  %v6934_v6 = vpop.f32.mrf.mxu1  ;;  %v6601_v1 = vsel %vm1503_vm10, %v6599_v13, %v6600_v4  ;;  %v6453_v62 = vshll.u32 %v6308_v31, 16  ;;  %v7458_v45 = vrot.slane %v7456_v9, 1  ;;  %v9786_v13 = vld [vmem:[#allocation2 + $0x90] sm:$0xf0]  ;;  %v9787_v4 = vld [vmem:[#allocation2 + $0x90] sm:$0xe] }
 0x567   : > { %7988 = vmatmul.bf16.gmra.mxu0 %v7452_v16  ;;  %v6935_v40 = vadd.f32 %v6934_v6, %v12247_v43  ;;  %v7463_v0 = vrot.slane %v7461_v19, 1  ;;  %v6149_v6 = vld [vmem:[#allocation2 + $0xa4] sm:$0x1]  ;;  %v9788_v9 = vor.u32 %v9787_v4, %v9786_v13  ;;  %v7473_v4 = vshll.u32 %v12271_v38, 16 }
 0x568   : > { %v7459_v57 = vor.u32 %v7458_v45, %v7454_v24  ;;  %v6293_v19 = vunpack.c.l.b16 %v6149_v6  ;;  %v13538_v45 = vld [vmem:[#allocation12_spill] sm:$0xff]  ;;  %v6458_v6 = vshrl.u32 %v12328_v35, 16 }
 0x569   : > { %6973 = vmatmul.bf16.gmra.mxu1 %v6444_v51  ;;  %v6455_v51 = vrot.slane %v6453_v62, 1  ;;  %v6078_v24 = vadd.f32 %v12621_v52, %v13538_v45 }
 0x56a   : > { %v7862_v63 = vpop.f32.mrf.mxu3 }
 0x56b   : > { %v7020_v37 = vpop.f32.mrf.mxu2 }
 0x56c   : > { %v7021_v21 = vadd.f32 %v7020_v37, %v6932_v27  ;;  %v7951_v17 = vpop.f32.mrf.mxu0 }
 0x56d   : > { %v12666_v46 = vadd.f32 %v7951_v17, %v7862_v63  ;;  %v6077_v63 = vadd.f32 %v12621_v52, %v12249_v11  ;;  %v13536_v11 = vunpack.c.h.b16 %v12259_v22 }
 0x56e   : > { %v12661_v59 = vadd.f32 %v7021_v21, %v6076_v14  ;;  %v6936_v42 = vpop.f32.mrf.mxu1  ;;  %v6456_v21 = vsel %vm1246_vm9, %v12319_v53, %v6455_v51  ;;  %v6602_v53 = vrot.slane %v9788_v9, 1 }
 0x56f   : > { %7904 = vmatmul.bf16.gmra.mxu3 %v9799_v54  ;;  %v7464_v54 = vsel %vm1246_vm9, %v7459_v57, %v7463_v0  ;;  %v7264_v17 = vpack.c.b16 %v13536_v11, %v7243_v15 }
 0x570   : > { %7062 = vmatmul.bf16.gmra.mxu2 %v6601_v1  ;;  %v6937_v1 = vadd.f32 %v6936_v42, %v13537_v36 }
 0x571   : > { %v7468_v56 = vshll.u32 %v7264_v17, 16  ;;  %v7466_v57 = vshrl.u32 %v7264_v17, 16 }
 0x572   : > { %v7865_v7 = vpop.f32.mrf.mxu3 }
 0x573   : > { %v7023_v60 = vpop.f32.mrf.mxu2 }
 0x574   : > { %v7024_v16 = vadd.f32 %v7023_v60, %v6935_v40  ;;  %v7954_v41 = vpop.f32.mrf.mxu0  ;;  %v6603_v40 = vrot.slane %v6308_v31, 1  ;;  %v7470_v31 = vrot.slane %v7468_v56, 1 }
 0x575   : > { %v12675_v14 = vadd.f32 %v7954_v41, %v7865_v7  ;;  %v6460_v7 = vshll.u32 %v12328_v35, 16 }
 0x576   : > { %v12673_v27 = vadd.f32 %v7024_v16, %v6077_v63  ;;  %v6939_v37 = vpop.f32.mrf.mxu1  ;;  %v6309_v63 = vpack.c.b16 %v6293_v19, %v6293_v19  ;;  %v6604_v42 = vsel %vm1503_vm10, %v6602_v53, %v6603_v40  ;;  %v7471_v9 = vor.u32 %v7470_v31, %v7466_v57  ;;  %v7169_v19 = vld [vmem:[#allocation2 + $0xb0] sm:$0x1] }
 0x577   : > { %7993 = vmatmul.bf16.gmra.mxu0 %v7464_v54  ;;  %v6462_v41 = vrot.slane %v6460_v7, 1  ;;  %v6940_v13 = vadd.f32 %v6939_v37, %v12308_v44  ;;  %v7475_v7 = vrot.slane %v7473_v4, 1 }
 0x578   : > { %v6465_v54 = vshll.u32 %v6309_v63, 16 }
 0x579   : > { %6978 = vmatmul.bf16.gmra.mxu1 %v6456_v21  ;;  %v9985_v21 = vld [vmem:[#allocation2 + $0x9c] sm:$0xe] }
 0x57a   : > { %v7867_v43 = vpop.f32.mrf.mxu3  ;;  %v6467_v37 = vrot.slane %v6465_v54, 1  ;;  %v9986_v45 = vor.u32 %v9985_v21, %v12330_v39 }
 0x57b   : > { %v7025_v62 = vpop.f32.mrf.mxu2 }
 0x57c   : > { %v7026_v60 = vadd.f32 %v7025_v62, %v6937_v1  ;;  %v7956_v0 = vpop.f32.mrf.mxu0  ;;  %v6463_v1 = vor.u32 %v6462_v41, %v6458_v6  ;;  %v6150_v62 = vld [vmem:[#allocation2 + $0xb0] sm:$0x1]  ;;  %v6605_v31 = vrot.slane %v9986_v45, 1  ;;  %v6606_v41 = vrot.slane %v6309_v63, 1  ;;  %v13540_v45 = vld [vmem:[#allocation16_spill] sm:$0xff] }
 0x57d   : > { %v12688_v16 = vadd.f32 %v7956_v0, %v7867_v43  ;;  %v6079_v43 = vadd.f32 %v12621_v52, %v12310_v5  ;;  %v7313_v5 = vunpack.c.l.b16 %v7169_v19  ;;  %v6294_v56 = vunpack.c.l.b16 %v6150_v62 }
 0x57e   : > { %v12686_v22 = vadd.f32 %v7026_v60, %v6078_v24  ;;  %v6941_v15 = vpop.f32.mrf.mxu1  ;;  %v7476_v24 = vsel %vm1246_vm9, %v7471_v9, %v7475_v7  ;;  %v6468_v60 = vsel %vm1246_vm9, %v6463_v1, %v6467_v37  ;;  %v6607_v63 = vsel %vm1503_vm10, %v6605_v31, %v6606_v41  ;;  %v9789_v31 = vld [vmem:[#allocation2 + $0xa8] sm:$0xf0]  ;;  %v9790_v41 = vld [vmem:[#allocation2 + $0xa8] sm:$0xe] }
 0x57f   : > { %7909 = vmatmul.bf16.gmra.mxu3 %v7264_v17  ;;  %v6942_v53 = vadd.f32 %v6941_v15, %v12321_v2  ;;  %v6310_v39 = vpack.c.b16 %v6294_v56, %v6294_v56  ;;  %v9438_v2 = vld [vmem:[%s13357_s3 + $0x200] sm:$0xff] }
 0x580   : > { %7067 = vmatmul.bf16.gmra.mxu2 %v6604_v42  ;;  %v9800_v42 = vld [vmem:[#allocation2 + $0xa8] sm:$0xff]   ;;  %8031 = vmatpush.bf16.msra.mxu1 %v9438_v2 }
 0x581   : > { %v7480_v54 = vshll.u32 %v9800_v42, 16  ;;  %v6477_v9 = vshll.u32 %v6310_v39, 16  ;;  %v7478_v19 = vshrl.u32 %v9800_v42, 16  ;;  %v13542_v2 = vld [vmem:[#allocation9_spill] sm:$0xff] }
 0x582   : > { %v7870_v51 = vpop.f32.mrf.mxu3 }
 0x583   : > { %v7028_v11 = vpop.f32.mrf.mxu2  ;;  %v7482_v1 = vrot.slane %v7480_v54, 1 }
 0x584   : > { %v7029_v36 = vadd.f32 %v7028_v11, %v6940_v13  ;;  %v7959_v40 = vpop.f32.mrf.mxu0  ;;  %v12706_v13 = vpack.c.b16 %v7313_v5, %v7313_v5 }
 0x585   : > { %v12698_v38 = vadd.f32 %v7959_v40, %v7870_v51  ;;  %v6080_v51 = vadd.f32 %v12621_v52, %v12323_v50  ;;  %v9861_v40 = vld [vmem:[#allocation2 + $0xb4] sm:$0xff]   ;;  %v7483_v56 = vor.u32 %v7482_v1, %v7478_v19 }
 0x586   : > { %v12696_v17 = vadd.f32 %v7029_v36, %v6079_v43  ;;  %v6944_v44 = vpop.f32.mrf.mxu1  ;;  %v7485_v50 = vshll.u32 %v12706_v13, 16  ;;  %v13539_v43 = vld [vmem:[#allocation17_spill] sm:$0xff]  ;;  %v7247_v7 = vunpack.c.l.b16 %v9861_v40 }
 0x587   : > { %7998 = vmatmul.bf16.gmra.mxu0 %v7476_v24  ;;  %v6945_v36 = vadd.f32 %v6944_v44, %v13539_v43  ;;  %v13544_v43 = vld [vmem:[#allocation19_spill] sm:$0xff] }
 0x588   : > { %v7487_v37 = vrot.slane %v7485_v50, 1 }
 0x589   : > { %6983 = vmatmul.bf16.gmra.mxu1 %v6468_v60  ;;  %v6479_v60 = vrot.slane %v6477_v9, 1  ;;  %v9791_v9 = vor.u32 %v9790_v41, %v9789_v31 }
 0x58a   : > { %v7872_v35 = vpop.f32.mrf.mxu3 }
 0x58b   : > { %v7030_v0 = vpop.f32.mrf.mxu2 }
 0x58c   : > { %v7031_v57 = vadd.f32 %v7030_v0, %v6942_v53  ;;  %v7961_v4 = vpop.f32.mrf.mxu0 }
 0x58d   : > { %v12713_v15 = vadd.f32 %v7961_v4, %v7872_v35  ;;  %v6081_v35 = vadd.f32 %v12621_v52, %v13540_v45  ;;  %v13541_v4 = vld [vmem:[#allocation7_spill] sm:$0xff]  ;;  %v13546_v45 = vld [vmem:[#allocation18_spill] sm:$0xff] }
 0x58e   : > { %v12708_v6 = vadd.f32 %v7031_v57, %v6080_v51  ;;  %v6946_v21 = vpop.f32.mrf.mxu1  ;;  %v7488_v57 = vsel %vm1246_vm9, %v7483_v56, %v7487_v37  ;;  %v6480_v54 = vsel %vm1246_vm9, %v13541_v4, %v6479_v60  ;;  %v6608_v60 = vrot.slane %v9791_v9, 1 }
 0x58f   : > { %7914 = vmatmul.bf16.gmra.mxu3 %v9800_v42  ;;  %v6151_v42 = vld [vmem:[#allocation2 + $0xbc] sm:$0x1] }
 0x590   : > { %7072 = vmatmul.bf16.gmra.mxu2 %v6607_v63  ;;  %v13543_v63 = vunpack.c.h.b16 %v13542_v2  ;;  %v6295_v1 = vunpack.c.l.b16 %v6151_v42 }
 0x592   : > { %v7875_v11 = vpop.f32.mrf.mxu3  ;;  %v7266_v50 = vpack.c.b16 %v13543_v63, %v7247_v7  ;;  %v13550_v63 = vld [vmem:[#allocation13_spill] sm:$0xff] }
 0x593   : > { %v7033_v62 = vpop.f32.mrf.mxu2 }
 0x594   : > { %v7034_v24 = vadd.f32 %v7033_v62, %v6945_v36  ;;  %v7964_v5 = vpop.f32.mrf.mxu0  ;;  %v6947_v36 = vadd.f32 %v6946_v21, %v13544_v43  ;;  %v6609_v62 = vrot.slane %v6310_v39, 1  ;;  %v7490_v4 = vshrl.u32 %v7266_v50, 16 }
 0x595   : > { %v12722_v51 = vadd.f32 %v7964_v5, %v7875_v11  ;;  %v13545_v11 = vld [vmem:[#allocation23_spill] sm:$0xff]  ;;  %v7497_v43 = vshll.u32 %v13550_v63, 16  ;;  %v13554_v63 = vld [vmem:[#allocation24_spill] sm:$0xff] }
 0x596   : > { %v12720_v53 = vadd.f32 %v7034_v24, %v6081_v35  ;;  %v6949_v0 = vpop.f32.mrf.mxu1  ;;  %v6484_v40 = vshll.u32 %v13545_v11, 16  ;;  %v6082_v35 = vadd.f32 %v12621_v52, %v13546_v45  ;;  %v7492_v24 = vshll.u32 %v7266_v50, 16 }
 0x597   : > { %8003 = vmatmul.bf16.gmra.mxu0 %v7488_v57  ;;  %v6311_v57 = vpack.c.b16 %v6295_v1, %v6295_v1  ;;  %v6610_v21 = vsel %vm1503_vm10, %v6608_v60, %v6609_v62  ;;  %v6482_v9 = vshrl.u32 %v13545_v11, 16  ;;  %v13551_v1 = vld [vmem:[#allocation8_spill] sm:$0xff]  ;;  %v7171_v60 = vld [vmem:[#allocation2 + $0xc8] sm:$0x1] }
 0x598   : > { %v7494_v39 = vrot.slane %v7492_v24, 1  ;;  %v6486_v42 = vrot.slane %v6484_v40, 1  ;;  %v6152_v24 = vld [vmem:[#allocation2 + $0xc8] sm:$0x1]  ;;  %v7499_v40 = vrot.slane %v7497_v43, 1 }
 0x599   : > { %6988 = vmatmul.bf16.gmra.mxu1 %v6480_v54  ;;  %v13549_v54 = vld [vmem:[#allocation20_spill] sm:$0xff] }
 0x59a   : > { %v7877_v44 = vpop.f32.mrf.mxu3  ;;  %v6950_v2 = vadd.f32 %v6949_v0, %v13549_v54  ;;  %v6487_v62 = vor.u32 %v6486_v42, %v6482_v9  ;;  %v13555_v42 = vld [vmem:[#allocation21_spill] sm:$0xff] }
 0x59b   : > { %v7035_v19 = vpop.f32.mrf.mxu2 }
 0x59c   : > { %v7036_v37 = vadd.f32 %v7035_v19, %v6947_v36  ;;  %v7966_v5 = vpop.f32.mrf.mxu0  ;;  %v6489_v36 = vshll.u32 %v6311_v57, 16  ;;  %v9988_v19 = vld [vmem:[#allocation2 + $0xb4] sm:$0xe] }
 0x59d   : > { %v12735_v31 = vadd.f32 %v7966_v5, %v7877_v44  ;;  %v6083_v44 = vadd.f32 %v12621_v52, %v13551_v1  ;;  %v7315_v1 = vunpack.c.l.b16 %v7171_v60 }
 0x59e   : > { %v12733_v56 = vadd.f32 %v7036_v37, %v6082_v35  ;;  %v6951_v7 = vpop.f32.mrf.mxu1  ;;  %v7495_v35 = vor.u32 %v7494_v39, %v7490_v4 }
 0x59f   : > { %7919 = vmatmul.bf16.gmra.mxu3 %v7266_v50  ;;  %13548 = vst [vmem:[#allocation12_spill] sm:$0xff] %v12735_v31  ;;  %v6952_v9 = vadd.f32 %v6951_v7, %v13555_v42  ;;  %v9792_v31 = vld [vmem:[#allocation2 + $0xc0] sm:$0xf0] }
 0x5a0   : > { %13547 = vst [vmem:[#allocation11_spill] sm:$0xff] %v12733_v56  ;;  %7077 = vmatmul.bf16.gmra.mxu2 %v6610_v21  ;;  %v6491_v21 = vrot.slane %v6489_v36, 1  ;;  %v9989_v56 = vor.u32 %v9988_v19, %v13554_v63  ;;  %v7500_v39 = vsel %vm1246_vm9, %v7495_v35, %v7499_v40  ;;  %v13556_v36 = vld [vmem:[#allocation22_spill] sm:$0xff]  ;;  %v9862_v35 = vld [vmem:[#allocation2 + $0xc0] sm:$0xff]  }
 0x5a2   : > { %v7880_v41 = vpop.f32.mrf.mxu3  ;;  %v6492_v4 = vsel %vm1246_vm9, %v6487_v62, %v6491_v21  ;;  %v6496_v62 = vshll.u32 %v9862_v35, 16 }
 0x5a3   : > { %v7038_v45 = vpop.f32.mrf.mxu2 }
 0x5a4   : > { %v7039_v37 = vadd.f32 %v7038_v45, %v6950_v2  ;;  %v7969_v5 = vpop.f32.mrf.mxu0  ;;  %v6296_v2 = vunpack.c.l.b16 %v6152_v24  ;;  %v9801_v45 = vld [vmem:[#allocation2 + $0xc0] sm:$0xff]  }
 0x5a5   : > { %v12745_v54 = vadd.f32 %v7969_v5, %v7880_v41  ;;  %v6084_v41 = vadd.f32 %v12621_v52, %v13556_v36  ;;  %v7504_v40 = vshll.u32 %v9801_v45, 16 }
 0x5a6   : > { %v12743_v50 = vadd.f32 %v7039_v37, %v6083_v44  ;;  %v6954_v0 = vpop.f32.mrf.mxu1  ;;  %v6611_v44 = vrot.slane %v9989_v56, 1  ;;  %v6612_v37 = vrot.slane %v6311_v57, 1  ;;  %v6312_v19 = vpack.c.b16 %v6296_v2, %v6296_v2 }
 0x5a7   : > { %13553 = vst [vmem:[#allocation16_spill] sm:$0xff] %v12745_v54  ;;  %8008 = vmatmul.bf16.gmra.mxu0 %v7500_v39  ;;  %v7506_v2 = vrot.slane %v7504_v40, 1  ;;  %v13561_v54 = vld [vmem:[#allocation26_spill] sm:$0xff] }
 0x5a8   : > { %13552 = vst [vmem:[#allocation17_spill] sm:$0xff] %v12743_v50  ;;  %v12753_v50 = vpack.c.b16 %v7315_v1, %v7315_v1  ;;  %v6613_v56 = vsel %vm1503_vm10, %v6611_v44, %v6612_v37  ;;  %v6501_v39 = vshll.u32 %v6312_v19, 16  ;;  %v13560_v1 = vld [vmem:[#allocation25_spill] sm:$0xff] }
 0x5a9   : > { %6993 = vmatmul.bf16.gmra.mxu1 %v6492_v4  ;;  %v6498_v4 = vrot.slane %v6496_v62, 1  ;;  %v6955_v42 = vadd.f32 %v6954_v0, %v13560_v1  ;;  %v9793_v0 = vld [vmem:[#allocation2 + $0xc0] sm:$0xe]  ;;  %v13562_v1 = vld [vmem:[#allocation10_spill] sm:$0xff] }
 0x5aa   : > { %v7882_v11 = vpop.f32.mrf.mxu3  ;;  %13557 = vst [vmem:[#allocation7_spill] sm:$0xff] %v12753_v50  ;;  %v7509_v63 = vshll.u32 %v12753_v50, 16  ;;  %v6503_v44 = vrot.slane %v6501_v39, 1  ;;  %v9794_v39 = vor.u32 %v9793_v0, %v9792_v31 }
 0x5ab   : > { %v7040_v43 = vpop.f32.mrf.mxu2 }
 0x5ac   : > { %v7041_v5 = vadd.f32 %v7040_v43, %v6952_v9  ;;  %v7971_v60 = vpop.f32.mrf.mxu0  ;;  %v6494_v9 = vshrl.u32 %v9862_v35, 16  ;;  %v7502_v43 = vshrl.u32 %v9801_v45, 16 }
 0x5ad   : > { %v12757_v7 = vadd.f32 %v7971_v60, %v7882_v11  ;;  %v6085_v11 = vadd.f32 %v12621_v52, %v13561_v54 }
 0x5ae   : > { %v12755_v24 = vadd.f32 %v7041_v5, %v6084_v41  ;;  %v6956_v21 = vpop.f32.mrf.mxu1  ;;  %v9863_v41 = vld [vmem:[#allocation2 + $0xcc] sm:$0xff]   ;;  %v6499_v37 = vor.u32 %v6498_v4, %v6494_v9  ;;  %v7507_v50 = vor.u32 %v7506_v2, %v7502_v43  ;;  %v13564_v4 = vld [vmem:[#allocation27_spill] sm:$0xff]  ;;  %v6615_v9 = vrot.slane %v6312_v19, 1  ;;  %v13565_v43 = vld [vmem:[#allocation28_spill] sm:$0xff] }
 0x5af   : > { %7924 = vmatmul.bf16.gmra.mxu3 %v9801_v45  ;;  %13559 = vst [vmem:[#allocation19_spill] sm:$0xff] %v12757_v7  ;;  %v7251_v5 = vunpack.c.l.b16 %v9863_v41  ;;  %v13563_v41 = vunpack.c.h.b16 %v13562_v1  ;;  %v13567_v19 = vld [vmem:[#allocation29_spill] sm:$0xff]  ;;  %v13568_v1 = vld [vmem:[#allocation14_spill] sm:$0xff] }
 0x5b0   : > { %13558 = vst [vmem:[#allocation9_spill] sm:$0xff] %v12755_v24  ;;  %7082 = vmatmul.bf16.gmra.mxu2 %v6613_v56  ;;  %v7511_v24 = vrot.slane %v7509_v63, 1  ;;  %v6504_v63 = vsel %vm1246_vm9, %v6499_v37, %v6503_v44  ;;  %v9802_v37 = vld [vmem:[#allocation2 + $0x18] sm:$0xf0] }
 0x5b1   : > { %v7268_v54 = vpack.c.b16 %v13563_v41, %v7251_v5  ;;  %v7521_v41 = vshll.u32 %v13568_v1, 16 }
 0x5b2   : > { %v7885_v57 = vpop.f32.mrf.mxu3  ;;  %v7512_v35 = vsel %vm1246_vm9, %v7507_v50, %v7511_v24 }
 0x5b3   : > { %v7043_v36 = vpop.f32.mrf.mxu2 }
 0x5b4   : > { %v7044_v60 = vadd.f32 %v7043_v36, %v6955_v42  ;;  %v7974_v7 = vpop.f32.mrf.mxu0  ;;  %v6957_v42 = vadd.f32 %v6956_v21, %v13564_v4  ;;  %v6086_v36 = vadd.f32 %v12621_v52, %v13565_v43  ;;  %v9803_v21 = vld [vmem:[#allocation2 + $0x18] sm:$0xe] }
 0x5b5   : > { %v12766_v40 = vadd.f32 %v7974_v7, %v7885_v57  ;;  %v7516_v57 = vshll.u32 %v7268_v54, 16  ;;  %v9804_v4 = vor.u32 %v9803_v21, %v9802_v37  ;;  %v13571_v21 = vld [vmem:[#allocation32_spill] sm:$0xff] }
 0x5b6   : > { %v12764_v56 = vadd.f32 %v7044_v60, %v6085_v11  ;;  %v6959_v62 = vpop.f32.mrf.mxu1  ;;  %v6614_v11 = vrot.slane %v9794_v39, 1 }
 0x5b7   : > { %8013 = vmatmul.bf16.gmra.mxu0 %v7512_v35  ;;  %v7518_v0 = vrot.slane %v7516_v57, 1  ;;  %v6960_v35 = vadd.f32 %v6959_v62, %v13567_v19 }
 0x5b8   : > { %v6616_v5 = vsel %vm1503_vm10, %v6614_v11, %v6615_v9  ;;  %v7523_v11 = vrot.slane %v7521_v41, 1 }
 0x5b9   : > { %6998 = vmatmul.bf16.gmra.mxu1 %v6504_v63  ;;  %v7514_v63 = vshrl.u32 %v7268_v54, 16 }
 0x5ba   : > { %v7887_v45 = vpop.f32.mrf.mxu3 }
 0x5bb   : > { %v7045_v2 = vpop.f32.mrf.mxu2 }
 0x5bc   : > { %v7046_v7 = vadd.f32 %v7045_v2, %v6957_v42  ;;  %v7976_v50 = vpop.f32.mrf.mxu0  ;;  %v7519_v42 = vor.u32 %v7518_v0, %v7514_v63  ;;  %v13569_v2 = vld [vmem:[#allocation30_spill] sm:$0xff]  ;;  %v13572_v63 = vld [vmem:[#allocation33_spill] sm:$0xff] }
 0x5bd   : > { %v12777_v44 = vadd.f32 %v7976_v50, %v7887_v45  ;;  %v6087_v43 = vadd.f32 %v12621_v52, %v13569_v2  ;;  %v6088_v1 = vadd.f32 %v12621_v52, %v13572_v63 }
 0x5be   : > { %v12775_v24 = vadd.f32 %v7046_v7, %v6086_v36  ;;  %v6961_v60 = vpop.f32.mrf.mxu1  ;;  %v13570_v36 = vld [vmem:[#allocation31_spill] sm:$0xff] }
 0x5bf   : > { %7929 = vmatmul.bf16.gmra.mxu3 %v7268_v54  ;;  %v7590_v7 = vrot.slane %v13570_v36, 1  ;;  %v7524_v54 = vsel %vm1246_vm9, %v7519_v42, %v7523_v11  ;;  %v6962_v0 = vadd.f32 %v6961_v60, %v13571_v21 }
 0x5c0   : > { %13566 = vst [vmem:[#allocation23_spill] sm:$0xff] %v12775_v24  ;;  %7087 = vmatmul.bf16.gmra.mxu2 %v6616_v5  ;;  %v7589_v5 = vrot.slane %v9804_v4, 1 }
 0x5c2   : > { %v7890_v31 = vpop.f32.mrf.mxu3  ;;  %v7591_v37 = vsel %vm1503_vm10, %v7589_v5, %v7590_v7 }
 0x5c3   : > { %v7048_v39 = vpop.f32.mrf.mxu2 }
 0x5c4   : > { %v7049_v45 = vadd.f32 %v7048_v39, %v6960_v35  ;;  %v7979_v9 = vpop.f32.mrf.mxu0  ;;  %v9991_v35 = vld [vmem:[#allocation2 + $0x24] sm:$0xe] }
 0x5c5   : > { %v12787_v24 = vadd.f32 %v7979_v9, %v7890_v31  ;;  %v9992_v42 = vor.u32 %v9991_v35, %v12472_v26  ;;  %v13574_v9 = vld [vmem:[#allocation35_spill] sm:$0xff]  ;;  %v13576_v26 = vld [vmem:[#allocation36_spill] sm:$0xff] }
 0x5c6   : > { %v12785_v50 = vadd.f32 %v7049_v45, %v6087_v43  ;;  %v6964_v57 = vpop.f32.mrf.mxu1  ;;  %v13573_v45 = vld [vmem:[#allocation34_spill] sm:$0xff]  ;;  %v6089_v60 = vadd.f32 %v12621_v52, %v13574_v9 }
 0x5c7   : > { %8018 = vmatmul.bf16.gmra.mxu0 %v7524_v54  ;;  %v6965_v36 = vadd.f32 %v6964_v57, %v13573_v45  ;;  %v7592_v5 = vrot.slane %v9992_v42, 1  ;;  %v13575_v54 = vld [vmem:[#allocation38_spill] sm:$0xff] }
 0x5c9   : > { %8032 = vmatmul.bf16.vlgmr.msra.gmra.mxu1 %v7591_v37  ;;  %v7593_v37 = vrot.slane %v13575_v54, 1 }
 0x5ca   : > { %v7892_v62 = vpop.f32.mrf.mxu3 }
 0x5cb   : > { %v7050_v19 = vpop.f32.mrf.mxu2 }
 0x5cc   : > { %v7051_v41 = vadd.f32 %v7050_v19, %v6962_v0  ;;  %v7981_v39 = vpop.f32.mrf.mxu0 }
 0x5cd   : > { %v12796_v4 = vadd.f32 %v7981_v39, %v7892_v62 }
 0x5ce   : > { %v12794_v2 = vadd.f32 %v7051_v41, %v6088_v1  ;;  %v6966_v31 = vpop.f32.mrf.mxu1  ;;  %v7594_v1 = vsel %vm1503_vm10, %v7592_v5, %v7593_v37  ;;  %v13577_v41 = vld [vmem:[#allocation37_spill] sm:$0xff] }
 0x5cf   : > { %v6967_v57 = vadd.f32 %v6966_v31, %v13576_v26  ;;  %v6090_v39 = vadd.f32 %v12621_v52, %v13577_v41  ;;  %v6091_v31 = vadd.f32 %v12621_v52, %v12493_v32 }
 0x5d2   : > { %v7895_v43 = vpop.f32.mrf.mxu3 }
 0x5d3   : > { %v7053_v7 = vpop.f32.mrf.mxu2 }
 0x5d4   : > { %v7054_v11 = vadd.f32 %v7053_v7, %v6965_v36  ;;  %v7984_v21 = vpop.f32.mrf.mxu0 }
 0x5d5   : > { %v12805_v63 = vadd.f32 %v7984_v21, %v7895_v43  ;;  %v9806_v43 = vld [vmem:[#allocation2 + $0x30] sm:$0xe] }
 0x5d6   : > { %v12803_v0 = vadd.f32 %v7054_v11, %v6089_v60  ;;  %v6969_v19 = vpop.f32.mrf.mxu1  ;;  %v9805_v60 = vld [vmem:[#allocation2 + $0x30] sm:$0xf0] }
 0x5d7   : > { %v6970_v54 = vadd.f32 %v6969_v19, %v12491_v23  ;;  %v9807_v5 = vor.u32 %v9806_v43, %v9805_v60  ;;  %v9994_v43 = vld [vmem:[#allocation2 + $0x3c] sm:$0xe] }
 0x5d9   : > { %8037 = vmatmul.bf16.gmra.mxu1 %v7594_v1  ;;  %v13579_v1 = vld [vmem:[#allocation39_spill] sm:$0xff] }
 0x5da   : > { %v7897_v62 = vpop.f32.mrf.mxu3  ;;  %v7596_v26 = vrot.slane %v13579_v1, 1 }
 0x5db   : > { %v7055_v35 = vpop.f32.mrf.mxu2 }
 0x5dc   : > { %v7056_v45 = vadd.f32 %v7055_v35, %v6967_v57  ;;  %v7986_v42 = vpop.f32.mrf.mxu0 }
 0x5dd   : > { %v12813_v9 = vadd.f32 %v7986_v42, %v7897_v62  ;;  %v13582_v42 = vld [vmem:[#allocation40_spill] sm:$0xff] }
 0x5de   : > { %v12811_v36 = vadd.f32 %v7056_v45, %v6090_v39  ;;  %v6971_v7 = vpop.f32.mrf.mxu1  ;;  %v7595_v39 = vrot.slane %v9807_v5, 1 }
 0x5df   : > { %v6972_v23 = vadd.f32 %v6971_v7, %v13582_v42  ;;  %v13585_v7 = vld [vmem:[#allocation43_spill] sm:$0xff] }
 0x5e0   : > { %13578 = vst [vmem:[#allocation18_spill] sm:$0xff] %v12811_v36  ;;  %v7597_v45 = vsel %vm1503_vm10, %v7595_v39, %v7596_v26  ;;  %v13583_v36 = vld [vmem:[#allocation41_spill] sm:$0xff] }
 0x5e1   : > { %v6092_v32 = vadd.f32 %v12621_v52, %v13583_v36 }
 0x5e2   : > { %v7900_v11 = vpop.f32.mrf.mxu3 }
 0x5e3   : > { %v7058_v37 = vpop.f32.mrf.mxu2 }
 0x5e4   : > { %v7059_v21 = vadd.f32 %v7058_v37, %v6970_v54  ;;  %v7989_v57 = vpop.f32.mrf.mxu0 }
 0x5e5   : > { %v12821_v62 = vadd.f32 %v7989_v57, %v7900_v11  ;;  %v13584_v11 = vld [vmem:[#allocation42_spill] sm:$0xff] }
 0x5e6   : > { %v12819_v35 = vadd.f32 %v7059_v21, %v6091_v31  ;;  %v6974_v41 = vpop.f32.mrf.mxu1  ;;  %v9995_v5 = vor.u32 %v9994_v43, %v13584_v11  ;;  %v13587_v43 = vld [vmem:[#allocation44_spill] sm:$0xff] }
 0x5e7   : > { %13581 = vst [vmem:[#allocation13_spill] sm:$0xff] %v12821_v62  ;;  %v6975_v26 = vadd.f32 %v6974_v41, %v12511_v47  ;;  %v13586_v62 = vld [vmem:[#allocation46_spill] sm:$0xff] }
 0x5e8   : > { %13580 = vst [vmem:[#allocation20_spill] sm:$0xff] %v12819_v35  ;;  %v7598_v35 = vrot.slane %v9995_v5, 1  ;;  %v7599_v36 = vrot.slane %v13586_v62, 1  ;;  %v9808_v62 = vld [vmem:[#allocation2 + $0x48] sm:$0xf0] }
 0x5e9   : > { %8042 = vmatmul.bf16.gmra.mxu1 %v7597_v45  ;;  %v6093_v45 = vadd.f32 %v12621_v52, %v13585_v7 }
 0x5ea   : > { %v7902_v19 = vpop.f32.mrf.mxu3 }
 0x5eb   : > { %v7060_v60 = vpop.f32.mrf.mxu2 }
 0x5ec   : > { %v7061_v54 = vadd.f32 %v7060_v60, %v6972_v23  ;;  %v7991_v37 = vpop.f32.mrf.mxu0 }
 0x5ed   : > { %v12829_v21 = vadd.f32 %v7991_v37, %v7902_v19  ;;  %v7600_v19 = vsel %vm1503_vm10, %v7598_v35, %v7599_v36  ;;  %v13588_v37 = vld [vmem:[#allocation45_spill] sm:$0xff]  ;;  %v6095_v35 = vadd.f32 %v12621_v52, %v12530_v20 }
 0x5ee   : > { %v12827_v1 = vadd.f32 %v7061_v54, %v6092_v32  ;;  %v6976_v31 = vpop.f32.mrf.mxu1  ;;  %v6094_v11 = vadd.f32 %v12621_v52, %v13588_v37 }
 0x5ef   : > { %v6977_v47 = vadd.f32 %v6976_v31, %v13587_v43 }
 0x5f2   : > { %v7905_v39 = vpop.f32.mrf.mxu3 }
 0x5f3   : > { %v7063_v57 = vpop.f32.mrf.mxu2 }
 0x5f4   : > { %v7064_v42 = vadd.f32 %v7063_v57, %v6975_v26  ;;  %v7994_v23 = vpop.f32.mrf.mxu0  ;;  %v9809_v57 = vld [vmem:[#allocation2 + $0x48] sm:$0xe] }
 0x5f5   : > { %v12838_v54 = vadd.f32 %v7994_v23, %v7905_v39  ;;  %v13590_v23 = vld [vmem:[#allocation47_spill] sm:$0xff] }
 0x5f6   : > { %v12836_v60 = vadd.f32 %v7064_v42, %v6093_v45  ;;  %v6979_v32 = vpop.f32.mrf.mxu1  ;;  %v9810_v42 = vor.u32 %v9809_v57, %v9808_v62  ;;  %v7602_v31 = vrot.slane %v13590_v23, 1 }
 0x5f7   : > { %v6980_v45 = vadd.f32 %v6979_v32, %v12528_v10  ;;  %v13593_v10 = vld [vmem:[#allocation49_spill] sm:$0xff] }
 0x5f8   : > { %v7601_v37 = vrot.slane %v9810_v42, 1  ;;  %v6096_v32 = vadd.f32 %v12621_v52, %v13593_v10  ;;  %v13595_v42 = vld [vmem:[#allocation51_spill] sm:$0xff] }
 0x5f9   : > { %8047 = vmatmul.bf16.gmra.mxu1 %v7600_v19  ;;  %v6097_v23 = vadd.f32 %v12621_v52, %v13595_v42 }
 0x5fb   : > { %v7065_v41 = vpop.f32.mrf.mxu2 }
 0x5fc   : > { %v7066_v7 = vadd.f32 %v7065_v41, %v6977_v47  ;;  %v7603_v47 = vsel %vm1503_vm10, %v7601_v37, %v7602_v31  ;;  %v13592_v41 = vld [vmem:[#allocation48_spill] sm:$0xff] }
 0x5fe   : > { %v12844_v26 = vadd.f32 %v7066_v7, %v6094_v11  ;;  %v6981_v5 = vpop.f32.mrf.mxu1 }
 0x5ff   : > { %v6982_v11 = vadd.f32 %v6981_v5, %v13592_v41  ;;  %v13596_v5 = vld [vmem:[#allocation54_spill] sm:$0xff] }
 0x600   : > { %13589 = vst [vmem:[#allocation8_spill] sm:$0xff] %v12844_v26  ;;  %v9997_v26 = vld [vmem:[#allocation2 + $0x54] sm:$0xe] }
 0x603   : > { %v7068_v39 = vpop.f32.mrf.mxu2 }
 0x604   : > { %v7069_v36 = vadd.f32 %v7068_v39, %v6980_v45  ;;  %v13594_v45 = vld [vmem:[#allocation50_spill] sm:$0xff] }
 0x605   : > { %v9998_v39 = vor.u32 %v9997_v26, %v13594_v45  ;;  %v13598_v26 = vld [vmem:[#allocation53_spill] sm:$0xff] }
 0x606   : > { %v12850_v19 = vadd.f32 %v7069_v36, %v6095_v35  ;;  %v6984_v43 = vpop.f32.mrf.mxu1 }
 0x607   : > { %v6985_v35 = vadd.f32 %v6984_v43, %v12548_v58  ;;  %v7604_v37 = vrot.slane %v9998_v39, 1  ;;  %v6098_v58 = vadd.f32 %v12621_v52, %v13598_v26  ;;  %v9812_v39 = vld [vmem:[#allocation2 + $0x60] sm:$0xe] }
 0x608   : > { %13591 = vst [vmem:[#allocation24_spill] sm:$0xff] %v12850_v19 }
 0x609   : > { %8052 = vmatmul.bf16.gmra.mxu1 %v7603_v47  ;;  %v7605_v47 = vrot.slane %v13596_v5, 1 }
 0x60b   : > { %v7070_v7 = vpop.f32.mrf.mxu2 }
 0x60c   : > { %v7071_v62 = vadd.f32 %v7070_v7, %v6982_v11  ;;  %v7606_v11 = vsel %vm1503_vm10, %v7604_v37, %v7605_v47  ;;  %v13597_v7 = vld [vmem:[#allocation52_spill] sm:$0xff] }
 0x60e   : > { %v12856_v57 = vadd.f32 %v7071_v62, %v6096_v32  ;;  %v6986_v20 = vpop.f32.mrf.mxu1 }
 0x60f   : > { %v6987_v10 = vadd.f32 %v6986_v20, %v13597_v7  ;;  %v7608_v20 = vrot.slane %v12572_v18, 1 }
 0x613   : > { %v7073_v36 = vpop.f32.mrf.mxu2 }
 0x614   : > { %v7074_v31 = vadd.f32 %v7073_v36, %v6985_v35  ;;  %v9811_v35 = vld [vmem:[#allocation2 + $0x60] sm:$0xf0] }
 0x615   : > { %v9813_v42 = vor.u32 %v9812_v39, %v9811_v35  ;;  %v13601_v39 = vld [vmem:[#allocation57_spill] sm:$0xff] }
 0x616   : > { %v12863_v41 = vadd.f32 %v7074_v31, %v6097_v23  ;;  %v6989_v19 = vpop.f32.mrf.mxu1  ;;  %v6099_v31 = vadd.f32 %v12621_v52, %v12567_v33 }
 0x617   : > { %v6990_v36 = vadd.f32 %v6989_v19, %v12565_v34 }
 0x619   : > { %8057 = vmatmul.bf16.gmra.mxu1 %v7606_v11  ;;  %v7607_v11 = vrot.slane %v9813_v42, 1 }
 0x61b   : > { %v7075_v32 = vpop.f32.mrf.mxu2  ;;  %v7609_v7 = vsel %vm1503_vm10, %v7607_v11, %v7608_v20  ;;  %v13603_v11 = vld [vmem:[#allocation58_spill] sm:$0xff] }
 0x61c   : > { %v7076_v43 = vadd.f32 %v7075_v32, %v6987_v10  ;;  %v13599_v10 = vld [vmem:[#allocation55_spill] sm:$0xff] }
 0x61e   : > { %v12869_v62 = vadd.f32 %v7076_v43, %v6098_v58  ;;  %v6991_v45 = vpop.f32.mrf.mxu1  ;;  %v13600_v58 = vld [vmem:[#allocation56_spill] sm:$0xff] }
 0x61f   : > { %v6992_v32 = vadd.f32 %v6991_v45, %v13599_v10  ;;  %v6100_v34 = vadd.f32 %v12621_v52, %v13600_v58 }
 0x623   : > { %v7078_v23 = vpop.f32.mrf.mxu2 }
 0x624   : > { %v7079_v37 = vadd.f32 %v7078_v23, %v6990_v36  ;;  %v6101_v36 = vadd.f32 %v12621_v52, %v13601_v39  ;;  %v13604_v39 = vld [vmem:[#allocation59_spill] sm:$0xff] }
 0x626   : > { %v12875_v5 = vadd.f32 %v7079_v37, %v6099_v31  ;;  %v6994_v47 = vpop.f32.mrf.mxu1  ;;  %v13602_v37 = vld [vmem:[#allocation15_spill] sm:$0xff] }
 0x627   : > { %v6995_v35 = vadd.f32 %v6994_v47, %v12583_v12  ;;  %v9814_v47 = vld [vmem:[#allocation2 + $0x78] sm:$0xf0] }
 0x629   : > { %8062 = vmatmul.bf16.gmra.mxu1 %v7609_v7  ;;  %v6102_v7 = vadd.f32 %v12621_v52, %v13603_v11 }
 0x62b   : > { %v7080_v26 = vpop.f32.mrf.mxu2 }
 0x62c   : > { %v7081_v19 = vadd.f32 %v7080_v26, %v6992_v32  ;;  %v9815_v26 = vld [vmem:[#allocation2 + $0x78] sm:$0xe] }
 0x62e   : > { %v12881_v43 = vadd.f32 %v7081_v19, %v6100_v34  ;;  %v6996_v33 = vpop.f32.mrf.mxu1  ;;  %v9816_v34 = vor.u32 %v9815_v26, %v9814_v47 }
 0x62f   : > { %v6997_v45 = vadd.f32 %v6996_v33, %v12593_v48  ;;  %v7614_v48 = vrot.slane %v13604_v39, 1  ;;  %v9817_v39 = vld [vmem:[#allocation2 + $0x90] sm:$0xf0] }
 0x633   : > { %v7083_v18 = vpop.f32.mrf.mxu2 }
 0x634   : > { %v7084_v42 = vadd.f32 %v7083_v18, %v6995_v35  ;;  %v6103_v35 = vadd.f32 %v12621_v52, %v12602_v30  ;;  %v9864_v30 = vld [vmem:[%s13358_s4] ss:$0 sm:$0xff]  ;;  %v13606_v52 = vld [vmem:[#allocation61_spill] sm:$0xff] }
 0x636   : > { %v12886_v23 = vadd.f32 %v7084_v42, %v6101_v36  ;;  %v6999_v31 = vpop.f32.mrf.mxu1  ;;  %v7613_v42 = vrot.slane %v9816_v34, 1 }
 0x637   : > { %v7000_v58 = vadd.f32 %v6999_v31, %v12600_v49  ;;  %v13605_v49 = vld [vmem:[#allocation60_spill] sm:$0xff] }
 0x639   : > { %8067 = vmatmul.bf16.gmra.mxu1 %v13602_v37 }
 0x63b   : > { %v7085_v20 = vpop.f32.mrf.mxu2 }
 0x63c   : > { %v7086_v10 = vadd.f32 %v7085_v20, %v6997_v45  ;;  %v7615_v45 = vsel %vm1503_vm10, %v7613_v42, %v7614_v48  ;;  %v9818_v48 = vld [vmem:[#allocation2 + $0x90] sm:$0xe] }
 0x63e   : > { %v12892_v32 = vadd.f32 %v7086_v10, %v6102_v7  ;;  %v7001_v12 = vpop.f32.mrf.mxu1  ;;  %v6104_v7 = vadd.f32 %v9864_v30, %v13606_v52  ;;  %v13608_v30 = vld [vmem:[#allocation5_spill] sm:$0xff] }
 0x63f   : > { %v7002_v31 = vadd.f32 %v7001_v12, %v13605_v49 }
 0x643   : > { %v7088_v19 = vpop.f32.mrf.mxu2 }
 0x644   : > { %v7089_v18 = vadd.f32 %v7088_v19, %v7000_v58  ;;  %v13607_v19 = vld [vmem:[#allocation3_spill] sm:$0xff] }
 0x646   : > { %v12898_v33 = vadd.f32 %v7089_v18, %v6103_v35  ;;  %v8033_v36 = vpop.f32.mrf.mxu1 }
 0x647   : > { %v8034_v37 = vadd.f32 %v8033_v36, %v12628_v55 }
 0x649   : > { %v12903_v20 = vadd.f32 %v8034_v37, %v12626_v25  ;;  %8072 = vmatmul.bf16.gmra.mxu1 %v7615_v45 }
 0x64b   : > { %v7090_v11 = vpop.f32.mrf.mxu2 }
 0x64c   : > { %v7091_v10 = vadd.f32 %v7090_v11, %v7002_v31 }
 0x64e   : > { %v12910_v47 = vadd.f32 %v7091_v10, %v6104_v7  ;;  %v8035_v26 = vpop.f32.mrf.mxu1  ;;  %v9821_v7 = vld [vmem:[#allocation2 + $0xa8] sm:$0xe] }
 0x64f   : > { %v8036_v55 = vadd.f32 %v8035_v26, %v12641_v3  ;;  %v9819_v3 = vor.u32 %v9818_v48, %v9817_v39  ;;  %v13611_v39 = vld [vmem:[#allocation16_spill] sm:$0xff] }
 0x651   : > { %v12914_v58 = vadd.f32 %v8036_v55, %v12639_v61  ;;  %v7620_v61 = vrot.slane %v12659_v29, 1  ;;  %v7619_v37 = vrot.slane %v9819_v3, 1 }
 0x656   : > { %v8038_v25 = vpop.f32.mrf.mxu1 }
 0x657   : > { %v8039_v34 = vadd.f32 %v8038_v25, %v12651_v8 }
 0x659   : > { %v12918_v12 = vadd.f32 %v8039_v34, %v12649_v28  ;;  %8077 = vmatmul.bf16.gmra.mxu1 %v13607_v19  ;;  %v7621_v28 = vsel %vm1503_vm10, %v7619_v37, %v7620_v61  ;;  %v13613_v61 = vld [vmem:[#allocation4_spill] sm:$0xff] }
 0x65e   : > { %v8040_v35 = vpop.f32.mrf.mxu1 }
 0x65f   : > { %v8041_v18 = vadd.f32 %v8040_v35, %v12666_v46  ;;  %v13610_v35 = vld [vmem:[#allocation11_spill] sm:$0xff] }
 0x661   : > { %v12923_v36 = vadd.f32 %v8041_v18, %v12661_v59 }
 0x666   : > { %v8043_v42 = vpop.f32.mrf.mxu1 }
 0x667   : > { %v8044_v8 = vadd.f32 %v8043_v42, %v12675_v14  ;;  %v13614_v42 = vld [vmem:[#allocation19_spill] sm:$0xff] }
 0x669   : > { %v12929_v45 = vadd.f32 %v8044_v8, %v12673_v27  ;;  %8082 = vmatmul.bf16.gmra.mxu1 %v7621_v28  ;;  %v9820_v27 = vld [vmem:[#allocation2 + $0xa8] sm:$0xf0]  ;;  %v9824_v8 = vld [vmem:[#allocation2 + $0xc0] sm:$0xe] }
 0x66a   : > { %v13615_v28 = vld [vmem:[#allocation9_spill] sm:$0xff] }
 0x66e   : > { %v8045_v49 = vpop.f32.mrf.mxu1 }
 0x66f   : > { %v8046_v46 = vadd.f32 %v8045_v49, %v12688_v16  ;;  %v9822_v16 = vor.u32 %v9821_v7, %v9820_v27 }
 0x671   : > { %v12933_v31 = vadd.f32 %v8046_v46, %v12686_v22  ;;  %v7626_v22 = vrot.slane %v12706_v13, 1  ;;  %v7625_v55 = vrot.slane %v9822_v16, 1  ;;  %v13612_v13 = vld [vmem:[#allocation17_spill] sm:$0xff] }
 0x676   : > { %v8048_v59 = vpop.f32.mrf.mxu1 }
 0x677   : > { %v8049_v11 = vadd.f32 %v8048_v59, %v12698_v38  ;;  %v13616_v59 = vld [vmem:[#allocation7_spill] sm:$0xff] }
 0x679   : > { %v12937_v29 = vadd.f32 %v8049_v11, %v12696_v17  ;;  %8087 = vmatmul.bf16.gmra.mxu1 %v13608_v30  ;;  %v7627_v17 = vsel %vm1503_vm10, %v7625_v55, %v7626_v22  ;;  %v7632_v11 = vrot.slane %v13616_v59, 1 }
 0x67e   : > { %v8050_v14 = vpop.f32.mrf.mxu1 }
 0x67f   : > { %v8051_v52 = vadd.f32 %v8050_v14, %v12713_v15  ;;  %v13609_v15 = vld [vmem:[#allocation12_spill] sm:$0xff] }
 0x681   : > { %v12942_v10 = vadd.f32 %v8051_v52, %v12708_v6 }
 0x686   : > { %v8053_v26 = vpop.f32.mrf.mxu1 }
 0x687   : > { %v8054_v38 = vadd.f32 %v8053_v26, %v12722_v51  ;;  %v13617_v26 = vld [vmem:[#allocation23_spill] sm:$0xff] }
 0x689   : > { %v12948_v25 = vadd.f32 %v8054_v38, %v12720_v53  ;;  %8092 = vmatmul.bf16.gmra.mxu1 %v7627_v17  ;;  %v9823_v53 = vld [vmem:[#allocation2 + $0xc0] sm:$0xf0] }
 0x68a   : > { %v9825_v46 = vor.u32 %v9824_v8, %v9823_v53 }
 0x68c   : > { %v7631_v14 = vrot.slane %v9825_v46, 1 }
 0x68e   : > { %v8055_v34 = vpop.f32.mrf.mxu1  ;;  %v7633_v27 = vsel %vm1503_vm10, %v7631_v14, %v7632_v11  ;;  %v8183_v14 = vmul.f32 %v12903_v20, %v12903_v20 }
 0x68f   : > { %v8056_v19 = vadd.f32 %v8055_v34, %v13609_v15  ;;  %v13618_v15 = vld [vmem:[#allocation6_spill] sm:$0xff] }
 0x691   : > { %v12952_v18 = vadd.f32 %v8056_v19, %v13610_v35 }
 0x696   : > { %v8058_v6 = vpop.f32.mrf.mxu1 }
 0x697   : > { %v8059_v48 = vadd.f32 %v8058_v6, %v13611_v39 }
 0x699   : > { %v12956_v3 = vadd.f32 %v8059_v48, %v13612_v13  ;;  %8097 = vmatmul.bf16.gmra.mxu1 %v13613_v61  ;;  %v13619_v48 = vld [vmem:[#allocation18_spill] sm:$0xff]  ;;  %v12990_v13 = vpop.f32.mrf.mxu3 }
 0x69e   : > { %v8060_v51 = vpop.f32.mrf.mxu1 }
 0x69f   : > { %v8061_v37 = vadd.f32 %v8060_v51, %v13614_v42  ;;  %v13620_v51 = vld [vmem:[#allocation13_spill] sm:$0xff]  ;;  %v12993_v42 = vpop.f32.mrf.mxu0 }
 0x6a1   : > { %v12961_v49 = vadd.f32 %v8061_v37, %v13615_v28  ;;  %v12999_v53 = vpop.f32.mrf.mxu3 }
 0x6a6   : > { %v8063_v30 = vpop.f32.mrf.mxu1 }
 0x6a7   : > { %v8064_v52 = vadd.f32 %v8063_v30, %v12766_v40  ;;  %v13004_v8 = vpop.f32.mrf.mxu0 }
 0x6a9   : > { %v12967_v7 = vadd.f32 %v8064_v52, %v12764_v56  ;;  %8102 = vmatmul.bf16.gmra.mxu1 %v7633_v27  ;;  %v13010_v11 = vpop.f32.mrf.mxu3 }
 0x6ae   : > { %v8065_v16 = vpop.f32.mrf.mxu1 }
 0x6af   : > { %v8066_v22 = vadd.f32 %v8065_v16, %v12777_v44  ;;  %v13012_v30 = vpop.f32.mrf.mxu0 }
 0x6b1   : > { %v12971_v55 = vadd.f32 %v8066_v22, %v13617_v26  ;;  %v8187_v26 = vmul.f32 %v12929_v45, %v12929_v45 }
 0x6b6   : > { %v8068_v38 = vpop.f32.mrf.mxu1 }
 0x6b7   : > { %v8069_v17 = vadd.f32 %v8068_v38, %v12787_v24 }
 0x6b9   : > { %v12975_v34 = vadd.f32 %v8069_v17, %v12785_v50  ;;  %8107 = vmatmul.bf16.gmra.mxu1 %v13618_v15  ;;  %v7915_v17 = vpop.f32.mrf.mxu3 }
 0x6be   : > { %v8070_v40 = vpop.f32.mrf.mxu1 }
 0x6bf   : > { %v8071_v19 = vadd.f32 %v8070_v40, %v12796_v4  ;;  %v8188_v40 = vmul.f32 %v12933_v31, %v12933_v31 }
 0x6c1   : > { %v12980_v56 = vadd.f32 %v8071_v19, %v12794_v2  ;;  %v13621_v2 = vld [vmem:[#allocation20_spill] sm:$0xff] }
 0x6c6   : > { %v8073_v35 = vpop.f32.mrf.mxu1 }
 0x6c7   : > { %v8074_v44 = vadd.f32 %v8073_v35, %v12805_v63  ;;  %v8004_v35 = vpop.f32.mrf.mxu0 }
 0x6c9   : > { %v12984_v6 = vadd.f32 %v8074_v44, %v12803_v0 }
 0x6ce   : > { %v8075_v39 = vpop.f32.mrf.mxu1 }
 0x6cf   : > { %v8076_v24 = vadd.f32 %v8075_v39, %v12813_v9  ;;  %v8189_v39 = vmul.f32 %v12937_v29, %v12937_v29 }
 0x6d1   : > { %v12988_v50 = vadd.f32 %v8076_v24, %v13619_v48 }
 0x6d6   : > { %v8078_v61 = vpop.f32.mrf.mxu1 }
 0x6d7   : > { %v8079_v4 = vadd.f32 %v8078_v61, %v13620_v51  ;;  %v8190_v51 = vmul.f32 %v12942_v10, %v12942_v10 }
 0x6d9   : > { %v12996_v37 = vadd.f32 %v8079_v4, %v13621_v2 }
 0x6de   : > { %v8080_v63 = vpop.f32.mrf.mxu1 }
 0x6df   : > { %v8081_v0 = vadd.f32 %v8080_v63, %v12829_v21  ;;  %v8184_v21 = vmul.f32 %v12914_v58, %v12914_v58  ;;  %v8191_v63 = vmul.f32 %v12948_v25, %v12948_v25 }
 0x6e1   : > { %v13002_v9 = vadd.f32 %v8081_v0, %v12827_v1  ;;  %v8185_v1 = vmul.f32 %v12918_v12, %v12918_v12  ;;  %v8215_v27 = vadd.f32 %v8184_v21, %v8183_v14  ;;  %v7917_v14 = vpop.f32.mrf.mxu3 }
 0x6e3   : > { %v8216_v22 = vadd.f32 %v8215_v27, %v8185_v1 }
 0x6e6   : > { %v8083_v28 = vpop.f32.mrf.mxu1 }
 0x6e7   : > { %v8084_v46 = vadd.f32 %v8083_v28, %v12838_v54  ;;  %v8145_v54 = vadd.f32 %v12914_v58, %v12903_v20 }
 0x6e9   : > { %v13008_v59 = vadd.f32 %v8084_v46, %v12836_v60  ;;  %v8186_v60 = vmul.f32 %v12923_v36, %v12923_v36  ;;  %v8146_v16 = vadd.f32 %v8145_v54, %v12918_v12  ;;  %v8192_v46 = vmul.f32 %v12952_v18, %v12952_v18 }
 0x6ea   : > { %v8193_v54 = vmul.f32 %v12956_v3, %v12956_v3 }
 0x6eb   : > { %v8147_v38 = vadd.f32 %v8146_v16, %v12923_v36  ;;  %v8217_v15 = vadd.f32 %v8216_v22, %v8186_v60  ;;  %v8006_v16 = vpop.f32.mrf.mxu0 }
 0x6ed   : > { %v8148_v19 = vadd.f32 %v8147_v38, %v12929_v45  ;;  %v8218_v44 = vadd.f32 %v8217_v15, %v8187_v26  ;;  %v8194_v26 = vmul.f32 %v12961_v49, %v12961_v49 }
 0x6ee   : > { %v8085_v52 = vpop.f32.mrf.mxu1 }
 0x6ef   : > { %v8149_v48 = vadd.f32 %v8148_v19, %v12933_v31  ;;  %v8219_v61 = vadd.f32 %v8218_v44, %v8188_v40  ;;  %v8195_v40 = vmul.f32 %v12967_v7, %v12967_v7 }
 0x6f1   : > { %v8150_v4 = vadd.f32 %v8149_v48, %v12937_v29  ;;  %v8220_v2 = vadd.f32 %v8219_v61, %v8189_v39  ;;  %v8196_v39 = vmul.f32 %v12971_v55, %v12971_v55 }
 0x6f3   : > { %v8151_v0 = vadd.f32 %v8150_v4, %v12942_v10  ;;  %v8221_v28 = vadd.f32 %v8220_v2, %v8190_v51  ;;  %v8197_v51 = vmul.f32 %v12975_v34, %v12975_v34 }
 0x6f5   : > { %v8152_v21 = vadd.f32 %v8151_v0, %v12948_v25  ;;  %v8222_v1 = vadd.f32 %v8221_v28, %v8191_v63  ;;  %v7920_v63 = vpop.f32.mrf.mxu3  ;;  %v8198_v28 = vmul.f32 %v12980_v56, %v12980_v56 }
 0x6f6   : > { %v8088_v24 = vpop.f32.mrf.mxu1 }
 0x6f7   : > { %v8153_v60 = vadd.f32 %v8152_v21, %v12952_v18  ;;  %v8223_v22 = vadd.f32 %v8222_v1, %v8192_v46  ;;  %v8009_v21 = vpop.f32.mrf.mxu0 }
 0x6f9   : > { %v8154_v38 = vadd.f32 %v8153_v60, %v12956_v3  ;;  %v8224_v15 = vadd.f32 %v8223_v22, %v8193_v54  ;;  %v8199_v54 = vmul.f32 %v12984_v6, %v12984_v6  ;;  %v7997_v60 = vadd.f32 %v12993_v42, %v12990_v13 }
 0x6fa   : > { %v8002_v13 = vadd.f32 %v13012_v30, %v13010_v11  ;;  %v8007_v11 = vadd.f32 %v8006_v16, %v7917_v14 }
 0x6fb   : > { %v8155_v19 = vadd.f32 %v8154_v38, %v12961_v49  ;;  %v8225_v44 = vadd.f32 %v8224_v15, %v8194_v26  ;;  %v8200_v38 = vmul.f32 %v12988_v50, %v12988_v50  ;;  %v8000_v15 = vadd.f32 %v13004_v8, %v12999_v53  ;;  %v13622_v8 = vld [vmem:[#allocation8_spill] sm:$0xff] }
 0x6fd   : > { %v8156_v48 = vadd.f32 %v8155_v19, %v12967_v7  ;;  %v8226_v61 = vadd.f32 %v8225_v44, %v8195_v40  ;;  %v8086_v19 = vadd.f32 %v8085_v52, %v7997_v60 }
 0x6fe   : > { %v8090_v27 = vpop.f32.mrf.mxu1 }
 0x6ff   : > { %v8157_v2 = vadd.f32 %v8156_v48, %v12971_v55  ;;  %v8227_v0 = vadd.f32 %v8226_v61, %v8196_v39  ;;  %v8201_v39 = vmul.f32 %v12996_v37, %v12996_v37  ;;  %v8089_v61 = vadd.f32 %v8088_v24, %v8000_v15  ;;  %v13623_v24 = vld [vmem:[#allocation24_spill] sm:$0xff] }
 0x700   : > { %v13080_v52 = vadd.f32 %v8086_v19, %v13622_v8 }
 0x701   : > { %v8158_v46 = vadd.f32 %v8157_v2, %v12975_v34  ;;  %v8228_v1 = vadd.f32 %v8227_v0, %v8197_v51  ;;  %v8202_v2 = vmul.f32 %v13002_v9, %v13002_v9  ;;  %v8005_v0 = vadd.f32 %v8004_v35, %v7915_v17 }
 0x702   : > { %v13086_v60 = vadd.f32 %v8089_v61, %v13623_v24  ;;  %v8010_v17 = vadd.f32 %v8009_v21, %v7920_v63 }
 0x703   : > { %v8159_v22 = vadd.f32 %v8158_v46, %v12980_v56  ;;  %v8229_v26 = vadd.f32 %v8228_v1, %v8198_v28  ;;  %v8091_v28 = vadd.f32 %v8090_v27, %v8002_v13  ;;  %v7922_v46 = vpop.f32.mrf.mxu3  ;;  %v8204_v27 = vmul.f32 %v13080_v52, %v13080_v52 }
 0x705   : > { %v8160_v40 = vadd.f32 %v8159_v22, %v12984_v6  ;;  %v8230_v44 = vadd.f32 %v8229_v26, %v8199_v54  ;;  %v8203_v54 = vmul.f32 %v13008_v59, %v13008_v59  ;;  %v8011_v26 = vpop.f32.mrf.mxu0  ;;  %v13092_v15 = vadd.f32 %v8091_v28, %v12856_v57 }
 0x706   : > { %v8093_v4 = vpop.f32.mrf.mxu1 }
 0x707   : > { %v8161_v42 = vadd.f32 %v8160_v40, %v12988_v50  ;;  %v8231_v51 = vadd.f32 %v8230_v44, %v8200_v38  ;;  %v8094_v22 = vadd.f32 %v8093_v4, %v8005_v0  ;;  %v8205_v44 = vmul.f32 %v13086_v60, %v13086_v60 }
 0x708   : > { %v8206_v13 = vmul.f32 %v13092_v15, %v13092_v15 }
 0x709   : > { %v8162_v53 = vadd.f32 %v8161_v42, %v12996_v37  ;;  %v8232_v1 = vadd.f32 %v8231_v51, %v8201_v39  ;;  %v13098_v4 = vadd.f32 %v8094_v22, %v12863_v41 }
 0x70b   : > { %v8163_v30 = vadd.f32 %v8162_v53, %v13002_v9  ;;  %v8233_v35 = vadd.f32 %v8232_v1, %v8202_v2  ;;  %v8207_v61 = vmul.f32 %v13098_v4, %v13098_v4  ;;  %v7925_v41 = vpop.f32.mrf.mxu3  ;;  %v8012_v2 = vadd.f32 %v8011_v26, %v7922_v46 }
 0x70d   : > { %v8164_v38 = vadd.f32 %v8163_v30, %v13008_v59  ;;  %v8234_v19 = vadd.f32 %v8233_v35, %v8203_v54  ;;  %v8014_v28 = vpop.f32.mrf.mxu0 }
 0x70e   : > { %v8095_v48 = vpop.f32.mrf.mxu1  ;;  %v8015_v35 = vadd.f32 %v8014_v28, %v7925_v41 }
 0x70f   : > { %v8096_v40 = vadd.f32 %v8095_v48, %v8007_v11  ;;  %v8165_v16 = vadd.f32 %v8164_v38, %v13080_v52  ;;  %v8235_v21 = vadd.f32 %v8234_v19, %v8204_v27 }
 0x711   : > { %v8166_v39 = vadd.f32 %v8165_v16, %v13086_v60  ;;  %v13104_v57 = vadd.f32 %v8096_v40, %v12869_v62  ;;  %v8236_v48 = vadd.f32 %v8235_v21, %v8205_v44 }
 0x713   : > { %v8167_v42 = vadd.f32 %v8166_v39, %v13092_v15  ;;  %v8237_v0 = vadd.f32 %v8236_v48, %v8206_v13  ;;  %v8208_v8 = vmul.f32 %v13104_v57, %v13104_v57  ;;  %v7927_v27 = vpop.f32.mrf.mxu3 }
 0x715   : > { %v8168_v53 = vadd.f32 %v8167_v42, %v13098_v4  ;;  %v8238_v1 = vadd.f32 %v8237_v0, %v8207_v61 }
 0x716   : > { %v8098_v14 = vpop.f32.mrf.mxu1 }
 0x717   : > { %v8099_v63 = vadd.f32 %v8098_v14, %v8010_v17  ;;  %v8169_v54 = vadd.f32 %v8168_v53, %v13104_v57  ;;  %v8239_v24 = vadd.f32 %v8238_v1, %v8208_v8  ;;  %v8016_v14 = vpop.f32.mrf.mxu0 }
 0x719   : > { %v13110_v51 = vadd.f32 %v8099_v63, %v12875_v5  ;;  %v8017_v63 = vadd.f32 %v8016_v14, %v7927_v27 }
 0x71b   : > { %v8209_v11 = vmul.f32 %v13110_v51, %v13110_v51  ;;  %v8170_v5 = vadd.f32 %v8169_v54, %v13110_v51  ;;  %v7930_v48 = vpop.f32.mrf.mxu3 }
 0x71d   : > { %v8240_v22 = vadd.f32 %v8239_v24, %v8209_v11 }
 0x71e   : > { %v8100_v62 = vpop.f32.mrf.mxu1 }
 0x71f   : > { %v8101_v30 = vadd.f32 %v8100_v62, %v8012_v2  ;;  %v8019_v61 = vpop.f32.mrf.mxu0 }
 0x720   : > { %v8020_v2 = vadd.f32 %v8019_v61, %v7930_v48 }
 0x721   : > { %v13120_v46 = vadd.f32 %v8101_v30, %v12881_v43 }
 0x723   : > { %v8171_v26 = vadd.f32 %v8170_v5, %v13120_v46  ;;  %v8210_v17 = vmul.f32 %v13120_v46, %v13120_v46  ;;  %v7932_v62 = vpop.f32.mrf.mxu3 }
 0x725   : > { %v8241_v38 = vadd.f32 %v8240_v22, %v8210_v17 }
 0x726   : > { %v8103_v40 = vpop.f32.mrf.mxu1 }
 0x727   : > { %v8104_v19 = vadd.f32 %v8103_v40, %v8015_v35  ;;  %v8021_v54 = vpop.f32.mrf.mxu0 }
 0x728   : > { %v8022_v11 = vadd.f32 %v8021_v54, %v7932_v62 }
 0x729   : > { %v13126_v16 = vadd.f32 %v8104_v19, %v12886_v23 }
 0x72b   : > { %v8172_v44 = vadd.f32 %v8171_v26, %v13126_v16  ;;  %v8211_v43 = vmul.f32 %v13126_v16, %v13126_v16 }
 0x72d   : > { %v8242_v21 = vadd.f32 %v8241_v38, %v8211_v43 }
 0x72e   : > { %v8105_v39 = vpop.f32.mrf.mxu1 }
 0x72f   : > { %v8106_v13 = vadd.f32 %v8105_v39, %v8017_v63 }
 0x731   : > { %v13132_v42 = vadd.f32 %v8106_v13, %v12892_v32 }
 0x733   : > { %v8173_v41 = vadd.f32 %v8172_v44, %v13132_v42  ;;  %v8212_v23 = vmul.f32 %v13132_v42, %v13132_v42 }
 0x735   : > { %v8243_v0 = vadd.f32 %v8242_v21, %v8212_v23 }
 0x736   : > { %v8108_v53 = vpop.f32.mrf.mxu1 }
 0x737   : > { %v8109_v8 = vadd.f32 %v8108_v53, %v8020_v2 }
 0x739   : > { %v13138_v28 = vadd.f32 %v8109_v8, %v12898_v33 }
 0x73b   : > { %v8174_v1 = vadd.f32 %v8173_v41, %v13138_v28  ;;  %v8213_v32 = vmul.f32 %v13138_v28, %v13138_v28 }
 0x73d   : > { %v8244_v30 = vadd.f32 %v8243_v0, %v8213_v32 }
 0x73e   : > { %v8110_v24 = vpop.f32.mrf.mxu1 }
 0x73f   : > { %v8111_v5 = vadd.f32 %v8110_v24, %v8022_v11 }
 0x741   : > { %v13144_v22 = vadd.f32 %v8111_v5, %v12910_v47 }
 0x743   : > { %v8175_v26 = vadd.f32 %v8174_v1, %v13144_v22  ;;  %v8214_v33 = vmul.f32 %v13144_v22, %v13144_v22 }
 0x745   : > { %v8176_v17 = vrot.slane %v8175_v26, 4  ;;  %v8245_v35 = vadd.f32 %v8244_v30, %v8214_v33 }
 0x747   : > { %v8177_v38 = vadd.f32 %v8176_v17, %v8175_v26  ;;  %v8246_v27 = vrot.slane %v8245_v35, 4 }
 0x749   : > { %v8178_v40 = vrot.slane %v8177_v38, 2  ;;  %v8247_v19 = vadd.f32 %v8246_v27, %v8245_v35 }
 0x74b   : > { %v8179_v14 = vadd.f32 %v8178_v40, %v8177_v38  ;;  %v8248_v44 = vrot.slane %v8247_v19, 2 }
 0x74d   : > { %v8180_v43 = vrot.slane %v8179_v14, 1  ;;  %v8249_v63 = vadd.f32 %v8248_v44, %v8247_v19 }
 0x74f   : > { %v8181_v21 = vadd.f32 %v8180_v43, %v8179_v14  ;;  %v8250_v39 = vrot.slane %v8249_v63, 1 }
 0x751   : > { %v13149_v13 = vmul.f32 0.00390625, %v8181_v21  ;;  %v8251_v47 = vadd.f32 %v8250_v39, %v8249_v63 }
 0x753   : > { %v8252_v48 = vmul.f32 0.00390625, %v8251_v47  ;;  %v8253_v61 = vmul.f32 %v13149_v13, %v13149_v13  ;;  %v8281_v23 = vsub.f32 %v13110_v51, %v13149_v13  ;;  %v8282_v2 = vsub.f32 %v13120_v46, %v13149_v13 }
 0x754   : > { %v8283_v0 = vsub.f32 %v13126_v16, %v13149_v13  ;;  %v8284_v53 = vsub.f32 %v13132_v42, %v13149_v13  ;;  %v8285_v8 = vsub.f32 %v13138_v28, %v13149_v13  ;;  %v8286_v62 = vsub.f32 %v13144_v22, %v13149_v13  ;;  %v9868_v28 = vld [vmem:[%s10089_s6 + $0x18] sm:$0xff]  ;;  %v9870_v22 = vld [vmem:[%s10089_s6 + $0x28] sm:$0xff] }
 0x755   : > { %v8254_v41 = vsub.f32 %v8252_v48, %v8253_v61  ;;  %v8255_v30 = vsub.f32 %v12903_v20, %v13149_v13  ;;  %v8256_v24 = vsub.f32 %v12914_v58, %v13149_v13  ;;  %v8257_v5 = vsub.f32 %v12918_v12, %v13149_v13 }
 0x756   : > { %v8258_v26 = vsub.f32 %v12923_v36, %v13149_v13  ;;  %v8259_v33 = vsub.f32 %v12929_v45, %v13149_v13  ;;  %v8260_v17 = vsub.f32 %v12933_v31, %v13149_v13  ;;  %v8261_v35 = vsub.f32 %v12937_v29, %v13149_v13 }
 0x757   : > { %v8287_v1 = vadd.f32 1e-05, %v8254_v41  ;;  %v8262_v20 = vsub.f32 %v12942_v10, %v13149_v13  ;;  %v8263_v58 = vsub.f32 %v12948_v25, %v13149_v13  ;;  %v8264_v12 = vsub.f32 %v12952_v18, %v13149_v13 }
 0x758   : > { %v8265_v36 = vsub.f32 %v12956_v3, %v13149_v13  ;;  %v8266_v45 = vsub.f32 %v12961_v49, %v13149_v13  ;;  %v8267_v31 = vsub.f32 %v12967_v7, %v13149_v13  ;;  %v8268_v10 = vsub.f32 %v12971_v55, %v13149_v13 }
 0x759   : > { %9854 = vrsqrt.f32 %v8287_v1  ;;  %v8269_v25 = vsub.f32 %v12975_v34, %v13149_v13  ;;  %v8270_v18 = vsub.f32 %v12980_v56, %v13149_v13  ;;  %v8271_v3 = vsub.f32 %v12984_v6, %v13149_v13 }
 0x75a   : > { %v8272_v49 = vsub.f32 %v12988_v50, %v13149_v13  ;;  %v8273_v7 = vsub.f32 %v12996_v37, %v13149_v13  ;;  %vm8294_vm15 = vweird.f32 %v8287_v1  ;;  %v8274_v55 = vsub.f32 %v13002_v9, %v13149_v13 }
 0x75b   : > { %v8275_v34 = vsub.f32 %v13008_v59, %v13149_v13  ;;  %v8276_v56 = vsub.f32 %v13080_v52, %v13149_v13  ;;  %v8277_v6 = vsub.f32 %v13086_v60, %v13149_v13  ;;  %v8278_v50 = vsub.f32 %v13092_v15, %v13149_v13 }
 0x75c   : > { %v8279_v37 = vsub.f32 %v13098_v4, %v13149_v13  ;;  %v8280_v40 = vsub.f32 %v13104_v57, %v13149_v13 }
 0x75f   : > { %v9855_v32 = vpop.eup %9854 }
 0x760   : > { %v8289_v54 = vmul.f32 %v9855_v32, %v8287_v1  ;;  %vm8295_vm14 = vweird.f32 %v9855_v32 }
 0x761   : > { %vm8296_vm0 = vmor %vm8294_vm15, %vm8295_vm14 }
 0x762   : > { %v8290_v11 = vmul.f32 %v9855_v32, %v8289_v54 }
 0x764   : > { %v8291_v38 = vmul.f32 0.5, %v8290_v11 }
 0x766   : > { %v8292_v29 = vsub.f32 1.5, %v8291_v38  ;;  %v9866_v38 = vld [vmem:[%s10089_s6 + $0x8] sm:$0xff] }
 0x768   : > { %v8293_v27 = vmul.f32 %v9855_v32, %v8292_v29  ;;  %v9873_v29 = vld [vmem:[%s10089_s6 + $0x40] sm:$0xff] }
 0x76a   : > { %v8297_v9 = vsel %vm8296_vm0, %v9855_v32, %v8293_v27 }
 0x76b   : > { %v8298_v19 = vmul.f32 %v8297_v9, %v8255_v30  ;;  %v8299_v14 = vmul.f32 %v8297_v9, %v8256_v24  ;;  %v8300_v59 = vmul.f32 %v8297_v9, %v8257_v5  ;;  %v8301_v44 = vmul.f32 %v8297_v9, %v8258_v26 }
 0x76c   : > { %v8302_v43 = vmul.f32 %v8297_v9, %v8259_v33  ;;  %v8303_v52 = vmul.f32 %v8297_v9, %v8260_v17  ;;  %v8304_v63 = vmul.f32 %v8297_v9, %v8261_v35  ;;  %v8305_v21 = vmul.f32 %v8297_v9, %v8262_v20 }
 0x76d   : > { %v8306_v60 = vmul.f32 %v8297_v9, %v8263_v58  ;;  %v8307_v39 = vmul.f32 %v8297_v9, %v8264_v12  ;;  %v8308_v47 = vmul.f32 %v8297_v9, %v8265_v36  ;;  %v8309_v48 = vmul.f32 %v8297_v9, %v8266_v45  ;;  %v9869_v58 = vld [vmem:[%s10089_s6 + $0x20] sm:$0xff]  ;;  %v9872_v45 = vld [vmem:[%s10089_s6 + $0x38] sm:$0xff] }
 0x76e   : > { %v8310_v15 = vmul.f32 %v8297_v9, %v8267_v31  ;;  %v8311_v61 = vmul.f32 %v8297_v9, %v8268_v10  ;;  %v8312_v4 = vmul.f32 %v8297_v9, %v8269_v25  ;;  %v8313_v41 = vmul.f32 %v8297_v9, %v8270_v18  ;;  %v9874_v25 = vld [vmem:[%s10089_s6 + $0x48] sm:$0xff] }
 0x76f   : > { %v8314_v1 = vmul.f32 %v8297_v9, %v8271_v3  ;;  %v13217_v57 = vmul.f32 %v8297_v9, %v8272_v49  ;;  %v13219_v32 = vmul.f32 %v8297_v9, %v8273_v7  ;;  %v13221_v54 = vmul.f32 %v8297_v9, %v8274_v55  ;;  %v9875_v3 = vld [vmem:[%s10089_s6 + $0x50] sm:$0xff]  ;;  %v9876_v7 = vld [vmem:[%s10089_s6 + $0x58] sm:$0xff]  ;;  %v9877_v55 = vld [vmem:[%s10089_s6 + $0x60] sm:$0xff] }
 0x770   : > { %v13223_v11 = vmul.f32 %v8297_v9, %v8275_v34  ;;  %v13225_v30 = vmul.f32 %v8297_v9, %v8276_v56  ;;  %v13227_v24 = vmul.f32 %v8297_v9, %v8277_v6  ;;  %v13229_v5 = vmul.f32 %v8297_v9, %v8278_v50  ;;  %v9878_v56 = vld [vmem:[%s10089_s6 + $0x68] sm:$0xff]  ;;  %v9879_v50 = vld [vmem:[%s10089_s6 + $0x70] sm:$0xff] }
 0x771   : > { %v13231_v26 = vmul.f32 %v8297_v9, %v8279_v37  ;;  %v13233_v33 = vmul.f32 %v8297_v9, %v8280_v40  ;;  %v13238_v17 = vmul.f32 %v8297_v9, %v8281_v23  ;;  %v13243_v35 = vmul.f32 %v8297_v9, %v8282_v2  ;;  %v9865_v2 = vld [vmem:[%s10089_s6] sm:$0xff]  ;;  %v9880_v40 = vld [vmem:[%s10089_s6 + $0x78] sm:$0xff] }
 0x772   : > { %v13255_v51 = vmul.f32 %v8297_v9, %v8283_v0  ;;  %v13260_v23 = vmul.f32 %v8297_v9, %v8284_v53  ;;  %v13265_v46 = vmul.f32 %v8297_v9, %v8285_v8  ;;  %v13270_v16 = vmul.f32 %v8297_v9, %v8286_v62  ;;  %v9867_v53 = vld [vmem:[%s10089_s6 + $0x10] sm:$0xff] }
 0x773   : > { %v8330_v0 = vadd.f32 %v9865_v2, %v8298_v19  ;;  %v8331_v42 = vadd.f32 %v9866_v38, %v8299_v14  ;;  %v8332_v20 = vadd.f32 %v9867_v53, %v8300_v59  ;;  %v8333_v8 = vadd.f32 %v9868_v28, %v8301_v44  ;;  %v9871_v62 = vld [vmem:[%s10089_s6 + $0x30] sm:$0xff]  ;;  %v9881_v19 = vld [vmem:[%s10089_s6 + $0x80] sm:$0xff]  ;;  %v9882_v59 = vld [vmem:[%s10089_s6 + $0x88] sm:$0xff] }
 0x774   : > { %v8334_v12 = vadd.f32 %v9869_v58, %v8302_v43  ;;  %v8335_v13 = vadd.f32 %v9870_v22, %v8303_v52  ;;  %v8336_v36 = vadd.f32 %v9871_v62, %v8304_v63  ;;  %v8337_v31 = vadd.f32 %v9872_v45, %v8305_v21  ;;  %v9883_v43 = vld [vmem:[%s10089_s6 + $0x90] sm:$0xff]  ;;  %v9884_v63 = vld [vmem:[%s10089_s6 + $0x98] sm:$0xff] }
 0x775   : > { %8362 = vst [vmem:[%s13250_s26] sm:$0xff] %v8330_v0  ;;  %v8338_v10 = vadd.f32 %v9873_v29, %v8306_v60  ;;  %v8339_v18 = vadd.f32 %v9874_v25, %v8307_v39  ;;  %v8340_v49 = vadd.f32 %v9875_v3, %v8308_v47  ;;  %v8341_v27 = vadd.f32 %v9876_v7, %v8309_v48  ;;  %v9885_v60 = vld [vmem:[%s10089_s6 + $0xa0] sm:$0xff]  ;;  %v9886_v47 = vld [vmem:[%s10089_s6 + $0xa8] sm:$0xff]  ;;  %v9895_v38 = vld [vmem:[%s10089_s6 + $0xf0] sm:$0xff] }
 0x776   : > { %8363 = vst [vmem:[%s13250_s26 + $0x8] sm:$0xff] %v8331_v42  ;;  %v8342_v34 = vadd.f32 %v9877_v55, %v8310_v15  ;;  %v8343_v6 = vadd.f32 %v9878_v56, %v8311_v61  ;;  %v8344_v37 = vadd.f32 %v9879_v50, %v8312_v4  ;;  %v8345_v9 = vadd.f32 %v9880_v40, %v8313_v41  ;;  %v9887_v15 = vld [vmem:[%s10089_s6 + $0xb0] sm:$0xff]  ;;  %v9888_v4 = vld [vmem:[%s10089_s6 + $0xb8] sm:$0xff] }
 0x777   : > { %8364 = vst [vmem:[%s13250_s26 + $0x10] sm:$0xff] %v8332_v20  ;;  %v8346_v14 = vadd.f32 %v9881_v19, %v8314_v1  ;;  %v8347_v44 = vadd.f32 %v9882_v59, %v13217_v57  ;;  %v8348_v52 = vadd.f32 %v9883_v43, %v13219_v32  ;;  %v8349_v21 = vadd.f32 %v9884_v63, %v13221_v54  ;;  %v9889_v1 = vld [vmem:[%s10089_s6 + $0xc0] sm:$0xff]  ;;  %v9890_v32 = vld [vmem:[%s10089_s6 + $0xc8] sm:$0xff]  ;;  %v9896_v42 = vld [vmem:[%s10089_s6 + $0xf8] sm:$0xff] }
 0x778   : > { %8365 = vst [vmem:[%s13250_s26 + $0x18] sm:$0xff] %v8333_v8  ;;  %v8350_v39 = vadd.f32 %v9885_v60, %v13223_v11  ;;  %v8351_v48 = vadd.f32 %v9886_v47, %v13225_v30  ;;  %v8352_v61 = vadd.f32 %v9887_v15, %v13227_v24  ;;  %v8353_v41 = vadd.f32 %v9888_v4, %v13229_v5  ;;  %v9891_v11 = vld [vmem:[%s10089_s6 + $0xd0] sm:$0xff]  ;;  %v9892_v24 = vld [vmem:[%s10089_s6 + $0xd8] sm:$0xff] }
 0x779   : > { %8366 = vst [vmem:[%s13250_s26 + $0x20] sm:$0xff] %v8334_v12  ;;  %v8354_v57 = vadd.f32 %v9889_v1, %v13231_v26  ;;  %v8355_v54 = vadd.f32 %v9890_v32, %v13233_v33  ;;  %v8356_v30 = vadd.f32 %v9891_v11, %v13238_v17  ;;  %v8357_v5 = vadd.f32 %v9892_v24, %v13243_v35  ;;  %v9893_v26 = vld [vmem:[%s10089_s6 + $0xe0] sm:$0xff]  ;;  %v9894_v33 = vld [vmem:[%s10089_s6 + $0xe8] sm:$0xff] }
 0x77a   : > { %8367 = vst [vmem:[%s13250_s26 + $0x28] sm:$0xff] %v8335_v13  ;;  %v8358_v2 = vadd.f32 %v9893_v26, %v13255_v51  ;;  %v8359_v0 = vadd.f32 %v9894_v33, %v13260_v23  ;;  %v8360_v17 = vadd.f32 %v9895_v38, %v13265_v46  ;;  %v8361_v53 = vadd.f32 %v9896_v42, %v13270_v16 }
 0x77b   : > { %8368 = vst [vmem:[%s13250_s26 + $0x30] sm:$0xff] %v8336_v36 }
 0x77c   : > { %8369 = vst [vmem:[%s13250_s26 + $0x38] sm:$0xff] %v8337_v31 }
 0x77d   : > { %8370 = vst [vmem:[%s13250_s26 + $0x40] sm:$0xff] %v8338_v10 }
 0x77e   : > { %8371 = vst [vmem:[%s13250_s26 + $0x48] sm:$0xff] %v8339_v18 }
 0x77f   : > { %8372 = vst [vmem:[%s13250_s26 + $0x50] sm:$0xff] %v8340_v49 }
 0x780   : > { %8373 = vst [vmem:[%s13250_s26 + $0x58] sm:$0xff] %v8341_v27 }
 0x781   : > { %8374 = vst [vmem:[%s13250_s26 + $0x60] sm:$0xff] %v8342_v34 }
 0x782   : > { %8375 = vst [vmem:[%s13250_s26 + $0x68] sm:$0xff] %v8343_v6 }
 0x783   : > { %8376 = vst [vmem:[%s13250_s26 + $0x70] sm:$0xff] %v8344_v37 }
 0x784   : > { %8377 = vst [vmem:[%s13250_s26 + $0x78] sm:$0xff] %v8345_v9 }
 0x785   : > { %8378 = vst [vmem:[%s13250_s26 + $0x80] sm:$0xff] %v8346_v14 }
 0x786   : > { %8379 = vst [vmem:[%s13250_s26 + $0x88] sm:$0xff] %v8347_v44 }
 0x787   : > { %8380 = vst [vmem:[%s13250_s26 + $0x90] sm:$0xff] %v8348_v52 }
 0x788   : > { %8381 = vst [vmem:[%s13250_s26 + $0x98] sm:$0xff] %v8349_v21 }
 0x789   : > { %8382 = vst [vmem:[%s13250_s26 + $0xa0] sm:$0xff] %v8350_v39 }
 0x78a   : > { %8383 = vst [vmem:[%s13250_s26 + $0xa8] sm:$0xff] %v8351_v48 }
 0x78b   : > { %8384 = vst [vmem:[%s13250_s26 + $0xb0] sm:$0xff] %v8352_v61 }
 0x78c   : > { %8385 = vst [vmem:[%s13250_s26 + $0xb8] sm:$0xff] %v8353_v41 }
 0x78d   : > { %8386 = vst [vmem:[%s13250_s26 + $0xc0] sm:$0xff] %v8354_v57 }
 0x78e   : > { %8387 = vst [vmem:[%s13250_s26 + $0xc8] sm:$0xff] %v8355_v54 }
 0x78f   : > { %8388 = vst [vmem:[%s13250_s26 + $0xd0] sm:$0xff] %v8356_v30 }
 0x790   : > { %8389 = vst [vmem:[%s13250_s26 + $0xd8] sm:$0xff] %v8357_v5 }
 0x791   : > { %8390 = vst [vmem:[%s13250_s26 + $0xe0] sm:$0xff] %v8358_v2 }
 0x792   : > { %8391 = vst [vmem:[%s13250_s26 + $0xe8] sm:$0xff] %v8359_v0 }
 0x793   : > { %8392 = vst [vmem:[%s13250_s26 + $0xf0] sm:$0xff] %v8360_v17 }
 0x794   : > { %8393 = vst [vmem:[%s13250_s26 + $0xf8] sm:$0xff] %v8361_v53 }
 0x795 PF: > { %s15_s18 = sadd.s32 1, %s10029_s18  }
 0x796   : > { %p12_p4 = scmp.ge.s32.totalorder %s15_s18, 4  }
 0x798   :  { %14 = sbr.rel (!%p12_p4) target bundleno = 1 (0x1), region = 77 }

</bundles_post_ra>
